<compile_context>
chip_gen: v7x
topology: tpu7x:2x2x1
jax: 0.10.0
libtpu: 0.0.40
codegen_flags: <defaults>
</compile_context>

<pallas_src>
import functools

import jax
import jax.numpy as jnp
from jax import lax
from jax.experimental import pallas as pl
from jax.experimental.pallas import tpu as pltpu

EPS = 1e-5
LANE = 128
VMEM_LIMIT = 48 * 1024 * 1024       # explicit scoped-VMEM cap (v7x-safe)
TILE_BUDGET = 24 * 1024 * 1024      # th-dependent per-tile budget (passes 2/3)
ROW_BUDGET = 4 * 1024 * 1024        # per-block input budget (pass 1)


# ----------------------------- small helpers --------------------------------

def _round_up(x, m):
    return (x + m - 1) // m * m


def _hardswish(y):
    # x * relu6(x + 3) / 6, with the 1/6 folded into a multiply (VPU only).
    return y * jnp.clip(y + 3.0, 0.0, 6.0) * (1.0 / 6.0)


def _pick_row_tile(n_rows, cap):
    """Largest divisor of n_rows that is a multiple of 8 and <= cap (else full)."""
    cap = max(8, min(n_rows, cap))
    for d in range(cap, 0, -1):
        if n_rows % d == 0 and d % 8 == 0:
            return d
    return n_rows


def _pick_spatial_tile(ho, wo, stride, n_par, wc8, ce_pad, cout_p, budget):
    """Largest output-row tile th (divisor of ho, capped at 64 for unroll size)
    whose fused-kernel VMEM footprint fits `budget`.  th == ho is always
    layout-legal (the y3 block then spans the full ho*wo axis)."""
    def fits(th):
        th_in = (th - 1) * stride + 3
        e = n_par * th_in * wc8 * ce_pad * 2        # bf16 expanded activation
        h = th * wo * ce_pad * 4                    # f32 depthwise rows
        y = th * wo * cout_p * (4 + 2 * 2)          # f32 temp + 2x bf16 out buf
        return e + h + y <= budget

    cands = [d for d in range(1, min(ho, 64) + 1)
             if ho % d == 0 and (d * wo) % 8 == 0]
    if not cands:
        cands = [ho]   # full-height tile: block == full ho*wo dim, always legal
    ok = [d for d in cands if fits(d)]
    # TODO(synk): if even the smallest legal tile exceeds the budget we still
    # return it (best effort) rather than re-tiling along channels.
    return max(ok) if ok else min(cands)


def _bn_scale_shift(s, sq, count, gamma, beta):
    """Fold batch statistics (sum / sum-of-squares, shape (1, C)) into BN
    scale/shift vectors."""
    mean = s / count
    var = jnp.maximum(sq / count - mean * mean, 0.0)
    scale = gamma.reshape(1, -1) * lax.rsqrt(var + EPS)
    shift = beta.reshape(1, -1) - mean * scale
    return scale.astype(jnp.float32), shift.astype(jnp.float32)


# ------------------------------ Pallas kernels -------------------------------

def _gram_kernel(x_ref, g_ref, s_ref):
    """Per-row-tile Gram matrix X^T X and column sum of x (for expand-BN stats)."""
    x = x_ref[...]                                           # (tr, cin) bf16
    g_ref[...] = lax.dot_general(x, x, (((0,), (0,)), ((), ())),
                                 preferred_element_type=jnp.float32)
    s_ref[...] = jnp.sum(x.astype(jnp.float32), axis=0, keepdims=True)


def _make_proj_bn_kernel(cout):
    """Final project BatchNorm + fused NHWC->NCHW transpose."""
    def kernel(y_ref, sc_ref, sh_ref, o_ref):
        y = y_ref[...].astype(jnp.float32) * sc_ref[...] + sh_ref[...]  # (hw, cout_p)
        o_ref[...] = jnp.transpose(y)[:cout, :]                          # (cout, hw)
    return kernel


def _make_window_kernels(*, stride, th, th_in, wo, wc8, n_par, ce_pad):
    """Build the fused expand->BN->hswish->depthwise window kernels.

    Static config (python ints): stride 1/2, th output rows per tile,
    th_in = (th-1)*stride + 3 haloed input rows, wo output width, wc8
    8-aligned padded row pitch of each column-parity buffer, n_par parity
    buffers, ce_pad lane-padded expanded channel count.
    """
    win = th_in * wc8

    def dw_rows(x_refs, m_refs, w_exp_ref, sc1_ref, sh1_ref, w_dw_ref):
        ti = pl.program_id(1)
        row0 = pl.multiple_of(ti * (th * stride * wc8), 8)    # wc8 % 8 == 0

        # Haloed windows of all column-parity buffers, merged into ONE expand
        # matmul (bf16 MXU operands, f32 accumulation).  The Ce-wide expanded
        # activation never leaves VMEM.
        xw = jnp.concatenate(
            [x_refs[b][pl.ds(row0, win), :] for b in range(n_par)], axis=0)
        mw = jnp.concatenate(
            [m_refs[b][pl.ds(row0, win), :] for b in range(n_par)], axis=0)
        e = jnp.dot(xw, w_exp_ref[...], preferred_element_type=jnp.float32)
        # BN + Hardswish, then zero the spatial zero-padding ring (the Conv2d
        # padding applies to the post-activation tensor in the reference).
        e = _hardswish(e * sc1_ref[...] + sh1_ref[...]) * mw
        e = e.astype(jnp.bfloat16)     # bf16 storage halves VMEM/vreg footprint

        w_dw = w_dw_ref[...]           # (9, ce_pad) f32
        rows = []
        for r in range(th):
            acc = jnp.zeros((wo, ce_pad), jnp.float32)
            for dy in range(3):
                for dx in range(3):
                    b = dx % n_par
                    col0 = dx // n_par
                    start = b * win + (r * stride + dy) * wc8 + col0
                    # static, unit-stride slice; f32 accumulation (v5e-safe)
                    tap = e[start:start + wo, :].astype(jnp.float32)
                    acc = acc + tap * w_dw[3 * dy + dx:3 * dy + dx + 1, :]
            rows.append(acc)
        return rows

    def dw_stats_kernel(*refs):
        x_refs = refs[:n_par]
        m_refs = refs[n_par:2 * n_par]
        w_exp_ref, sc1_ref, sh1_ref, w_dw_ref, sum_ref, sq_ref = refs[2 * n_par:]
        rows = dw_rows(x_refs, m_refs, w_exp_ref, sc1_ref, sh1_ref, w_dw_ref)
        acc1 = jnp.zeros((1, ce_pad), jnp.float32)
        acc2 = jnp.zeros((1, ce_pad), jnp.float32)
        for r in rows:
            acc1 = acc1 + jnp.sum(r, axis=0, keepdims=True)
            acc2 = acc2 + jnp.sum(r * r, axis=0, keepdims=True)
        sum_ref[...] = acc1
        sq_ref[...] = acc2

    def block_kernel(*refs):
        x_refs = refs[:n_par]
        m_refs = refs[n_par:2 * n_par]
        (w_exp_ref, sc1_ref, sh1_ref, w_dw_ref, sc2_ref, sh2_ref, w_proj_ref,
         y_ref, sum_ref, sq_ref) = refs[2 * n_par:]
        rows = dw_rows(x_refs, m_refs, w_exp_ref, sc1_ref, sh1_ref, w_dw_ref)
        sc2 = sc2_ref[...]
        sh2 = sh2_ref[...]
        h = jnp.concatenate([_hardswish(r * sc2 + sh2) for r in rows], axis=0)
        y = jnp.dot(h.astype(jnp.bfloat16), w_proj_ref[...],
                    preferred_element_type=jnp.float32)      # (th*wo, cout_p)
        y_ref[...] = y.astype(y_ref.dtype)                   # bf16, lane-dense
        sum_ref[...] = jnp.sum(y, axis=0, keepdims=True)
        sq_ref[...] = jnp.sum(y * y, axis=0, keepdims=True)

    return dw_stats_kernel, block_kernel


# --------------------------------- forward -----------------------------------

def depthwise_separable_conv_forward(params, x_nchw, stride):
    """Forward pass of DepthwiseSeparableConv (NCHW in / NCHW out)."""
    if stride not in (1, 2):
        raise NotImplementedError("only stride 1 or 2 (MobileNetV3 uses these)")

    cin, ce = params["expand_w"].shape
    cout = params["proj_w"].shape[1]
    ce_pad = _round_up(ce, LANE)
    cout_p = _round_up(cout, LANE)

    # Lane-dense channel padding.  Padded channels carry exact zeros through
    # the whole block (pad gamma=1 / beta=0 keeps BN of a zero channel at 0),
    # so all stores are unmasked full-lane writes; the pad is sliced off at
    # the very end.  Conv biases are omitted: training-mode (batch-stat) BN
    # cancels any per-channel constant exactly.
    w_exp = jnp.pad(params["expand_w"],
                    ((0, 0), (0, ce_pad - ce))).astype(jnp.bfloat16)
    w_dw = jnp.pad(params["dw_w"].reshape(9, ce),
                   ((0, 0), (0, ce_pad - ce))).astype(jnp.float32)
    w_proj = jnp.pad(params["proj_w"],
                     ((0, ce_pad - ce), (0, cout_p - cout))).astype(jnp.bfloat16)
    g1 = jnp.pad(params["expand_gamma"], (0, ce_pad - ce), constant_values=1.0)
    b1 = jnp.pad(params["expand_beta"], (0, ce_pad - ce))
    g2 = jnp.pad(params["dw_gamma"], (0, ce_pad - ce), constant_values=1.0)
    b2 = jnp.pad(params["dw_beta"], (0, ce_pad - ce))
    g3 = jnp.pad(params["proj_gamma"], (0, cout_p - cout), constant_values=1.0)
    b3 = jnp.pad(params["proj_beta"], (0, cout_p - cout))

    x = jnp.transpose(x_nchw, (0, 2, 3, 1)).astype(jnp.float32)   # NHWC
    n, h, w, _ = x.shape
    ho = (h - 1) // stride + 1
    wo = (w - 1) // stride + 1

    # ---- pass 1: expand-BN stats via a Gram matrix (no full expand matmul) --
    #   sum_rows(e) = (sum_rows x) @ W ;  sum_rows(e^2) = diag(W^T (X^T X) W)
    r1 = n * h * w
    x_flat = x.reshape(r1, cin).astype(jnp.bfloat16)
    tr1 = _pick_row_tile(r1, ROW_BUDGET // (cin * 2))
    t1 = r1 // tr1
    g_parts, s_parts = pl.pallas_call(
        _gram_kernel,
        grid=(t1,),
        in_specs=[pl.BlockSpec((tr1, cin), lambda i: (i, 0))],
        out_specs=[pl.BlockSpec((None, cin, cin), lambda i: (i, 0, 0)),
                   pl.BlockSpec((None, 1, cin), lambda i: (i, 0, 0))],
        out_shape=[jax.ShapeDtypeStruct((t1, cin, cin), jnp.float32),
                   jax.ShapeDtypeStruct((t1, 1, cin), jnp.float32)],
        compiler_params=pltpu.CompilerParams(dimension_semantics=("parallel",)),
    )(x_flat)
    gram = jnp.sum(g_parts, axis=0)                  # (cin, cin)
    colsum = jnp.sum(s_parts, axis=0)                # (1, cin)
    w_e32 = w_exp.astype(jnp.float32)                # bf16-rounded weights
    s1 = colsum @ w_e32                              # (1, ce_pad)
    sq1 = jnp.sum((gram @ w_e32) * w_e32, axis=0, keepdims=True)
    sc1, sh1 = _bn_scale_shift(s1, sq1, r1, g1, b1)

    # ---- spatial layout for the fused window kernels ------------------------
    hpad = h + 2
    xpad = jnp.pad(x, ((0, 0), (1, 1), (1, 1), (0, 0)))
    mask = jnp.pad(jnp.ones((h, w), jnp.float32), ((1, 1), (1, 1)))
    if stride == 1:
        xs, ms = [xpad], [mask]
    else:   # split padded columns by parity so all in-kernel taps are unit stride
        xs = [xpad[:, :, p::2, :] for p in range(2)]
        ms = [mask[:, p::2] for p in range(2)]
    n_par = len(xs)
    wc8 = _round_up(max(a.shape[2] for a in xs), 8)   # 8-aligned row pitch
    x_bufs = [jnp.pad(a, ((0, 0), (0, 0), (0, wc8 - a.shape[2]), (0, 0)))
              .astype(jnp.bfloat16).reshape(n, hpad * wc8, cin) for a in xs]
    m_bufs = [jnp.pad(m, ((0, 0), (0, wc8 - m.shape[1])))
              .reshape(1, hpad * wc8, 1) for m in ms]

    th = _pick_spatial_tile(ho, wo, stride, n_par, wc8, ce_pad, cout_p,
                            TILE_BUDGET)
    n_tiles = ho // th
    th_in = (th - 1) * stride + 3
    dw_stats_kernel, block_kernel = _make_window_kernels(
        stride=stride, th=th, th_in=th_in, wo=wo, wc8=wc8, n_par=n_par,
        ce_pad=ce_pad)

    x_specs = [pl.BlockSpec((None, hpad * wc8, cin), lambda bi, ti: (bi, 0, 0))
               for _ in range(n_par)]
    m_specs = [pl.BlockSpec((None, hpad * wc8, 1), lambda bi, ti: (0, 0, 0))
               for _ in range(n_par)]
    wexp_spec = pl.BlockSpec((cin, ce_pad), lambda bi, ti: (0, 0))
    vec_ce = pl.BlockSpec((1, ce_pad), lambda bi, ti: (0, 0))
    wdw_spec = pl.BlockSpec((9, ce_pad), lambda bi, ti: (0, 0))
    stat_ce = pl.BlockSpec((None, 1, ce_pad),
                           lambda bi, ti: (bi * n_tiles + ti, 0, 0))
    fused_params = pltpu.CompilerParams(
        dimension_semantics=("parallel", "arbitrary"),
        vmem_limit_bytes=VMEM_LIMIT)

    # ---- pass 2: depthwise-BN batch statistics (activation stays in VMEM) ---
    r2 = n * ho * wo
    ps2, pq2 = pl.pallas_call(
        dw_stats_kernel,
        grid=(n, n_tiles),
        in_specs=x_specs + m_specs + [wexp_spec, vec_ce, vec_ce, wdw_spec],
        out_specs=[stat_ce, stat_ce],
        out_shape=[jax.ShapeDtypeStruct((n * n_tiles, 1, ce_pad), jnp.float32)] * 2,
        compiler_params=fused_params,
    )(*x_bufs, *m_bufs, w_exp, sc1, sh1, w_dw)
    sc2, sh2 = _bn_scale_shift(jnp.sum(ps2, axis=0), jnp.sum(pq2, axis=0),
                               r2, g2, b2)

    # ---- pass 3: fused expand -> depthwise -> project (bf16, lane-dense y) --
    wproj_spec = pl.BlockSpec((ce_pad, cout_p), lambda bi, ti: (0, 0))
    stat_co = pl.BlockSpec((None, 1, cout_p),
                           lambda bi, ti: (bi * n_tiles + ti, 0, 0))
    y_spec = pl.BlockSpec((None, th * wo, cout_p), lambda bi, ti: (bi, ti, 0))
    y3, ps3, pq3 = pl.pallas_call(
        block_kernel,
        grid=(n, n_tiles),
        in_specs=(x_specs + m_specs
                  + [wexp_spec, vec_ce, vec_ce, wdw_spec, vec_ce, vec_ce,
                     wproj_spec]),
        out_specs=[y_spec, stat_co, stat_co],
        out_shape=[jax.ShapeDtypeStruct((n, ho * wo, cout_p), jnp.bfloat16),
                   jax.ShapeDtypeStruct((n * n_tiles, 1, cout_p), jnp.float32),
                   jax.ShapeDtypeStruct((n * n_tiles, 1, cout_p), jnp.float32)],
        compiler_params=fused_params,
    )(*x_bufs, *m_bufs, w_exp, sc1, sh1, w_dw, sc2, sh2, w_proj)
    sc3, sh3 = _bn_scale_shift(jnp.sum(ps3, axis=0), jnp.sum(pq3, axis=0),
                               r2, g3, b3)

    # ---- pass 4: project BatchNorm + fused NHWC->NCHW transpose -------------
    out_flat = pl.pallas_call(
        _make_proj_bn_kernel(cout),
        grid=(n,),
        in_specs=[pl.BlockSpec((None, ho * wo, cout_p), lambda bi: (bi, 0, 0)),
                  pl.BlockSpec((1, cout_p), lambda bi: (0, 0)),
                  pl.BlockSpec((1, cout_p), lambda bi: (0, 0))],
        out_specs=pl.BlockSpec((None, cout, ho * wo), lambda bi: (bi, 0, 0)),
        out_shape=jax.ShapeDtypeStruct((n, cout, ho * wo), jnp.float32),
        compiler_params=pltpu.CompilerParams(
            dimension_semantics=("parallel",), vmem_limit_bytes=VMEM_LIMIT),
    )(y3, sc3, sh3)
    return out_flat.reshape(n, cout, ho, wo)     # contiguous reshape (free)


# ------------------------------ parameters -----------------------------------

def init_params(key, in_channels, out_channels, expansion_factor):
    ce = in_channels * expansion_factor
    ks = jax.random.split(key, 6)

    def bn(k, c):
        k1, k2 = jax.random.split(k)
        return (1.0 + 0.1 * jax.random.normal(k1, (c,), jnp.float32),
                0.1 * jax.random.normal(k2, (c,), jnp.float32))

    eg, eb = bn(ks[3], ce)
    dg, db = bn(ks[4], ce)
    pg, pb = bn(ks[5], out_channels)
    # Conv biases omitted: training-mode (batch-stat) BatchNorm right after
    # every conv cancels any per-channel constant exactly.
    return {
        "expand_w": (1.0 / in_channels) ** 0.5
                    * jax.random.normal(ks[0], (in_channels, ce), jnp.float32),
        "dw_w": (1.0 / 3.0)
                * jax.random.normal(ks[1], (3, 3, ce), jnp.float32),
        "proj_w": (1.0 / ce) ** 0.5
                  * jax.random.normal(ks[2], (ce, out_channels), jnp.float32),
        "expand_gamma": eg, "expand_beta": eb,
        "dw_gamma": dg, "dw_beta": db,
        "proj_gamma": pg, "proj_beta": pb,
    }


# --------------------------- pure-JAX reference -------------------------------

def _bn_ref(y, gamma, beta):
    mean = jnp.mean(y, axis=(0, 2, 3), keepdims=True)
    var = jnp.mean((y - mean) ** 2, axis=(0, 2, 3), keepdims=True)
    return ((y - mean) * lax.rsqrt(var + EPS) * gamma[None, :, None, None]
            + beta[None, :, None, None])


def _hswish_ref(y):
    return y * jnp.clip(y + 3.0, 0.0, 6.0) / 6.0


def reference_forward(params, x_nchw, stride):
    x = x_nchw.astype(jnp.float32)
    ce = params["expand_w"].shape[1]
    y = jnp.einsum("nchw,ce->nehw", x, params["expand_w"])
    y = _hswish_ref(_bn_ref(y, params["expand_gamma"], params["expand_beta"]))
    wdw = jnp.transpose(params["dw_w"], (2, 0, 1))[:, None, :, :]   # (ce,1,3,3)
    y = lax.conv_general_dilated(
        y, wdw, (stride, stride), ((1, 1), (1, 1)),
        dimension_numbers=("NCHW", "OIHW", "NCHW"), feature_group_count=ce)
    y = _hswish_ref(_bn_ref(y, params["dw_gamma"], params["dw_beta"]))
    z = jnp.einsum("nchw,co->nohw", y, params["proj_w"])
    return _bn_ref(z, params["proj_gamma"], params["proj_beta"])


# ----------------------------------- main -------------------------------------

if __name__ == "__main__":
    in_channels, out_channels, stride, expansion = 16, 24, 2, 2
    key = jax.random.PRNGKey(0)
    pkey, xkey = jax.random.split(key)
    params = init_params(pkey, in_channels, out_channels, expansion)
    x = jax.random.normal(xkey, (2, in_channels, 16, 16), jnp.float32)

    fwd = jax.jit(functools.partial(depthwise_separable_conv_forward,
                                    stride=stride))
    out = fwd(params, x)
    jax.block_until_ready(out)

    assert out.shape == (2, out_channels, 8, 8), out.shape
    assert bool(jnp.all(jnp.isfinite(out)))

    # Loose check vs. a pure-JAX f32 reference (kernel uses bf16 MXU operands
    # and bf16 intermediates).
    ref = reference_forward(params, x, stride)
    err = float(jnp.max(jnp.abs(out - ref)) / (1e-3 + jnp.max(jnp.abs(ref))))
    assert err < 0.1, f"mismatch vs reference: rel-max err {err:.4f}"

    print("KERNEL_OK")
</pallas_src>

<mosaic_0001>
module attributes {stable_mosaic.version = 11 : i64} {
  func.func @_gram_kernel(%arg0: i32, %arg1: memref<512x16xbf16, #tpu.memory_space<vmem>>, %arg2: memref<1x16x16xf32, #tpu.memory_space<vmem>>, %arg3: memref<1x1x16xf32, #tpu.memory_space<vmem>>) attributes {dimension_semantics = [#tpu.dimension_semantics<parallel>], iteration_bounds = array<i64: 1>, scalar_prefetch = 0 : i64, scratch_operands = 0 : i64, tpu.core_type = #tpu.core_type<tc>, window_params = [{transform_indices = @transform_0, window_bounds = array<i64: 512, 16>}, {transform_indices = @transform_1, window_bounds = array<i64: 1, 16, 16>}, {transform_indices = @transform_2, window_bounds = array<i64: 1, 1, 16>}]} {
    %c0 = arith.constant 0 : index
    %c0_0 = arith.constant 0 : index
    %0 = vector.load %arg1[%c0, %c0_0] : memref<512x16xbf16, #tpu.memory_space<vmem>>, vector<512x16xbf16>
    %cst = arith.constant dense<0.000000e+00> : vector<16x16xf32>
    %1 = tpu.matmul %0, %0, %cst {dimension_numbers = #tpu.dot_dimension_numbers<[0], [0], [1], [1], [0, 1, 1, 1], [], []>} : vector<512x16xbf16>, vector<512x16xbf16>, vector<16x16xf32> -> vector<16x16xf32>
    %c0_1 = arith.constant 0 : index
    %c0_2 = arith.constant 0 : index
    %c0_3 = arith.constant 0 : index
    %2 = vector.load %arg2[%c0_1, %c0_2, %c0_3] : memref<1x16x16xf32, #tpu.memory_space<vmem>>, vector<1x16x16xf32>
    %3 = vector.shape_cast %2 : vector<1x16x16xf32> to vector<16x16xf32>
    %4 = vector.shape_cast %1 : vector<16x16xf32> to vector<1x16x16xf32>
    tpu.vector_store %arg2[%c0_1, %c0_2, %c0_3], %4 {strides = array<i32>} : memref<1x16x16xf32, #tpu.memory_space<vmem>>, vector<1x16x16xf32>,
    %5 = arith.extf %0 : vector<512x16xbf16> to vector<512x16xf32>
    %cst_4 = arith.constant dense<0.000000e+00> : vector<16xf32>
    %6 = vector.multi_reduction <add>, %5, %cst_4 [0] : vector<512x16xf32> to vector<16xf32>
    %7 = vector.shape_cast %6 : vector<16xf32> to vector<1x16xf32>
    %c0_5 = arith.constant 0 : index
    %c0_6 = arith.constant 0 : index
    %c0_7 = arith.constant 0 : index
    %8 = vector.load %arg3[%c0_5, %c0_6, %c0_7] : memref<1x1x16xf32, #tpu.memory_space<vmem>>, vector<1x1x16xf32>
    %9 = vector.shape_cast %8 : vector<1x1x16xf32> to vector<1x16xf32>
    %10 = vector.shape_cast %7 : vector<1x16xf32> to vector<1x1x16xf32>
    tpu.vector_store %arg3[%c0_5, %c0_6, %c0_7], %10 {strides = array<i32>} : memref<1x1x16xf32, #tpu.memory_space<vmem>>, vector<1x1x16xf32>,
    return
  }
  func.func @transform_0(%arg0: i32) -> (i32, i32) {
    %c0_i32 = arith.constant 0 : i32
    %c0_i32_0 = arith.constant 0 : i32
    return %arg0, %c0_i32 : i32, i32
  }
  func.func @transform_1(%arg0: i32) -> (i32, i32, i32) {
    %c0_i32 = arith.constant 0 : i32
    %c0_i32_0 = arith.constant 0 : i32
    %c0_i32_1 = arith.constant 0 : i32
    return %arg0, %c0_i32, %c0_i32_0 : i32, i32, i32
  }
  func.func @transform_2(%arg0: i32) -> (i32, i32, i32) {
    %c0_i32 = arith.constant 0 : i32
    %c0_i32_0 = arith.constant 0 : i32
    %c0_i32_1 = arith.constant 0 : i32
    return %arg0, %c0_i32, %c0_i32_0 : i32, i32, i32
  }
}

module attributes {stable_mosaic.version = 11 : i64} {
  func.func @dw_stats_kernel(%arg0: i32, %arg1: i32, %arg2: memref<1x288x16xbf16, #tpu.memory_space<vmem>>, %arg3: memref<1x288x16xbf16, #tpu.memory_space<vmem>>, %arg4: memref<1x288x1xf32, #tpu.memory_space<vmem>>, %arg5: memref<1x288x1xf32, #tpu.memory_space<vmem>>, %arg6: memref<16x128xbf16, #tpu.memory_space<vmem>>, %arg7: memref<1x128xf32, #tpu.memory_space<vmem>>, %arg8: memref<1x128xf32, #tpu.memory_space<vmem>>, %arg9: memref<9x128xf32, #tpu.memory_space<vmem>>, %arg10: memref<1x1x128xf32, #tpu.memory_space<vmem>>, %arg11: memref<1x1x128xf32, #tpu.memory_space<vmem>>) attributes {dimension_semantics = [#tpu.dimension_semantics<parallel>, #tpu.dimension_semantics<arbitrary>], iteration_bounds = array<i64: 2, 1>, scalar_prefetch = 0 : i64, scratch_operands = 0 : i64, tpu.core_type = #tpu.core_type<tc>, window_params = [{transform_indices = @transform_0, window_bounds = array<i64: 1, 288, 16>}, {transform_indices = @transform_1, window_bounds = array<i64: 1, 288, 16>}, {pipeline_mode = #tpu.pipeline_mode<synchronous>, transform_indices = @transform_2, window_bounds = array<i64: 1, 288, 1>}, {pipeline_mode = #tpu.pipeline_mode<synchronous>, transform_indices = @transform_3, window_bounds = array<i64: 1, 288, 1>}, {pipeline_mode = #tpu.pipeline_mode<synchronous>, transform_indices = @transform_4, window_bounds = array<i64: 16, 128>}, {pipeline_mode = #tpu.pipeline_mode<synchronous>, transform_indices = @transform_5, window_bounds = array<i64: 1, 128>}, {pipeline_mode = #tpu.pipeline_mode<synchronous>, transform_indices = @transform_6, window_bounds = array<i64: 1, 128>}, {pipeline_mode = #tpu.pipeline_mode<synchronous>, transform_indices = @transform_7, window_bounds = array<i64: 9, 128>}, {transform_indices = @transform_8, window_bounds = array<i64: 1, 1, 128>}, {transform_indices = @transform_9, window_bounds = array<i64: 1, 1, 128>}]} {
    %c256_i32 = arith.constant 256 : i32
    %0 = arith.muli %arg1, %c256_i32 : i32
    %1 = tpu.assume_multiple %0, 8 : i32
    %c0 = arith.constant 0 : index
    %2 = arith.index_cast %1 : i32 to index
    %c0_0 = arith.constant 0 : index
    %3 = vector.load %arg2[%c0, %2, %c0_0] : memref<1x288x16xbf16, #tpu.memory_space<vmem>>, vector<1x272x16xbf16>
    %4 = vector.shape_cast %3 : vector<1x272x16xbf16> to vector<272x16xbf16>
    %c0_1 = arith.constant 0 : index
    %5 = arith.index_cast %1 : i32 to index
    %c0_2 = arith.constant 0 : index
    %6 = vector.load %arg3[%c0_1, %5, %c0_2] : memref<1x288x16xbf16, #tpu.memory_space<vmem>>, vector<1x272x16xbf16>
    %7 = vector.shape_cast %6 : vector<1x272x16xbf16> to vector<272x16xbf16>
    %8 = tpu.concatenate %4, %7 in 0 : vector<272x16xbf16>, vector<272x16xbf16> -> vector<544x16xbf16>
    %c0_3 = arith.constant 0 : index
    %9 = arith.index_cast %1 : i32 to index
    %c0_4 = arith.constant 0 : index
    %10 = vector.load %arg4[%c0_3, %9, %c0_4] : memref<1x288x1xf32, #tpu.memory_space<vmem>>, vector<1x272x1xf32>
    %11 = vector.shape_cast %10 : vector<1x272x1xf32> to vector<272x1xf32>
    %c0_5 = arith.constant 0 : index
    %12 = arith.index_cast %1 : i32 to index
    %c0_6 = arith.constant 0 : index
    %13 = vector.load %arg5[%c0_5, %12, %c0_6] : memref<1x288x1xf32, #tpu.memory_space<vmem>>, vector<1x272x1xf32>
    %14 = vector.shape_cast %13 : vector<1x272x1xf32> to vector<272x1xf32>
    %15 = tpu.concatenate %11, %14 in 0 : vector<272x1xf32>, vector<272x1xf32> -> vector<544x1xf32>
    %c0_7 = arith.constant 0 : index
    %c0_8 = arith.constant 0 : index
    %16 = vector.load %arg6[%c0_7, %c0_8] : memref<16x128xbf16, #tpu.memory_space<vmem>>, vector<16x128xbf16>
    %cst = arith.constant dense<0.000000e+00> : vector<544x128xf32>
    %17 = tpu.matmul %8, %16, %cst {dimension_numbers = #tpu.dot_dimension_numbers<[1], [0], [0], [1], [0, 0, 1, 1], [], []>} : vector<544x16xbf16>, vector<16x128xbf16>, vector<544x128xf32> -> vector<544x128xf32>
    %c0_9 = arith.constant 0 : index
    %c0_10 = arith.constant 0 : index
    %18 = vector.load %arg7[%c0_9, %c0_10] : memref<1x128xf32, #tpu.memory_space<vmem>>, vector<1x128xf32>
    %19 = vector.broadcast %18 : vector<1x128xf32> to vector<544x128xf32>
    %20 = arith.mulf %17, %19 : vector<544x128xf32>
    %c0_11 = arith.constant 0 : index
    %c0_12 = arith.constant 0 : index
    %21 = vector.load %arg8[%c0_11, %c0_12] : memref<1x128xf32, #tpu.memory_space<vmem>>, vector<1x128xf32>
    %22 = vector.broadcast %21 : vector<1x128xf32> to vector<544x128xf32>
    %23 = arith.addf %20, %22 : vector<544x128xf32>
    %cst_13 = arith.constant 3.000000e+00 : f32
    %24 = vector.broadcast %cst_13 : f32 to vector<544x128xf32>
    %25 = arith.addf %23, %24 : vector<544x128xf32>
    %cst_14 = arith.constant 0.000000e+00 : f32
    %cst_15 = arith.constant 6.000000e+00 : f32
    %26 = vector.broadcast %cst_14 : f32 to vector<544x128xf32>
    %27 = arith.maximumf %26, %25 : vector<544x128xf32>
    %28 = vector.broadcast %cst_15 : f32 to vector<544x128xf32>
    %29 = arith.minimumf %28, %27 : vector<544x128xf32>
    %30 = arith.mulf %23, %29 : vector<544x128xf32>
    %cst_16 = arith.constant 0.166666672 : f32
    %31 = vector.broadcast %cst_16 : f32 to vector<544x128xf32>
    %32 = arith.mulf %30, %31 : vector<544x128xf32>
    %33 = vector.broadcast %15 : vector<544x1xf32> to vector<544x128xf32>
    %34 = arith.mulf %32, %33 : vector<544x128xf32>
    %35 = arith.truncf %34 : vector<544x128xf32> to vector<544x128xbf16>
    %c0_17 = arith.constant 0 : index
    %c0_18 = arith.constant 0 : index
    %36 = vector.load %arg9[%c0_17, %c0_18] : memref<9x128xf32, #tpu.memory_space<vmem>>, vector<9x128xf32>
    %cst_19 = arith.constant 0.000000e+00 : f32
    %37 = vector.broadcast %cst_19 : f32 to vector<8x128xf32>
    %38 = vector.extract_strided_slice %35 {offsets = [0, 0], sizes = [8, 128], strides = [1, 1]} : vector<544x128xbf16> to vector<8x128xbf16>
    %39 = arith.extf %38 : vector<8x128xbf16> to vector<8x128xf32>
    %40 = vector.extract_strided_slice %36 {offsets = [0, 0], sizes = [1, 128], strides = [1, 1]} : vector<9x128xf32> to vector<1x128xf32>
    %41 = vector.broadcast %40 : vector<1x128xf32> to vector<8x128xf32>
    %42 = arith.mulf %39, %41 : vector<8x128xf32>
    %43 = arith.addf %37, %42 : vector<8x128xf32>
    %44 = vector.extract_strided_slice %35 {offsets = [272, 0], sizes = [8, 128], strides = [1, 1]} : vector<544x128xbf16> to vector<8x128xbf16>
    %45 = arith.extf %44 : vector<8x128xbf16> to vector<8x128xf32>
    %46 = vector.extract_strided_slice %36 {offsets = [1, 0], sizes = [1, 128], strides = [1, 1]} : vector<9x128xf32> to vector<1x128xf32>
    %47 = vector.broadcast %46 : vector<1x128xf32> to vector<8x128xf32>
    %48 = arith.mulf %45, %47 : vector<8x128xf32>
    %49 = arith.addf %43, %48 : vector<8x128xf32>
    %50 = vector.extract_strided_slice %35 {offsets = [1, 0], sizes = [8, 128], strides = [1, 1]} : vector<544x128xbf16> to vector<8x128xbf16>
    %51 = arith.extf %50 : vector<8x128xbf16> to vector<8x128xf32>
    %52 = vector.extract_strided_slice %36 {offsets = [2, 0], sizes = [1, 128], strides = [1, 1]} : vector<9x128xf32> to vector<1x128xf32>
    %53 = vector.broadcast %52 : vector<1x128xf32> to vector<8x128xf32>
    %54 = arith.mulf %51, %53 : vector<8x128xf32>
    %55 = arith.addf %49, %54 : vector<8x128xf32>
    %56 = vector.extract_strided_slice %35 {offsets = [16, 0], sizes = [8, 128], strides = [1, 1]} : vector<544x128xbf16> to vector<8x128xbf16>
    %57 = arith.extf %56 : vector<8x128xbf16> to vector<8x128xf32>
    %58 = vector.extract_strided_slice %36 {offsets = [3, 0], sizes = [1, 128], strides = [1, 1]} : vector<9x128xf32> to vector<1x128xf32>
    %59 = vector.broadcast %58 : vector<1x128xf32> to vector<8x128xf32>
    %60 = arith.mulf %57, %59 : vector<8x128xf32>
    %61 = arith.addf %55, %60 : vector<8x128xf32>
    %62 = vector.extract_strided_slice %35 {offsets = [288, 0], sizes = [8, 128], strides = [1, 1]} : vector<544x128xbf16> to vector<8x128xbf16>
    %63 = arith.extf %62 : vector<8x128xbf16> to vector<8x128xf32>
    %64 = vector.extract_strided_slice %36 {offsets = [4, 0], sizes = [1, 128], strides = [1, 1]} : vector<9x128xf32> to vector<1x128xf32>
    %65 = vector.broadcast %64 : vector<1x128xf32> to vector<8x128xf32>
    %66 = arith.mulf %63, %65 : vector<8x128xf32>
    %67 = arith.addf %61, %66 : vector<8x128xf32>
    %68 = vector.extract_strided_slice %35 {offsets = [17, 0], sizes = [8, 128], strides = [1, 1]} : vector<544x128xbf16> to vector<8x128xbf16>
    %69 = arith.extf %68 : vector<8x128xbf16> to vector<8x128xf32>
    %70 = vector.extract_strided_slice %36 {offsets = [5, 0], sizes = [1, 128], strides = [1, 1]} : vector<9x128xf32> to vector<1x128xf32>
    %71 = vector.broadcast %70 : vector<1x128xf32> to vector<8x128xf32>
    %72 = arith.mulf %69, %71 : vector<8x128xf32>
    %73 = arith.addf %67, %72 : vector<8x128xf32>
    %74 = vector.extract_strided_slice %35 {offsets = [32, 0], sizes = [8, 128], strides = [1, 1]} : vector<544x128xbf16> to vector<8x128xbf16>
    %75 = arith.extf %74 : vector<8x128xbf16> to vector<8x128xf32>
    %76 = vector.extract_strided_slice %36 {offsets = [6, 0], sizes = [1, 128], strides = [1, 1]} : vector<9x128xf32> to vector<1x128xf32>
    %77 = vector.broadcast %76 : vector<1x128xf32> to vector<8x128xf32>
    %78 = arith.mulf %75, %77 : vector<8x128xf32>
    %79 = arith.addf %73, %78 : vector<8x128xf32>
    %80 = vector.extract_strided_slice %35 {offsets = [304, 0], sizes = [8, 128], strides = [1, 1]} : vector<544x128xbf16> to vector<8x128xbf16>
    %81 = arith.extf %80 : vector<8x128xbf16> to vector<8x128xf32>
    %82 = vector.extract_strided_slice %36 {offsets = [7, 0], sizes = [1, 128], strides = [1, 1]} : vector<9x128xf32> to vector<1x128xf32>
    %83 = vector.broadcast %82 : vector<1x128xf32> to vector<8x128xf32>
    %84 = arith.mulf %81, %83 : vector<8x128xf32>
    %85 = arith.addf %79, %84 : vector<8x128xf32>
    %86 = vector.extract_strided_slice %35 {offsets = [33, 0], sizes = [8, 128], strides = [1, 1]} : vector<544x128xbf16> to vector<8x128xbf16>
    %87 = arith.extf %86 : vector<8x128xbf16> to vector<8x128xf32>
    %88 = vector.extract_strided_slice %36 {offsets = [8, 0], sizes = [1, 128], strides = [1, 1]} : vector<9x128xf32> to vector<1x128xf32>
    %89 = vector.broadcast %88 : vector<1x128xf32> to vector<8x128xf32>
    %90 = arith.mulf %87, %89 : vector<8x128xf32>
    %91 = arith.addf %85, %90 : vector<8x128xf32>
    %cst_20 = arith.constant 0.000000e+00 : f32
    %92 = vector.broadcast %cst_20 : f32 to vector<8x128xf32>
    %93 = vector.extract_strided_slice %35 {offsets = [32, 0], sizes = [8, 128], strides = [1, 1]} : vector<544x128xbf16> to vector<8x128xbf16>
    %94 = arith.extf %93 : vector<8x128xbf16> to vector<8x128xf32>
    %95 = vector.extract_strided_slice %36 {offsets = [0, 0], sizes = [1, 128], strides = [1, 1]} : vector<9x128xf32> to vector<1x128xf32>
    %96 = vector.broadcast %95 : vector<1x128xf32> to vector<8x128xf32>
    %97 = arith.mulf %94, %96 : vector<8x128xf32>
    %98 = arith.addf %92, %97 : vector<8x128xf32>
    %99 = vector.extract_strided_slice %35 {offsets = [304, 0], sizes = [8, 128], strides = [1, 1]} : vector<544x128xbf16> to vector<8x128xbf16>
    %100 = arith.extf %99 : vector<8x128xbf16> to vector<8x128xf32>
    %101 = vector.extract_strided_slice %36 {offsets = [1, 0], sizes = [1, 128], strides = [1, 1]} : vector<9x128xf32> to vector<1x128xf32>
    %102 = vector.broadcast %101 : vector<1x128xf32> to vector<8x128xf32>
    %103 = arith.mulf %100, %102 : vector<8x128xf32>
    %104 = arith.addf %98, %103 : vector<8x128xf32>
    %105 = vector.extract_strided_slice %35 {offsets = [33, 0], sizes = [8, 128], strides = [1, 1]} : vector<544x128xbf16> to vector<8x128xbf16>
    %106 = arith.extf %105 : vector<8x128xbf16> to vector<8x128xf32>
    %107 = vector.extract_strided_slice %36 {offsets = [2, 0], sizes = [1, 128], strides = [1, 1]} : vector<9x128xf32> to vector<1x128xf32>
    %108 = vector.broadcast %107 : vector<1x128xf32> to vector<8x128xf32>
    %109 = arith.mulf %106, %108 : vector<8x128xf32>
    %110 = arith.addf %104, %109 : vector<8x128xf32>
    %111 = vector.extract_strided_slice %35 {offsets = [48, 0], sizes = [8, 128], strides = [1, 1]} : vector<544x128xbf16> to vector<8x128xbf16>
    %112 = arith.extf %111 : vector<8x128xbf16> to vector<8x128xf32>
    %113 = vector.extract_strided_slice %36 {offsets = [3, 0], sizes = [1, 128], strides = [1, 1]} : vector<9x128xf32> to vector<1x128xf32>
    %114 = vector.broadcast %113 : vector<1x128xf32> to vector<8x128xf32>
    %115 = arith.mulf %112, %114 : vector<8x128xf32>
    %116 = arith.addf %110, %115 : vector<8x128xf32>
    %117 = vector.extract_strided_slice %35 {offsets = [320, 0], sizes = [8, 128], strides = [1, 1]} : vector<544x128xbf16> to vector<8x128xbf16>
    %118 = arith.extf %117 : vector<8x128xbf16> to vector<8x128xf32>
    %119 = vector.extract_strided_slice %36 {offsets = [4, 0], sizes = [1, 128], strides = [1, 1]} : vector<9x128xf32> to vector<1x128xf32>
    %120 = vector.broadcast %119 : vector<1x128xf32> to vector<8x128xf32>
    %121 = arith.mulf %118, %120 : vector<8x128xf32>
    %122 = arith.addf %116, %121 : vector<8x128xf32>
    %123 = vector.extract_strided_slice %35 {offsets = [49, 0], sizes = [8, 128], strides = [1, 1]} : vector<544x128xbf16> to vector<8x128xbf16>
    %124 = arith.extf %123 : vector<8x128xbf16> to vector<8x128xf32>
    %125 = vector.extract_strided_slice %36 {offsets = [5, 0], sizes = [1, 128], strides = [1, 1]} : vector<9x128xf32> to vector<1x128xf32>
    %126 = vector.broadcast %125 : vector<1x128xf32> to vector<8x128xf32>
    %127 = arith.mulf %124, %126 : vector<8x128xf32>
    %128 = arith.addf %122, %127 : vector<8x128xf32>
    %129 = vector.extract_strided_slice %35 {offsets = [64, 0], sizes = [8, 128], strides = [1, 1]} : vector<544x128xbf16> to vector<8x128xbf16>
    %130 = arith.extf %129 : vector<8x128xbf16> to vector<8x128xf32>
    %131 = vector.extract_strided_slice %36 {offsets = [6, 0], sizes = [1, 128], strides = [1, 1]} : vector<9x128xf32> to vector<1x128xf32>
    %132 = vector.broadcast %131 : vector<1x128xf32> to vector<8x128xf32>
    %133 = arith.mulf %130, %132 : vector<8x128xf32>
    %134 = arith.addf %128, %133 : vector<8x128xf32>
    %135 = vector.extract_strided_slice %35 {offsets = [336, 0], sizes = [8, 128], strides = [1, 1]} : vector<544x128xbf16> to vector<8x128xbf16>
    %136 = arith.extf %135 : vector<8x128xbf16> to vector<8x128xf32>
    %137 = vector.extract_strided_slice %36 {offsets = [7, 0], sizes = [1, 128], strides = [1, 1]} : vector<9x128xf32> to vector<1x128xf32>
    %138 = vector.broadcast %137 : vector<1x128xf32> to vector<8x128xf32>
    %139 = arith.mulf %136, %138 : vector<8x128xf32>
    %140 = arith.addf %134, %139 : vector<8x128xf32>
    %141 = vector.extract_strided_slice %35 {offsets = [65, 0], sizes = [8, 128], strides = [1, 1]} : vector<544x128xbf16> to vector<8x128xbf16>
    %142 = arith.extf %141 : vector<8x128xbf16> to vector<8x128xf32>
    %143 = vector.extract_strided_slice %36 {offsets = [8, 0], sizes = [1, 128], strides = [1, 1]} : vector<9x128xf32> to vector<1x128xf32>
    %144 = vector.broadcast %143 : vector<1x128xf32> to vector<8x128xf32>
    %145 = arith.mulf %142, %144 : vector<8x128xf32>
    %146 = arith.addf %140, %145 : vector<8x128xf32>
    %cst_21 = arith.constant 0.000000e+00 : f32
    %147 = vector.broadcast %cst_21 : f32 to vector<8x128xf32>
    %148 = vector.extract_strided_slice %35 {offsets = [64, 0], sizes = [8, 128], strides = [1, 1]} : vector<544x128xbf16> to vector<8x128xbf16>
    %149 = arith.extf %148 : vector<8x128xbf16> to vector<8x128xf32>
    %150 = vector.extract_strided_slice %36 {offsets = [0, 0], sizes = [1, 128], strides = [1, 1]} : vector<9x128xf32> to vector<1x128xf32>
    %151 = vector.broadcast %150 : vector<1x128xf32> to vector<8x128xf32>
    %152 = arith.mulf %149, %151 : vector<8x128xf32>
    %153 = arith.addf %147, %152 : vector<8x128xf32>
    %154 = vector.extract_strided_slice %35 {offsets = [336, 0], sizes = [8, 128], strides = [1, 1]} : vector<544x128xbf16> to vector<8x128xbf16>
    %155 = arith.extf %154 : vector<8x128xbf16> to vector<8x128xf32>
    %156 = vector.extract_strided_slice %36 {offsets = [1, 0], sizes = [1, 128], strides = [1, 1]} : vector<9x128xf32> to vector<1x128xf32>
    %157 = vector.broadcast %156 : vector<1x128xf32> to vector<8x128xf32>
    %158 = arith.mulf %155, %157 : vector<8x128xf32>
    %159 = arith.addf %153, %158 : vector<8x128xf32>
    %160 = vector.extract_strided_slice %35 {offsets = [65, 0], sizes = [8, 128], strides = [1, 1]} : vector<544x128xbf16> to vector<8x128xbf16>
    %161 = arith.extf %160 : vector<8x128xbf16> to vector<8x128xf32>
    %162 = vector.extract_strided_slice %36 {offsets = [2, 0], sizes = [1, 128], strides = [1, 1]} : vector<9x128xf32> to vector<1x128xf32>
    %163 = vector.broadcast %162 : vector<1x128xf32> to vector<8x128xf32>
    %164 = arith.mulf %161, %163 : vector<8x128xf32>
    %165 = arith.addf %159, %164 : vector<8x128xf32>
    %166 = vector.extract_strided_slice %35 {offsets = [80, 0], sizes = [8, 128], strides = [1, 1]} : vector<544x128xbf16> to vector<8x128xbf16>
    %167 = arith.extf %166 : vector<8x128xbf16> to vector<8x128xf32>
    %168 = vector.extract_strided_slice %36 {offsets = [3, 0], sizes = [1, 128], strides = [1, 1]} : vector<9x128xf32> to vector<1x128xf32>
    %169 = vector.broadcast %168 : vector<1x128xf32> to vector<8x128xf32>
    %170 = arith.mulf %167, %169 : vector<8x128xf32>
    %171 = arith.addf %165, %170 : vector<8x128xf32>
    %172 = vector.extract_strided_slice %35 {offsets = [352, 0], sizes = [8, 128], strides = [1, 1]} : vector<544x128xbf16> to vector<8x128xbf16>
    %173 = arith.extf %172 : vector<8x128xbf16> to vector<8x128xf32>
    %174 = vector.extract_strided_slice %36 {offsets = [4, 0], sizes = [1, 128], strides = [1, 1]} : vector<9x128xf32> to vector<1x128xf32>
    %175 = vector.broadcast %174 : vector<1x128xf32> to vector<8x128xf32>
    %176 = arith.mulf %173, %175 : vector<8x128xf32>
    %177 = arith.addf %171, %176 : vector<8x128xf32>
    %178 = vector.extract_strided_slice %35 {offsets = [81, 0], sizes = [8, 128], strides = [1, 1]} : vector<544x128xbf16> to vector<8x128xbf16>
    %179 = arith.extf %178 : vector<8x128xbf16> to vector<8x128xf32>
    %180 = vector.extract_strided_slice %36 {offsets = [5, 0], sizes = [1, 128], strides = [1, 1]} : vector<9x128xf32> to vector<1x128xf32>
    %181 = vector.broadcast %180 : vector<1x128xf32> to vector<8x128xf32>
    %182 = arith.mulf %179, %181 : vector<8x128xf32>
    %183 = arith.addf %177, %182 : vector<8x128xf32>
    %184 = vector.extract_strided_slice %35 {offsets = [96, 0], sizes = [8, 128], strides = [1, 1]} : vector<544x128xbf16> to vector<8x128xbf16>
    %185 = arith.extf %184 : vector<8x128xbf16> to vector<8x128xf32>
    %186 = vector.extract_strided_slice %36 {offsets = [6, 0], sizes = [1, 128], strides = [1, 1]} : vector<9x128xf32> to vector<1x128xf32>
    %187 = vector.broadcast %186 : vector<1x128xf32> to vector<8x128xf32>
    %188 = arith.mulf %185, %187 : vector<8x128xf32>
    %189 = arith.addf %183, %188 : vector<8x128xf32>
    %190 = vector.extract_strided_slice %35 {offsets = [368, 0], sizes = [8, 128], strides = [1, 1]} : vector<544x128xbf16> to vector<8x128xbf16>
    %191 = arith.extf %190 : vector<8x128xbf16> to vector<8x128xf32>
    %192 = vector.extract_strided_slice %36 {offsets = [7, 0], sizes = [1, 128], strides = [1, 1]} : vector<9x128xf32> to vector<1x128xf32>
    %193 = vector.broadcast %192 : vector<1x128xf32> to vector<8x128xf32>
    %194 = arith.mulf %191, %193 : vector<8x128xf32>
    %195 = arith.addf %189, %194 : vector<8x128xf32>
    %196 = vector.extract_strided_slice %35 {offsets = [97, 0], sizes = [8, 128], strides = [1, 1]} : vector<544x128xbf16> to vector<8x128xbf16>
    %197 = arith.extf %196 : vector<8x128xbf16> to vector<8x128xf32>
    %198 = vector.extract_strided_slice %36 {offsets = [8, 0], sizes = [1, 128], strides = [1, 1]} : vector<9x128xf32> to vector<1x128xf32>
    %199 = vector.broadcast %198 : vector<1x128xf32> to vector<8x128xf32>
    %200 = arith.mulf %197, %199 : vector<8x128xf32>
    %201 = arith.addf %195, %200 : vector<8x128xf32>
    %cst_22 = arith.constant 0.000000e+00 : f32
    %202 = vector.broadcast %cst_22 : f32 to vector<8x128xf32>
    %203 = vector.extract_strided_slice %35 {offsets = [96, 0], sizes = [8, 128], strides = [1, 1]} : vector<544x128xbf16> to vector<8x128xbf16>
    %204 = arith.extf %203 : vector<8x128xbf16> to vector<8x128xf32>
    %205 = vector.extract_strided_slice %36 {offsets = [0, 0], sizes = [1, 128], strides = [1, 1]} : vector<9x128xf32> to vector<1x128xf32>
    %206 = vector.broadcast %205 : vector<1x128xf32> to vector<8x128xf32>
    %207 = arith.mulf %204, %206 : vector<8x128xf32>
    %208 = arith.addf %202, %207 : vector<8x128xf32>
    %209 = vector.extract_strided_slice %35 {offsets = [368, 0], sizes = [8, 128], strides = [1, 1]} : vector<544x128xbf16> to vector<8x128xbf16>
    %210 = arith.extf %209 : vector<8x128xbf16> to vector<8x128xf32>
    %211 = vector.extract_strided_slice %36 {offsets = [1, 0], sizes = [1, 128], strides = [1, 1]} : vector<9x128xf32> to vector<1x128xf32>
    %212 = vector.broadcast %211 : vector<1x128xf32> to vector<8x128xf32>
    %213 = arith.mulf %210, %212 : vector<8x128xf32>
    %214 = arith.addf %208, %213 : vector<8x128xf32>
    %215 = vector.extract_strided_slice %35 {offsets = [97, 0], sizes = [8, 128], strides = [1, 1]} : vector<544x128xbf16> to vector<8x128xbf16>
    %216 = arith.extf %215 : vector<8x128xbf16> to vector<8x128xf32>
    %217 = vector.extract_strided_slice %36 {offsets = [2, 0], sizes = [1, 128], strides = [1, 1]} : vector<9x128xf32> to vector<1x128xf32>
    %218 = vector.broadcast %217 : vector<1x128xf32> to vector<8x128xf32>
    %219 = arith.mulf %216, %218 : vector<8x128xf32>
    %220 = arith.addf %214, %219 : vector<8x128xf32>
    %221 = vector.extract_strided_slice %35 {offsets = [112, 0], sizes = [8, 128], strides = [1, 1]} : vector<544x128xbf16> to vector<8x128xbf16>
    %222 = arith.extf %221 : vector<8x128xbf16> to vector<8x128xf32>
    %223 = vector.extract_strided_slice %36 {offsets = [3, 0], sizes = [1, 128], strides = [1, 1]} : vector<9x128xf32> to vector<1x128xf32>
    %224 = vector.broadcast %223 : vector<1x128xf32> to vector<8x128xf32>
    %225 = arith.mulf %222, %224 : vector<8x128xf32>
    %226 = arith.addf %220, %225 : vector<8x128xf32>
    %227 = vector.extract_strided_slice %35 {offsets = [384, 0], sizes = [8, 128], strides = [1, 1]} : vector<544x128xbf16> to vector<8x128xbf16>
    %228 = arith.extf %227 : vector<8x128xbf16> to vector<8x128xf32>
    %229 = vector.extract_strided_slice %36 {offsets = [4, 0], sizes = [1, 128], strides = [1, 1]} : vector<9x128xf32> to vector<1x128xf32>
    %230 = vector.broadcast %229 : vector<1x128xf32> to vector<8x128xf32>
    %231 = arith.mulf %228, %230 : vector<8x128xf32>
    %232 = arith.addf %226, %231 : vector<8x128xf32>
    %233 = vector.extract_strided_slice %35 {offsets = [113, 0], sizes = [8, 128], strides = [1, 1]} : vector<544x128xbf16> to vector<8x128xbf16>
    %234 = arith.extf %233 : vector<8x128xbf16> to vector<8x128xf32>
    %235 = vector.extract_strided_slice %36 {offsets = [5, 0], sizes = [1, 128], strides = [1, 1]} : vector<9x128xf32> to vector<1x128xf32>
    %236 = vector.broadcast %235 : vector<1x128xf32> to vector<8x128xf32>
    %237 = arith.mulf %234, %236 : vector<8x128xf32>
    %238 = arith.addf %232, %237 : vector<8x128xf32>
    %239 = vector.extract_strided_slice %35 {offsets = [128, 0], sizes = [8, 128], strides = [1, 1]} : vector<544x128xbf16> to vector<8x128xbf16>
    %240 = arith.extf %239 : vector<8x128xbf16> to vector<8x128xf32>
    %241 = vector.extract_strided_slice %36 {offsets = [6, 0], sizes = [1, 128], strides = [1, 1]} : vector<9x128xf32> to vector<1x128xf32>
    %242 = vector.broadcast %241 : vector<1x128xf32> to vector<8x128xf32>
    %243 = arith.mulf %240, %242 : vector<8x128xf32>
    %244 = arith.addf %238, %243 : vector<8x128xf32>
    %245 = vector.extract_strided_slice %35 {offsets = [400, 0], sizes = [8, 128], strides = [1, 1]} : vector<544x128xbf16> to vector<8x128xbf16>
    %246 = arith.extf %245 : vector<8x128xbf16> to vector<8x128xf32>
    %247 = vector.extract_strided_slice %36 {offsets = [7, 0], sizes = [1, 128], strides = [1, 1]} : vector<9x128xf32> to vector<1x128xf32>
    %248 = vector.broadcast %247 : vector<1x128xf32> to vector<8x128xf32>
    %249 = arith.mulf %246, %248 : vector<8x128xf32>
    %250 = arith.addf %244, %249 : vector<8x128xf32>
    %251 = vector.extract_strided_slice %35 {offsets = [129, 0], sizes = [8, 128], strides = [1, 1]} : vector<544x128xbf16> to vector<8x128xbf16>
    %252 = arith.extf %251 : vector<8x128xbf16> to vector<8x128xf32>
    %253 = vector.extract_strided_slice %36 {offsets = [8, 0], sizes = [1, 128], strides = [1, 1]} : vector<9x128xf32> to vector<1x128xf32>
    %254 = vector.broadcast %253 : vector<1x128xf32> to vector<8x128xf32>
    %255 = arith.mulf %252, %254 : vector<8x128xf32>
    %256 = arith.addf %250, %255 : vector<8x128xf32>
    %cst_23 = arith.constant 0.000000e+00 : f32
    %257 = vector.broadcast %cst_23 : f32 to vector<8x128xf32>
    %258 = vector.extract_strided_slice %35 {offsets = [128, 0], sizes = [8, 128], strides = [1, 1]} : vector<544x128xbf16> to vector<8x128xbf16>
    %259 = arith.extf %258 : vector<8x128xbf16> to vector<8x128xf32>
    %260 = vector.extract_strided_slice %36 {offsets = [0, 0], sizes = [1, 128], strides = [1, 1]} : vector<9x128xf32> to vector<1x128xf32>
    %261 = vector.broadcast %260 : vector<1x128xf32> to vector<8x128xf32>
    %262 = arith.mulf %259, %261 : vector<8x128xf32>
    %263 = arith.addf %257, %262 : vector<8x128xf32>
    %264 = vector.extract_strided_slice %35 {offsets = [400, 0], sizes = [8, 128], strides = [1, 1]} : vector<544x128xbf16> to vector<8x128xbf16>
    %265 = arith.extf %264 : vector<8x128xbf16> to vector<8x128xf32>
    %266 = vector.extract_strided_slice %36 {offsets = [1, 0], sizes = [1, 128], strides = [1, 1]} : vector<9x128xf32> to vector<1x128xf32>
    %267 = vector.broadcast %266 : vector<1x128xf32> to vector<8x128xf32>
    %268 = arith.mulf %265, %267 : vector<8x128xf32>
    %269 = arith.addf %263, %268 : vector<8x128xf32>
    %270 = vector.extract_strided_slice %35 {offsets = [129, 0], sizes = [8, 128], strides = [1, 1]} : vector<544x128xbf16> to vector<8x128xbf16>
    %271 = arith.extf %270 : vector<8x128xbf16> to vector<8x128xf32>
    %272 = vector.extract_strided_slice %36 {offsets = [2, 0], sizes = [1, 128], strides = [1, 1]} : vector<9x128xf32> to vector<1x128xf32>
    %273 = vector.broadcast %272 : vector<1x128xf32> to vector<8x128xf32>
    %274 = arith.mulf %271, %273 : vector<8x128xf32>
    %275 = arith.addf %269, %274 : vector<8x128xf32>
    %276 = vector.extract_strided_slice %35 {offsets = [144, 0], sizes = [8, 128], strides = [1, 1]} : vector<544x128xbf16> to vector<8x128xbf16>
    %277 = arith.extf %276 : vector<8x128xbf16> to vector<8x128xf32>
    %278 = vector.extract_strided_slice %36 {offsets = [3, 0], sizes = [1, 128], strides = [1, 1]} : vector<9x128xf32> to vector<1x128xf32>
    %279 = vector.broadcast %278 : vector<1x128xf32> to vector<8x128xf32>
    %280 = arith.mulf %277, %279 : vector<8x128xf32>
    %281 = arith.addf %275, %280 : vector<8x128xf32>
    %282 = vector.extract_strided_slice %35 {offsets = [416, 0], sizes = [8, 128], strides = [1, 1]} : vector<544x128xbf16> to vector<8x128xbf16>
    %283 = arith.extf %282 : vector<8x128xbf16> to vector<8x128xf32>
    %284 = vector.extract_strided_slice %36 {offsets = [4, 0], sizes = [1, 128], strides = [1, 1]} : vector<9x128xf32> to vector<1x128xf32>
    %285 = vector.broadcast %284 : vector<1x128xf32> to vector<8x128xf32>
    %286 = arith.mulf %283, %285 : vector<8x128xf32>
    %287 = arith.addf %281, %286 : vector<8x128xf32>
    %288 = vector.extract_strided_slice %35 {offsets = [145, 0], sizes = [8, 128], strides = [1, 1]} : vector<544x128xbf16> to vector<8x128xbf16>
    %289 = arith.extf %288 : vector<8x128xbf16> to vector<8x128xf32>
    %290 = vector.extract_strided_slice %36 {offsets = [5, 0], sizes = [1, 128], strides = [1, 1]} : vector<9x128xf32> to vector<1x128xf32>
    %291 = vector.broadcast %290 : vector<1x128xf32> to vector<8x128xf32>
    %292 = arith.mulf %289, %291 : vector<8x128xf32>
    %293 = arith.addf %287, %292 : vector<8x128xf32>
    %294 = vector.extract_strided_slice %35 {offsets = [160, 0], sizes = [8, 128], strides = [1, 1]} : vector<544x128xbf16> to vector<8x128xbf16>
    %295 = arith.extf %294 : vector<8x128xbf16> to vector<8x128xf32>
    %296 = vector.extract_strided_slice %36 {offsets = [6, 0], sizes = [1, 128], strides = [1, 1]} : vector<9x128xf32> to vector<1x128xf32>
    %297 = vector.broadcast %296 : vector<1x128xf32> to vector<8x128xf32>
    %298 = arith.mulf %295, %297 : vector<8x128xf32>
    %299 = arith.addf %293, %298 : vector<8x128xf32>
    %300 = vector.extract_strided_slice %35 {offsets = [432, 0], sizes = [8, 128], strides = [1, 1]} : vector<544x128xbf16> to vector<8x128xbf16>
    %301 = arith.extf %300 : vector<8x128xbf16> to vector<8x128xf32>
    %302 = vector.extract_strided_slice %36 {offsets = [7, 0], sizes = [1, 128], strides = [1, 1]} : vector<9x128xf32> to vector<1x128xf32>
    %303 = vector.broadcast %302 : vector<1x128xf32> to vector<8x128xf32>
    %304 = arith.mulf %301, %303 : vector<8x128xf32>
    %305 = arith.addf %299, %304 : vector<8x128xf32>
    %306 = vector.extract_strided_slice %35 {offsets = [161, 0], sizes = [8, 128], strides = [1, 1]} : vector<544x128xbf16> to vector<8x128xbf16>
    %307 = arith.extf %306 : vector<8x128xbf16> to vector<8x128xf32>
    %308 = vector.extract_strided_slice %36 {offsets = [8, 0], sizes = [1, 128], strides = [1, 1]} : vector<9x128xf32> to vector<1x128xf32>
    %309 = vector.broadcast %308 : vector<1x128xf32> to vector<8x128xf32>
    %310 = arith.mulf %307, %309 : vector<8x128xf32>
    %311 = arith.addf %305, %310 : vector<8x128xf32>
    %cst_24 = arith.constant 0.000000e+00 : f32
    %312 = vector.broadcast %cst_24 : f32 to vector<8x128xf32>
    %313 = vector.extract_strided_slice %35 {offsets = [160, 0], sizes = [8, 128], strides = [1, 1]} : vector<544x128xbf16> to vector<8x128xbf16>
    %314 = arith.extf %313 : vector<8x128xbf16> to vector<8x128xf32>
    %315 = vector.extract_strided_slice %36 {offsets = [0, 0], sizes = [1, 128], strides = [1, 1]} : vector<9x128xf32> to vector<1x128xf32>
    %316 = vector.broadcast %315 : vector<1x128xf32> to vector<8x128xf32>
    %317 = arith.mulf %314, %316 : vector<8x128xf32>
    %318 = arith.addf %312, %317 : vector<8x128xf32>
    %319 = vector.extract_strided_slice %35 {offsets = [432, 0], sizes = [8, 128], strides = [1, 1]} : vector<544x128xbf16> to vector<8x128xbf16>
    %320 = arith.extf %319 : vector<8x128xbf16> to vector<8x128xf32>
    %321 = vector.extract_strided_slice %36 {offsets = [1, 0], sizes = [1, 128], strides = [1, 1]} : vector<9x128xf32> to vector<1x128xf32>
    %322 = vector.broadcast %321 : vector<1x128xf32> to vector<8x128xf32>
    %323 = arith.mulf %320, %322 : vector<8x128xf32>
    %324 = arith.addf %318, %323 : vector<8x128xf32>
    %325 = vector.extract_strided_slice %35 {offsets = [161, 0], sizes = [8, 128], strides = [1, 1]} : vector<544x128xbf16> to vector<8x128xbf16>
    %326 = arith.extf %325 : vector<8x128xbf16> to vector<8x128xf32>
    %327 = vector.extract_strided_slice %36 {offsets = [2, 0], sizes = [1, 128], strides = [1, 1]} : vector<9x128xf32> to vector<1x128xf32>
    %328 = vector.broadcast %327 : vector<1x128xf32> to vector<8x128xf32>
    %329 = arith.mulf %326, %328 : vector<8x128xf32>
    %330 = arith.addf %324, %329 : vector<8x128xf32>
    %331 = vector.extract_strided_slice %35 {offsets = [176, 0], sizes = [8, 128], strides = [1, 1]} : vector<544x128xbf16> to vector<8x128xbf16>
    %332 = arith.extf %331 : vector<8x128xbf16> to vector<8x128xf32>
    %333 = vector.extract_strided_slice %36 {offsets = [3, 0], sizes = [1, 128], strides = [1, 1]} : vector<9x128xf32> to vector<1x128xf32>
    %334 = vector.broadcast %333 : vector<1x128xf32> to vector<8x128xf32>
    %335 = arith.mulf %332, %334 : vector<8x128xf32>
    %336 = arith.addf %330, %335 : vector<8x128xf32>
    %337 = vector.extract_strided_slice %35 {offsets = [448, 0], sizes = [8, 128], strides = [1, 1]} : vector<544x128xbf16> to vector<8x128xbf16>
    %338 = arith.extf %337 : vector<8x128xbf16> to vector<8x128xf32>
    %339 = vector.extract_strided_slice %36 {offsets = [4, 0], sizes = [1, 128], strides = [1, 1]} : vector<9x128xf32> to vector<1x128xf32>
    %340 = vector.broadcast %339 : vector<1x128xf32> to vector<8x128xf32>
    %341 = arith.mulf %338, %340 : vector<8x128xf32>
    %342 = arith.addf %336, %341 : vector<8x128xf32>
    %343 = vector.extract_strided_slice %35 {offsets = [177, 0], sizes = [8, 128], strides = [1, 1]} : vector<544x128xbf16> to vector<8x128xbf16>
    %344 = arith.extf %343 : vector<8x128xbf16> to vector<8x128xf32>
    %345 = vector.extract_strided_slice %36 {offsets = [5, 0], sizes = [1, 128], strides = [1, 1]} : vector<9x128xf32> to vector<1x128xf32>
    %346 = vector.broadcast %345 : vector<1x128xf32> to vector<8x128xf32>
    %347 = arith.mulf %344, %346 : vector<8x128xf32>
    %348 = arith.addf %342, %347 : vector<8x128xf32>
    %349 = vector.extract_strided_slice %35 {offsets = [192, 0], sizes = [8, 128], strides = [1, 1]} : vector<544x128xbf16> to vector<8x128xbf16>
    %350 = arith.extf %349 : vector<8x128xbf16> to vector<8x128xf32>
    %351 = vector.extract_strided_slice %36 {offsets = [6, 0], sizes = [1, 128], strides = [1, 1]} : vector<9x128xf32> to vector<1x128xf32>
    %352 = vector.broadcast %351 : vector<1x128xf32> to vector<8x128xf32>
    %353 = arith.mulf %350, %352 : vector<8x128xf32>
    %354 = arith.addf %348, %353 : vector<8x128xf32>
    %355 = vector.extract_strided_slice %35 {offsets = [464, 0], sizes = [8, 128], strides = [1, 1]} : vector<544x128xbf16> to vector<8x128xbf16>
    %356 = arith.extf %355 : vector<8x128xbf16> to vector<8x128xf32>
    %357 = vector.extract_strided_slice %36 {offsets = [7, 0], sizes = [1, 128], strides = [1, 1]} : vector<9x128xf32> to vector<1x128xf32>
    %358 = vector.broadcast %357 : vector<1x128xf32> to vector<8x128xf32>
    %359 = arith.mulf %356, %358 : vector<8x128xf32>
    %360 = arith.addf %354, %359 : vector<8x128xf32>
    %361 = vector.extract_strided_slice %35 {offsets = [193, 0], sizes = [8, 128], strides = [1, 1]} : vector<544x128xbf16> to vector<8x128xbf16>
    %362 = arith.extf %361 : vector<8x128xbf16> to vector<8x128xf32>
    %363 = vector.extract_strided_slice %36 {offsets = [8, 0], sizes = [1, 128], strides = [1, 1]} : vector<9x128xf32> to vector<1x128xf32>
    %364 = vector.broadcast %363 : vector<1x128xf32> to vector<8x128xf32>
    %365 = arith.mulf %362, %364 : vector<8x128xf32>
    %366 = arith.addf %360, %365 : vector<8x128xf32>
    %cst_25 = arith.constant 0.000000e+00 : f32
    %367 = vector.broadcast %cst_25 : f32 to vector<8x128xf32>
    %368 = vector.extract_strided_slice %35 {offsets = [192, 0], sizes = [8, 128], strides = [1, 1]} : vector<544x128xbf16> to vector<8x128xbf16>
    %369 = arith.extf %368 : vector<8x128xbf16> to vector<8x128xf32>
    %370 = vector.extract_strided_slice %36 {offsets = [0, 0], sizes = [1, 128], strides = [1, 1]} : vector<9x128xf32> to vector<1x128xf32>
    %371 = vector.broadcast %370 : vector<1x128xf32> to vector<8x128xf32>
    %372 = arith.mulf %369, %371 : vector<8x128xf32>
    %373 = arith.addf %367, %372 : vector<8x128xf32>
    %374 = vector.extract_strided_slice %35 {offsets = [464, 0], sizes = [8, 128], strides = [1, 1]} : vector<544x128xbf16> to vector<8x128xbf16>
    %375 = arith.extf %374 : vector<8x128xbf16> to vector<8x128xf32>
    %376 = vector.extract_strided_slice %36 {offsets = [1, 0], sizes = [1, 128], strides = [1, 1]} : vector<9x128xf32> to vector<1x128xf32>
    %377 = vector.broadcast %376 : vector<1x128xf32> to vector<8x128xf32>
    %378 = arith.mulf %375, %377 : vector<8x128xf32>
    %379 = arith.addf %373, %378 : vector<8x128xf32>
    %380 = vector.extract_strided_slice %35 {offsets = [193, 0], sizes = [8, 128], strides = [1, 1]} : vector<544x128xbf16> to vector<8x128xbf16>
    %381 = arith.extf %380 : vector<8x128xbf16> to vector<8x128xf32>
    %382 = vector.extract_strided_slice %36 {offsets = [2, 0], sizes = [1, 128], strides = [1, 1]} : vector<9x128xf32> to vector<1x128xf32>
    %383 = vector.broadcast %382 : vector<1x128xf32> to vector<8x128xf32>
    %384 = arith.mulf %381, %383 : vector<8x128xf32>
    %385 = arith.addf %379, %384 : vector<8x128xf32>
    %386 = vector.extract_strided_slice %35 {offsets = [208, 0], sizes = [8, 128], strides = [1, 1]} : vector<544x128xbf16> to vector<8x128xbf16>
    %387 = arith.extf %386 : vector<8x128xbf16> to vector<8x128xf32>
    %388 = vector.extract_strided_slice %36 {offsets = [3, 0], sizes = [1, 128], strides = [1, 1]} : vector<9x128xf32> to vector<1x128xf32>
    %389 = vector.broadcast %388 : vector<1x128xf32> to vector<8x128xf32>
    %390 = arith.mulf %387, %389 : vector<8x128xf32>
    %391 = arith.addf %385, %390 : vector<8x128xf32>
    %392 = vector.extract_strided_slice %35 {offsets = [480, 0], sizes = [8, 128], strides = [1, 1]} : vector<544x128xbf16> to vector<8x128xbf16>
    %393 = arith.extf %392 : vector<8x128xbf16> to vector<8x128xf32>
    %394 = vector.extract_strided_slice %36 {offsets = [4, 0], sizes = [1, 128], strides = [1, 1]} : vector<9x128xf32> to vector<1x128xf32>
    %395 = vector.broadcast %394 : vector<1x128xf32> to vector<8x128xf32>
    %396 = arith.mulf %393, %395 : vector<8x128xf32>
    %397 = arith.addf %391, %396 : vector<8x128xf32>
    %398 = vector.extract_strided_slice %35 {offsets = [209, 0], sizes = [8, 128], strides = [1, 1]} : vector<544x128xbf16> to vector<8x128xbf16>
    %399 = arith.extf %398 : vector<8x128xbf16> to vector<8x128xf32>
    %400 = vector.extract_strided_slice %36 {offsets = [5, 0], sizes = [1, 128], strides = [1, 1]} : vector<9x128xf32> to vector<1x128xf32>
    %401 = vector.broadcast %400 : vector<1x128xf32> to vector<8x128xf32>
    %402 = arith.mulf %399, %401 : vector<8x128xf32>
    %403 = arith.addf %397, %402 : vector<8x128xf32>
    %404 = vector.extract_strided_slice %35 {offsets = [224, 0], sizes = [8, 128], strides = [1, 1]} : vector<544x128xbf16> to vector<8x128xbf16>
    %405 = arith.extf %404 : vector<8x128xbf16> to vector<8x128xf32>
    %406 = vector.extract_strided_slice %36 {offsets = [6, 0], sizes = [1, 128], strides = [1, 1]} : vector<9x128xf32> to vector<1x128xf32>
    %407 = vector.broadcast %406 : vector<1x128xf32> to vector<8x128xf32>
    %408 = arith.mulf %405, %407 : vector<8x128xf32>
    %409 = arith.addf %403, %408 : vector<8x128xf32>
    %410 = vector.extract_strided_slice %35 {offsets = [496, 0], sizes = [8, 128], strides = [1, 1]} : vector<544x128xbf16> to vector<8x128xbf16>
    %411 = arith.extf %410 : vector<8x128xbf16> to vector<8x128xf32>
    %412 = vector.extract_strided_slice %36 {offsets = [7, 0], sizes = [1, 128], strides = [1, 1]} : vector<9x128xf32> to vector<1x128xf32>
    %413 = vector.broadcast %412 : vector<1x128xf32> to vector<8x128xf32>
    %414 = arith.mulf %411, %413 : vector<8x128xf32>
    %415 = arith.addf %409, %414 : vector<8x128xf32>
    %416 = vector.extract_strided_slice %35 {offsets = [225, 0], sizes = [8, 128], strides = [1, 1]} : vector<544x128xbf16> to vector<8x128xbf16>
    %417 = arith.extf %416 : vector<8x128xbf16> to vector<8x128xf32>
    %418 = vector.extract_strided_slice %36 {offsets = [8, 0], sizes = [1, 128], strides = [1, 1]} : vector<9x128xf32> to vector<1x128xf32>
    %419 = vector.broadcast %418 : vector<1x128xf32> to vector<8x128xf32>
    %420 = arith.mulf %417, %419 : vector<8x128xf32>
    %421 = arith.addf %415, %420 : vector<8x128xf32>
    %cst_26 = arith.constant 0.000000e+00 : f32
    %422 = vector.broadcast %cst_26 : f32 to vector<8x128xf32>
    %423 = vector.extract_strided_slice %35 {offsets = [224, 0], sizes = [8, 128], strides = [1, 1]} : vector<544x128xbf16> to vector<8x128xbf16>
    %424 = arith.extf %423 : vector<8x128xbf16> to vector<8x128xf32>
    %425 = vector.extract_strided_slice %36 {offsets = [0, 0], sizes = [1, 128], strides = [1, 1]} : vector<9x128xf32> to vector<1x128xf32>
    %426 = vector.broadcast %425 : vector<1x128xf32> to vector<8x128xf32>
    %427 = arith.mulf %424, %426 : vector<8x128xf32>
    %428 = arith.addf %422, %427 : vector<8x128xf32>
    %429 = vector.extract_strided_slice %35 {offsets = [496, 0], sizes = [8, 128], strides = [1, 1]} : vector<544x128xbf16> to vector<8x128xbf16>
    %430 = arith.extf %429 : vector<8x128xbf16> to vector<8x128xf32>
    %431 = vector.extract_strided_slice %36 {offsets = [1, 0], sizes = [1, 128], strides = [1, 1]} : vector<9x128xf32> to vector<1x128xf32>
    %432 = vector.broadcast %431 : vector<1x128xf32> to vector<8x128xf32>
    %433 = arith.mulf %430, %432 : vector<8x128xf32>
    %434 = arith.addf %428, %433 : vector<8x128xf32>
    %435 = vector.extract_strided_slice %35 {offsets = [225, 0], sizes = [8, 128], strides = [1, 1]} : vector<544x128xbf16> to vector<8x128xbf16>
    %436 = arith.extf %435 : vector<8x128xbf16> to vector<8x128xf32>
    %437 = vector.extract_strided_slice %36 {offsets = [2, 0], sizes = [1, 128], strides = [1, 1]} : vector<9x128xf32> to vector<1x128xf32>
    %438 = vector.broadcast %437 : vector<1x128xf32> to vector<8x128xf32>
    %439 = arith.mulf %436, %438 : vector<8x128xf32>
    %440 = arith.addf %434, %439 : vector<8x128xf32>
    %441 = vector.extract_strided_slice %35 {offsets = [240, 0], sizes = [8, 128], strides = [1, 1]} : vector<544x128xbf16> to vector<8x128xbf16>
    %442 = arith.extf %441 : vector<8x128xbf16> to vector<8x128xf32>
    %443 = vector.extract_strided_slice %36 {offsets = [3, 0], sizes = [1, 128], strides = [1, 1]} : vector<9x128xf32> to vector<1x128xf32>
    %444 = vector.broadcast %443 : vector<1x128xf32> to vector<8x128xf32>
    %445 = arith.mulf %442, %444 : vector<8x128xf32>
    %446 = arith.addf %440, %445 : vector<8x128xf32>
    %447 = vector.extract_strided_slice %35 {offsets = [512, 0], sizes = [8, 128], strides = [1, 1]} : vector<544x128xbf16> to vector<8x128xbf16>
    %448 = arith.extf %447 : vector<8x128xbf16> to vector<8x128xf32>
    %449 = vector.extract_strided_slice %36 {offsets = [4, 0], sizes = [1, 128], strides = [1, 1]} : vector<9x128xf32> to vector<1x128xf32>
    %450 = vector.broadcast %449 : vector<1x128xf32> to vector<8x128xf32>
    %451 = arith.mulf %448, %450 : vector<8x128xf32>
    %452 = arith.addf %446, %451 : vector<8x128xf32>
    %453 = vector.extract_strided_slice %35 {offsets = [241, 0], sizes = [8, 128], strides = [1, 1]} : vector<544x128xbf16> to vector<8x128xbf16>
    %454 = arith.extf %453 : vector<8x128xbf16> to vector<8x128xf32>
    %455 = vector.extract_strided_slice %36 {offsets = [5, 0], sizes = [1, 128], strides = [1, 1]} : vector<9x128xf32> to vector<1x128xf32>
    %456 = vector.broadcast %455 : vector<1x128xf32> to vector<8x128xf32>
    %457 = arith.mulf %454, %456 : vector<8x128xf32>
    %458 = arith.addf %452, %457 : vector<8x128xf32>
    %459 = vector.extract_strided_slice %35 {offsets = [256, 0], sizes = [8, 128], strides = [1, 1]} : vector<544x128xbf16> to vector<8x128xbf16>
    %460 = arith.extf %459 : vector<8x128xbf16> to vector<8x128xf32>
    %461 = vector.extract_strided_slice %36 {offsets = [6, 0], sizes = [1, 128], strides = [1, 1]} : vector<9x128xf32> to vector<1x128xf32>
    %462 = vector.broadcast %461 : vector<1x128xf32> to vector<8x128xf32>
    %463 = arith.mulf %460, %462 : vector<8x128xf32>
    %464 = arith.addf %458, %463 : vector<8x128xf32>
    %465 = vector.extract_strided_slice %35 {offsets = [528, 0], sizes = [8, 128], strides = [1, 1]} : vector<544x128xbf16> to vector<8x128xbf16>
    %466 = arith.extf %465 : vector<8x128xbf16> to vector<8x128xf32>
    %467 = vector.extract_strided_slice %36 {offsets = [7, 0], sizes = [1, 128], strides = [1, 1]} : vector<9x128xf32> to vector<1x128xf32>
    %468 = vector.broadcast %467 : vector<1x128xf32> to vector<8x128xf32>
    %469 = arith.mulf %466, %468 : vector<8x128xf32>
    %470 = arith.addf %464, %469 : vector<8x128xf32>
    %471 = vector.extract_strided_slice %35 {offsets = [257, 0], sizes = [8, 128], strides = [1, 1]} : vector<544x128xbf16> to vector<8x128xbf16>
    %472 = arith.extf %471 : vector<8x128xbf16> to vector<8x128xf32>
    %473 = vector.extract_strided_slice %36 {offsets = [8, 0], sizes = [1, 128], strides = [1, 1]} : vector<9x128xf32> to vector<1x128xf32>
    %474 = vector.broadcast %473 : vector<1x128xf32> to vector<8x128xf32>
    %475 = arith.mulf %472, %474 : vector<8x128xf32>
    %476 = arith.addf %470, %475 : vector<8x128xf32>
    %cst_27 = arith.constant 0.000000e+00 : f32
    %477 = vector.broadcast %cst_27 : f32 to vector<1x128xf32>
    %cst_28 = arith.constant 0.000000e+00 : f32
    %478 = vector.broadcast %cst_28 : f32 to vector<1x128xf32>
    %cst_29 = arith.constant dense<0.000000e+00> : vector<128xf32>
    %479 = vector.multi_reduction <add>, %91, %cst_29 [0] : vector<8x128xf32> to vector<128xf32>
    %480 = vector.shape_cast %479 : vector<128xf32> to vector<1x128xf32>
    %481 = arith.addf %477, %480 : vector<1x128xf32>
    %482 = arith.mulf %91, %91 : vector<8x128xf32>
    %cst_30 = arith.constant dense<0.000000e+00> : vector<128xf32>
    %483 = vector.multi_reduction <add>, %482, %cst_30 [0] : vector<8x128xf32> to vector<128xf32>
    %484 = vector.shape_cast %483 : vector<128xf32> to vector<1x128xf32>
    %485 = arith.addf %478, %484 : vector<1x128xf32>
    %cst_31 = arith.constant dense<0.000000e+00> : vector<128xf32>
    %486 = vector.multi_reduction <add>, %146, %cst_31 [0] : vector<8x128xf32> to vector<128xf32>
    %487 = vector.shape_cast %486 : vector<128xf32> to vector<1x128xf32>
    %488 = arith.addf %481, %487 : vector<1x128xf32>
    %489 = arith.mulf %146, %146 : vector<8x128xf32>
    %cst_32 = arith.constant dense<0.000000e+00> : vector<128xf32>
    %490 = vector.multi_reduction <add>, %489, %cst_32 [0] : vector<8x128xf32> to vector<128xf32>
    %491 = vector.shape_cast %490 : vector<128xf32> to vector<1x128xf32>
    %492 = arith.addf %485, %491 : vector<1x128xf32>
    %cst_33 = arith.constant dense<0.000000e+00> : vector<128xf32>
    %493 = vector.multi_reduction <add>, %201, %cst_33 [0] : vector<8x128xf32> to vector<128xf32>
    %494 = vector.shape_cast %493 : vector<128xf32> to vector<1x128xf32>
    %495 = arith.addf %488, %494 : vector<1x128xf32>
    %496 = arith.mulf %201, %201 : vector<8x128xf32>
    %cst_34 = arith.constant dense<0.000000e+00> : vector<128xf32>
    %497 = vector.multi_reduction <add>, %496, %cst_34 [0] : vector<8x128xf32> to vector<128xf32>
    %498 = vector.shape_cast %497 : vector<128xf32> to vector<1x128xf32>
    %499 = arith.addf %492, %498 : vector<1x128xf32>
    %cst_35 = arith.constant dense<0.000000e+00> : vector<128xf32>
    %500 = vector.multi_reduction <add>, %256, %cst_35 [0] : vector<8x128xf32> to vector<128xf32>
    %501 = vector.shape_cast %500 : vector<128xf32> to vector<1x128xf32>
    %502 = arith.addf %495, %501 : vector<1x128xf32>
    %503 = arith.mulf %256, %256 : vector<8x128xf32>
    %cst_36 = arith.constant dense<0.000000e+00> : vector<128xf32>
    %504 = vector.multi_reduction <add>, %503, %cst_36 [0] : vector<8x128xf32> to vector<128xf32>
    %505 = vector.shape_cast %504 : vector<128xf32> to vector<1x128xf32>
    %506 = arith.addf %499, %505 : vector<1x128xf32>
    %cst_37 = arith.constant dense<0.000000e+00> : vector<128xf32>
    %507 = vector.multi_reduction <add>, %311, %cst_37 [0] : vector<8x128xf32> to vector<128xf32>
    %508 = vector.shape_cast %507 : vector<128xf32> to vector<1x128xf32>
    %509 = arith.addf %502, %508 : vector<1x128xf32>
    %510 = arith.mulf %311, %311 : vector<8x128xf32>
    %cst_38 = arith.constant dense<0.000000e+00> : vector<128xf32>
    %511 = vector.multi_reduction <add>, %510, %cst_38 [0] : vector<8x128xf32> to vector<128xf32>
    %512 = vector.shape_cast %511 : vector<128xf32> to vector<1x128xf32>
    %513 = arith.addf %506, %512 : vector<1x128xf32>
    %cst_39 = arith.constant dense<0.000000e+00> : vector<128xf32>
    %514 = vector.multi_reduction <add>, %366, %cst_39 [0] : vector<8x128xf32> to vector<128xf32>
    %515 = vector.shape_cast %514 : vector<128xf32> to vector<1x128xf32>
    %516 = arith.addf %509, %515 : vector<1x128xf32>
    %517 = arith.mulf %366, %366 : vector<8x128xf32>
    %cst_40 = arith.constant dense<0.000000e+00> : vector<128xf32>
    %518 = vector.multi_reduction <add>, %517, %cst_40 [0] : vector<8x128xf32> to vector<128xf32>
    %519 = vector.shape_cast %518 : vector<128xf32> to vector<1x128xf32>
    %520 = arith.addf %513, %519 : vector<1x128xf32>
    %cst_41 = arith.constant dense<0.000000e+00> : vector<128xf32>
    %521 = vector.multi_reduction <add>, %421, %cst_41 [0] : vector<8x128xf32> to vector<128xf32>
    %522 = vector.shape_cast %521 : vector<128xf32> to vector<1x128xf32>
    %523 = arith.addf %516, %522 : vector<1x128xf32>
    %524 = arith.mulf %421, %421 : vector<8x128xf32>
    %cst_42 = arith.constant dense<0.000000e+00> : vector<128xf32>
    %525 = vector.multi_reduction <add>, %524, %cst_42 [0] : vector<8x128xf32> to vector<128xf32>
    %526 = vector.shape_cast %525 : vector<128xf32> to vector<1x128xf32>
    %527 = arith.addf %520, %526 : vector<1x128xf32>
    %cst_43 = arith.constant dense<0.000000e+00> : vector<128xf32>
    %528 = vector.multi_reduction <add>, %476, %cst_43 [0] : vector<8x128xf32> to vector<128xf32>
    %529 = vector.shape_cast %528 : vector<128xf32> to vector<1x128xf32>
    %530 = arith.addf %523, %529 : vector<1x128xf32>
    %531 = arith.mulf %476, %476 : vector<8x128xf32>
    %cst_44 = arith.constant dense<0.000000e+00> : vector<128xf32>
    %532 = vector.multi_reduction <add>, %531, %cst_44 [0] : vector<8x128xf32> to vector<128xf32>
    %533 = vector.shape_cast %532 : vector<128xf32> to vector<1x128xf32>
    %534 = arith.addf %527, %533 : vector<1x128xf32>
    %c0_45 = arith.constant 0 : index
    %c0_46 = arith.constant 0 : index
    %c0_47 = arith.constant 0 : index
    %535 = vector.load %arg10[%c0_45, %c0_46, %c0_47] : memref<1x1x128xf32, #tpu.memory_space<vmem>>, vector<1x1x128xf32>
    %536 = vector.shape_cast %535 : vector<1x1x128xf32> to vector<1x128xf32>
    %537 = vector.shape_cast %530 : vector<1x128xf32> to vector<1x1x128xf32>
    tpu.vector_store %arg10[%c0_45, %c0_46, %c0_47], %537 {strides = array<i32>} : memref<1x1x128xf32, #tpu.memory_space<vmem>>, vector<1x1x128xf32>,
    %c0_48 = arith.constant 0 : index
    %c0_49 = arith.constant 0 : index
    %c0_50 = arith.constant 0 : index
    %538 = vector.load %arg11[%c0_48, %c0_49, %c0_50] : memref<1x1x128xf32, #tpu.memory_space<vmem>>, vector<1x1x128xf32>
    %539 = vector.shape_cast %538 : vector<1x1x128xf32> to vector<1x128xf32>
    %540 = vector.shape_cast %534 : vector<1x128xf32> to vector<1x1x128xf32>
    tpu.vector_store %arg11[%c0_48, %c0_49, %c0_50], %540 {strides = array<i32>} : memref<1x1x128xf32, #tpu.memory_space<vmem>>, vector<1x1x128xf32>,
    return
  }
  func.func @transform_0(%arg0: i32, %arg1: i32) -> (i32, i32, i32) {
    %c0_i32 = arith.constant 0 : i32
    %c0_i32_0 = arith.constant 0 : i32
    %c0_i32_1 = arith.constant 0 : i32
    return %arg0, %c0_i32, %c0_i32_0 : i32, i32, i32
  }
  func.func @transform_1(%arg0: i32, %arg1: i32) -> (i32, i32, i32) {
    %c0_i32 = arith.constant 0 : i32
    %c0_i32_0 = arith.constant 0 : i32
    %c0_i32_1 = arith.constant 0 : i32
    return %arg0, %c0_i32, %c0_i32_0 : i32, i32, i32
  }
  func.func @transform_2(%arg0: i32, %arg1: i32) -> (i32, i32, i32) {
    %c0_i32 = arith.constant 0 : i32
    %c0_i32_0 = arith.constant 0 : i32
    %c0_i32_1 = arith.constant 0 : i32
    %c0_i32_2 = arith.constant 0 : i32
    return %c0_i32, %c0_i32_0, %c0_i32_1 : i32, i32, i32
  }
  func.func @transform_3(%arg0: i32, %arg1: i32) -> (i32, i32, i32) {
    %c0_i32 = arith.constant 0 : i32
    %c0_i32_0 = arith.constant 0 : i32
    %c0_i32_1 = arith.constant 0 : i32
    %c0_i32_2 = arith.constant 0 : i32
    return %c0_i32, %c0_i32_0, %c0_i32_1 : i32, i32, i32
  }
  func.func @transform_4(%arg0: i32, %arg1: i32) -> (i32, i32) {
    %c0_i32 = arith.constant 0 : i32
    %c0_i32_0 = arith.constant 0 : i32
    %c0_i32_1 = arith.constant 0 : i32
    return %c0_i32, %c0_i32_0 : i32, i32
  }
  func.func @transform_5(%arg0: i32, %arg1: i32) -> (i32, i32) {
    %c0_i32 = arith.constant 0 : i32
    %c0_i32_0 = arith.constant 0 : i32
    %c0_i32_1 = arith.constant 0 : i32
    return %c0_i32, %c0_i32_0 : i32, i32
  }
  func.func @transform_6(%arg0: i32, %arg1: i32) -> (i32, i32) {
    %c0_i32 = arith.constant 0 : i32
    %c0_i32_0 = arith.constant 0 : i32
    %c0_i32_1 = arith.constant 0 : i32
    return %c0_i32, %c0_i32_0 : i32, i32
  }
  func.func @transform_7(%arg0: i32, %arg1: i32) -> (i32, i32) {
    %c0_i32 = arith.constant 0 : i32
    %c0_i32_0 = arith.constant 0 : i32
    %c0_i32_1 = arith.constant 0 : i32
    return %c0_i32, %c0_i32_0 : i32, i32
  }
  func.func @transform_8(%arg0: i32, %arg1: i32) -> (i32, i32, i32) {
    %c1_i32 = arith.constant 1 : i32
    %0 = arith.muli %arg0, %c1_i32 : i32
    %1 = arith.addi %0, %arg1 : i32
    %c0_i32 = arith.constant 0 : i32
    %c0_i32_0 = arith.constant 0 : i32
    %c0_i32_1 = arith.constant 0 : i32
    return %1, %c0_i32, %c0_i32_0 : i32, i32, i32
  }
  func.func @transform_9(%arg0: i32, %arg1: i32) -> (i32, i32, i32) {
    %c1_i32 = arith.constant 1 : i32
    %0 = arith.muli %arg0, %c1_i32 : i32
    %1 = arith.addi %0, %arg1 : i32
    %c0_i32 = arith.constant 0 : i32
    %c0_i32_0 = arith.constant 0 : i32
    %c0_i32_1 = arith.constant 0 : i32
    return %1, %c0_i32, %c0_i32_0 : i32, i32, i32
  }
}

module attributes {stable_mosaic.version = 11 : i64} {
  func.func @kernel(%arg0: i32, %arg1: memref<1x64x128xbf16, #tpu.memory_space<vmem>>, %arg2: memref<1x128xf32, #tpu.memory_space<vmem>>, %arg3: memref<1x128xf32, #tpu.memory_space<vmem>>, %arg4: memref<1x24x64xf32, #tpu.memory_space<vmem>>) attributes {dimension_semantics = [#tpu.dimension_semantics<parallel>], iteration_bounds = array<i64: 2>, scalar_prefetch = 0 : i64, scratch_operands = 0 : i64, tpu.core_type = #tpu.core_type<tc>, window_params = [{transform_indices = @transform_0, window_bounds = array<i64: 1, 64, 128>}, {pipeline_mode = #tpu.pipeline_mode<synchronous>, transform_indices = @transform_1, window_bounds = array<i64: 1, 128>}, {pipeline_mode = #tpu.pipeline_mode<synchronous>, transform_indices = @transform_2, window_bounds = array<i64: 1, 128>}, {transform_indices = @transform_3, window_bounds = array<i64: 1, 24, 64>}]} {
    %c0 = arith.constant 0 : index
    %c0_0 = arith.constant 0 : index
    %c0_1 = arith.constant 0 : index
    %0 = vector.load %arg1[%c0, %c0_0, %c0_1] : memref<1x64x128xbf16, #tpu.memory_space<vmem>>, vector<1x64x128xbf16>
    %1 = vector.shape_cast %0 : vector<1x64x128xbf16> to vector<64x128xbf16>
    %2 = arith.extf %1 : vector<64x128xbf16> to vector<64x128xf32>
    %c0_2 = arith.constant 0 : index
    %c0_3 = arith.constant 0 : index
    %3 = vector.load %arg2[%c0_2, %c0_3] : memref<1x128xf32, #tpu.memory_space<vmem>>, vector<1x128xf32>
    %4 = vector.broadcast %3 : vector<1x128xf32> to vector<64x128xf32>
    %5 = arith.mulf %2, %4 : vector<64x128xf32>
    %c0_4 = arith.constant 0 : index
    %c0_5 = arith.constant 0 : index
    %6 = vector.load %arg3[%c0_4, %c0_5] : memref<1x128xf32, #tpu.memory_space<vmem>>, vector<1x128xf32>
    %7 = vector.broadcast %6 : vector<1x128xf32> to vector<64x128xf32>
    %8 = arith.addf %5, %7 : vector<64x128xf32>
    %9 = tpu.transpose %8, [1, 0] : vector<64x128xf32> -> vector<128x64xf32>
    %10 = vector.extract_strided_slice %9 {offsets = [0, 0], sizes = [24, 64], strides = [1, 1]} : vector<128x64xf32> to vector<24x64xf32>
    %c0_6 = arith.constant 0 : index
    %c0_7 = arith.constant 0 : index
    %c0_8 = arith.constant 0 : index
    %11 = vector.load %arg4[%c0_6, %c0_7, %c0_8] : memref<1x24x64xf32, #tpu.memory_space<vmem>>, vector<1x24x64xf32>
    %12 = vector.shape_cast %11 : vector<1x24x64xf32> to vector<24x64xf32>
    %13 = vector.shape_cast %10 : vector<24x64xf32> to vector<1x24x64xf32>
    tpu.vector_store %arg4[%c0_6, %c0_7, %c0_8], %13 {strides = array<i32>} : memref<1x24x64xf32, #tpu.memory_space<vmem>>, vector<1x24x64xf32>,
    return
  }
  func.func @transform_0(%arg0: i32) -> (i32, i32, i32) {
    %c0_i32 = arith.constant 0 : i32
    %c0_i32_0 = arith.constant 0 : i32
    %c0_i32_1 = arith.constant 0 : i32
    return %arg0, %c0_i32, %c0_i32_0 : i32, i32, i32
  }
  func.func @transform_1(%arg0: i32) -> (i32, i32) {
    %c0_i32 = arith.constant 0 : i32
    %c0_i32_0 = arith.constant 0 : i32
    %c0_i32_1 = arith.constant 0 : i32
    return %c0_i32, %c0_i32_0 : i32, i32
  }
  func.func @transform_2(%arg0: i32) -> (i32, i32) {
    %c0_i32 = arith.constant 0 : i32
    %c0_i32_0 = arith.constant 0 : i32
    %c0_i32_1 = arith.constant 0 : i32
    return %c0_i32, %c0_i32_0 : i32, i32
  }
  func.func @transform_3(%arg0: i32) -> (i32, i32, i32) {
    %c0_i32 = arith.constant 0 : i32
    %c0_i32_0 = arith.constant 0 : i32
    %c0_i32_1 = arith.constant 0 : i32
    return %arg0, %c0_i32, %c0_i32_0 : i32, i32, i32
  }
}

module attributes {stable_mosaic.version = 11 : i64} {
  func.func @block_kernel(%arg0: i32, %arg1: i32, %arg2: memref<1x288x16xbf16, #tpu.memory_space<vmem>>, %arg3: memref<1x288x16xbf16, #tpu.memory_space<vmem>>, %arg4: memref<1x288x1xf32, #tpu.memory_space<vmem>>, %arg5: memref<1x288x1xf32, #tpu.memory_space<vmem>>, %arg6: memref<16x128xbf16, #tpu.memory_space<vmem>>, %arg7: memref<1x128xf32, #tpu.memory_space<vmem>>, %arg8: memref<1x128xf32, #tpu.memory_space<vmem>>, %arg9: memref<9x128xf32, #tpu.memory_space<vmem>>, %arg10: memref<1x128xf32, #tpu.memory_space<vmem>>, %arg11: memref<1x128xf32, #tpu.memory_space<vmem>>, %arg12: memref<128x128xbf16, #tpu.memory_space<vmem>>, %arg13: memref<1x64x128xbf16, #tpu.memory_space<vmem>>, %arg14: memref<1x1x128xf32, #tpu.memory_space<vmem>>, %arg15: memref<1x1x128xf32, #tpu.memory_space<vmem>>) attributes {dimension_semantics = [#tpu.dimension_semantics<parallel>, #tpu.dimension_semantics<arbitrary>], iteration_bounds = array<i64: 2, 1>, scalar_prefetch = 0 : i64, scratch_operands = 0 : i64, tpu.core_type = #tpu.core_type<tc>, window_params = [{transform_indices = @transform_0, window_bounds = array<i64: 1, 288, 16>}, {transform_indices = @transform_1, window_bounds = array<i64: 1, 288, 16>}, {pipeline_mode = #tpu.pipeline_mode<synchronous>, transform_indices = @transform_2, window_bounds = array<i64: 1, 288, 1>}, {pipeline_mode = #tpu.pipeline_mode<synchronous>, transform_indices = @transform_3, window_bounds = array<i64: 1, 288, 1>}, {pipeline_mode = #tpu.pipeline_mode<synchronous>, transform_indices = @transform_4, window_bounds = array<i64: 16, 128>}, {pipeline_mode = #tpu.pipeline_mode<synchronous>, transform_indices = @transform_5, window_bounds = array<i64: 1, 128>}, {pipeline_mode = #tpu.pipeline_mode<synchronous>, transform_indices = @transform_6, window_bounds = array<i64: 1, 128>}, {pipeline_mode = #tpu.pipeline_mode<synchronous>, transform_indices = @transform_7, window_bounds = array<i64: 9, 128>}, {pipeline_mode = #tpu.pipeline_mode<synchronous>, transform_indices = @transform_8, window_bounds = array<i64: 1, 128>}, {pipeline_mode = #tpu.pipeline_mode<synchronous>, transform_indices = @transform_9, window_bounds = array<i64: 1, 128>}, {pipeline_mode = #tpu.pipeline_mode<synchronous>, transform_indices = @transform_10, window_bounds = array<i64: 128, 128>}, {transform_indices = @transform_11, window_bounds = array<i64: 1, 64, 128>}, {transform_indices = @transform_12, window_bounds = array<i64: 1, 1, 128>}, {transform_indices = @transform_13, window_bounds = array<i64: 1, 1, 128>}]} {
    %c256_i32 = arith.constant 256 : i32
    %0 = arith.muli %arg1, %c256_i32 : i32
    %1 = tpu.assume_multiple %0, 8 : i32
    %c0 = arith.constant 0 : index
    %2 = arith.index_cast %1 : i32 to index
    %c0_0 = arith.constant 0 : index
    %3 = vector.load %arg2[%c0, %2, %c0_0] : memref<1x288x16xbf16, #tpu.memory_space<vmem>>, vector<1x272x16xbf16>
    %4 = vector.shape_cast %3 : vector<1x272x16xbf16> to vector<272x16xbf16>
    %c0_1 = arith.constant 0 : index
    %5 = arith.index_cast %1 : i32 to index
    %c0_2 = arith.constant 0 : index
    %6 = vector.load %arg3[%c0_1, %5, %c0_2] : memref<1x288x16xbf16, #tpu.memory_space<vmem>>, vector<1x272x16xbf16>
    %7 = vector.shape_cast %6 : vector<1x272x16xbf16> to vector<272x16xbf16>
    %8 = tpu.concatenate %4, %7 in 0 : vector<272x16xbf16>, vector<272x16xbf16> -> vector<544x16xbf16>
    %c0_3 = arith.constant 0 : index
    %9 = arith.index_cast %1 : i32 to index
    %c0_4 = arith.constant 0 : index
    %10 = vector.load %arg4[%c0_3, %9, %c0_4] : memref<1x288x1xf32, #tpu.memory_space<vmem>>, vector<1x272x1xf32>
    %11 = vector.shape_cast %10 : vector<1x272x1xf32> to vector<272x1xf32>
    %c0_5 = arith.constant 0 : index
    %12 = arith.index_cast %1 : i32 to index
    %c0_6 = arith.constant 0 : index
    %13 = vector.load %arg5[%c0_5, %12, %c0_6] : memref<1x288x1xf32, #tpu.memory_space<vmem>>, vector<1x272x1xf32>
    %14 = vector.shape_cast %13 : vector<1x272x1xf32> to vector<272x1xf32>
    %15 = tpu.concatenate %11, %14 in 0 : vector<272x1xf32>, vector<272x1xf32> -> vector<544x1xf32>
    %c0_7 = arith.constant 0 : index
    %c0_8 = arith.constant 0 : index
    %16 = vector.load %arg6[%c0_7, %c0_8] : memref<16x128xbf16, #tpu.memory_space<vmem>>, vector<16x128xbf16>
    %cst = arith.constant dense<0.000000e+00> : vector<544x128xf32>
    %17 = tpu.matmul %8, %16, %cst {dimension_numbers = #tpu.dot_dimension_numbers<[1], [0], [0], [1], [0, 0, 1, 1], [], []>} : vector<544x16xbf16>, vector<16x128xbf16>, vector<544x128xf32> -> vector<544x128xf32>
    %c0_9 = arith.constant 0 : index
    %c0_10 = arith.constant 0 : index
    %18 = vector.load %arg7[%c0_9, %c0_10] : memref<1x128xf32, #tpu.memory_space<vmem>>, vector<1x128xf32>
    %19 = vector.broadcast %18 : vector<1x128xf32> to vector<544x128xf32>
    %20 = arith.mulf %17, %19 : vector<544x128xf32>
    %c0_11 = arith.constant 0 : index
    %c0_12 = arith.constant 0 : index
    %21 = vector.load %arg8[%c0_11, %c0_12] : memref<1x128xf32, #tpu.memory_space<vmem>>, vector<1x128xf32>
    %22 = vector.broadcast %21 : vector<1x128xf32> to vector<544x128xf32>
    %23 = arith.addf %20, %22 : vector<544x128xf32>
    %cst_13 = arith.constant 3.000000e+00 : f32
    %24 = vector.broadcast %cst_13 : f32 to vector<544x128xf32>
    %25 = arith.addf %23, %24 : vector<544x128xf32>
    %cst_14 = arith.constant 0.000000e+00 : f32
    %cst_15 = arith.constant 6.000000e+00 : f32
    %26 = vector.broadcast %cst_14 : f32 to vector<544x128xf32>
    %27 = arith.maximumf %26, %25 : vector<544x128xf32>
    %28 = vector.broadcast %cst_15 : f32 to vector<544x128xf32>
    %29 = arith.minimumf %28, %27 : vector<544x128xf32>
    %30 = arith.mulf %23, %29 : vector<544x128xf32>
    %cst_16 = arith.constant 0.166666672 : f32
    %31 = vector.broadcast %cst_16 : f32 to vector<544x128xf32>
    %32 = arith.mulf %30, %31 : vector<544x128xf32>
    %33 = vector.broadcast %15 : vector<544x1xf32> to vector<544x128xf32>
    %34 = arith.mulf %32, %33 : vector<544x128xf32>
    %35 = arith.truncf %34 : vector<544x128xf32> to vector<544x128xbf16>
    %c0_17 = arith.constant 0 : index
    %c0_18 = arith.constant 0 : index
    %36 = vector.load %arg9[%c0_17, %c0_18] : memref<9x128xf32, #tpu.memory_space<vmem>>, vector<9x128xf32>
    %cst_19 = arith.constant 0.000000e+00 : f32
    %37 = vector.broadcast %cst_19 : f32 to vector<8x128xf32>
    %38 = vector.extract_strided_slice %35 {offsets = [0, 0], sizes = [8, 128], strides = [1, 1]} : vector<544x128xbf16> to vector<8x128xbf16>
    %39 = arith.extf %38 : vector<8x128xbf16> to vector<8x128xf32>
    %40 = vector.extract_strided_slice %36 {offsets = [0, 0], sizes = [1, 128], strides = [1, 1]} : vector<9x128xf32> to vector<1x128xf32>
    %41 = vector.broadcast %40 : vector<1x128xf32> to vector<8x128xf32>
    %42 = arith.mulf %39, %41 : vector<8x128xf32>
    %43 = arith.addf %37, %42 : vector<8x128xf32>
    %44 = vector.extract_strided_slice %35 {offsets = [272, 0], sizes = [8, 128], strides = [1, 1]} : vector<544x128xbf16> to vector<8x128xbf16>
    %45 = arith.extf %44 : vector<8x128xbf16> to vector<8x128xf32>
    %46 = vector.extract_strided_slice %36 {offsets = [1, 0], sizes = [1, 128], strides = [1, 1]} : vector<9x128xf32> to vector<1x128xf32>
    %47 = vector.broadcast %46 : vector<1x128xf32> to vector<8x128xf32>
    %48 = arith.mulf %45, %47 : vector<8x128xf32>
    %49 = arith.addf %43, %48 : vector<8x128xf32>
    %50 = vector.extract_strided_slice %35 {offsets = [1, 0], sizes = [8, 128], strides = [1, 1]} : vector<544x128xbf16> to vector<8x128xbf16>
    %51 = arith.extf %50 : vector<8x128xbf16> to vector<8x128xf32>
    %52 = vector.extract_strided_slice %36 {offsets = [2, 0], sizes = [1, 128], strides = [1, 1]} : vector<9x128xf32> to vector<1x128xf32>
    %53 = vector.broadcast %52 : vector<1x128xf32> to vector<8x128xf32>
    %54 = arith.mulf %51, %53 : vector<8x128xf32>
    %55 = arith.addf %49, %54 : vector<8x128xf32>
    %56 = vector.extract_strided_slice %35 {offsets = [16, 0], sizes = [8, 128], strides = [1, 1]} : vector<544x128xbf16> to vector<8x128xbf16>
    %57 = arith.extf %56 : vector<8x128xbf16> to vector<8x128xf32>
    %58 = vector.extract_strided_slice %36 {offsets = [3, 0], sizes = [1, 128], strides = [1, 1]} : vector<9x128xf32> to vector<1x128xf32>
    %59 = vector.broadcast %58 : vector<1x128xf32> to vector<8x128xf32>
    %60 = arith.mulf %57, %59 : vector<8x128xf32>
    %61 = arith.addf %55, %60 : vector<8x128xf32>
    %62 = vector.extract_strided_slice %35 {offsets = [288, 0], sizes = [8, 128], strides = [1, 1]} : vector<544x128xbf16> to vector<8x128xbf16>
    %63 = arith.extf %62 : vector<8x128xbf16> to vector<8x128xf32>
    %64 = vector.extract_strided_slice %36 {offsets = [4, 0], sizes = [1, 128], strides = [1, 1]} : vector<9x128xf32> to vector<1x128xf32>
    %65 = vector.broadcast %64 : vector<1x128xf32> to vector<8x128xf32>
    %66 = arith.mulf %63, %65 : vector<8x128xf32>
    %67 = arith.addf %61, %66 : vector<8x128xf32>
    %68 = vector.extract_strided_slice %35 {offsets = [17, 0], sizes = [8, 128], strides = [1, 1]} : vector<544x128xbf16> to vector<8x128xbf16>
    %69 = arith.extf %68 : vector<8x128xbf16> to vector<8x128xf32>
    %70 = vector.extract_strided_slice %36 {offsets = [5, 0], sizes = [1, 128], strides = [1, 1]} : vector<9x128xf32> to vector<1x128xf32>
    %71 = vector.broadcast %70 : vector<1x128xf32> to vector<8x128xf32>
    %72 = arith.mulf %69, %71 : vector<8x128xf32>
    %73 = arith.addf %67, %72 : vector<8x128xf32>
    %74 = vector.extract_strided_slice %35 {offsets = [32, 0], sizes = [8, 128], strides = [1, 1]} : vector<544x128xbf16> to vector<8x128xbf16>
    %75 = arith.extf %74 : vector<8x128xbf16> to vector<8x128xf32>
    %76 = vector.extract_strided_slice %36 {offsets = [6, 0], sizes = [1, 128], strides = [1, 1]} : vector<9x128xf32> to vector<1x128xf32>
    %77 = vector.broadcast %76 : vector<1x128xf32> to vector<8x128xf32>
    %78 = arith.mulf %75, %77 : vector<8x128xf32>
    %79 = arith.addf %73, %78 : vector<8x128xf32>
    %80 = vector.extract_strided_slice %35 {offsets = [304, 0], sizes = [8, 128], strides = [1, 1]} : vector<544x128xbf16> to vector<8x128xbf16>
    %81 = arith.extf %80 : vector<8x128xbf16> to vector<8x128xf32>
    %82 = vector.extract_strided_slice %36 {offsets = [7, 0], sizes = [1, 128], strides = [1, 1]} : vector<9x128xf32> to vector<1x128xf32>
    %83 = vector.broadcast %82 : vector<1x128xf32> to vector<8x128xf32>
    %84 = arith.mulf %81, %83 : vector<8x128xf32>
    %85 = arith.addf %79, %84 : vector<8x128xf32>
    %86 = vector.extract_strided_slice %35 {offsets = [33, 0], sizes = [8, 128], strides = [1, 1]} : vector<544x128xbf16> to vector<8x128xbf16>
    %87 = arith.extf %86 : vector<8x128xbf16> to vector<8x128xf32>
    %88 = vector.extract_strided_slice %36 {offsets = [8, 0], sizes = [1, 128], strides = [1, 1]} : vector<9x128xf32> to vector<1x128xf32>
    %89 = vector.broadcast %88 : vector<1x128xf32> to vector<8x128xf32>
    %90 = arith.mulf %87, %89 : vector<8x128xf32>
    %91 = arith.addf %85, %90 : vector<8x128xf32>
    %cst_20 = arith.constant 0.000000e+00 : f32
    %92 = vector.broadcast %cst_20 : f32 to vector<8x128xf32>
    %93 = vector.extract_strided_slice %35 {offsets = [32, 0], sizes = [8, 128], strides = [1, 1]} : vector<544x128xbf16> to vector<8x128xbf16>
    %94 = arith.extf %93 : vector<8x128xbf16> to vector<8x128xf32>
    %95 = vector.extract_strided_slice %36 {offsets = [0, 0], sizes = [1, 128], strides = [1, 1]} : vector<9x128xf32> to vector<1x128xf32>
    %96 = vector.broadcast %95 : vector<1x128xf32> to vector<8x128xf32>
    %97 = arith.mulf %94, %96 : vector<8x128xf32>
    %98 = arith.addf %92, %97 : vector<8x128xf32>
    %99 = vector.extract_strided_slice %35 {offsets = [304, 0], sizes = [8, 128], strides = [1, 1]} : vector<544x128xbf16> to vector<8x128xbf16>
    %100 = arith.extf %99 : vector<8x128xbf16> to vector<8x128xf32>
    %101 = vector.extract_strided_slice %36 {offsets = [1, 0], sizes = [1, 128], strides = [1, 1]} : vector<9x128xf32> to vector<1x128xf32>
    %102 = vector.broadcast %101 : vector<1x128xf32> to vector<8x128xf32>
    %103 = arith.mulf %100, %102 : vector<8x128xf32>
    %104 = arith.addf %98, %103 : vector<8x128xf32>
    %105 = vector.extract_strided_slice %35 {offsets = [33, 0], sizes = [8, 128], strides = [1, 1]} : vector<544x128xbf16> to vector<8x128xbf16>
    %106 = arith.extf %105 : vector<8x128xbf16> to vector<8x128xf32>
    %107 = vector.extract_strided_slice %36 {offsets = [2, 0], sizes = [1, 128], strides = [1, 1]} : vector<9x128xf32> to vector<1x128xf32>
    %108 = vector.broadcast %107 : vector<1x128xf32> to vector<8x128xf32>
    %109 = arith.mulf %106, %108 : vector<8x128xf32>
    %110 = arith.addf %104, %109 : vector<8x128xf32>
    %111 = vector.extract_strided_slice %35 {offsets = [48, 0], sizes = [8, 128], strides = [1, 1]} : vector<544x128xbf16> to vector<8x128xbf16>
    %112 = arith.extf %111 : vector<8x128xbf16> to vector<8x128xf32>
    %113 = vector.extract_strided_slice %36 {offsets = [3, 0], sizes = [1, 128], strides = [1, 1]} : vector<9x128xf32> to vector<1x128xf32>
    %114 = vector.broadcast %113 : vector<1x128xf32> to vector<8x128xf32>
    %115 = arith.mulf %112, %114 : vector<8x128xf32>
    %116 = arith.addf %110, %115 : vector<8x128xf32>
    %117 = vector.extract_strided_slice %35 {offsets = [320, 0], sizes = [8, 128], strides = [1, 1]} : vector<544x128xbf16> to vector<8x128xbf16>
    %118 = arith.extf %117 : vector<8x128xbf16> to vector<8x128xf32>
    %119 = vector.extract_strided_slice %36 {offsets = [4, 0], sizes = [1, 128], strides = [1, 1]} : vector<9x128xf32> to vector<1x128xf32>
    %120 = vector.broadcast %119 : vector<1x128xf32> to vector<8x128xf32>
    %121 = arith.mulf %118, %120 : vector<8x128xf32>
    %122 = arith.addf %116, %121 : vector<8x128xf32>
    %123 = vector.extract_strided_slice %35 {offsets = [49, 0], sizes = [8, 128], strides = [1, 1]} : vector<544x128xbf16> to vector<8x128xbf16>
    %124 = arith.extf %123 : vector<8x128xbf16> to vector<8x128xf32>
    %125 = vector.extract_strided_slice %36 {offsets = [5, 0], sizes = [1, 128], strides = [1, 1]} : vector<9x128xf32> to vector<1x128xf32>
    %126 = vector.broadcast %125 : vector<1x128xf32> to vector<8x128xf32>
    %127 = arith.mulf %124, %126 : vector<8x128xf32>
    %128 = arith.addf %122, %127 : vector<8x128xf32>
    %129 = vector.extract_strided_slice %35 {offsets = [64, 0], sizes = [8, 128], strides = [1, 1]} : vector<544x128xbf16> to vector<8x128xbf16>
    %130 = arith.extf %129 : vector<8x128xbf16> to vector<8x128xf32>
    %131 = vector.extract_strided_slice %36 {offsets = [6, 0], sizes = [1, 128], strides = [1, 1]} : vector<9x128xf32> to vector<1x128xf32>
    %132 = vector.broadcast %131 : vector<1x128xf32> to vector<8x128xf32>
    %133 = arith.mulf %130, %132 : vector<8x128xf32>
    %134 = arith.addf %128, %133 : vector<8x128xf32>
    %135 = vector.extract_strided_slice %35 {offsets = [336, 0], sizes = [8, 128], strides = [1, 1]} : vector<544x128xbf16> to vector<8x128xbf16>
    %136 = arith.extf %135 : vector<8x128xbf16> to vector<8x128xf32>
    %137 = vector.extract_strided_slice %36 {offsets = [7, 0], sizes = [1, 128], strides = [1, 1]} : vector<9x128xf32> to vector<1x128xf32>
    %138 = vector.broadcast %137 : vector<1x128xf32> to vector<8x128xf32>
    %139 = arith.mulf %136, %138 : vector<8x128xf32>
    %140 = arith.addf %134, %139 : vector<8x128xf32>
    %141 = vector.extract_strided_slice %35 {offsets = [65, 0], sizes = [8, 128], strides = [1, 1]} : vector<544x128xbf16> to vector<8x128xbf16>
    %142 = arith.extf %141 : vector<8x128xbf16> to vector<8x128xf32>
    %143 = vector.extract_strided_slice %36 {offsets = [8, 0], sizes = [1, 128], strides = [1, 1]} : vector<9x128xf32> to vector<1x128xf32>
    %144 = vector.broadcast %143 : vector<1x128xf32> to vector<8x128xf32>
    %145 = arith.mulf %142, %144 : vector<8x128xf32>
    %146 = arith.addf %140, %145 : vector<8x128xf32>
    %cst_21 = arith.constant 0.000000e+00 : f32
    %147 = vector.broadcast %cst_21 : f32 to vector<8x128xf32>
    %148 = vector.extract_strided_slice %35 {offsets = [64, 0], sizes = [8, 128], strides = [1, 1]} : vector<544x128xbf16> to vector<8x128xbf16>
    %149 = arith.extf %148 : vector<8x128xbf16> to vector<8x128xf32>
    %150 = vector.extract_strided_slice %36 {offsets = [0, 0], sizes = [1, 128], strides = [1, 1]} : vector<9x128xf32> to vector<1x128xf32>
    %151 = vector.broadcast %150 : vector<1x128xf32> to vector<8x128xf32>
    %152 = arith.mulf %149, %151 : vector<8x128xf32>
    %153 = arith.addf %147, %152 : vector<8x128xf32>
    %154 = vector.extract_strided_slice %35 {offsets = [336, 0], sizes = [8, 128], strides = [1, 1]} : vector<544x128xbf16> to vector<8x128xbf16>
    %155 = arith.extf %154 : vector<8x128xbf16> to vector<8x128xf32>
    %156 = vector.extract_strided_slice %36 {offsets = [1, 0], sizes = [1, 128], strides = [1, 1]} : vector<9x128xf32> to vector<1x128xf32>
    %157 = vector.broadcast %156 : vector<1x128xf32> to vector<8x128xf32>
    %158 = arith.mulf %155, %157 : vector<8x128xf32>
    %159 = arith.addf %153, %158 : vector<8x128xf32>
    %160 = vector.extract_strided_slice %35 {offsets = [65, 0], sizes = [8, 128], strides = [1, 1]} : vector<544x128xbf16> to vector<8x128xbf16>
    %161 = arith.extf %160 : vector<8x128xbf16> to vector<8x128xf32>
    %162 = vector.extract_strided_slice %36 {offsets = [2, 0], sizes = [1, 128], strides = [1, 1]} : vector<9x128xf32> to vector<1x128xf32>
    %163 = vector.broadcast %162 : vector<1x128xf32> to vector<8x128xf32>
    %164 = arith.mulf %161, %163 : vector<8x128xf32>
    %165 = arith.addf %159, %164 : vector<8x128xf32>
    %166 = vector.extract_strided_slice %35 {offsets = [80, 0], sizes = [8, 128], strides = [1, 1]} : vector<544x128xbf16> to vector<8x128xbf16>
    %167 = arith.extf %166 : vector<8x128xbf16> to vector<8x128xf32>
    %168 = vector.extract_strided_slice %36 {offsets = [3, 0], sizes = [1, 128], strides = [1, 1]} : vector<9x128xf32> to vector<1x128xf32>
    %169 = vector.broadcast %168 : vector<1x128xf32> to vector<8x128xf32>
    %170 = arith.mulf %167, %169 : vector<8x128xf32>
    %171 = arith.addf %165, %170 : vector<8x128xf32>
    %172 = vector.extract_strided_slice %35 {offsets = [352, 0], sizes = [8, 128], strides = [1, 1]} : vector<544x128xbf16> to vector<8x128xbf16>
    %173 = arith.extf %172 : vector<8x128xbf16> to vector<8x128xf32>
    %174 = vector.extract_strided_slice %36 {offsets = [4, 0], sizes = [1, 128], strides = [1, 1]} : vector<9x128xf32> to vector<1x128xf32>
    %175 = vector.broadcast %174 : vector<1x128xf32> to vector<8x128xf32>
    %176 = arith.mulf %173, %175 : vector<8x128xf32>
    %177 = arith.addf %171, %176 : vector<8x128xf32>
    %178 = vector.extract_strided_slice %35 {offsets = [81, 0], sizes = [8, 128], strides = [1, 1]} : vector<544x128xbf16> to vector<8x128xbf16>
    %179 = arith.extf %178 : vector<8x128xbf16> to vector<8x128xf32>
    %180 = vector.extract_strided_slice %36 {offsets = [5, 0], sizes = [1, 128], strides = [1, 1]} : vector<9x128xf32> to vector<1x128xf32>
    %181 = vector.broadcast %180 : vector<1x128xf32> to vector<8x128xf32>
    %182 = arith.mulf %179, %181 : vector<8x128xf32>
    %183 = arith.addf %177, %182 : vector<8x128xf32>
    %184 = vector.extract_strided_slice %35 {offsets = [96, 0], sizes = [8, 128], strides = [1, 1]} : vector<544x128xbf16> to vector<8x128xbf16>
    %185 = arith.extf %184 : vector<8x128xbf16> to vector<8x128xf32>
    %186 = vector.extract_strided_slice %36 {offsets = [6, 0], sizes = [1, 128], strides = [1, 1]} : vector<9x128xf32> to vector<1x128xf32>
    %187 = vector.broadcast %186 : vector<1x128xf32> to vector<8x128xf32>
    %188 = arith.mulf %185, %187 : vector<8x128xf32>
    %189 = arith.addf %183, %188 : vector<8x128xf32>
    %190 = vector.extract_strided_slice %35 {offsets = [368, 0], sizes = [8, 128], strides = [1, 1]} : vector<544x128xbf16> to vector<8x128xbf16>
    %191 = arith.extf %190 : vector<8x128xbf16> to vector<8x128xf32>
    %192 = vector.extract_strided_slice %36 {offsets = [7, 0], sizes = [1, 128], strides = [1, 1]} : vector<9x128xf32> to vector<1x128xf32>
    %193 = vector.broadcast %192 : vector<1x128xf32> to vector<8x128xf32>
    %194 = arith.mulf %191, %193 : vector<8x128xf32>
    %195 = arith.addf %189, %194 : vector<8x128xf32>
    %196 = vector.extract_strided_slice %35 {offsets = [97, 0], sizes = [8, 128], strides = [1, 1]} : vector<544x128xbf16> to vector<8x128xbf16>
    %197 = arith.extf %196 : vector<8x128xbf16> to vector<8x128xf32>
    %198 = vector.extract_strided_slice %36 {offsets = [8, 0], sizes = [1, 128], strides = [1, 1]} : vector<9x128xf32> to vector<1x128xf32>
    %199 = vector.broadcast %198 : vector<1x128xf32> to vector<8x128xf32>
    %200 = arith.mulf %197, %199 : vector<8x128xf32>
    %201 = arith.addf %195, %200 : vector<8x128xf32>
    %cst_22 = arith.constant 0.000000e+00 : f32
    %202 = vector.broadcast %cst_22 : f32 to vector<8x128xf32>
    %203 = vector.extract_strided_slice %35 {offsets = [96, 0], sizes = [8, 128], strides = [1, 1]} : vector<544x128xbf16> to vector<8x128xbf16>
    %204 = arith.extf %203 : vector<8x128xbf16> to vector<8x128xf32>
    %205 = vector.extract_strided_slice %36 {offsets = [0, 0], sizes = [1, 128], strides = [1, 1]} : vector<9x128xf32> to vector<1x128xf32>
    %206 = vector.broadcast %205 : vector<1x128xf32> to vector<8x128xf32>
    %207 = arith.mulf %204, %206 : vector<8x128xf32>
    %208 = arith.addf %202, %207 : vector<8x128xf32>
    %209 = vector.extract_strided_slice %35 {offsets = [368, 0], sizes = [8, 128], strides = [1, 1]} : vector<544x128xbf16> to vector<8x128xbf16>
    %210 = arith.extf %209 : vector<8x128xbf16> to vector<8x128xf32>
    %211 = vector.extract_strided_slice %36 {offsets = [1, 0], sizes = [1, 128], strides = [1, 1]} : vector<9x128xf32> to vector<1x128xf32>
    %212 = vector.broadcast %211 : vector<1x128xf32> to vector<8x128xf32>
    %213 = arith.mulf %210, %212 : vector<8x128xf32>
    %214 = arith.addf %208, %213 : vector<8x128xf32>
    %215 = vector.extract_strided_slice %35 {offsets = [97, 0], sizes = [8, 128], strides = [1, 1]} : vector<544x128xbf16> to vector<8x128xbf16>
    %216 = arith.extf %215 : vector<8x128xbf16> to vector<8x128xf32>
    %217 = vector.extract_strided_slice %36 {offsets = [2, 0], sizes = [1, 128], strides = [1, 1]} : vector<9x128xf32> to vector<1x128xf32>
    %218 = vector.broadcast %217 : vector<1x128xf32> to vector<8x128xf32>
    %219 = arith.mulf %216, %218 : vector<8x128xf32>
    %220 = arith.addf %214, %219 : vector<8x128xf32>
    %221 = vector.extract_strided_slice %35 {offsets = [112, 0], sizes = [8, 128], strides = [1, 1]} : vector<544x128xbf16> to vector<8x128xbf16>
    %222 = arith.extf %221 : vector<8x128xbf16> to vector<8x128xf32>
    %223 = vector.extract_strided_slice %36 {offsets = [3, 0], sizes = [1, 128], strides = [1, 1]} : vector<9x128xf32> to vector<1x128xf32>
    %224 = vector.broadcast %223 : vector<1x128xf32> to vector<8x128xf32>
    %225 = arith.mulf %222, %224 : vector<8x128xf32>
    %226 = arith.addf %220, %225 : vector<8x128xf32>
    %227 = vector.extract_strided_slice %35 {offsets = [384, 0], sizes = [8, 128], strides = [1, 1]} : vector<544x128xbf16> to vector<8x128xbf16>
    %228 = arith.extf %227 : vector<8x128xbf16> to vector<8x128xf32>
    %229 = vector.extract_strided_slice %36 {offsets = [4, 0], sizes = [1, 128], strides = [1, 1]} : vector<9x128xf32> to vector<1x128xf32>
    %230 = vector.broadcast %229 : vector<1x128xf32> to vector<8x128xf32>
    %231 = arith.mulf %228, %230 : vector<8x128xf32>
    %232 = arith.addf %226, %231 : vector<8x128xf32>
    %233 = vector.extract_strided_slice %35 {offsets = [113, 0], sizes = [8, 128], strides = [1, 1]} : vector<544x128xbf16> to vector<8x128xbf16>
    %234 = arith.extf %233 : vector<8x128xbf16> to vector<8x128xf32>
    %235 = vector.extract_strided_slice %36 {offsets = [5, 0], sizes = [1, 128], strides = [1, 1]} : vector<9x128xf32> to vector<1x128xf32>
    %236 = vector.broadcast %235 : vector<1x128xf32> to vector<8x128xf32>
    %237 = arith.mulf %234, %236 : vector<8x128xf32>
    %238 = arith.addf %232, %237 : vector<8x128xf32>
    %239 = vector.extract_strided_slice %35 {offsets = [128, 0], sizes = [8, 128], strides = [1, 1]} : vector<544x128xbf16> to vector<8x128xbf16>
    %240 = arith.extf %239 : vector<8x128xbf16> to vector<8x128xf32>
    %241 = vector.extract_strided_slice %36 {offsets = [6, 0], sizes = [1, 128], strides = [1, 1]} : vector<9x128xf32> to vector<1x128xf32>
    %242 = vector.broadcast %241 : vector<1x128xf32> to vector<8x128xf32>
    %243 = arith.mulf %240, %242 : vector<8x128xf32>
    %244 = arith.addf %238, %243 : vector<8x128xf32>
    %245 = vector.extract_strided_slice %35 {offsets = [400, 0], sizes = [8, 128], strides = [1, 1]} : vector<544x128xbf16> to vector<8x128xbf16>
    %246 = arith.extf %245 : vector<8x128xbf16> to vector<8x128xf32>
    %247 = vector.extract_strided_slice %36 {offsets = [7, 0], sizes = [1, 128], strides = [1, 1]} : vector<9x128xf32> to vector<1x128xf32>
    %248 = vector.broadcast %247 : vector<1x128xf32> to vector<8x128xf32>
    %249 = arith.mulf %246, %248 : vector<8x128xf32>
    %250 = arith.addf %244, %249 : vector<8x128xf32>
    %251 = vector.extract_strided_slice %35 {offsets = [129, 0], sizes = [8, 128], strides = [1, 1]} : vector<544x128xbf16> to vector<8x128xbf16>
    %252 = arith.extf %251 : vector<8x128xbf16> to vector<8x128xf32>
    %253 = vector.extract_strided_slice %36 {offsets = [8, 0], sizes = [1, 128], strides = [1, 1]} : vector<9x128xf32> to vector<1x128xf32>
    %254 = vector.broadcast %253 : vector<1x128xf32> to vector<8x128xf32>
    %255 = arith.mulf %252, %254 : vector<8x128xf32>
    %256 = arith.addf %250, %255 : vector<8x128xf32>
    %cst_23 = arith.constant 0.000000e+00 : f32
    %257 = vector.broadcast %cst_23 : f32 to vector<8x128xf32>
    %258 = vector.extract_strided_slice %35 {offsets = [128, 0], sizes = [8, 128], strides = [1, 1]} : vector<544x128xbf16> to vector<8x128xbf16>
    %259 = arith.extf %258 : vector<8x128xbf16> to vector<8x128xf32>
    %260 = vector.extract_strided_slice %36 {offsets = [0, 0], sizes = [1, 128], strides = [1, 1]} : vector<9x128xf32> to vector<1x128xf32>
    %261 = vector.broadcast %260 : vector<1x128xf32> to vector<8x128xf32>
    %262 = arith.mulf %259, %261 : vector<8x128xf32>
    %263 = arith.addf %257, %262 : vector<8x128xf32>
    %264 = vector.extract_strided_slice %35 {offsets = [400, 0], sizes = [8, 128], strides = [1, 1]} : vector<544x128xbf16> to vector<8x128xbf16>
    %265 = arith.extf %264 : vector<8x128xbf16> to vector<8x128xf32>
    %266 = vector.extract_strided_slice %36 {offsets = [1, 0], sizes = [1, 128], strides = [1, 1]} : vector<9x128xf32> to vector<1x128xf32>
    %267 = vector.broadcast %266 : vector<1x128xf32> to vector<8x128xf32>
    %268 = arith.mulf %265, %267 : vector<8x128xf32>
    %269 = arith.addf %263, %268 : vector<8x128xf32>
    %270 = vector.extract_strided_slice %35 {offsets = [129, 0], sizes = [8, 128], strides = [1, 1]} : vector<544x128xbf16> to vector<8x128xbf16>
    %271 = arith.extf %270 : vector<8x128xbf16> to vector<8x128xf32>
    %272 = vector.extract_strided_slice %36 {offsets = [2, 0], sizes = [1, 128], strides = [1, 1]} : vector<9x128xf32> to vector<1x128xf32>
    %273 = vector.broadcast %272 : vector<1x128xf32> to vector<8x128xf32>
    %274 = arith.mulf %271, %273 : vector<8x128xf32>
    %275 = arith.addf %269, %274 : vector<8x128xf32>
    %276 = vector.extract_strided_slice %35 {offsets = [144, 0], sizes = [8, 128], strides = [1, 1]} : vector<544x128xbf16> to vector<8x128xbf16>
    %277 = arith.extf %276 : vector<8x128xbf16> to vector<8x128xf32>
    %278 = vector.extract_strided_slice %36 {offsets = [3, 0], sizes = [1, 128], strides = [1, 1]} : vector<9x128xf32> to vector<1x128xf32>
    %279 = vector.broadcast %278 : vector<1x128xf32> to vector<8x128xf32>
    %280 = arith.mulf %277, %279 : vector<8x128xf32>
    %281 = arith.addf %275, %280 : vector<8x128xf32>
    %282 = vector.extract_strided_slice %35 {offsets = [416, 0], sizes = [8, 128], strides = [1, 1]} : vector<544x128xbf16> to vector<8x128xbf16>
    %283 = arith.extf %282 : vector<8x128xbf16> to vector<8x128xf32>
    %284 = vector.extract_strided_slice %36 {offsets = [4, 0], sizes = [1, 128], strides = [1, 1]} : vector<9x128xf32> to vector<1x128xf32>
    %285 = vector.broadcast %284 : vector<1x128xf32> to vector<8x128xf32>
    %286 = arith.mulf %283, %285 : vector<8x128xf32>
    %287 = arith.addf %281, %286 : vector<8x128xf32>
    %288 = vector.extract_strided_slice %35 {offsets = [145, 0], sizes = [8, 128], strides = [1, 1]} : vector<544x128xbf16> to vector<8x128xbf16>
    %289 = arith.extf %288 : vector<8x128xbf16> to vector<8x128xf32>
    %290 = vector.extract_strided_slice %36 {offsets = [5, 0], sizes = [1, 128], strides = [1, 1]} : vector<9x128xf32> to vector<1x128xf32>
    %291 = vector.broadcast %290 : vector<1x128xf32> to vector<8x128xf32>
    %292 = arith.mulf %289, %291 : vector<8x128xf32>
    %293 = arith.addf %287, %292 : vector<8x128xf32>
    %294 = vector.extract_strided_slice %35 {offsets = [160, 0], sizes = [8, 128], strides = [1, 1]} : vector<544x128xbf16> to vector<8x128xbf16>
    %295 = arith.extf %294 : vector<8x128xbf16> to vector<8x128xf32>
    %296 = vector.extract_strided_slice %36 {offsets = [6, 0], sizes = [1, 128], strides = [1, 1]} : vector<9x128xf32> to vector<1x128xf32>
    %297 = vector.broadcast %296 : vector<1x128xf32> to vector<8x128xf32>
    %298 = arith.mulf %295, %297 : vector<8x128xf32>
    %299 = arith.addf %293, %298 : vector<8x128xf32>
    %300 = vector.extract_strided_slice %35 {offsets = [432, 0], sizes = [8, 128], strides = [1, 1]} : vector<544x128xbf16> to vector<8x128xbf16>
    %301 = arith.extf %300 : vector<8x128xbf16> to vector<8x128xf32>
    %302 = vector.extract_strided_slice %36 {offsets = [7, 0], sizes = [1, 128], strides = [1, 1]} : vector<9x128xf32> to vector<1x128xf32>
    %303 = vector.broadcast %302 : vector<1x128xf32> to vector<8x128xf32>
    %304 = arith.mulf %301, %303 : vector<8x128xf32>
    %305 = arith.addf %299, %304 : vector<8x128xf32>
    %306 = vector.extract_strided_slice %35 {offsets = [161, 0], sizes = [8, 128], strides = [1, 1]} : vector<544x128xbf16> to vector<8x128xbf16>
    %307 = arith.extf %306 : vector<8x128xbf16> to vector<8x128xf32>
    %308 = vector.extract_strided_slice %36 {offsets = [8, 0], sizes = [1, 128], strides = [1, 1]} : vector<9x128xf32> to vector<1x128xf32>
    %309 = vector.broadcast %308 : vector<1x128xf32> to vector<8x128xf32>
    %310 = arith.mulf %307, %309 : vector<8x128xf32>
    %311 = arith.addf %305, %310 : vector<8x128xf32>
    %cst_24 = arith.constant 0.000000e+00 : f32
    %312 = vector.broadcast %cst_24 : f32 to vector<8x128xf32>
    %313 = vector.extract_strided_slice %35 {offsets = [160, 0], sizes = [8, 128], strides = [1, 1]} : vector<544x128xbf16> to vector<8x128xbf16>
    %314 = arith.extf %313 : vector<8x128xbf16> to vector<8x128xf32>
    %315 = vector.extract_strided_slice %36 {offsets = [0, 0], sizes = [1, 128], strides = [1, 1]} : vector<9x128xf32> to vector<1x128xf32>
    %316 = vector.broadcast %315 : vector<1x128xf32> to vector<8x128xf32>
    %317 = arith.mulf %314, %316 : vector<8x128xf32>
    %318 = arith.addf %312, %317 : vector<8x128xf32>
    %319 = vector.extract_strided_slice %35 {offsets = [432, 0], sizes = [8, 128], strides = [1, 1]} : vector<544x128xbf16> to vector<8x128xbf16>
    %320 = arith.extf %319 : vector<8x128xbf16> to vector<8x128xf32>
    %321 = vector.extract_strided_slice %36 {offsets = [1, 0], sizes = [1, 128], strides = [1, 1]} : vector<9x128xf32> to vector<1x128xf32>
    %322 = vector.broadcast %321 : vector<1x128xf32> to vector<8x128xf32>
    %323 = arith.mulf %320, %322 : vector<8x128xf32>
    %324 = arith.addf %318, %323 : vector<8x128xf32>
    %325 = vector.extract_strided_slice %35 {offsets = [161, 0], sizes = [8, 128], strides = [1, 1]} : vector<544x128xbf16> to vector<8x128xbf16>
    %326 = arith.extf %325 : vector<8x128xbf16> to vector<8x128xf32>
    %327 = vector.extract_strided_slice %36 {offsets = [2, 0], sizes = [1, 128], strides = [1, 1]} : vector<9x128xf32> to vector<1x128xf32>
    %328 = vector.broadcast %327 : vector<1x128xf32> to vector<8x128xf32>
    %329 = arith.mulf %326, %328 : vector<8x128xf32>
    %330 = arith.addf %324, %329 : vector<8x128xf32>
    %331 = vector.extract_strided_slice %35 {offsets = [176, 0], sizes = [8, 128], strides = [1, 1]} : vector<544x128xbf16> to vector<8x128xbf16>
    %332 = arith.extf %331 : vector<8x128xbf16> to vector<8x128xf32>
    %333 = vector.extract_strided_slice %36 {offsets = [3, 0], sizes = [1, 128], strides = [1, 1]} : vector<9x128xf32> to vector<1x128xf32>
    %334 = vector.broadcast %333 : vector<1x128xf32> to vector<8x128xf32>
    %335 = arith.mulf %332, %334 : vector<8x128xf32>
    %336 = arith.addf %330, %335 : vector<8x128xf32>
    %337 = vector.extract_strided_slice %35 {offsets = [448, 0], sizes = [8, 128], strides = [1, 1]} : vector<544x128xbf16> to vector<8x128xbf16>
    %338 = arith.extf %337 : vector<8x128xbf16> to vector<8x128xf32>
    %339 = vector.extract_strided_slice %36 {offsets = [4, 0], sizes = [1, 128], strides = [1, 1]} : vector<9x128xf32> to vector<1x128xf32>
    %340 = vector.broadcast %339 : vector<1x128xf32> to vector<8x128xf32>
    %341 = arith.mulf %338, %340 : vector<8x128xf32>
    %342 = arith.addf %336, %341 : vector<8x128xf32>
    %343 = vector.extract_strided_slice %35 {offsets = [177, 0], sizes = [8, 128], strides = [1, 1]} : vector<544x128xbf16> to vector<8x128xbf16>
    %344 = arith.extf %343 : vector<8x128xbf16> to vector<8x128xf32>
    %345 = vector.extract_strided_slice %36 {offsets = [5, 0], sizes = [1, 128], strides = [1, 1]} : vector<9x128xf32> to vector<1x128xf32>
    %346 = vector.broadcast %345 : vector<1x128xf32> to vector<8x128xf32>
    %347 = arith.mulf %344, %346 : vector<8x128xf32>
    %348 = arith.addf %342, %347 : vector<8x128xf32>
    %349 = vector.extract_strided_slice %35 {offsets = [192, 0], sizes = [8, 128], strides = [1, 1]} : vector<544x128xbf16> to vector<8x128xbf16>
    %350 = arith.extf %349 : vector<8x128xbf16> to vector<8x128xf32>
    %351 = vector.extract_strided_slice %36 {offsets = [6, 0], sizes = [1, 128], strides = [1, 1]} : vector<9x128xf32> to vector<1x128xf32>
    %352 = vector.broadcast %351 : vector<1x128xf32> to vector<8x128xf32>
    %353 = arith.mulf %350, %352 : vector<8x128xf32>
    %354 = arith.addf %348, %353 : vector<8x128xf32>
    %355 = vector.extract_strided_slice %35 {offsets = [464, 0], sizes = [8, 128], strides = [1, 1]} : vector<544x128xbf16> to vector<8x128xbf16>
    %356 = arith.extf %355 : vector<8x128xbf16> to vector<8x128xf32>
    %357 = vector.extract_strided_slice %36 {offsets = [7, 0], sizes = [1, 128], strides = [1, 1]} : vector<9x128xf32> to vector<1x128xf32>
    %358 = vector.broadcast %357 : vector<1x128xf32> to vector<8x128xf32>
    %359 = arith.mulf %356, %358 : vector<8x128xf32>
    %360 = arith.addf %354, %359 : vector<8x128xf32>
    %361 = vector.extract_strided_slice %35 {offsets = [193, 0], sizes = [8, 128], strides = [1, 1]} : vector<544x128xbf16> to vector<8x128xbf16>
    %362 = arith.extf %361 : vector<8x128xbf16> to vector<8x128xf32>
    %363 = vector.extract_strided_slice %36 {offsets = [8, 0], sizes = [1, 128], strides = [1, 1]} : vector<9x128xf32> to vector<1x128xf32>
    %364 = vector.broadcast %363 : vector<1x128xf32> to vector<8x128xf32>
    %365 = arith.mulf %362, %364 : vector<8x128xf32>
    %366 = arith.addf %360, %365 : vector<8x128xf32>
    %cst_25 = arith.constant 0.000000e+00 : f32
    %367 = vector.broadcast %cst_25 : f32 to vector<8x128xf32>
    %368 = vector.extract_strided_slice %35 {offsets = [192, 0], sizes = [8, 128], strides = [1, 1]} : vector<544x128xbf16> to vector<8x128xbf16>
    %369 = arith.extf %368 : vector<8x128xbf16> to vector<8x128xf32>
    %370 = vector.extract_strided_slice %36 {offsets = [0, 0], sizes = [1, 128], strides = [1, 1]} : vector<9x128xf32> to vector<1x128xf32>
    %371 = vector.broadcast %370 : vector<1x128xf32> to vector<8x128xf32>
    %372 = arith.mulf %369, %371 : vector<8x128xf32>
    %373 = arith.addf %367, %372 : vector<8x128xf32>
    %374 = vector.extract_strided_slice %35 {offsets = [464, 0], sizes = [8, 128], strides = [1, 1]} : vector<544x128xbf16> to vector<8x128xbf16>
    %375 = arith.extf %374 : vector<8x128xbf16> to vector<8x128xf32>
    %376 = vector.extract_strided_slice %36 {offsets = [1, 0], sizes = [1, 128], strides = [1, 1]} : vector<9x128xf32> to vector<1x128xf32>
    %377 = vector.broadcast %376 : vector<1x128xf32> to vector<8x128xf32>
    %378 = arith.mulf %375, %377 : vector<8x128xf32>
    %379 = arith.addf %373, %378 : vector<8x128xf32>
    %380 = vector.extract_strided_slice %35 {offsets = [193, 0], sizes = [8, 128], strides = [1, 1]} : vector<544x128xbf16> to vector<8x128xbf16>
    %381 = arith.extf %380 : vector<8x128xbf16> to vector<8x128xf32>
    %382 = vector.extract_strided_slice %36 {offsets = [2, 0], sizes = [1, 128], strides = [1, 1]} : vector<9x128xf32> to vector<1x128xf32>
    %383 = vector.broadcast %382 : vector<1x128xf32> to vector<8x128xf32>
    %384 = arith.mulf %381, %383 : vector<8x128xf32>
    %385 = arith.addf %379, %384 : vector<8x128xf32>
    %386 = vector.extract_strided_slice %35 {offsets = [208, 0], sizes = [8, 128], strides = [1, 1]} : vector<544x128xbf16> to vector<8x128xbf16>
    %387 = arith.extf %386 : vector<8x128xbf16> to vector<8x128xf32>
    %388 = vector.extract_strided_slice %36 {offsets = [3, 0], sizes = [1, 128], strides = [1, 1]} : vector<9x128xf32> to vector<1x128xf32>
    %389 = vector.broadcast %388 : vector<1x128xf32> to vector<8x128xf32>
    %390 = arith.mulf %387, %389 : vector<8x128xf32>
    %391 = arith.addf %385, %390 : vector<8x128xf32>
    %392 = vector.extract_strided_slice %35 {offsets = [480, 0], sizes = [8, 128], strides = [1, 1]} : vector<544x128xbf16> to vector<8x128xbf16>
    %393 = arith.extf %392 : vector<8x128xbf16> to vector<8x128xf32>
    %394 = vector.extract_strided_slice %36 {offsets = [4, 0], sizes = [1, 128], strides = [1, 1]} : vector<9x128xf32> to vector<1x128xf32>
    %395 = vector.broadcast %394 : vector<1x128xf32> to vector<8x128xf32>
    %396 = arith.mulf %393, %395 : vector<8x128xf32>
    %397 = arith.addf %391, %396 : vector<8x128xf32>
    %398 = vector.extract_strided_slice %35 {offsets = [209, 0], sizes = [8, 128], strides = [1, 1]} : vector<544x128xbf16> to vector<8x128xbf16>
    %399 = arith.extf %398 : vector<8x128xbf16> to vector<8x128xf32>
    %400 = vector.extract_strided_slice %36 {offsets = [5, 0], sizes = [1, 128], strides = [1, 1]} : vector<9x128xf32> to vector<1x128xf32>
    %401 = vector.broadcast %400 : vector<1x128xf32> to vector<8x128xf32>
    %402 = arith.mulf %399, %401 : vector<8x128xf32>
    %403 = arith.addf %397, %402 : vector<8x128xf32>
    %404 = vector.extract_strided_slice %35 {offsets = [224, 0], sizes = [8, 128], strides = [1, 1]} : vector<544x128xbf16> to vector<8x128xbf16>
    %405 = arith.extf %404 : vector<8x128xbf16> to vector<8x128xf32>
    %406 = vector.extract_strided_slice %36 {offsets = [6, 0], sizes = [1, 128], strides = [1, 1]} : vector<9x128xf32> to vector<1x128xf32>
    %407 = vector.broadcast %406 : vector<1x128xf32> to vector<8x128xf32>
    %408 = arith.mulf %405, %407 : vector<8x128xf32>
    %409 = arith.addf %403, %408 : vector<8x128xf32>
    %410 = vector.extract_strided_slice %35 {offsets = [496, 0], sizes = [8, 128], strides = [1, 1]} : vector<544x128xbf16> to vector<8x128xbf16>
    %411 = arith.extf %410 : vector<8x128xbf16> to vector<8x128xf32>
    %412 = vector.extract_strided_slice %36 {offsets = [7, 0], sizes = [1, 128], strides = [1, 1]} : vector<9x128xf32> to vector<1x128xf32>
    %413 = vector.broadcast %412 : vector<1x128xf32> to vector<8x128xf32>
    %414 = arith.mulf %411, %413 : vector<8x128xf32>
    %415 = arith.addf %409, %414 : vector<8x128xf32>
    %416 = vector.extract_strided_slice %35 {offsets = [225, 0], sizes = [8, 128], strides = [1, 1]} : vector<544x128xbf16> to vector<8x128xbf16>
    %417 = arith.extf %416 : vector<8x128xbf16> to vector<8x128xf32>
    %418 = vector.extract_strided_slice %36 {offsets = [8, 0], sizes = [1, 128], strides = [1, 1]} : vector<9x128xf32> to vector<1x128xf32>
    %419 = vector.broadcast %418 : vector<1x128xf32> to vector<8x128xf32>
    %420 = arith.mulf %417, %419 : vector<8x128xf32>
    %421 = arith.addf %415, %420 : vector<8x128xf32>
    %cst_26 = arith.constant 0.000000e+00 : f32
    %422 = vector.broadcast %cst_26 : f32 to vector<8x128xf32>
    %423 = vector.extract_strided_slice %35 {offsets = [224, 0], sizes = [8, 128], strides = [1, 1]} : vector<544x128xbf16> to vector<8x128xbf16>
    %424 = arith.extf %423 : vector<8x128xbf16> to vector<8x128xf32>
    %425 = vector.extract_strided_slice %36 {offsets = [0, 0], sizes = [1, 128], strides = [1, 1]} : vector<9x128xf32> to vector<1x128xf32>
    %426 = vector.broadcast %425 : vector<1x128xf32> to vector<8x128xf32>
    %427 = arith.mulf %424, %426 : vector<8x128xf32>
    %428 = arith.addf %422, %427 : vector<8x128xf32>
    %429 = vector.extract_strided_slice %35 {offsets = [496, 0], sizes = [8, 128], strides = [1, 1]} : vector<544x128xbf16> to vector<8x128xbf16>
    %430 = arith.extf %429 : vector<8x128xbf16> to vector<8x128xf32>
    %431 = vector.extract_strided_slice %36 {offsets = [1, 0], sizes = [1, 128], strides = [1, 1]} : vector<9x128xf32> to vector<1x128xf32>
    %432 = vector.broadcast %431 : vector<1x128xf32> to vector<8x128xf32>
    %433 = arith.mulf %430, %432 : vector<8x128xf32>
    %434 = arith.addf %428, %433 : vector<8x128xf32>
    %435 = vector.extract_strided_slice %35 {offsets = [225, 0], sizes = [8, 128], strides = [1, 1]} : vector<544x128xbf16> to vector<8x128xbf16>
    %436 = arith.extf %435 : vector<8x128xbf16> to vector<8x128xf32>
    %437 = vector.extract_strided_slice %36 {offsets = [2, 0], sizes = [1, 128], strides = [1, 1]} : vector<9x128xf32> to vector<1x128xf32>
    %438 = vector.broadcast %437 : vector<1x128xf32> to vector<8x128xf32>
    %439 = arith.mulf %436, %438 : vector<8x128xf32>
    %440 = arith.addf %434, %439 : vector<8x128xf32>
    %441 = vector.extract_strided_slice %35 {offsets = [240, 0], sizes = [8, 128], strides = [1, 1]} : vector<544x128xbf16> to vector<8x128xbf16>
    %442 = arith.extf %441 : vector<8x128xbf16> to vector<8x128xf32>
    %443 = vector.extract_strided_slice %36 {offsets = [3, 0], sizes = [1, 128], strides = [1, 1]} : vector<9x128xf32> to vector<1x128xf32>
    %444 = vector.broadcast %443 : vector<1x128xf32> to vector<8x128xf32>
    %445 = arith.mulf %442, %444 : vector<8x128xf32>
    %446 = arith.addf %440, %445 : vector<8x128xf32>
    %447 = vector.extract_strided_slice %35 {offsets = [512, 0], sizes = [8, 128], strides = [1, 1]} : vector<544x128xbf16> to vector<8x128xbf16>
    %448 = arith.extf %447 : vector<8x128xbf16> to vector<8x128xf32>
    %449 = vector.extract_strided_slice %36 {offsets = [4, 0], sizes = [1, 128], strides = [1, 1]} : vector<9x128xf32> to vector<1x128xf32>
    %450 = vector.broadcast %449 : vector<1x128xf32> to vector<8x128xf32>
    %451 = arith.mulf %448, %450 : vector<8x128xf32>
    %452 = arith.addf %446, %451 : vector<8x128xf32>
    %453 = vector.extract_strided_slice %35 {offsets = [241, 0], sizes = [8, 128], strides = [1, 1]} : vector<544x128xbf16> to vector<8x128xbf16>
    %454 = arith.extf %453 : vector<8x128xbf16> to vector<8x128xf32>
    %455 = vector.extract_strided_slice %36 {offsets = [5, 0], sizes = [1, 128], strides = [1, 1]} : vector<9x128xf32> to vector<1x128xf32>
    %456 = vector.broadcast %455 : vector<1x128xf32> to vector<8x128xf32>
    %457 = arith.mulf %454, %456 : vector<8x128xf32>
    %458 = arith.addf %452, %457 : vector<8x128xf32>
    %459 = vector.extract_strided_slice %35 {offsets = [256, 0], sizes = [8, 128], strides = [1, 1]} : vector<544x128xbf16> to vector<8x128xbf16>
    %460 = arith.extf %459 : vector<8x128xbf16> to vector<8x128xf32>
    %461 = vector.extract_strided_slice %36 {offsets = [6, 0], sizes = [1, 128], strides = [1, 1]} : vector<9x128xf32> to vector<1x128xf32>
    %462 = vector.broadcast %461 : vector<1x128xf32> to vector<8x128xf32>
    %463 = arith.mulf %460, %462 : vector<8x128xf32>
    %464 = arith.addf %458, %463 : vector<8x128xf32>
    %465 = vector.extract_strided_slice %35 {offsets = [528, 0], sizes = [8, 128], strides = [1, 1]} : vector<544x128xbf16> to vector<8x128xbf16>
    %466 = arith.extf %465 : vector<8x128xbf16> to vector<8x128xf32>
    %467 = vector.extract_strided_slice %36 {offsets = [7, 0], sizes = [1, 128], strides = [1, 1]} : vector<9x128xf32> to vector<1x128xf32>
    %468 = vector.broadcast %467 : vector<1x128xf32> to vector<8x128xf32>
    %469 = arith.mulf %466, %468 : vector<8x128xf32>
    %470 = arith.addf %464, %469 : vector<8x128xf32>
    %471 = vector.extract_strided_slice %35 {offsets = [257, 0], sizes = [8, 128], strides = [1, 1]} : vector<544x128xbf16> to vector<8x128xbf16>
    %472 = arith.extf %471 : vector<8x128xbf16> to vector<8x128xf32>
    %473 = vector.extract_strided_slice %36 {offsets = [8, 0], sizes = [1, 128], strides = [1, 1]} : vector<9x128xf32> to vector<1x128xf32>
    %474 = vector.broadcast %473 : vector<1x128xf32> to vector<8x128xf32>
    %475 = arith.mulf %472, %474 : vector<8x128xf32>
    %476 = arith.addf %470, %475 : vector<8x128xf32>
    %c0_27 = arith.constant 0 : index
    %c0_28 = arith.constant 0 : index
    %477 = vector.load %arg10[%c0_27, %c0_28] : memref<1x128xf32, #tpu.memory_space<vmem>>, vector<1x128xf32>
    %c0_29 = arith.constant 0 : index
    %c0_30 = arith.constant 0 : index
    %478 = vector.load %arg11[%c0_29, %c0_30] : memref<1x128xf32, #tpu.memory_space<vmem>>, vector<1x128xf32>
    %479 = vector.broadcast %477 : vector<1x128xf32> to vector<8x128xf32>
    %480 = arith.mulf %91, %479 : vector<8x128xf32>
    %481 = vector.broadcast %478 : vector<1x128xf32> to vector<8x128xf32>
    %482 = arith.addf %480, %481 : vector<8x128xf32>
    %cst_31 = arith.constant 3.000000e+00 : f32
    %483 = vector.broadcast %cst_31 : f32 to vector<8x128xf32>
    %484 = arith.addf %482, %483 : vector<8x128xf32>
    %cst_32 = arith.constant 0.000000e+00 : f32
    %cst_33 = arith.constant 6.000000e+00 : f32
    %485 = vector.broadcast %cst_32 : f32 to vector<8x128xf32>
    %486 = arith.maximumf %485, %484 : vector<8x128xf32>
    %487 = vector.broadcast %cst_33 : f32 to vector<8x128xf32>
    %488 = arith.minimumf %487, %486 : vector<8x128xf32>
    %489 = arith.mulf %482, %488 : vector<8x128xf32>
    %cst_34 = arith.constant 0.166666672 : f32
    %490 = vector.broadcast %cst_34 : f32 to vector<8x128xf32>
    %491 = arith.mulf %489, %490 : vector<8x128xf32>
    %492 = vector.broadcast %477 : vector<1x128xf32> to vector<8x128xf32>
    %493 = arith.mulf %146, %492 : vector<8x128xf32>
    %494 = vector.broadcast %478 : vector<1x128xf32> to vector<8x128xf32>
    %495 = arith.addf %493, %494 : vector<8x128xf32>
    %cst_35 = arith.constant 3.000000e+00 : f32
    %496 = vector.broadcast %cst_35 : f32 to vector<8x128xf32>
    %497 = arith.addf %495, %496 : vector<8x128xf32>
    %cst_36 = arith.constant 0.000000e+00 : f32
    %cst_37 = arith.constant 6.000000e+00 : f32
    %498 = vector.broadcast %cst_36 : f32 to vector<8x128xf32>
    %499 = arith.maximumf %498, %497 : vector<8x128xf32>
    %500 = vector.broadcast %cst_37 : f32 to vector<8x128xf32>
    %501 = arith.minimumf %500, %499 : vector<8x128xf32>
    %502 = arith.mulf %495, %501 : vector<8x128xf32>
    %cst_38 = arith.constant 0.166666672 : f32
    %503 = vector.broadcast %cst_38 : f32 to vector<8x128xf32>
    %504 = arith.mulf %502, %503 : vector<8x128xf32>
    %505 = vector.broadcast %477 : vector<1x128xf32> to vector<8x128xf32>
    %506 = arith.mulf %201, %505 : vector<8x128xf32>
    %507 = vector.broadcast %478 : vector<1x128xf32> to vector<8x128xf32>
    %508 = arith.addf %506, %507 : vector<8x128xf32>
    %cst_39 = arith.constant 3.000000e+00 : f32
    %509 = vector.broadcast %cst_39 : f32 to vector<8x128xf32>
    %510 = arith.addf %508, %509 : vector<8x128xf32>
    %cst_40 = arith.constant 0.000000e+00 : f32
    %cst_41 = arith.constant 6.000000e+00 : f32
    %511 = vector.broadcast %cst_40 : f32 to vector<8x128xf32>
    %512 = arith.maximumf %511, %510 : vector<8x128xf32>
    %513 = vector.broadcast %cst_41 : f32 to vector<8x128xf32>
    %514 = arith.minimumf %513, %512 : vector<8x128xf32>
    %515 = arith.mulf %508, %514 : vector<8x128xf32>
    %cst_42 = arith.constant 0.166666672 : f32
    %516 = vector.broadcast %cst_42 : f32 to vector<8x128xf32>
    %517 = arith.mulf %515, %516 : vector<8x128xf32>
    %518 = vector.broadcast %477 : vector<1x128xf32> to vector<8x128xf32>
    %519 = arith.mulf %256, %518 : vector<8x128xf32>
    %520 = vector.broadcast %478 : vector<1x128xf32> to vector<8x128xf32>
    %521 = arith.addf %519, %520 : vector<8x128xf32>
    %cst_43 = arith.constant 3.000000e+00 : f32
    %522 = vector.broadcast %cst_43 : f32 to vector<8x128xf32>
    %523 = arith.addf %521, %522 : vector<8x128xf32>
    %cst_44 = arith.constant 0.000000e+00 : f32
    %cst_45 = arith.constant 6.000000e+00 : f32
    %524 = vector.broadcast %cst_44 : f32 to vector<8x128xf32>
    %525 = arith.maximumf %524, %523 : vector<8x128xf32>
    %526 = vector.broadcast %cst_45 : f32 to vector<8x128xf32>
    %527 = arith.minimumf %526, %525 : vector<8x128xf32>
    %528 = arith.mulf %521, %527 : vector<8x128xf32>
    %cst_46 = arith.constant 0.166666672 : f32
    %529 = vector.broadcast %cst_46 : f32 to vector<8x128xf32>
    %530 = arith.mulf %528, %529 : vector<8x128xf32>
    %531 = vector.broadcast %477 : vector<1x128xf32> to vector<8x128xf32>
    %532 = arith.mulf %311, %531 : vector<8x128xf32>
    %533 = vector.broadcast %478 : vector<1x128xf32> to vector<8x128xf32>
    %534 = arith.addf %532, %533 : vector<8x128xf32>
    %cst_47 = arith.constant 3.000000e+00 : f32
    %535 = vector.broadcast %cst_47 : f32 to vector<8x128xf32>
    %536 = arith.addf %534, %535 : vector<8x128xf32>
    %cst_48 = arith.constant 0.000000e+00 : f32
    %cst_49 = arith.constant 6.000000e+00 : f32
    %537 = vector.broadcast %cst_48 : f32 to vector<8x128xf32>
    %538 = arith.maximumf %537, %536 : vector<8x128xf32>
    %539 = vector.broadcast %cst_49 : f32 to vector<8x128xf32>
    %540 = arith.minimumf %539, %538 : vector<8x128xf32>
    %541 = arith.mulf %534, %540 : vector<8x128xf32>
    %cst_50 = arith.constant 0.166666672 : f32
    %542 = vector.broadcast %cst_50 : f32 to vector<8x128xf32>
    %543 = arith.mulf %541, %542 : vector<8x128xf32>
    %544 = vector.broadcast %477 : vector<1x128xf32> to vector<8x128xf32>
    %545 = arith.mulf %366, %544 : vector<8x128xf32>
    %546 = vector.broadcast %478 : vector<1x128xf32> to vector<8x128xf32>
    %547 = arith.addf %545, %546 : vector<8x128xf32>
    %cst_51 = arith.constant 3.000000e+00 : f32
    %548 = vector.broadcast %cst_51 : f32 to vector<8x128xf32>
    %549 = arith.addf %547, %548 : vector<8x128xf32>
    %cst_52 = arith.constant 0.000000e+00 : f32
    %cst_53 = arith.constant 6.000000e+00 : f32
    %550 = vector.broadcast %cst_52 : f32 to vector<8x128xf32>
    %551 = arith.maximumf %550, %549 : vector<8x128xf32>
    %552 = vector.broadcast %cst_53 : f32 to vector<8x128xf32>
    %553 = arith.minimumf %552, %551 : vector<8x128xf32>
    %554 = arith.mulf %547, %553 : vector<8x128xf32>
    %cst_54 = arith.constant 0.166666672 : f32
    %555 = vector.broadcast %cst_54 : f32 to vector<8x128xf32>
    %556 = arith.mulf %554, %555 : vector<8x128xf32>
    %557 = vector.broadcast %477 : vector<1x128xf32> to vector<8x128xf32>
    %558 = arith.mulf %421, %557 : vector<8x128xf32>
    %559 = vector.broadcast %478 : vector<1x128xf32> to vector<8x128xf32>
    %560 = arith.addf %558, %559 : vector<8x128xf32>
    %cst_55 = arith.constant 3.000000e+00 : f32
    %561 = vector.broadcast %cst_55 : f32 to vector<8x128xf32>
    %562 = arith.addf %560, %561 : vector<8x128xf32>
    %cst_56 = arith.constant 0.000000e+00 : f32
    %cst_57 = arith.constant 6.000000e+00 : f32
    %563 = vector.broadcast %cst_56 : f32 to vector<8x128xf32>
    %564 = arith.maximumf %563, %562 : vector<8x128xf32>
    %565 = vector.broadcast %cst_57 : f32 to vector<8x128xf32>
    %566 = arith.minimumf %565, %564 : vector<8x128xf32>
    %567 = arith.mulf %560, %566 : vector<8x128xf32>
    %cst_58 = arith.constant 0.166666672 : f32
    %568 = vector.broadcast %cst_58 : f32 to vector<8x128xf32>
    %569 = arith.mulf %567, %568 : vector<8x128xf32>
    %570 = vector.broadcast %477 : vector<1x128xf32> to vector<8x128xf32>
    %571 = arith.mulf %476, %570 : vector<8x128xf32>
    %572 = vector.broadcast %478 : vector<1x128xf32> to vector<8x128xf32>
    %573 = arith.addf %571, %572 : vector<8x128xf32>
    %cst_59 = arith.constant 3.000000e+00 : f32
    %574 = vector.broadcast %cst_59 : f32 to vector<8x128xf32>
    %575 = arith.addf %573, %574 : vector<8x128xf32>
    %cst_60 = arith.constant 0.000000e+00 : f32
    %cst_61 = arith.constant 6.000000e+00 : f32
    %576 = vector.broadcast %cst_60 : f32 to vector<8x128xf32>
    %577 = arith.maximumf %576, %575 : vector<8x128xf32>
    %578 = vector.broadcast %cst_61 : f32 to vector<8x128xf32>
    %579 = arith.minimumf %578, %577 : vector<8x128xf32>
    %580 = arith.mulf %573, %579 : vector<8x128xf32>
    %cst_62 = arith.constant 0.166666672 : f32
    %581 = vector.broadcast %cst_62 : f32 to vector<8x128xf32>
    %582 = arith.mulf %580, %581 : vector<8x128xf32>
    %583 = tpu.concatenate %491, %504, %517, %530, %543, %556, %569, %582 in 0 : vector<8x128xf32>, vector<8x128xf32>, vector<8x128xf32>, vector<8x128xf32>, vector<8x128xf32>, vector<8x128xf32>, vector<8x128xf32>, vector<8x128xf32> -> vector<64x128xf32>
    %584 = arith.truncf %583 : vector<64x128xf32> to vector<64x128xbf16>
    %c0_63 = arith.constant 0 : index
    %c0_64 = arith.constant 0 : index
    %585 = vector.load %arg12[%c0_63, %c0_64] : memref<128x128xbf16, #tpu.memory_space<vmem>>, vector<128x128xbf16>
    %cst_65 = arith.constant dense<0.000000e+00> : vector<64x128xf32>
    %586 = tpu.matmul %584, %585, %cst_65 {dimension_numbers = #tpu.dot_dimension_numbers<[1], [0], [0], [1], [0, 0, 1, 1], [], []>} : vector<64x128xbf16>, vector<128x128xbf16>, vector<64x128xf32> -> vector<64x128xf32>
    %587 = arith.truncf %586 : vector<64x128xf32> to vector<64x128xbf16>
    %c0_66 = arith.constant 0 : index
    %c0_67 = arith.constant 0 : index
    %c0_68 = arith.constant 0 : index
    %588 = vector.load %arg13[%c0_66, %c0_67, %c0_68] : memref<1x64x128xbf16, #tpu.memory_space<vmem>>, vector<1x64x128xbf16>
    %589 = vector.shape_cast %588 : vector<1x64x128xbf16> to vector<64x128xbf16>
    %590 = vector.shape_cast %587 : vector<64x128xbf16> to vector<1x64x128xbf16>
    tpu.vector_store %arg13[%c0_66, %c0_67, %c0_68], %590 {strides = array<i32>} : memref<1x64x128xbf16, #tpu.memory_space<vmem>>, vector<1x64x128xbf16>,
    %cst_69 = arith.constant dense<0.000000e+00> : vector<128xf32>
    %591 = vector.multi_reduction <add>, %586, %cst_69 [0] : vector<64x128xf32> to vector<128xf32>
    %592 = vector.shape_cast %591 : vector<128xf32> to vector<1x128xf32>
    %c0_70 = arith.constant 0 : index
    %c0_71 = arith.constant 0 : index
    %c0_72 = arith.constant 0 : index
    %593 = vector.load %arg14[%c0_70, %c0_71, %c0_72] : memref<1x1x128xf32, #tpu.memory_space<vmem>>, vector<1x1x128xf32>
    %594 = vector.shape_cast %593 : vector<1x1x128xf32> to vector<1x128xf32>
    %595 = vector.shape_cast %592 : vector<1x128xf32> to vector<1x1x128xf32>
    tpu.vector_store %arg14[%c0_70, %c0_71, %c0_72], %595 {strides = array<i32>} : memref<1x1x128xf32, #tpu.memory_space<vmem>>, vector<1x1x128xf32>,
    %596 = arith.mulf %586, %586 : vector<64x128xf32>
    %cst_73 = arith.constant dense<0.000000e+00> : vector<128xf32>
    %597 = vector.multi_reduction <add>, %596, %cst_73 [0] : vector<64x128xf32> to vector<128xf32>
    %598 = vector.shape_cast %597 : vector<128xf32> to vector<1x128xf32>
    %c0_74 = arith.constant 0 : index
    %c0_75 = arith.constant 0 : index
    %c0_76 = arith.constant 0 : index
    %599 = vector.load %arg15[%c0_74, %c0_75, %c0_76] : memref<1x1x128xf32, #tpu.memory_space<vmem>>, vector<1x1x128xf32>
    %600 = vector.shape_cast %599 : vector<1x1x128xf32> to vector<1x128xf32>
    %601 = vector.shape_cast %598 : vector<1x128xf32> to vector<1x1x128xf32>
    tpu.vector_store %arg15[%c0_74, %c0_75, %c0_76], %601 {strides = array<i32>} : memref<1x1x128xf32, #tpu.memory_space<vmem>>, vector<1x1x128xf32>,
    return
  }
  func.func @transform_0(%arg0: i32, %arg1: i32) -> (i32, i32, i32) {
    %c0_i32 = arith.constant 0 : i32
    %c0_i32_0 = arith.constant 0 : i32
    %c0_i32_1 = arith.constant 0 : i32
    return %arg0, %c0_i32, %c0_i32_0 : i32, i32, i32
  }
  func.func @transform_1(%arg0: i32, %arg1: i32) -> (i32, i32, i32) {
    %c0_i32 = arith.constant 0 : i32
    %c0_i32_0 = arith.constant 0 : i32
    %c0_i32_1 = arith.constant 0 : i32
    return %arg0, %c0_i32, %c0_i32_0 : i32, i32, i32
  }
  func.func @transform_2(%arg0: i32, %arg1: i32) -> (i32, i32, i32) {
    %c0_i32 = arith.constant 0 : i32
    %c0_i32_0 = arith.constant 0 : i32
    %c0_i32_1 = arith.constant 0 : i32
    %c0_i32_2 = arith.constant 0 : i32
    return %c0_i32, %c0_i32_0, %c0_i32_1 : i32, i32, i32
  }
  func.func @transform_3(%arg0: i32, %arg1: i32) -> (i32, i32, i32) {
    %c0_i32 = arith.constant 0 : i32
    %c0_i32_0 = arith.constant 0 : i32
    %c0_i32_1 = arith.constant 0 : i32
    %c0_i32_2 = arith.constant 0 : i32
    return %c0_i32, %c0_i32_0, %c0_i32_1 : i32, i32, i32
  }
  func.func @transform_4(%arg0: i32, %arg1: i32) -> (i32, i32) {
    %c0_i32 = arith.constant 0 : i32
    %c0_i32_0 = arith.constant 0 : i32
    %c0_i32_1 = arith.constant 0 : i32
    return %c0_i32, %c0_i32_0 : i32, i32
  }
  func.func @transform_5(%arg0: i32, %arg1: i32) -> (i32, i32) {
    %c0_i32 = arith.constant 0 : i32
    %c0_i32_0 = arith.constant 0 : i32
    %c0_i32_1 = arith.constant 0 : i32
    return %c0_i32, %c0_i32_0 : i32, i32
  }
  func.func @transform_6(%arg0: i32, %arg1: i32) -> (i32, i32) {
    %c0_i32 = arith.constant 0 : i32
    %c0_i32_0 = arith.constant 0 : i32
    %c0_i32_1 = arith.constant 0 : i32
    return %c0_i32, %c0_i32_0 : i32, i32
  }
  func.func @transform_7(%arg0: i32, %arg1: i32) -> (i32, i32) {
    %c0_i32 = arith.constant 0 : i32
    %c0_i32_0 = arith.constant 0 : i32
    %c0_i32_1 = arith.constant 0 : i32
    return %c0_i32, %c0_i32_0 : i32, i32
  }
  func.func @transform_8(%arg0: i32, %arg1: i32) -> (i32, i32) {
    %c0_i32 = arith.constant 0 : i32
    %c0_i32_0 = arith.constant 0 : i32
    %c0_i32_1 = arith.constant 0 : i32
    return %c0_i32, %c0_i32_0 : i32, i32
  }
  func.func @transform_9(%arg0: i32, %arg1: i32) -> (i32, i32) {
    %c0_i32 = arith.constant 0 : i32
    %c0_i32_0 = arith.constant 0 : i32
    %c0_i32_1 = arith.constant 0 : i32
    return %c0_i32, %c0_i32_0 : i32, i32
  }
  func.func @transform_10(%arg0: i32, %arg1: i32) -> (i32, i32) {
    %c0_i32 = arith.constant 0 : i32
    %c0_i32_0 = arith.constant 0 : i32
    %c0_i32_1 = arith.constant 0 : i32
    return %c0_i32, %c0_i32_0 : i32, i32
  }
  func.func @transform_11(%arg0: i32, %arg1: i32) -> (i32, i32, i32) {
    %c0_i32 = arith.constant 0 : i32
    %c0_i32_0 = arith.constant 0 : i32
    return %arg0, %arg1, %c0_i32 : i32, i32, i32
  }
  func.func @transform_12(%arg0: i32, %arg1: i32) -> (i32, i32, i32) {
    %c1_i32 = arith.constant 1 : i32
    %0 = arith.muli %arg0, %c1_i32 : i32
    %1 = arith.addi %0, %arg1 : i32
    %c0_i32 = arith.constant 0 : i32
    %c0_i32_0 = arith.constant 0 : i32
    %c0_i32_1 = arith.constant 0 : i32
    return %1, %c0_i32, %c0_i32_0 : i32, i32, i32
  }
  func.func @transform_13(%arg0: i32, %arg1: i32) -> (i32, i32, i32) {
    %c1_i32 = arith.constant 1 : i32
    %0 = arith.muli %arg0, %c1_i32 : i32
    %1 = arith.addi %0, %arg1 : i32
    %c0_i32 = arith.constant 0 : i32
    %c0_i32_0 = arith.constant 0 : i32
    %c0_i32_1 = arith.constant 0 : i32
    return %1, %c0_i32, %c0_i32_0 : i32, i32, i32
  }
}

</mosaic_0001>

<bundles_post_ra>
// kernel: depthwise_separable_conv_forward.4
= control target key start
LH: loop header
LB: loop body
LE: loop exit
PB: predicated region body
PF: predicated region fallthrough
CT: control target
= control target key end

     0   :  { %vm413_vm0 = vcmask 130048   ;;  %vm613_vm1 = vcmask 122880   ;;  %s1099_s0 = inlined_call_operand.vmem [shape: bf16[512,16], index: 0, kind: input, shape index: {}]   ;;  %s1100_s2 = inlined_call_operand.vmem [shape: f32[1,1,16], index: 2, kind: output, shape index: {1}]   ;;  %s1101_s1 = inlined_call_operand.vmem [shape: f32[1,16,16], index: 1, kind: output, shape index: {0}]  }
   0x1   :  { %v781_v0 = vld [vmem:[%s1099_s0 + $0xc0] sm:$0xff]   ;;  %v791_v2 = vld [vmem:[%s1099_s0 + $0xc8] sm:$0xff]   ;;  %v803_v4 = vld [vmem:[%s1099_s0 + $0xd0] sm:$0xff]  }
   0x2   :  { %v786_v1 = vld [vmem:[%s1099_s0 + $0x40] sm:$0xff]   ;;  %v796_v3 = vld [vmem:[%s1099_s0 + $0x48] sm:$0xff]   ;;  %315 = vxpose.xlu1.c.b16.start [1/8] (narrow) %v781_v0, 16  ;;  %v808_v5 = vld [vmem:[%s1099_s0 + $0x50] sm:$0xff]   ;;  %677 = vmatprep.subr.bf16.mxu1 %v781_v0 }
   0x3   :  { %283 = vxpose.xlu0.c.b16.start [1/8] (narrow) %v786_v1, 16  ;;  %655 = vmatprep.subr.bf16.mxu0 %v786_v1  ;;  %v817_v6 = vld [vmem:[%s1099_s0 + $0xd8] sm:$0xff]   ;;  %v829_v8 = vld [vmem:[%s1099_s0 + $0xe0] sm:$0xff]   ;;  %v841_v10 = vld [vmem:[%s1099_s0 + $0xe8] sm:$0xff]  }
   0x4   :  { %v822_v7 = vld [vmem:[%s1099_s0 + $0x58] sm:$0xff]   ;;  %v834_v9 = vld [vmem:[%s1099_s0 + $0x60] sm:$0xff]   ;;  %v846_v11 = vld [vmem:[%s1099_s0 + $0x68] sm:$0xff]  }
   0x5   :  { %v851_v12 = vld [vmem:[%s1099_s0 + $0x80] sm:$0xff]   ;;  %v861_v14 = vld [vmem:[%s1099_s0 + $0xf0] sm:$0xff]   ;;  %v871_v16 = vld [vmem:[%s1099_s0 + $0x88] sm:$0xff]  }
   0x6   :  { %316 = vxpose.xlu1.c.b16.cont [2/8] (narrow) %v791_v2, 16  ;;  %v11_v13 = vld [vmem:[%s1099_s0] sm:$0xff]   ;;  %v866_v15 = vld [vmem:[%s1099_s0 + $0x70] sm:$0xff]   ;;  %678 = vmatpush3.bf16.msra.mxu1 %v851_v12  ;;  %v879_v19 = vld [vmem:[%s1099_s0 + $0xf8] sm:$0xff]  }
   0x7   :  { %284 = vxpose.xlu0.c.b16.cont [2/8] (narrow) %v796_v3, 16  ;;  %v416_v17 = vunpack.c.l.bf16 %v11_v13  ;;  %v417_v18 = vunpack.c.h.bf16 %v11_v13  ;;  %v13_v20 = vld [vmem:[%s1099_s0 + $0x8] sm:$0xff]   ;;  %v887_v21 = vld [vmem:[%s1099_s0 + $0x78] sm:$0xff]   ;;  %656 = vmatpush3.bf16.msra.mxu0 %v11_v13  ;;  %v895_v27 = vld [vmem:[%s1099_s0 + $0x90] sm:$0xff]  }
   0x8   :  { %v418_v24 = vunpack.c.l.bf16 %v13_v20  ;;  %v419_v25 = vunpack.c.h.bf16 %v13_v20  ;;  %679 = vmatprep.subr.bf16.mxu1 %v791_v2  ;;  %657 = vmatprep.subr.bf16.mxu0 %v796_v3  ;;  %v15_v30 = vld [vmem:[%s1099_s0 + $0x10] sm:$0xff]   ;;  %v911_v36 = vld [vmem:[%s1099_s0 + $0x98] sm:$0xff]   ;;  %v925_v43 = vld [vmem:[%s1099_s0 + $0x20] sm:$0xff]  }
   0x9   :  { %v480_v22 = vsel %vm413_vm0, %v416_v17, 0.0  ;;  %v481_v23 = vsel %vm413_vm0, %v417_v18, 0.0  ;;  %v420_v32 = vunpack.c.l.bf16 %v15_v30  ;;  %v421_v33 = vunpack.c.h.bf16 %v15_v30  ;;  %v17_v37 = vld [vmem:[%s1099_s0 + $0x18] sm:$0xff]   ;;  %v931_v45 = vld [vmem:[%s1099_s0 + $0xa0] sm:$0xff]   ;;  %v21_v50 = vld [vmem:[%s1099_s0 + $0x28] sm:$0xff]  }
   0xa   :  { %317 = vxpose.xlu1.c.b16.cont [3/8] (narrow) %v803_v4, 16  ;;  %v482_v26 = vadd.f32 %v481_v23, %v480_v22  ;;  %v483_v28 = vsel %vm413_vm0, %v418_v24, 0.0  ;;  %v485_v29 = vsel %vm413_vm0, %v419_v25, 0.0  ;;  %680 = vmatpush3.bf16.msra.mxu1 %v871_v16  ;;  %v422_v39 = vunpack.c.l.bf16 %v17_v37  ;;  %v947_v54 = vld [vmem:[%s1099_s0 + $0xa8] sm:$0xff]   ;;  %v23_v58 = vld [vmem:[%s1099_s0 + $0x30] sm:$0xff]   ;;  %v25_v18 = vld [vmem:[%s1099_s0 + $0x38] sm:$0xff]  }
   0xb   :  { %285 = vxpose.xlu0.c.b16.cont [3/8] (narrow) %v808_v5, 16  ;;  %658 = vmatpush3.bf16.msra.mxu0 %v13_v20  ;;  %v487_v35 = vsel %vm413_vm0, %v420_v32, 0.0  ;;  %v489_v38 = vsel %vm413_vm0, %v421_v33, 0.0  ;;  %v423_v40 = vunpack.c.h.bf16 %v17_v37  ;;  %v424_v46 = vunpack.c.l.bf16 %v925_v43  ;;  %v962_v62 = vld [vmem:[%s1099_s0 + $0xb0] sm:$0xff]   ;;  %v976_v24 = vld [vmem:[%s1099_s0 + $0xb8] sm:$0xff]  }
   0xc   :  { %v484_v31 = vadd.f32 %v483_v28, %v482_v26  ;;  %681 = vmatprep.subr.bf16.mxu1 %v803_v4  ;;  %659 = vmatprep.subr.bf16.mxu0 %v808_v5  ;;  %v491_v42 = vsel %vm413_vm0, %v422_v39, 0.0  ;;  %v425_v48 = vunpack.c.h.bf16 %v925_v43  ;;  %v426_v52 = vunpack.c.l.bf16 %v21_v50 }
   0xd   :  { %v493_v47 = vsel %vm413_vm0, %v423_v40, 0.0  ;;  %v495_v51 = vsel %vm413_vm0, %v424_v46, 0.0  ;;  %v427_v56 = vunpack.c.h.bf16 %v21_v50  ;;  %v428_v60 = vunpack.c.l.bf16 %v23_v58 }
   0xe   :  { %318 = vxpose.xlu1.c.b16.cont [4/8] (narrow) %v817_v6, 16  ;;  %v486_v34 = vadd.f32 %v485_v29, %v484_v31  ;;  %682 = vmatpush3.bf16.msra.mxu1 %v895_v27  ;;  %v497_v55 = vsel %vm413_vm0, %v425_v48, 0.0  ;;  %v499_v59 = vsel %vm413_vm0, %v426_v52, 0.0  ;;  %v430_v22 = vunpack.c.l.bf16 %v25_v18 }
   0xf   :  { %286 = vxpose.xlu0.c.b16.cont [4/8] (narrow) %v822_v7, 16  ;;  %660 = vmatpush3.bf16.msra.mxu0 %v15_v30  ;;  %v501_v63 = vsel %vm413_vm0, %v427_v56, 0.0  ;;  %v431_v26 = vunpack.c.h.bf16 %v25_v18  ;;  %v432_v29 = vunpack.c.l.bf16 %v786_v1  ;;  %v433_v32 = vunpack.c.h.bf16 %v786_v1 }
  0x10   :  { %v488_v41 = vadd.f32 %v487_v35, %v486_v34  ;;  %683 = vmatprep.subr.bf16.mxu1 %v817_v6  ;;  %661 = vmatprep.subr.bf16.mxu0 %v822_v7  ;;  %v435_v40 = vunpack.c.h.bf16 %v796_v3  ;;  %v437_v46 = vunpack.c.h.bf16 %v808_v5 }
  0x11   :  { %v509_v33 = vsel %vm413_vm0, %v431_v26, 0.0  ;;  %v511_v35 = vsel %vm413_vm0, %v432_v29, 0.0  ;;  %v513_v39 = vsel %vm413_vm0, %v433_v32, 0.0  ;;  %v446_v26 = vunpack.c.l.bf16 %v887_v21 }
  0x12   :  { %319 = vxpose.xlu1.c.b16.cont [5/8] (narrow) %v829_v8, 16  ;;  %v490_v44 = vadd.f32 %v489_v38, %v488_v41  ;;  %684 = vmatpush3.bf16.msra.mxu1 %v911_v36  ;;  %v448_v32 = vunpack.c.l.bf16 %v851_v12 }
  0x13   :  { %287 = vxpose.xlu0.c.b16.cont [5/8] (narrow) %v834_v9, 16  ;;  %662 = vmatpush3.bf16.msra.mxu0 %v17_v37 }
  0x14   :  { %v492_v49 = vadd.f32 %v491_v42, %v490_v44  ;;  %685 = vmatprep.subr.bf16.mxu1 %v829_v8  ;;  %663 = vmatprep.subr.bf16.mxu0 %v834_v9  ;;  %v436_v42 = vunpack.c.l.bf16 %v808_v5  ;;  %v517_v44 = vsel %vm413_vm0, %v435_v40, 0.0  ;;  %v440_v5 = vunpack.c.l.bf16 %v834_v9 }
  0x16   :  { %320 = vxpose.xlu1.c.b16.cont [6/8] (narrow) %v841_v10, 16  ;;  %v494_v53 = vadd.f32 %v493_v47, %v492_v49  ;;  %686 = vmatpush3.bf16.msra.mxu1 %v931_v45  ;;  %v519_v48 = vsel %vm413_vm0, %v436_v42, 0.0  ;;  %v452_v42 = vunpack.c.l.bf16 %v895_v27 }
  0x17   :  { %288 = vxpose.xlu0.c.b16.cont [6/8] (narrow) %v846_v11, 16  ;;  %664 = vmatpush3.bf16.msra.mxu0 %v925_v43 }
  0x18   :  { %v496_v57 = vadd.f32 %v495_v51, %v494_v53  ;;  %687 = vmatprep.subr.bf16.mxu1 %v841_v10  ;;  %665 = vmatprep.subr.bf16.mxu0 %v846_v11  ;;  %v439_v51 = vunpack.c.h.bf16 %v822_v7 }
  0x1a   :  { %321 = vxpose.xlu1.c.b16.cont [7/8] (narrow) %v861_v14, 16  ;;  %v498_v61 = vadd.f32 %v497_v55, %v496_v57  ;;  %688 = vmatpush3.bf16.msra.mxu1 %v947_v54  ;;  %v525_v56 = vsel %vm413_vm0, %v439_v51, 0.0  ;;  %v441_v57 = vunpack.c.h.bf16 %v834_v9  ;;  %v445_v9 = vunpack.c.h.bf16 %v866_v15 }
  0x1b   :  { %289 = vxpose.xlu0.c.b16.cont [7/8] (narrow) %v866_v15, 16  ;;  %666 = vmatpush3.bf16.msra.mxu0 %v21_v50 }
  0x1c   :  { %v500_v17 = vadd.f32 %v499_v59, %v498_v61  ;;  %689 = vmatprep.subr.bf16.mxu1 %v861_v14  ;;  %667 = vmatprep.subr.bf16.mxu0 %v866_v15  ;;  %v527_v59 = vsel %vm413_vm0, %v440_v5, 0.0  ;;  %v537_v29 = vsel %vm413_vm0, %v445_v9, 0.0  ;;  %v462_v9 = vunpack.c.l.bf16 %v976_v24 }
  0x1e   :  { %322 = vxpose.xlu1.c.b16.end [8/8] (narrow) %v879_v19, 16  ;;  %v502_v23 = vadd.f32 %v501_v63, %v500_v17  ;;  %690 = vmatpush3.bf16.msra.mxu1 %v962_v62  ;;  %v443_v63 = vunpack.c.h.bf16 %v846_v11 }
  0x1f   :  { %290 = vxpose.xlu0.c.b16.end [8/8] (narrow) %v887_v21, 16  ;;  %668 = vmatpush3.bf16.msra.mxu0 %v23_v58 }
  0x20   :  { %691 = vmatprep.subr.bf16.mxu1 %v879_v19  ;;  %669 = vmatprep.subr.bf16.mxu0 %v887_v21 }
  0x22   :  { %299 = vxpose.xlu1.c.b16.start [1/8] (narrow) %v851_v12, 16  ;;  %692 = vmatpush3.bf16.msra.mxu1 %v976_v24 }
  0x23   :  { %267 = vxpose.xlu0.c.b16.start [1/8] (narrow) %v11_v13, 16  ;;  %v429_v13 = vunpack.c.h.bf16 %v23_v58  ;;  %670 = vmatpush3.bf16.msra.mxu0 %v25_v18 }
  0x25   :  { %v505_v25 = vsel %vm413_vm0, %v429_v13, 0.0 }
  0x26   :  { %300 = vxpose.xlu1.c.b16.cont [2/8] (narrow) %v871_v16, 16 }
  0x27   :  { %268 = vxpose.xlu0.c.b16.cont [2/8] (narrow) %v13_v20, 16  ;;  %v503_v20 = vsel %vm413_vm0, %v428_v60, 0.0  ;;  %v442_v60 = vunpack.c.l.bf16 %v846_v11  ;;  %v447_v11 = vunpack.c.h.bf16 %v887_v21  ;;  %v451_v21 = vunpack.c.h.bf16 %v871_v16 }
  0x28   :  { %v504_v28 = vadd.f32 %v503_v20, %v502_v23 }
  0x29   :  { %v531_v17 = vsel %vm413_vm0, %v442_v60, 0.0 }
  0x2a   :  { %301 = vxpose.xlu1.c.b16.cont [3/8] (narrow) %v895_v27, 16  ;;  %v506_v31 = vadd.f32 %v505_v25, %v504_v28 }
  0x2b   :  { %269 = vxpose.xlu0.c.b16.cont [3/8] (narrow) %v15_v30, 16  ;;  %v507_v30 = vsel %vm413_vm0, %v430_v22, 0.0  ;;  %v533_v22 = vsel %vm413_vm0, %v443_v63, 0.0 }
  0x2c   :  { %v508_v34 = vadd.f32 %v507_v30, %v506_v31  ;;  %v539_v31 = vsel %vm413_vm0, %v446_v26, 0.0 }
  0x2e   :  { %302 = vxpose.xlu1.c.b16.cont [4/8] (narrow) %v911_v36, 16  ;;  %v510_v38 = vadd.f32 %v509_v33, %v508_v34  ;;  %v541_v34 = vsel %vm413_vm0, %v447_v11, 0.0 }
  0x2f   :  { %270 = vxpose.xlu0.c.b16.cont [4/8] (narrow) %v17_v37, 16  ;;  %v434_v37 = vunpack.c.l.bf16 %v796_v3  ;;  %v438_v3 = vunpack.c.l.bf16 %v822_v7  ;;  %v529_v7 = vsel %vm413_vm0, %v441_v57, 0.0  ;;  %v458_v57 = vunpack.c.l.bf16 %v947_v54 }
  0x30   :  { %v512_v1 = vadd.f32 %v511_v35, %v510_v38  ;;  %v450_v38 = vunpack.c.l.bf16 %v871_v16  ;;  %v455_v16 = vunpack.c.h.bf16 %v911_v36 }
  0x31   :  { %v515_v41 = vsel %vm413_vm0, %v434_v37, 0.0  ;;  %v523_v53 = vsel %vm413_vm0, %v438_v3, 0.0  ;;  %v543_v37 = vsel %vm413_vm0, %v448_v32, 0.0 }
  0x32   :  { %303 = vxpose.xlu1.c.b16.cont [5/8] (narrow) %v931_v45, 16  ;;  %v557_v5 = vsel %vm413_vm0, %v455_v16, 0.0  ;;  %v474_v16 = vunpack.c.l.bf16 %v841_v10 }
  0x33   :  { %271 = vxpose.xlu0.c.b16.cont [5/8] (narrow) %v925_v43, 16  ;;  %v514_v43 = vadd.f32 %v513_v39, %v512_v1 }
  0x35   :  { %v516_v47 = vadd.f32 %v515_v41, %v514_v43  ;;  %v547_v41 = vsel %vm413_vm0, %v450_v38, 0.0  ;;  %v468_v38 = vunpack.c.l.bf16 %v803_v4 }
  0x36   :  { %304 = vxpose.xlu1.c.b16.cont [6/8] (narrow) %v947_v54, 16 }
  0x37   :  { %272 = vxpose.xlu0.c.b16.cont [6/8] (narrow) %v21_v50, 16  ;;  %v518_v49 = vadd.f32 %v517_v44, %v516_v47  ;;  %v521_v50 = vsel %vm413_vm0, %v437_v46, 0.0  ;;  %v549_v44 = vsel %vm413_vm0, %v451_v21, 0.0  ;;  %v551_v47 = vsel %vm413_vm0, %v452_v42, 0.0 }
  0x39   :  { %v520_v52 = vadd.f32 %v519_v48, %v518_v49  ;;  %v454_v48 = vunpack.c.l.bf16 %v911_v36  ;;  %v459_v36 = vunpack.c.h.bf16 %v947_v54 }
  0x3a   :  { %305 = vxpose.xlu1.c.b16.cont [7/8] (narrow) %v962_v62, 16 }
  0x3b   :  { %273 = vxpose.xlu0.c.b16.cont [7/8] (narrow) %v23_v58, 16  ;;  %v522_v55 = vadd.f32 %v521_v50, %v520_v52  ;;  %v555_v51 = vsel %vm413_vm0, %v454_v48, 0.0  ;;  %v456_v52 = vunpack.c.l.bf16 %v931_v45 }
  0x3d   :  { %v524_v58 = vadd.f32 %v523_v53, %v522_v55 }
  0x3e   :  { %306 = vxpose.xlu1.c.b16.end [8/8] (narrow) %v976_v24, 16 }
  0x3f   :  { %274 = vxpose.xlu0.c.b16.end [8/8] (narrow) %v25_v18, 16  ;;  %v526_v61 = vadd.f32 %v525_v56, %v524_v58  ;;  %v444_v18 = vunpack.c.l.bf16 %v866_v15  ;;  %v449_v15 = vunpack.c.h.bf16 %v851_v12  ;;  %v453_v12 = vunpack.c.h.bf16 %v895_v27 }
  0x40   :  { %v457_v27 = vunpack.c.h.bf16 %v931_v45  ;;  %v559_v56 = vsel %vm413_vm0, %v456_v52, 0.0  ;;  %v565_v45 = vsel %vm413_vm0, %v459_v36, 0.0  ;;  %v478_v36 = vunpack.c.l.bf16 %v879_v19 }
  0x41   :  { %v528_v13 = vadd.f32 %v527_v59, %v526_v61  ;;  %v535_v25 = vsel %vm413_vm0, %v444_v18, 0.0  ;;  %v545_v40 = vsel %vm413_vm0, %v449_v15, 0.0  ;;  %v553_v49 = vsel %vm413_vm0, %v453_v12, 0.0 }
  0x42   :  { %v561_v59 = vsel %vm413_vm0, %v457_v27, 0.0  ;;  %v563_v61 = vsel %vm413_vm0, %v458_v57, 0.0  ;;  %v461_v18 = vunpack.c.h.bf16 %v962_v62  ;;  %v477_v57 = vunpack.c.h.bf16 %v861_v14 }
  0x43   :  { %v530_v20 = vadd.f32 %v529_v7, %v528_v13  ;;  %v460_v7 = vunpack.c.l.bf16 %v962_v62  ;;  %v465_v62 = vunpack.c.h.bf16 %v781_v0 }
  0x45   :  { %v532_v23 = vadd.f32 %v531_v17, %v530_v20  ;;  %v577_v15 = vsel %vm413_vm0, %v465_v62, 0.0 }
  0x47   :  { %v534_v28 = vadd.f32 %v533_v22, %v532_v23  ;;  %v567_v22 = vsel %vm413_vm0, %v460_v7, 0.0  ;;  %v569_v23 = vsel %vm413_vm0, %v461_v18, 0.0 }
  0x49   :  { %v536_v30 = vadd.f32 %v535_v25, %v534_v28  ;;  %v463_v25 = vunpack.c.h.bf16 %v976_v24  ;;  %v464_v28 = vunpack.c.l.bf16 %v781_v0  ;;  %v467_v24 = vunpack.c.h.bf16 %v791_v2 }
  0x4b   :  { %v538_v33 = vadd.f32 %v537_v29, %v536_v30  ;;  %v571_v29 = vsel %vm413_vm0, %v462_v9, 0.0  ;;  %v573_v30 = vsel %vm413_vm0, %v463_v25, 0.0  ;;  %v575_v32 = vsel %vm413_vm0, %v464_v28, 0.0 }
  0x4c   :  { %v581_v0 = vsel %vm413_vm0, %v467_v24, 0.0 }
  0x4d   :  { %v540_v35 = vadd.f32 %v539_v31, %v538_v33  ;;  %v466_v33 = vunpack.c.l.bf16 %v791_v2  ;;  %v471_v2 = vunpack.c.h.bf16 %v817_v6 }
  0x4f   :  { %v542_v39 = vadd.f32 %v541_v34, %v540_v35  ;;  %v589_v48 = vsel %vm413_vm0, %v471_v2, 0.0 }
  0x51   :  { %v544_v1 = vadd.f32 %v543_v37, %v542_v39  ;;  %v579_v37 = vsel %vm413_vm0, %v466_v33, 0.0 }
  0x53   :  { %v546_v43 = vadd.f32 %v545_v40, %v544_v1  ;;  %v469_v40 = vunpack.c.h.bf16 %v803_v4  ;;  %v583_v1 = vsel %vm413_vm0, %v468_v38, 0.0  ;;  %v473_v4 = vunpack.c.h.bf16 %v829_v8 }
  0x55   :  { %v548_v46 = vadd.f32 %v547_v41, %v546_v43  ;;  %v470_v41 = vunpack.c.l.bf16 %v817_v6  ;;  %v585_v43 = vsel %vm413_vm0, %v469_v40, 0.0  ;;  %v475_v6 = vunpack.c.h.bf16 %v841_v10 }
  0x57   :  { %v550_v3 = vadd.f32 %v549_v44, %v548_v46  ;;  %v587_v12 = vsel %vm413_vm0, %v470_v41, 0.0  ;;  %v472_v46 = vunpack.c.l.bf16 %v829_v8  ;;  %v597_v8 = vsel %vm413_vm0, %v475_v6, 0.0 }
  0x59   :  { %v552_v50 = vadd.f32 %v551_v47, %v550_v3 }
  0x5b   :  { %v554_v53 = vadd.f32 %v553_v49, %v552_v50  ;;  %v591_v49 = vsel %vm413_vm0, %v472_v46, 0.0 }
  0x5d   :  { %v556_v55 = vadd.f32 %v555_v51, %v554_v53  ;;  %v593_v51 = vsel %vm413_vm0, %v473_v4, 0.0  ;;  %v595_v53 = vsel %vm413_vm0, %v474_v16, 0.0 }
  0x5f   :  { %v558_v58 = vadd.f32 %v557_v5, %v556_v55  ;;  %v476_v5 = vunpack.c.l.bf16 %v861_v14 }
  0x61   :  { %v560_v60 = vadd.f32 %v559_v56, %v558_v58 }
  0x63   :  { %v562_v63 = vadd.f32 %v561_v59, %v560_v60  ;;  %v599_v59 = vsel %vm413_vm0, %v476_v5, 0.0  ;;  %v601_v60 = vsel %vm413_vm0, %v477_v57, 0.0 }
  0x65   :  { %v564_v20 = vadd.f32 %v563_v61, %v562_v63  ;;  %v479_v61 = vunpack.c.h.bf16 %v879_v19  ;;  %v603_v63 = vsel %vm413_vm0, %v478_v36, 0.0 }
  0x67   :  { %v566_v54 = vadd.f32 %v565_v45, %v564_v20 }
  0x68   :  { %v323_v13 = vpop.trf.xlu1 }
  0x69   :  { %v291_v17 = vpop.trf.xlu0  ;;  %404 = vmatprep.mubr.bf16.mxu1 %v323_v13  ;;  %v568_v26 = vadd.f32 %v567_v22, %v566_v54 }
  0x6a   :  { %363 = vmatprep.mubr.bf16.mxu0 %v291_v17  ;;  %v605_v17 = vsel %vm413_vm0, %v479_v61, 0.0 }
  0x6b   :  { %v570_v11 = vadd.f32 %v569_v23, %v568_v26 }
  0x6d   :  { %v572_v31 = vadd.f32 %v571_v29, %v570_v11 }
  0x6f   :  { %v574_v34 = vadd.f32 %v573_v30, %v572_v31 }
  0x71   :  { %v576_v35 = vadd.f32 %v575_v32, %v574_v34 }
  0x73   :  { %v578_v39 = vadd.f32 %v577_v15, %v576_v35 }
  0x75   :  { %v580_v21 = vadd.f32 %v579_v37, %v578_v39 }
  0x77   :  { %v582_v42 = vadd.f32 %v581_v0, %v580_v21 }
  0x79   :  { %v584_v44 = vadd.f32 %v583_v1, %v582_v42 }
  0x7b   :  { %v586_v47 = vadd.f32 %v585_v43, %v584_v44 }
  0x7d   :  { %v588_v3 = vadd.f32 %v587_v12, %v586_v47 }
  0x7f   :  { %v590_v50 = vadd.f32 %v589_v48, %v588_v3 }
  0x81   :  { %v592_v52 = vadd.f32 %v591_v49, %v590_v50 }
  0x83   :  { %v594_v27 = vadd.f32 %v593_v51, %v592_v52 }
  0x85   :  { %v596_v58 = vadd.f32 %v595_v53, %v594_v27 }
  0x87   :  { %v598_v10 = vadd.f32 %v597_v8, %v596_v58 }
  0x88   :  { %v307_v55 = vpop.trf.xlu1 }
  0x89   :  { %v275_v56 = vpop.trf.xlu0  ;;  %405 = vmatmul.mubr.bf16.vlgmr.msra.gmra.mrb[0].mxu1 %v307_v55  ;;  %v600_v7 = vadd.f32 %v599_v59, %v598_v10 }
  0x8a   :  { %364 = vmatmul.mubr.bf16.vlgmr.msra.gmra.mrb[0].mxu0 %v275_v56 }
  0x8b   :  { %v602_v13 = vadd.f32 %v601_v60, %v600_v7 }
  0x8d   :  { %v604_v45 = vadd.f32 %v603_v63, %v602_v13 }
  0x8f   :  { %v606_v14 = vadd.f32 %v605_v17, %v604_v45 }
  0x91   :  { %v607_v18 = vrot.slane %v606_v14, 4 }
  0x93   :  { %v608_v20 = vadd.f32 %v607_v18, %v606_v14 }
  0x95   :  { %v609_v22 = vrot.slane %v608_v20, 2 }
  0x97   :  { %v610_v9 = vadd.f32 %v609_v22, %v608_v20 }
  0x99   :  { %v611_v54 = vrot.slane %v610_v9, 1 }
  0x9b   :  { %v612_v23 = vadd.f32 %v611_v54, %v610_v9 }
  0x9d   :  { %614 = vst.msk [vmem:[%s1100_s2] sm:$0x1] %vm613_vm1, %v612_v23 }
 0x15c   :  { %v693_v25 = vpop.f32.mrb[0].mxu1 }
 0x15d   :  { %v671_v19 = vpop.f32.mrb[0].mxu0  ;;  %v694_v28 = vpop.f32.mrb[1].mxu1 }
 0x15e   :  { %v672_v26 = vpop.f32.mrb[1].mxu0  ;;  %v695_v11 = vadd.f32 %v694_v28, %v693_v25  ;;  %v696_v30 = vpop.f32.mrb[2].mxu1 }
 0x15f   :  { %v673_v29 = vadd.f32 %v672_v26, %v671_v19  ;;  %v674_v62 = vpop.f32.mrb[2].mxu0  ;;  %v697_v32 = vpop.f32.mrb[3].mxu1 }
 0x160   :  { %v675_v31 = vpop.f32.mrb[3].mxu0  ;;  %v698_v15 = vadd.f32 %v697_v32, %v696_v30 }
 0x161   :  { %v407_v33 = vadd.f32 %v695_v11, %v673_v29  ;;  %v676_v34 = vadd.f32 %v675_v31, %v674_v62 }
 0x163   :  { %414 = vst.msk [vmem:[%s1101_s1] sm:$0xff] %vm413_vm0, %v407_v33  ;;  %v410_v24 = vadd.f32 %v698_v15, %v676_v34 }
 0x165   :  { %415 = vst.msk [vmem:[%s1101_s1 + $0x8] sm:$0xff] %vm413_vm0, %v410_v24 }

// kernel: depthwise_separable_conv_forward.7
= control target key start
LH: loop header
LB: loop body
LE: loop exit
PB: predicated region body
PF: predicated region fallthrough
CT: control target
= control target key end

     0   :  { %s378_s12 = smov 0   ;;  %s405_s0 = inlined_call_operand.vmem [shape: bf16[2,64,128], index: 0, kind: input, shape index: {}]   ;;  %s406_s1 = inlined_call_operand.vmem [shape: f32[1,128], index: 1, kind: input, shape index: {}]   ;;  %s407_s2 = inlined_call_operand.vmem [shape: f32[1,128], index: 2, kind: input, shape index: {}]   ;;  %s408_s3 = inlined_call_operand.vmem [shape: f32[2,24,64], index: 3, kind: output, shape index: {}]  }
   0x1 LB: > { %s308_s13 = sadd.s32 4294967295, %s356_s12   ;;  %p312_p0 = scmp.ge.s32.totalorder %s356_s12, 1  ;;  %s356_s12 = sphi %s378_s12, %s13_s12  }
   0x2   : > { %p137_p1 = scmp.lt.s32.totalorder %s356_s12, 3 }
   0x4   : > { %p138_p2 = pnand %p312_p0, %p137_p1 }
   0x5   : > { %p161_p3 = scmp.lt.s32.totalorder (!%p138_p2), %s308_s13, 1  ;;  %v316_v1 = vld [vmem:[%s406_s1] ss:$0 sm:$0xff] (!%p138_p2)  ;;  %vm249_vm0 = vcmask (!%p138_p2), 523264  }
   0x6   : > { %141 = sbr.rel (%p138_p2) target bundleno = 161 (0xa1), region = 32  ;;  %v317_v5 = vld [vmem:[%s407_s2] ss:$0 sm:$0xff] (!%p138_p2) }
   0xd   : > { %s410_s13 = smov (!%p161_p3, %s308_s13), 1 }
   0xe   : > { %s320_s14 = sshll.u32 %s410_s13, 5  ;;  %s340_s22 = smul.u32 24, %s410_s13 }
   0xf   : > { %s165_s17 = scalar_lea.vmem %s405_s0, %s320_s14 }
  0x10   : > { %v322_v0 = vld [vmem:[%s165_s17] sm:$0xff]   ;;  %v337_v2 = vld [vmem:[%s165_s17 + $0x8] sm:$0xff]   ;;  %v338_v13 = vld [vmem:[%s165_s17 + $0x10] sm:$0xff]   ;;  %s170_s25 = scalar_lea.vmem %s408_s3, %s340_s22 }
  0x11   : > { %v323_v3 = vunpack.c.l.bf16 %v322_v0  ;;  %v324_v4 = vunpack.c.h.bf16 %v322_v0  ;;  %v327_v8 = vunpack.c.l.bf16 %v337_v2  ;;  %v328_v12 = vunpack.c.h.bf16 %v337_v2  ;;  %v339_v20 = vld [vmem:[%s165_s17 + $0x18] sm:$0xff]  }
  0x12   : > { %v331_v16 = vunpack.c.l.bf16 %v338_v13  ;;  %v332_v19 = vunpack.c.h.bf16 %v338_v13  ;;  %v335_v23 = vunpack.c.l.bf16 %v339_v20  ;;  %v336_v26 = vunpack.c.h.bf16 %v339_v20 }
  0x13   : > { %v194_v6 = vmul.f32 %v323_v3, %v316_v1  ;;  %v195_v7 = vmul.f32 %v324_v4, %v316_v1  ;;  %v196_v11 = vmul.f32 %v327_v8, %v316_v1  ;;  %v197_v15 = vmul.f32 %v328_v12, %v316_v1 }
  0x14   : > { %v198_v18 = vmul.f32 %v331_v16, %v316_v1  ;;  %v199_v22 = vmul.f32 %v332_v19, %v316_v1  ;;  %v200_v25 = vmul.f32 %v335_v23, %v316_v1  ;;  %v201_v28 = vmul.f32 %v336_v26, %v316_v1 }
  0x15   : > { %v209_v9 = vadd.f32 %v317_v5, %v194_v6  ;;  %v210_v10 = vadd.f32 %v317_v5, %v195_v7  ;;  %v211_v14 = vadd.f32 %v317_v5, %v196_v11  ;;  %v212_v17 = vadd.f32 %v317_v5, %v197_v15 }
  0x16   : > { %v213_v21 = vadd.f32 %v317_v5, %v198_v18  ;;  %v214_v24 = vadd.f32 %v317_v5, %v199_v22  ;;  %v215_v27 = vadd.f32 %v317_v5, %v200_v25  ;;  %v216_v29 = vadd.f32 %v317_v5, %v201_v28 }
  0x17   : > { %217 = vxpose.xlu0.b32.start [1/8] (short) (narrow) %v209_v9, 24 }
  0x1b   : > { %218 = vxpose.xlu0.b32.cont [2/8] (short) (narrow) %v210_v10, 24 }
  0x1f   : > { %219 = vxpose.xlu0.b32.cont [3/8] (short) (narrow) %v211_v14, 24 }
  0x23   : > { %220 = vxpose.xlu0.b32.cont [4/8] (short) (narrow) %v212_v17, 24 }
  0x27   : > { %221 = vxpose.xlu0.b32.cont [5/8] (short) (narrow) %v213_v21, 24 }
  0x2b   : > { %222 = vxpose.xlu0.b32.cont [6/8] (short) (narrow) %v214_v24, 24 }
  0x2f   : > { %223 = vxpose.xlu0.b32.cont [7/8] (short) (narrow) %v215_v27, 24 }
  0x33   : > { %224 = vxpose.xlu0.b32.end [8/8] (short) (narrow) %v216_v29, 24 }
  0x97   : > { %v233_v30 = vpop.trf.xlu0 }
  0x98   : > { %250 = vst.msk [vmem:[%s170_s25] sm:$0xff] %vm249_vm0, %v233_v30 }
  0x9b   : > { %v234_v31 = vpop.trf.xlu0 }
  0x9c   : > { %251 = vst.msk [vmem:[%s170_s25 + $0x8] sm:$0xff] %vm249_vm0, %v234_v31 }
  0x9f   : > { %v235_v32 = vpop.trf.xlu0 }
  0xa0   : > { %252 = vst.msk [vmem:[%s170_s25 + $0x10] sm:$0xff] %vm249_vm0, %v235_v32 }
  0xa1 PF: > { %s13_s12 = sadd.s32 1, %s356_s12  }
  0xa2   : > { %p10_p4 = scmp.ge.s32.totalorder %s13_s12, 4  }
  0xa4   :  { %12 = sbr.rel (!%p10_p4) target bundleno = 1 (0x1), region = 62 }

// kernel: depthwise_separable_conv_forward.5
= control target key start
LH: loop header
LB: loop body
LE: loop exit
PB: predicated region body
PF: predicated region fallthrough
CT: control target
= control target key end

     0   :  { %s3004_s30 = smov 0   ;;  %s3006_s10 = smov 0   ;;  %s4219_s0 = inlined_call_operand.vmem [shape: bf16[2,288,16], index: 0, kind: input, shape index: {}]   ;;  %s4220_s1 = inlined_call_operand.vmem [shape: bf16[2,288,16], index: 1, kind: input, shape index: {}]   ;;  %s4221_s2 = inlined_call_operand.vmem [shape: f32[1,288,1], index: 2, kind: input, shape index: {}]   ;;  %s4222_s3 = inlined_call_operand.vmem [shape: f32[1,288,1], index: 3, kind: input, shape index: {}]   ;;  %s4223_s4 = inlined_call_operand.vmem [shape: bf16[16,128], index: 4, kind: input, shape index: {}]   ;;  %s4224_s5 = inlined_call_operand.vmem [shape: f32[1,128], index: 5, kind: input, shape index: {}]   ;;  %s4225_s6 = inlined_call_operand.vmem [shape: f32[1,128], index: 6, kind: input, shape index: {}]   ;;  %s4226_s7 = inlined_call_operand.vmem [shape: f32[9,128], index: 7, kind: input, shape index: {}]   ;;  %s4227_s8 = inlined_call_operand.vmem [shape: f32[2,1,128], index: 8, kind: output, shape index: {0}]   ;;  %s4228_s9 = inlined_call_operand.vmem [shape: f32[2,1,128], index: 9, kind: output, shape index: {1}]  }
   0x1   :  { %s3008_s11 = smov 0  }
   0x2 LB: > { %s32_s12 = sadd.s32 1, %s2947_s10  ;;  %p2679_p0 = scmp.ge.s32.totalorder %s2951_s11, 1  ;;  %s2951_s11 = sphi %s3008_s11, %s20_s11   ;;  %s2947_s10 = sphi %s3006_s10, %s4355_s10   ;;  %s2943_s30 = sphi %s3004_s30, %s4354_s30  }
   0x3   : > { %p34_p1 = scmp.ge.s32.totalorder %s32_s12, 2  ;;  %p316_p2 = scmp.lt.s32.totalorder %s2951_s11, 3 }
   0x5   : > { %s4357_s12 = smov (%p34_p1, %s32_s12), 0  ;;  %p317_p3 = pnand %p2679_p0, %p316_p2 }
   0x7   : > { %320 = sbr.rel (%p317_p3) target bundleno = 496 (0x1f0), region = 52 }
   0xe   : > { %v629_v0 = vld [vmem:[%s4221_s2 + $0x10] sm:$0xff]  ;;  %v627_v1 = vld [vmem:[%s4221_s2] sm:$0xff]  ;;  %p360_p4 = scmp.lt.s32.totalorder %s2943_s30, 1  ;;  %v2953_v2 = vmov 0   ;;  %v630_v4 = vld [vmem:[%s4221_s2 + $0x18] sm:$0xff]  ;;  %vm704_vm0 = vcmask 130048  }
   0xf   : > { %2890 = vset.pattern.permute.xlu1 %v2953_v2  ;;  %2889 = vset.pattern.permute.xlu0 %v2953_v2  ;;  %v2891_v3 = vld [vmem:[%s4223_s4] sm:$0xff]   ;;  %v628_v5 = vld [vmem:[%s4221_s2 + $0x8] sm:$0xff]  ;;  %v634_v11 = vld [vmem:[%s4221_s2 + $0x38] sm:$0xff]  ;;  %vm2069_vm1 = vcmask 1046528  }
  0x10   : > { %1614 = vperm.xlu1 %2890, %v629_v0   ;;  %1604 = vperm.xlu0 %2889, %v627_v1   ;;  %s4359_s30 = smov (!%p360_p4, %s2943_s30), 1  ;;  %v632_v6 = vld [vmem:[%s4221_s2 + $0x28] sm:$0xff]  ;;  %v631_v7 = vld [vmem:[%s4221_s2 + $0x20] sm:$0xff]  ;;  %v633_v12 = vld [vmem:[%s4221_s2 + $0x30] sm:$0xff] }
  0x11   : > { %2791 = vmatprep.subr.bf16.mxu0 %v2891_v3  ;;  %2861 = vmatprep.subr.bf16.mxu1 %v2891_v3  ;;  %s2863_s23 = smul.u32 144, %s4359_s30  ;;  %v636_v16 = vld [vmem:[%s4221_s2 + $0x48] sm:$0xff]  ;;  %v635_v17 = vld [vmem:[%s4221_s2 + $0x40] sm:$0xff]  ;;  %v638_v22 = vld [vmem:[%s4221_s2 + $0x58] sm:$0xff]  ;;  %s373_s27 = scalar_lea.vmem %s4227_s8, %s4359_s30 }
  0x12   : > { %2792 = vmatpush3.bf16.msra.mxu0 %v2891_v3  ;;  %2862 = vmatpush3.bf16.msra.mxu1 %v2891_v3  ;;  %v637_v23 = vld [vmem:[%s4221_s2 + $0x50] sm:$0xff]  ;;  %v640_v24 = vld [vmem:[%s4221_s2 + $0x68] sm:$0xff]  ;;  %v639_v25 = vld [vmem:[%s4221_s2 + $0x60] sm:$0xff]  ;;  %s378_s14 = scalar_lea.vmem %s4228_s9, %s4359_s30 }
  0x13   : > { %s3049_s13 = scalar_lea.vmem %s4219_s0, %s2863_s23  ;;  %s3054_s16 = scalar_lea.vmem %s4220_s1, %s2863_s23  ;;  %v642_v30 = vld [vmem:[%s4221_s2 + $0x78] sm:$0xff]  ;;  %v641_v31 = vld [vmem:[%s4221_s2 + $0x70] sm:$0xff]  ;;  %v644_v32 = vld [vmem:[%s4221_s2 + $0x88] sm:$0xff] }
  0x14   : > { %1619 = vperm.xlu1 %2890, %v630_v4   ;;  %1609 = vperm.xlu0 %2889, %v628_v5   ;;  %v2892_v8 = vld [vmem:[%s3049_s13] sm:$0xff]   ;;  %v2893_v9 = vld [vmem:[%s3054_s16 + $0x8] sm:$0xff]   ;;  %v2895_v13 = vld [vmem:[%s3054_s16 + $0x10] sm:$0xff]  }
  0x15   : > { %2793 = vmatprep.mubr.msk.bf16.mxu0 %vm704_vm0, %v2892_v8  ;;  %v2894_v10 = vld [vmem:[%s3049_s13 + $0x8] sm:$0xff]   ;;  %2829 = vmatprep.mubr.msk.bf16.mxu1 %vm704_vm0, %v2893_v9  ;;  %v2896_v14 = vld [vmem:[%s3049_s13 + $0x10] sm:$0xff]   ;;  %v2897_v15 = vld [vmem:[%s3054_s16 + $0x18] sm:$0xff]  }
  0x16   : > { %2794 = vmatmul.mubr.msk.bf16.vlgmr.msra.gmra.mrb[0].mxu0 %vm704_vm0, %v2894_v10  ;;  %2830 = vmatmul.mubr.msk.bf16.vlgmr.msra.gmra.mrb[0].mxu1 %vm704_vm0, %v2895_v13  ;;  %v2898_v18 = vld [vmem:[%s3049_s13 + $0x18] sm:$0xff]   ;;  %v2899_v19 = vld [vmem:[%s3054_s16 + $0x20] sm:$0xff]   ;;  %v2901_v21 = vld [vmem:[%s3054_s16 + $0x28] sm:$0xff]  }
  0x17   : > { %2797 = vmatprep.mubr.msk.bf16.mxu0 %vm704_vm0, %v2896_v14  ;;  %2833 = vmatprep.mubr.msk.bf16.mxu1 %vm704_vm0, %v2897_v15  ;;  %v2900_v20 = vld [vmem:[%s3049_s13 + $0x20] sm:$0xff]   ;;  %v2902_v26 = vld [vmem:[%s3049_s13 + $0x28] sm:$0xff]   ;;  %v2903_v27 = vld [vmem:[%s3054_s16 + $0x30] sm:$0xff]  }
  0x18   : > { %1629 = vperm.xlu1 %2890, %v632_v6   ;;  %1624 = vperm.xlu0 %2889, %v631_v7   ;;  %v2904_v28 = vld [vmem:[%s3049_s13 + $0x30] sm:$0xff]   ;;  %v2905_v29 = vld [vmem:[%s3054_s16 + $0x38] sm:$0xff]   ;;  %v643_v33 = vld [vmem:[%s4221_s2 + $0x80] sm:$0xff] }
  0x19   : > { %v2906_v34 = vld [vmem:[%s3049_s13 + $0x38] sm:$0xff]   ;;  %v2907_v35 = vld [vmem:[%s3054_s16 + $0x40] sm:$0xff]   ;;  %v2909_v37 = vld [vmem:[%s3054_s16 + $0x48] sm:$0xff]  }
  0x1a   : > { %v2908_v36 = vld [vmem:[%s3049_s13 + $0x40] sm:$0xff]   ;;  %v646_v38 = vld [vmem:[%s4221_s2 + $0x98] sm:$0xff]  ;;  %v645_v39 = vld [vmem:[%s4221_s2 + $0x90] sm:$0xff] }
  0x1b   : > { %v648_v40 = vld [vmem:[%s4221_s2 + $0xa8] sm:$0xff]  ;;  %v647_v41 = vld [vmem:[%s4221_s2 + $0xa0] sm:$0xff]  ;;  %v2911_v43 = vld [vmem:[%s3054_s16 + $0x50] sm:$0xff]  }
  0x1c   : > { %1639 = vperm.xlu1 %2890, %v634_v11   ;;  %1634 = vperm.xlu0 %2889, %v633_v12   ;;  %v2910_v42 = vld [vmem:[%s3049_s13 + $0x48] sm:$0xff]   ;;  %v2912_v44 = vld [vmem:[%s3049_s13 + $0x50] sm:$0xff]   ;;  %v2913_v45 = vld [vmem:[%s3054_s16 + $0x58] sm:$0xff]  }
  0x1d   : > { %v650_v46 = vld [vmem:[%s4221_s2 + $0xb8] sm:$0xff]  ;;  %v649_v47 = vld [vmem:[%s4221_s2 + $0xb0] sm:$0xff]  ;;  %v652_v48 = vld [vmem:[%s4221_s2 + $0xc8] sm:$0xff] }
  0x1e   : > { %2798 = vmatmul.mubr.msk.bf16.gmra.mrb[4].mxu0 %vm704_vm0, %v2898_v18  ;;  %2834 = vmatmul.mubr.msk.bf16.gmra.mrb[4].mxu1 %vm704_vm0, %v2899_v19  ;;  %v651_v49 = vld [vmem:[%s4221_s2 + $0xc0] sm:$0xff]  ;;  %v2914_v50 = vld [vmem:[%s3049_s13 + $0x58] sm:$0xff]   ;;  %v2917_v53 = vld [vmem:[%s3054_s16 + $0x68] sm:$0xff]  }
  0x1f   : > { %2801 = vmatprep.mubr.msk.bf16.mxu0 %vm704_vm0, %v2900_v20  ;;  %2837 = vmatprep.mubr.msk.bf16.mxu1 %vm704_vm0, %v2901_v21  ;;  %v2915_v51 = vld [vmem:[%s3054_s16 + $0x60] sm:$0xff]   ;;  %v654_v54 = vld [vmem:[%s4221_s2 + $0xd8] sm:$0xff]  ;;  %v653_v55 = vld [vmem:[%s4221_s2 + $0xd0] sm:$0xff] }
  0x20   : > { %1649 = vperm.xlu1 %2890, %v636_v16   ;;  %1644 = vperm.xlu0 %2889, %v635_v17   ;;  %v2916_v52 = vld [vmem:[%s3049_s13 + $0x60] sm:$0xff]   ;;  %v656_v56 = vld [vmem:[%s4221_s2 + $0xe8] sm:$0xff]  ;;  %v2919_v59 = vld [vmem:[%s3054_s16 + $0x70] sm:$0xff]  }
  0x21   : > { %v655_v57 = vld [vmem:[%s4221_s2 + $0xe0] sm:$0xff]  ;;  %v2918_v58 = vld [vmem:[%s3049_s13 + $0x68] sm:$0xff]   ;;  %v2920_v60 = vld [vmem:[%s3049_s13 + $0x70] sm:$0xff]  }
  0x22   : > { %v2921_v61 = vld [vmem:[%s3054_s16 + $0x78] sm:$0xff]   ;;  %v657_v63 = vld [vmem:[%s4221_s2 + $0xf0] sm:$0xff]  ;;  %v660_v0 = vld [vmem:[%s4221_s2 + $0x108] sm:$0xff] }
  0x23   : > { %v658_v62 = vld [vmem:[%s4221_s2 + $0xf8] sm:$0xff]  ;;  %v659_v1 = vld [vmem:[%s4221_s2 + $0x100] sm:$0xff]  ;;  %v663_v5 = vld [vmem:[%s4222_s3 + $0x8] sm:$0xff] }
  0x24   : > { %1659 = vperm.xlu1 %2890, %v638_v22   ;;  %1654 = vperm.xlu0 %2889, %v637_v23   ;;  %v2922_v2 = vld [vmem:[%s3049_s13 + $0x78] sm:$0xff]   ;;  %v2923_v3 = vld [vmem:[%s3054_s16 + $0x80] sm:$0xff]   ;;  %v664_v8 = vld [vmem:[%s4222_s3 + $0x10] sm:$0xff] }
  0x25   : > { %v2924_v4 = vld [vmem:[%s3049_s13 + $0x80] sm:$0xff]   ;;  %v665_v7 = vld [vmem:[%s4222_s3 + $0x18] sm:$0xff]  ;;  %v667_v10 = vld [vmem:[%s4222_s3 + $0x28] sm:$0xff] }
  0x26   : > { %2802 = vmatmul.mubr.msk.bf16.gmra.mrb[8].mxu0 %vm704_vm0, %v2902_v26  ;;  %2838 = vmatmul.mubr.msk.bf16.gmra.mrb[8].mxu1 %vm704_vm0, %v2903_v27  ;;  %v662_v6 = vld [vmem:[%s4222_s3] sm:$0xff]  ;;  %v671_v12 = vld [vmem:[%s4222_s3 + $0x48] sm:$0xff]  ;;  %v669_v16 = vld [vmem:[%s4222_s3 + $0x38] sm:$0xff] }
  0x27   : > { %2805 = vmatprep.mubr.msk.bf16.mxu0 %vm704_vm0, %v2904_v28  ;;  %2841 = vmatprep.mubr.msk.bf16.mxu1 %vm704_vm0, %v2905_v29  ;;  %v2925_v9 = vld [vmem:[%s3054_s16] sm:$0xff]   ;;  %v675_v14 = vld [vmem:[%s4222_s3 + $0x68] sm:$0xff]  ;;  %v668_v17 = vld [vmem:[%s4222_s3 + $0x30] sm:$0xff] }
  0x28   : > { %1669 = vperm.xlu1 %2890, %v640_v24   ;;  %1664 = vperm.xlu0 %2889, %v639_v25   ;;  %v666_v11 = vld [vmem:[%s4222_s3 + $0x20] sm:$0xff]  ;;  %v679_v18 = vld [vmem:[%s4222_s3 + $0x88] sm:$0xff]  ;;  %v673_v20 = vld [vmem:[%s4222_s3 + $0x58] sm:$0xff] }
  0x29   : > { %v670_v13 = vld [vmem:[%s4222_s3 + $0x40] sm:$0xff]  ;;  %v672_v21 = vld [vmem:[%s4222_s3 + $0x50] sm:$0xff]  ;;  %v683_v22 = vld [vmem:[%s4222_s3 + $0xa8] sm:$0xff] }
  0x2a   : > { %v674_v15 = vld [vmem:[%s4222_s3 + $0x60] sm:$0xff]  ;;  %v677_v24 = vld [vmem:[%s4222_s3 + $0x78] sm:$0xff]  ;;  %v676_v25 = vld [vmem:[%s4222_s3 + $0x70] sm:$0xff] }
  0x2b   : > { %v678_v19 = vld [vmem:[%s4222_s3 + $0x80] sm:$0xff]  ;;  %v687_v26 = vld [vmem:[%s4222_s3 + $0xc8] sm:$0xff]  ;;  %v681_v28 = vld [vmem:[%s4222_s3 + $0x98] sm:$0xff] }
  0x2c   : > { %1679 = vperm.xlu1 %2890, %v642_v30   ;;  %1674 = vperm.xlu0 %2889, %v641_v31   ;;  %v682_v23 = vld [vmem:[%s4222_s3 + $0xa0] sm:$0xff]  ;;  %v680_v29 = vld [vmem:[%s4222_s3 + $0x90] sm:$0xff]  ;;  %v691_v30 = vld [vmem:[%s4222_s3 + $0xe8] sm:$0xff] }
  0x2d   : > { %v686_v27 = vld [vmem:[%s4222_s3 + $0xc0] sm:$0xff] }
  0x2e   : > { %2806 = vmatmul.mubr.msk.bf16.gmra.mrb[12].mxu0 %vm704_vm0, %v2906_v34  ;;  %2842 = vmatmul.mubr.msk.bf16.gmra.mrb[12].mxu1 %vm704_vm0, %v2907_v35  ;;  %v690_v31 = vld [vmem:[%s4222_s3 + $0xe0] sm:$0xff]  ;;  %v689_v34 = vld [vmem:[%s4222_s3 + $0xd8] sm:$0xff]  ;;  %v688_v35 = vld [vmem:[%s4222_s3 + $0xd0] sm:$0xff] }
  0x2f   : > { %2809 = vmatprep.mubr.msk.bf16.mxu0 %vm704_vm0, %v2908_v36  ;;  %2845 = vmatprep.mubr.msk.bf16.mxu1 %vm704_vm0, %v2909_v37  ;;  %v693_v36 = vld [vmem:[%s4222_s3 + $0xf8] sm:$0xff]  ;;  %v692_v37 = vld [vmem:[%s4222_s3 + $0xf0] sm:$0xff] }
  0x30   : > { %1689 = vperm.xlu1 %2890, %v644_v32   ;;  %1684 = vperm.xlu0 %2889, %v643_v33   ;;  %v685_v32 = vld [vmem:[%s4222_s3 + $0xb8] sm:$0xff]  ;;  %v684_v33 = vld [vmem:[%s4222_s3 + $0xb0] sm:$0xff] }
  0x34   : > { %1699 = vperm.xlu1 %2890, %v646_v38   ;;  %1694 = vperm.xlu0 %2889, %v645_v39  }
  0x36   : > { %2810 = vmatmul.mubr.msk.bf16.gmra.mrb[16].mxu0 %vm704_vm0, %v2910_v42  ;;  %2846 = vmatmul.mubr.msk.bf16.gmra.mrb[16].mxu1 %vm704_vm0, %v2911_v43 }
  0x37   : > { %2813 = vmatprep.mubr.msk.bf16.mxu0 %vm704_vm0, %v2912_v44  ;;  %2849 = vmatprep.mubr.msk.bf16.mxu1 %vm704_vm0, %v2913_v45 }
  0x38   : > { %1709 = vperm.xlu1 %2890, %v648_v40   ;;  %1704 = vperm.xlu0 %2889, %v647_v41   ;;  %v695_v40 = vld [vmem:[%s4222_s3 + $0x108] sm:$0xff]  ;;  %v694_v41 = vld [vmem:[%s4222_s3 + $0x100] sm:$0xff] }
  0x3c   : > { %1719 = vperm.xlu1 %2890, %v650_v46   ;;  %1714 = vperm.xlu0 %2889, %v649_v47  }
  0x3e   : > { %2814 = vmatmul.mubr.msk.bf16.gmra.mrb[20].mxu0 %vm704_vm0, %v2914_v50  ;;  %2850 = vmatmul.mubr.msk.bf16.gmra.mrb[20].mxu1 %vm704_vm0, %v2915_v51 }
  0x3f   : > { %2817 = vmatprep.mubr.msk.bf16.mxu0 %vm704_vm0, %v2916_v52  ;;  %2853 = vmatprep.mubr.msk.bf16.mxu1 %vm704_vm0, %v2917_v53 }
  0x40   : > { %1729 = vperm.xlu1 %2890, %v652_v48   ;;  %1724 = vperm.xlu0 %2889, %v651_v49  }
  0x44   : > { %1739 = vperm.xlu1 %2890, %v654_v54   ;;  %1734 = vperm.xlu0 %2889, %v653_v55  }
  0x46   : > { %2818 = vmatmul.mubr.msk.bf16.gmra.mrb[24].mxu0 %vm704_vm0, %v2918_v58  ;;  %2854 = vmatmul.mubr.msk.bf16.gmra.mrb[24].mxu1 %vm704_vm0, %v2919_v59 }
  0x47   : > { %2821 = vmatprep.mubr.msk.bf16.mxu0 %vm704_vm0, %v2920_v60  ;;  %2857 = vmatprep.mubr.msk.bf16.mxu1 %vm704_vm0, %v2921_v61 }
  0x48   : > { %1749 = vperm.xlu1 %2890, %v656_v56   ;;  %1744 = vperm.xlu0 %2889, %v655_v57  }
  0x4c   : > { %1759 = vperm.xlu1 %2890, %v658_v62   ;;  %1754 = vperm.xlu0 %2889, %v657_v63  }
  0x4e   : > { %2822 = vmatmul.mubr.msk.bf16.gmra.mrb[28].mxu0 %vm704_vm0, %v2922_v2  ;;  %2858 = vmatmul.mubr.msk.bf16.gmra.mrb[28].mxu1 %vm704_vm0, %v2923_v3 }
  0x4f   : > { %2825 = vmatprep.mubr.msk.bf16.mxu0 %vm704_vm0, %v2924_v4 }
  0x50   : > { %1769 = vperm.xlu1 %2890, %v660_v0   ;;  %1764 = vperm.xlu0 %2889, %v659_v1  }
  0x54   : > { %1779 = vperm.xlu1 %2890, %v663_v5   ;;  %1774 = vperm.xlu0 %2889, %v662_v6  }
  0x56   : > { %2826 = vmatmul.mubr.msk.bf16.gmra.mrb[32].mxu0 %vm704_vm0, %v2925_v9 }
  0x58   : > { %1789 = vperm.xlu1 %2890, %v665_v7   ;;  %1784 = vperm.xlu0 %2889, %v664_v8  }
  0x5c   : > { %1799 = vperm.xlu1 %2890, %v667_v10   ;;  %1794 = vperm.xlu0 %2889, %v666_v11   ;;  %v3381_v10 = vld [vmem:[%s4224_s5] ss:$0 sm:$0xff] }
  0x60   : > { %1819 = vperm.xlu1 %2890, %v671_v12   ;;  %1814 = vperm.xlu0 %2889, %v670_v13  }
  0x64   : > { %1839 = vperm.xlu1 %2890, %v675_v14   ;;  %1834 = vperm.xlu0 %2889, %v674_v15   ;;  %v3390_v14 = vld [vmem:[%s4225_s6] ss:$0 sm:$0xff] }
  0x68   : > { %1809 = vperm.xlu1 %2890, %v669_v16   ;;  %1804 = vperm.xlu0 %2889, %v668_v17  }
  0x6c   : > { %1859 = vperm.xlu1 %2890, %v679_v18   ;;  %1854 = vperm.xlu0 %2889, %v678_v19  }
  0x70   : > { %1829 = vperm.xlu1 %2890, %v673_v20   ;;  %1824 = vperm.xlu0 %2889, %v672_v21  }
  0x74   : > { %1879 = vperm.xlu1 %2890, %v683_v22   ;;  %1874 = vperm.xlu0 %2889, %v682_v23  }
  0x78   : > { %1849 = vperm.xlu1 %2890, %v677_v24   ;;  %1844 = vperm.xlu0 %2889, %v676_v25  }
  0x7c   : > { %1899 = vperm.xlu1 %2890, %v687_v26   ;;  %1894 = vperm.xlu0 %2889, %v686_v27  }
  0x80   : > { %1869 = vperm.xlu1 %2890, %v681_v28   ;;  %1864 = vperm.xlu0 %2889, %v680_v29  }
  0x84   : > { %1919 = vperm.xlu1 %2890, %v691_v30   ;;  %1914 = vperm.xlu0 %2889, %v690_v31  }
  0x88   : > { %1889 = vperm.xlu1 %2890, %v685_v32   ;;  %1884 = vperm.xlu0 %2889, %v684_v33  }
  0x8c   : > { %1909 = vperm.xlu1 %2890, %v689_v34   ;;  %1904 = vperm.xlu0 %2889, %v688_v35  }
  0x8f   : > { %v3304_v38 = vpop.permute.xlu1 %1614  ;;  %v3306_v39 = vpop.permute.xlu0 %1604 }
  0x90   : > { %1929 = vperm.xlu1 %2890, %v693_v36   ;;  %1924 = vperm.xlu0 %2889, %v692_v37  }
  0x93   : > { %v3314_v42 = vpop.permute.xlu1 %1619  ;;  %v3316_v43 = vpop.permute.xlu0 %1609 }
  0x94   : > { %1939 = vperm.xlu1 %2890, %v695_v40   ;;  %1934 = vperm.xlu0 %2889, %v694_v41  }
  0x97   : > { %v3318_v44 = vpop.permute.xlu1 %1629  ;;  %v3320_v45 = vpop.permute.xlu0 %1624 }
  0x9b   : > { %v3322_v46 = vpop.permute.xlu1 %1639  ;;  %v3324_v47 = vpop.permute.xlu0 %1634 }
  0x9f   : > { %v3326_v48 = vpop.permute.xlu1 %1649  ;;  %v3328_v49 = vpop.permute.xlu0 %1644 }
  0xa3   : > { %v3330_v50 = vpop.permute.xlu1 %1659  ;;  %v3332_v51 = vpop.permute.xlu0 %1654 }
  0xa7   : > { %v3334_v52 = vpop.permute.xlu1 %1669  ;;  %v3336_v53 = vpop.permute.xlu0 %1664 }
  0xa8   : > { %4238 = vst [vmem:[#allocation2_spill] sm:$0xff] %v3334_v52  ;;  %4239 = vst [vmem:[#allocation3_spill] sm:$0xff] %v3336_v53 }
  0xab   : > { %v3338_v54 = vpop.permute.xlu1 %1679  ;;  %v3340_v55 = vpop.permute.xlu0 %1674 }
  0xac   : > { %4240 = vst [vmem:[#allocation4_spill] sm:$0xff] %v3338_v54  ;;  %4241 = vst [vmem:[#allocation5_spill] sm:$0xff] %v3340_v55 }
  0xaf   : > { %v3342_v56 = vpop.permute.xlu1 %1689  ;;  %v3344_v57 = vpop.permute.xlu0 %1684 }
  0xb0   : > { %4242 = vst [vmem:[#allocation6_spill] sm:$0xff] %v3342_v56  ;;  %4243 = vst [vmem:[#allocation7_spill] sm:$0xff] %v3344_v57 }
  0xb3   : > { %v3346_v58 = vpop.permute.xlu1 %1699  ;;  %v3348_v59 = vpop.permute.xlu0 %1694 }
  0xb4   : > { %4244 = vst [vmem:[#allocation8_spill] sm:$0xff] %v3346_v58  ;;  %4245 = vst [vmem:[#allocation9_spill] sm:$0xff] %v3348_v59 }
  0xb7   : > { %v3350_v60 = vpop.permute.xlu1 %1709  ;;  %v3352_v61 = vpop.permute.xlu0 %1704 }
  0xb8   : > { %4246 = vst [vmem:[#allocation10_spill] sm:$0xff] %v3350_v60  ;;  %4247 = vst [vmem:[#allocation11_spill] sm:$0xff] %v3352_v61 }
  0xbb   : > { %v3354_v62 = vpop.permute.xlu1 %1719  ;;  %v3356_v63 = vpop.permute.xlu0 %1714 }
  0xbc   : > { %4248 = vst [vmem:[#allocation12_spill] sm:$0xff] %v3354_v62  ;;  %4249 = vst [vmem:[#allocation13_spill] sm:$0xff] %v3356_v63 }
  0xbf   : > { %v3358_v0 = vpop.permute.xlu1 %1729  ;;  %v3360_v1 = vpop.permute.xlu0 %1724 }
  0xc0   : > { %4250 = vst [vmem:[#allocation14_spill] sm:$0xff] %v3358_v0  ;;  %4251 = vst [vmem:[#allocation15_spill] sm:$0xff] %v3360_v1 }
  0xc3   : > { %v3362_v2 = vpop.permute.xlu1 %1739  ;;  %v3364_v3 = vpop.permute.xlu0 %1734 }
  0xc4   : > { %4252 = vst [vmem:[#allocation16_spill] sm:$0xff] %v3362_v2  ;;  %4253 = vst [vmem:[#allocation17_spill] sm:$0xff] %v3364_v3 }
  0xc7   : > { %v3366_v4 = vpop.permute.xlu1 %1749  ;;  %v3368_v5 = vpop.permute.xlu0 %1744 }
  0xc8   : > { %4254 = vst [vmem:[#allocation18_spill] sm:$0xff] %v3366_v4  ;;  %4255 = vst [vmem:[#allocation19_spill] sm:$0xff] %v3368_v5 }
  0xcb   : > { %v3370_v6 = vpop.permute.xlu1 %1759  ;;  %v3372_v7 = vpop.permute.xlu0 %1754 }
  0xcc   : > { %4256 = vst [vmem:[#allocation20_spill] sm:$0xff] %v3370_v6  ;;  %4257 = vst [vmem:[#allocation21_spill] sm:$0xff] %v3372_v7 }
  0xcf   : > { %v3374_v8 = vpop.permute.xlu1 %1769  ;;  %v3376_v9 = vpop.permute.xlu0 %1764 }
  0xd0   : > { %4258 = vst [vmem:[#allocation22_spill] sm:$0xff] %v3374_v8  ;;  %4259 = vst [vmem:[#allocation23_spill] sm:$0xff] %v3376_v9 }
  0xd3   : > { %v3383_v11 = vpop.permute.xlu1 %1779  ;;  %v3385_v12 = vpop.permute.xlu0 %1774 }
  0xd4   : > { %4260 = vst [vmem:[#allocation24_spill] sm:$0xff] %v3383_v11  ;;  %4261 = vst [vmem:[#allocation25_spill] sm:$0xff] %v3385_v12 }
  0xd7   : > { %v3406_v41 = vpop.permute.xlu1 %1789 }
  0xe9   : > { %v2795_v13 = vpop.f32.mrb[0].mxu0  ;;  %v2831_v16 = vpop.f32.mrb[0].mxu1 }
  0xea   : > { %v1121_v15 = vmul.f32 %v2795_v13, %v3381_v10  ;;  %v841_v17 = vpop.f32.mrb[1].mxu0  ;;  %v1157_v18 = vmul.f32 %v2831_v16, %v3381_v10  ;;  %v985_v20 = vpop.f32.mrb[1].mxu1 }
  0xeb   : > { %v1119_v19 = vmul.f32 %v3381_v10, %v841_v17  ;;  %v2796_v21 = vpop.f32.mrb[2].mxu0  ;;  %v1155_v23 = vmul.f32 %v3381_v10, %v985_v20  ;;  %v2832_v25 = vpop.f32.mrb[2].mxu1 }
  0xec   : > { %v1196_v22 = vadd.f32 %v3390_v14, %v1121_v15  ;;  %v1122_v24 = vmul.f32 %v2796_v21, %v3381_v10  ;;  %v1232_v26 = vadd.f32 %v3390_v14, %v1157_v18  ;;  %v1158_v28 = vmul.f32 %v2832_v25, %v3381_v10  ;;  %v844_v29 = vpop.f32.mrb[3].mxu0  ;;  %v988_v34 = vpop.f32.mrb[3].mxu1 }
  0xed   : > { %v1194_v27 = vadd.f32 %v3390_v14, %v1119_v19  ;;  %v1230_v31 = vadd.f32 %v3390_v14, %v1155_v23  ;;  %v1120_v33 = vmul.f32 %v3381_v10, %v844_v29  ;;  %v1156_v40 = vmul.f32 %v3381_v10, %v988_v34  ;;  %v1785_v18 = vpop.permute.xlu0 %1784 }
  0xee   : > { %v1264_v30 = vadd.f32 3.0, %v1196_v22  ;;  %v1197_v32 = vadd.f32 %v3390_v14, %v1122_v24  ;;  %v1300_v35 = vadd.f32 3.0, %v1232_v26  ;;  %v1233_v37 = vadd.f32 %v3390_v14, %v1158_v28 }
  0xef   : > { %v1262_v36 = vadd.f32 3.0, %v1194_v27  ;;  %v1298_v15 = vadd.f32 3.0, %v1230_v31  ;;  %v1195_v17 = vadd.f32 %v3390_v14, %v1120_v33  ;;  %v1231_v23 = vadd.f32 %v3390_v14, %v1156_v40 }
  0xf0   : > { %v1332_v13 = vmax.f32 %v1264_v30, 0.0  ;;  %v1265_v16 = vadd.f32 3.0, %v1197_v32  ;;  %v1368_v19 = vmax.f32 %v1300_v35, 0.0  ;;  %v1301_v21 = vadd.f32 3.0, %v1233_v37 }
  0xf1   : > { %v1330_v20 = vmax.f32 %v1262_v36, 0.0  ;;  %v2799_v24 = vpop.f32.mrb[4].mxu0  ;;  %v1366_v29 = vmax.f32 %v1298_v15, 0.0  ;;  %v1263_v28 = vadd.f32 3.0, %v1195_v17  ;;  %v2835_v9 = vpop.f32.mrb[4].mxu1  ;;  %v1299_v4 = vadd.f32 3.0, %v1231_v23 }
  0xf2   : > { %v1400_v25 = vmin.f32 %v1332_v13, 6.0  ;;  %v1333_v8 = vmax.f32 %v1265_v16, 0.0  ;;  %v857_v34 = vpop.f32.mrb[5].mxu0  ;;  %v1436_v11 = vmin.f32 %v1368_v19, 6.0  ;;  %v1369_v30 = vmax.f32 %v1301_v21, 0.0  ;;  %v1001_v6 = vpop.f32.mrb[5].mxu1 }
  0xf3   : > { %v1398_v12 = vmin.f32 %v1330_v20, 6.0  ;;  %v3410_v5 = vpop.f32.mrb[6].mxu0  ;;  %v1434_v35 = vmin.f32 %v1366_v29, 6.0  ;;  %v1331_v7 = vmax.f32 %v1263_v28, 0.0  ;;  %v3412_v0 = vpop.f32.mrb[6].mxu1  ;;  %v1367_v16 = vmax.f32 %v1299_v4, 0.0 }
  0xf4   : > { %v1468_v33 = vmul.f32 %v1400_v25, %v1196_v22  ;;  %v1401_v36 = vmin.f32 %v1333_v8, 6.0  ;;  %v1504_v40 = vmul.f32 %v1436_v11, %v1232_v26  ;;  %v1437_v15 = vmin.f32 %v1369_v30, 6.0  ;;  %v3414_v1 = vpop.f32.mrb[7].mxu0  ;;  %v3416_v3 = vpop.f32.mrb[7].mxu1 }
  0xf5   : > { %v1466_v13 = vmul.f32 %v1398_v12, %v1194_v27  ;;  %v1502_v19 = vmul.f32 %v1434_v35, %v1230_v31  ;;  %v1399_v21 = vmin.f32 %v1331_v7, 6.0  ;;  %v1435_v25 = vmin.f32 %v1367_v16, 6.0  ;;  %v1795_v8 = vpop.permute.xlu0 %1794  ;;  %v1800_v11 = vpop.permute.xlu1 %1799 }
  0xf6   : > { %v1536_v2 = vmul.f32 0.16666667, %v1468_v33  ;;  %v1469_v20 = vmul.f32 %v1401_v36, %v1197_v32  ;;  %v1572_v60 = vmul.f32 0.16666667, %v1504_v40  ;;  %v1505_v22 = vmul.f32 %v1437_v15, %v1233_v37 }
  0xf7   : > { %v1534_v61 = vmul.f32 0.16666667, %v1466_v13  ;;  %v1570_v29 = vmul.f32 0.16666667, %v1502_v19  ;;  %v1467_v62 = vmul.f32 %v1399_v21, %v1195_v17  ;;  %v1503_v27 = vmul.f32 %v1435_v25, %v1231_v23 }
  0xf8   : > { %v1537_v28 = vmul.f32 0.16666667, %v1469_v20  ;;  %v1944_v12 = vmul.f32 %v3304_v38, %v1536_v2  ;;  %v3419_v4 = vmul.f32 %v1795_v8, %v1572_v60  ;;  %v1573_v26 = vmul.f32 0.16666667, %v1505_v22 }
  0xf9   : > { %v3421_v31 = vpop.f32.mrb[8].mxu0  ;;  %v1942_v7 = vmul.f32 %v3306_v39, %v1534_v61  ;;  %v1535_v30 = vmul.f32 0.16666667, %v1467_v62  ;;  %v1125_v37 = vmul.f32 %v2799_v24, %v3381_v10  ;;  %v3426_v33 = vpop.f32.mrb[8].mxu1  ;;  %v1571_v38 = vmul.f32 0.16666667, %v1503_v27 }
  0xfa   : > { %v1945_v32 = vmul.f32 %v3314_v42, %v1537_v28  ;;  %v3428_v35 = vpop.f32.mrb[9].mxu0  ;;  %v3430_v17 = vmul.f32 %v1800_v11, %v1573_v26  ;;  %v1161_v60 = vmul.f32 %v2835_v9, %v3381_v10  ;;  %v1123_v2 = vmul.f32 %v3381_v10, %v857_v34  ;;  %v3434_v23 = vpop.f32.mrb[9].mxu1 }
  0xfb   : > { %v3436_v36 = vpop.f32.mrb[10].mxu0  ;;  %v3438_v39 = vmul.f32 %v1785_v18, %v1570_v29  ;;  %v1943_v61 = vmul.f32 %v3316_v43, %v1535_v30  ;;  %v1200_v62 = vadd.f32 %v3390_v14, %v1125_v37  ;;  %v3444_v24 = vpop.f32.mrb[10].mxu1  ;;  %v3449_v9 = vmul.f32 %v3406_v41, %v1571_v38 }
  0xfc   : > { %v3440_v42 = vpack.c.bf16 %v1945_v32, %v1944_v12  ;;  %v1236_v34 = vadd.f32 %v3390_v14, %v1161_v60  ;;  %v1198_v13 = vadd.f32 %v3390_v14, %v1123_v2  ;;  %v3453_v18 = vpop.f32.mrb[11].mxu0  ;;  %v3457_v16 = vpop.f32.mrb[11].mxu1  ;;  %v2047_v43 = vlaneseq }
  0xfd   : > { %4262 = vst [vmem:[#allocation26_spill] sm:$0xff] %v3438_v39  ;;  %4264 = vst [vmem:[#allocation28_spill] sm:$0xff] %v3449_v9  ;;  %v3455_v15 = vpack.c.bf16 %v1943_v61, %v1942_v7  ;;  %v1268_v20 = vadd.f32 3.0, %v1200_v62  ;;  %v1159_v41 = vmul.f32 %v3381_v10, %v1001_v6  ;;  %v3462_v25 = vpop.permute.xlu1 %1819  ;;  %v3476_v32 = vpop.permute.xlu0 %1814  ;;  %v1126_v60 = vmul.f32 %v3410_v5, %v3381_v10 }
  0xfe   : > { %4263 = vst [vmem:[#allocation27_spill] sm:$0xff] %v3440_v42  ;;  %v1304_v21 = vadd.f32 3.0, %v1236_v34  ;;  %v1266_v22 = vadd.f32 3.0, %v1198_v13  ;;  %v3470_v11 = vshrl.u32 %v2047_v43, 7  ;;  %v1160_v5 = vmul.f32 %v3381_v10, %v3416_v3 }
  0xff   : > { %4265 = vst [vmem:[#allocation29_spill] sm:$0xff] %v3455_v15  ;;  %v1336_v12 = vmax.f32 %v1268_v20, 0.0  ;;  %v1234_v6 = vadd.f32 %v3390_v14, %v1159_v41  ;;  %v1162_v20 = vmul.f32 %v3412_v0, %v3381_v10 }
 0x100   : > { %v1372_v26 = vmax.f32 %v1304_v21, 0.0  ;;  %v1334_v30 = vmax.f32 %v1266_v22, 0.0  ;;  %v1124_v21 = vmul.f32 %v3381_v10, %v3414_v1  ;;  %v2092_v22 = vsub.s32 5, %v3470_v11 }
 0x101   : > { %v3464_v8 = vpop.f32.mrb[12].mxu0  ;;  %v3466_v29 = vpop.f32.mrb[12].mxu1  ;;  %v1404_v38 = vmin.f32 %v1336_v12, 6.0  ;;  %v1302_v43 = vadd.f32 3.0, %v1234_v6  ;;  %v1201_v12 = vadd.f32 %v3390_v14, %v1126_v60  ;;  %v1237_v39 = vadd.f32 %v3390_v14, %v1162_v20 }
 0x102   : > { %v3468_v28 = vpop.f32.mrb[13].mxu0  ;;  %v3472_v27 = vpop.f32.mrb[13].mxu1  ;;  %v1440_v61 = vmin.f32 %v1372_v26, 6.0  ;;  %v1402_v41 = vmin.f32 %v1334_v30, 6.0  ;;  %v3498_v26 = vld [vmem:[%s4226_s7] sm:$0xff]  ;;  %v1199_v1 = vadd.f32 %v3390_v14, %v1124_v21  ;;  %v2056_v30 = vsub.s32 1, %v3470_v11 }
 0x103   : > { %v3474_v7 = vpop.f32.mrb[14].mxu0  ;;  %v3479_v37 = vpop.f32.mrb[14].mxu1  ;;  %v1472_v40 = vmul.f32 %v1404_v38, %v1200_v62  ;;  %v1370_v0 = vmax.f32 %v1302_v43, 0.0  ;;  %v1269_v42 = vadd.f32 3.0, %v1201_v12  ;;  %v1235_v3 = vadd.f32 %v3390_v14, %v1160_v5 }
 0x104   : > { %v3483_v2 = vpop.f32.mrb[15].mxu0  ;;  %v3489_v19 = vpop.f32.mrb[15].mxu1  ;;  %v1508_v56 = vmul.f32 %v1440_v61, %v1236_v34  ;;  %v1305_v38 = vadd.f32 3.0, %v1237_v39  ;;  %v1267_v43 = vadd.f32 3.0, %v1199_v1  ;;  %v3514_v21 = vrot.slane %v3498_v26, %v2092_v22 }
 0x105   : > { %v3502_v9 = vpop.permute.xlu1 %1839  ;;  %v3509_v63 = vpop.permute.xlu0 %1834  ;;  %v1438_v62 = vmin.f32 %v1370_v0, 6.0  ;;  %v1470_v57 = vmul.f32 %v1402_v41, %v1198_v13  ;;  %v1337_v58 = vmax.f32 %v1269_v42, 0.0  ;;  %v1303_v59 = vadd.f32 3.0, %v1235_v3 }
 0x106   : > { %v1540_v5 = vmul.f32 0.16666667, %v1472_v40  ;;  %v1373_v53 = vmax.f32 %v1305_v38, 0.0  ;;  %v1335_v55 = vmax.f32 %v1267_v43, 0.0  ;;  %v1129_v22 = vmul.f32 %v3421_v31, %v3381_v10 }
 0x107   : > { %v1506_v54 = vmul.f32 %v1438_v62, %v1234_v6  ;;  %v1405_v0 = vmin.f32 %v1337_v58, 6.0  ;;  %v1165_v42 = vmul.f32 %v3426_v33, %v3381_v10  ;;  %v1576_v13 = vmul.f32 0.16666667, %v1508_v56 }
 0x108   : > { %v1441_v41 = vmin.f32 %v1373_v53, 6.0  ;;  %v1127_v40 = vmul.f32 %v3381_v10, %v3428_v35  ;;  %v3535_v38 = vrot.slane %v3498_v26, %v2056_v30  ;;  %v1538_v58 = vmul.f32 0.16666667, %v1470_v57 }
 0x109   : > { %v3507_v15 = vpop.f32.mrb[16].mxu0  ;;  %v3511_v20 = vpop.f32.mrb[16].mxu1  ;;  %v3538_v33 = vadd.f32 %v3390_v14, %v1129_v22  ;;  %v3541_v53 = vadd.f32 %v3390_v14, %v1165_v42  ;;  %v1948_v56 = vmul.f32 %v3324_v47, %v1540_v5  ;;  %v1574_v35 = vmul.f32 0.16666667, %v1506_v54 }
 0x10a   : > { %4266 = vst [vmem:[#allocation30_spill] sm:$0xff] %v3511_v20  ;;  %v3516_v60 = vpop.f32.mrb[17].mxu0  ;;  %v3518_v52 = vpop.f32.mrb[17].mxu1  ;;  %v1371_v20 = vmax.f32 %v1303_v59, 0.0  ;;  %v1473_v59 = vmul.f32 %v1405_v0, %v1201_v12  ;;  %v1509_v31 = vmul.f32 %v1441_v41, %v1237_v39  ;;  %v3545_v30 = vmul.f32 %v3476_v32, %v1576_v13 }
 0x10b   : > { %4267 = vst [vmem:[#allocation31_spill] sm:$0xff] %v3516_v60  ;;  %v3520_v34 = vpop.f32.mrb[18].mxu0  ;;  %v3522_v61 = vpop.f32.mrb[18].mxu1  ;;  %v1403_v60 = vmin.f32 %v1335_v55, 6.0  ;;  %v3548_v39 = vadd.f32 %v3390_v14, %v1127_v40  ;;  %v1163_v47 = vmul.f32 %v3381_v10, %v3434_v23  ;;  %v1308_v22 = vadd.f32 3.0, %v3541_v53 }
 0x10c   : > { %4268 = vst [vmem:[#allocation32_spill] sm:$0xff] %v3520_v34  ;;  %4269 = vst [vmem:[#allocation33_spill] sm:$0xff] %v3522_v61  ;;  %v3530_v6 = vpop.f32.mrb[19].mxu0  ;;  %v3532_v62 = vpop.f32.mrb[19].mxu1  ;;  %v1439_v43 = vmin.f32 %v1371_v20, 6.0  ;;  %v2063_v42 = vsub.s32 2, %v3470_v11 }
 0x10d   : > { %4270 = vst [vmem:[#allocation34_spill] sm:$0xff] %v3530_v6  ;;  %4271 = vst [vmem:[#allocation35_spill] sm:$0xff] %v3532_v62  ;;  %v1471_v61 = vmul.f32 %v1403_v60, %v1199_v1  ;;  %v1810_v55 = vpop.permute.xlu1 %1809  ;;  %v1541_v6 = vmul.f32 0.16666667, %v1473_v59  ;;  %v1805_v34 = vpop.permute.xlu0 %1804  ;;  %v1577_v57 = vmul.f32 0.16666667, %v1509_v31  ;;  %v1946_v60 = vmul.f32 %v3320_v45, %v1538_v58 }
 0x10e   : > { %v1507_v62 = vmul.f32 %v1439_v43, %v1235_v3  ;;  %v1982_v23 = vmul.f32 %v1805_v34, %v1574_v35  ;;  %v1270_v59 = vadd.f32 3.0, %v3548_v39 }
 0x10f   : > { %v1539_v12 = vmul.f32 0.16666667, %v1471_v61  ;;  %v1949_v20 = vmul.f32 %v3322_v46, %v1541_v6  ;;  %v3561_v32 = vmul.f32 %v3462_v25, %v1577_v57  ;;  %v1272_v61 = vadd.f32 3.0, %v3538_v33 }
 0x110   : > { %v1575_v0 = vmul.f32 0.16666667, %v1507_v62  ;;  %v1376_v57 = vmax.f32 %v1308_v22, 0.0  ;;  %v1338_v62 = vmax.f32 %v1270_v59, 0.0 }
 0x111   : > { %v3550_v1 = vpop.f32.mrb[20].mxu0  ;;  %v3556_v54 = vpop.f32.mrb[20].mxu1  ;;  %v1947_v5 = vmul.f32 %v3318_v44, %v1539_v12  ;;  %v2013_v13 = vpack.c.bf16 %v1949_v20, %v1948_v56  ;;  %v4276_v44 = vpack.c.bf16 %v3430_v17, %v3419_v4  ;;  %v3588_v56 = vadd.f32 %v3390_v14, %v1163_v47 }
 0x112   : > { %v3558_v3 = vpop.f32.mrb[21].mxu0  ;;  %v3566_v45 = vpop.f32.mrb[21].mxu1  ;;  %v1983_v41 = vmul.f32 %v1810_v55, %v1575_v0  ;;  %v1340_v17 = vmax.f32 %v1272_v61, 0.0  ;;  %v2078_v12 = vsub.s32 3, %v3470_v11  ;;  %v2085_v0 = vsub.s32 4, %v3470_v11 }
 0x113   : > { %4272 = vst [vmem:[#allocation36_spill] sm:$0xff] %v3566_v45  ;;  %v3568_v46 = vpop.f32.mrb[22].mxu0  ;;  %v3571_v40 = vpop.f32.mrb[22].mxu1  ;;  %v3578_v25 = vunpack.c.l.bf16 %v4276_v44  ;;  %v3582_v58 = vpack.c.bf16 %v1947_v5, %v1946_v60  ;;  %v2144_v34 = vunpack.c.l.bf16 %v2013_v13  ;;  %v2150_v31 = vunpack.c.h.bf16 %v2013_v13 }
 0x114   : > { %4273 = vst [vmem:[#allocation37_spill] sm:$0xff] %v3568_v46  ;;  %4274 = vst [vmem:[#allocation38_spill] sm:$0xff] %v3571_v40  ;;  %v3573_v6 = vpop.f32.mrb[23].mxu0  ;;  %v3585_v43 = vpop.f32.mrb[23].mxu1  ;;  %v2030_v55 = vpack.c.bf16 %v1983_v41, %v1982_v23  ;;  %v4281_v60 = vsub.s32 0, %v3470_v11  ;;  %v3605_v23 = vrot.slane %v3498_v26, %v2063_v42  ;;  %v1306_v47 = vadd.f32 3.0, %v3588_v56 }
 0x115   : > { %4275 = vst [vmem:[#allocation39_spill] sm:$0xff] %v3573_v6  ;;  %4277 = vst [vmem:[#allocation40_spill] sm:$0xff] %v3578_v25  ;;  %v3591_v35 = vunpack.c.l.bf16 %v3582_v58  ;;  %v2151_v61 = vmul.f32 %v2144_v34, %v3514_v21  ;;  %v2152_v22 = vmul.f32 %v2150_v31, %v3514_v21  ;;  %v2133_v44 = vmul.f32 %v3578_v25, %v3535_v38 }
 0x116   : > { %4278 = vst [vmem:[#allocation41_spill] sm:$0xff] %v3582_v58  ;;  %4279 = vst [vmem:[#allocation42_spill] sm:$0xff] %v3585_v43  ;;  %v3598_v20 = vrot.slane %v3498_v26, %v4281_v60  ;;  %v1444_v43 = vmin.f32 %v1376_v57, 6.0  ;;  %v3632_v59 = vrot.slane %v3498_v26, %v2078_v12  ;;  %v2147_v40 = vunpack.c.l.bf16 %v2030_v55 }
 0x117   : > { %4280 = vst [vmem:[#allocation43_spill] sm:$0xff] %v3591_v35  ;;  %v2135_v31 = vmul.f32 %v3591_v35, %v3605_v23  ;;  %v2156_v45 = vrot.slane %v2152_v22, 1  ;;  %v1406_v57 = vmin.f32 %v1338_v62, 6.0  ;;  %v1166_v55 = vmul.f32 %v3444_v24, %v3381_v10 }
 0x118   : > { %v2131_v60 = vmul.f32 %v3591_v35, %v3598_v20  ;;  %v2155_v35 = vrot.slane %v2151_v61, 1  ;;  %v2145_v61 = vmul.f32 %v2144_v34, %v3632_v59  ;;  %v1128_v62 = vmul.f32 %v3381_v10, %v3453_v18 }
 0x119   : > { %v3601_v5 = vpop.f32.mrb[24].mxu0  ;;  %v3609_v13 = vpop.f32.mrb[24].mxu1 }
 0x11a   : > { %4282 = vst [vmem:[#allocation44_spill] sm:$0xff] %v3601_v5  ;;  %4283 = vst [vmem:[#allocation45_spill] sm:$0xff] %v3609_v13  ;;  %v3611_v41 = vpop.f32.mrb[25].mxu0  ;;  %v3618_v4 = vpop.f32.mrb[25].mxu1  ;;  %v4287_v13 = vunpack.c.h.bf16 %v3582_v58  ;;  %v1408_v5 = vmin.f32 %v1340_v17, 6.0  ;;  %v2139_v58 = vrot.slane %v2135_v31, 1  ;;  %v1203_v18 = vadd.f32 %v3390_v14, %v1128_v62 }
 0x11b   : > { %4284 = vst [vmem:[#allocation46_spill] sm:$0xff] %v3611_v41  ;;  %4285 = vst [vmem:[#allocation47_spill] sm:$0xff] %v3618_v4  ;;  %v3620_v42 = vpop.f32.mrb[26].mxu0  ;;  %v3627_v25 = vpop.f32.mrb[26].mxu1  ;;  %v3635_v4 = vrot.slane %v3498_v26, %v2085_v0 }
 0x11c   : > { %4286 = vst [vmem:[#allocation48_spill] sm:$0xff] %v3620_v42  ;;  %v2136_v41 = vmul.f32 %v4287_v13, %v3605_v23  ;;  %4288 = vst [vmem:[#allocation49_spill] sm:$0xff] %v3627_v25  ;;  %v3629_v6 = vpop.f32.mrb[27].mxu0  ;;  %v2134_v42 = vadd.f32 %v2133_v44, %v2131_v60  ;;  %v3637_v46 = vpop.f32.mrb[27].mxu1  ;;  %v1374_v25 = vmax.f32 %v1306_v47, 0.0  ;;  %v1476_v0 = vmul.f32 %v1408_v5, %v3538_v33 }
 0x11d   : > { %4289 = vst [vmem:[#allocation50_spill] sm:$0xff] %v3629_v6  ;;  %v1130_v6 = vmul.f32 %v3436_v36, %v3381_v10  ;;  %v1512_v44 = vmul.f32 %v1444_v43, %v3541_v53  ;;  %v2148_v36 = vmul.f32 %v2147_v40, %v3635_v4  ;;  %v1241_v33 = vadd.f32 %v3390_v14, %v1166_v55 }
 0x11e   : > { %v2140_v13 = vrot.slane %v2136_v41, 1  ;;  %v1164_v53 = vmul.f32 %v3381_v10, %v3457_v16  ;;  %v1169_v40 = vmul.f32 %v3466_v29, %v3381_v10  ;;  %v1544_v31 = vmul.f32 0.16666667, %v1476_v0 }
 0x11f   : > { %v1205_v41 = vadd.f32 %v3390_v14, %v1130_v6  ;;  %v1442_v6 = vmin.f32 %v1374_v25, 6.0  ;;  %v1309_v60 = vadd.f32 3.0, %v1241_v33  ;;  %v1580_v55 = vmul.f32 0.16666667, %v1512_v44  ;;  %v3682_v44 = vpop.permute.xlu1 %1859 }
 0x120   : > { %v2141_v12 = vsel %vm2069_vm1, %v2139_v58, %v2140_v13  ;;  %v2157_v58 = vsel %vm2069_vm1, %v2155_v35, %v2156_v45  ;;  %v1133_v45 = vmul.f32 %v3464_v8, %v3381_v10  ;;  %v1474_v25 = vmul.f32 %v1406_v57, %v3548_v39 }
 0x121   : > { %v2143_v22 = vadd.f32 %v2141_v12, %v2134_v42  ;;  %v3651_v47 = vpop.f32.mrb[28].mxu0  ;;  %v3658_v24 = vpop.f32.mrb[28].mxu1  ;;  %v1273_v5 = vadd.f32 3.0, %v1205_v41  ;;  %v1239_v42 = vadd.f32 %v3390_v14, %v1164_v53  ;;  %v1271_v12 = vadd.f32 3.0, %v1203_v18 }
 0x122   : > { %4290 = vst [vmem:[#allocation51_spill] sm:$0xff] %v3658_v24  ;;  %v3660_v43 = vpop.f32.mrb[29].mxu0  ;;  %v3668_v35 = vpop.f32.mrb[29].mxu1  ;;  %v1510_v53 = vmul.f32 %v1442_v6, %v3588_v56  ;;  %v3680_v0 = vadd.f32 %v3390_v14, %v1169_v40  ;;  %v1167_v56 = vmul.f32 %v3381_v10, %v3472_v27  ;;  %v1952_v6 = vmul.f32 %v3332_v51, %v1544_v31 }
 0x123   : > { %4291 = vst [vmem:[#allocation52_spill] sm:$0xff] %v3660_v43  ;;  %v2146_v34 = vadd.f32 %v2145_v61, %v2143_v22  ;;  %v1341_v13 = vmax.f32 %v1273_v5, 0.0  ;;  %v1377_v61 = vmax.f32 %v1309_v60, 0.0  ;;  %v1307_v22 = vadd.f32 3.0, %v1239_v42  ;;  %v3674_v43 = vpop.permute.xlu0 %1854 }
 0x124   : > { %v1339_v8 = vmax.f32 %v1271_v12, 0.0  ;;  %v1542_v5 = vmul.f32 0.16666667, %v1474_v25  ;;  %v1578_v40 = vmul.f32 0.16666667, %v1510_v53  ;;  %v1312_v27 = vadd.f32 3.0, %v3680_v0 }
 0x125   : > { %v2149_v16 = vadd.f32 %v2148_v36, %v2146_v34  ;;  %v1409_v17 = vmin.f32 %v1341_v13, 6.0  ;;  %v1445_v29 = vmin.f32 %v1377_v61, 6.0  ;;  %v1375_v24 = vmax.f32 %v1307_v22, 0.0  ;;  %v3688_v34 = vpop.f32.mrb[30].mxu0 }
 0x126   : > { %v3677_v36 = vadd.f32 %v3390_v14, %v1133_v45  ;;  %v1407_v57 = vmin.f32 %v1339_v8, 6.0  ;;  %v3703_v31 = vpop.f32.mrb[31].mxu0  ;;  %v4292_v25 = vpack.c.bf16 %v3561_v32, %v3545_v30  ;;  %v1380_v32 = vmax.f32 %v1312_v27, 0.0 }
 0x127   : > { %v3671_v62 = vadd.f32 %v2157_v58, %v2149_v16  ;;  %v1477_v39 = vmul.f32 %v1409_v17, %v1205_v41  ;;  %v1131_v58 = vmul.f32 %v3381_v10, %v3468_v28  ;;  %v1513_v60 = vmul.f32 %v1445_v29, %v1241_v33  ;;  %v3691_v16 = vpop.f32.mrb[30].mxu1  ;;  %v1830_v29 = vpop.permute.xlu1 %1829 }
 0x128   : > { %v1443_v45 = vmin.f32 %v1375_v24, 6.0  ;;  %v1475_v12 = vmul.f32 %v1407_v57, %v1203_v18  ;;  %v1276_v61 = vadd.f32 3.0, %v3677_v36  ;;  %v3701_v24 = vadd.f32 %v3390_v14, %v1167_v56  ;;  %v1825_v18 = vpop.permute.xlu0 %1824 }
 0x129   : > { %v1545_v13 = vmul.f32 0.16666667, %v1477_v39  ;;  %v3694_v17 = vadd.f32 %v3390_v14, %v1131_v58  ;;  %v1581_v41 = vmul.f32 0.16666667, %v1513_v60  ;;  %v2163_v53 = vunpack.c.l.bf16 %v4292_v25 }
 0x12a   : > { %v1511_v28 = vmul.f32 %v1443_v45, %v1239_v42  ;;  %v1543_v51 = vmul.f32 0.16666667, %v1475_v12  ;;  %v3709_v42 = vmul.f32 %v3509_v63, %v1580_v55  ;;  %v1950_v39 = vmul.f32 %v3328_v49, %v1542_v5  ;;  %v3729_v5 = vpop.f32.mrb[31].mxu1 }
 0x12b   : > { %v1953_v22 = vmul.f32 %v3330_v50, %v1545_v13  ;;  %v1274_v33 = vadd.f32 3.0, %v3694_v17  ;;  %v3712_v8 = vmul.f32 %v3502_v9, %v1581_v41  ;;  %v1986_v57 = vmul.f32 %v1825_v18, %v1578_v40  ;;  %4295 = vst [vmem:[#allocation53_spill] sm:$0xff] %v3729_v5  ;;  %v3750_v5 = vpop.f32.mrb[32].mxu0 }
 0x12c   : > { %v1579_v50 = vmul.f32 0.16666667, %v1511_v28  ;;  %v1951_v56 = vmul.f32 %v3326_v48, %v1543_v51  ;;  %v1344_v30 = vmax.f32 %v1276_v61, 0.0  ;;  %v4293_v63 = vsub.s32 7, %v3470_v11 }
 0x12d   : > { %v2015_v58 = vpack.c.bf16 %v1953_v22, %v1952_v6  ;;  %v1342_v13 = vmax.f32 %v1274_v33, 0.0  ;;  %v1310_v12 = vadd.f32 3.0, %v3701_v24  ;;  %v4294_v49 = vsub.s32 6, %v3470_v11  ;;  %v3736_v22 = vld [vmem:[%s4226_s7 + $0x8] ss:$0 sm:$0xff] }
 0x12e   : > { %v1987_v45 = vmul.f32 %v1830_v29, %v1579_v50  ;;  %v3721_v55 = vrot.slane %v3498_v26, %v4293_v63  ;;  %v2014_v9 = vpack.c.bf16 %v1951_v56, %v1950_v39  ;;  %v2178_v27 = vmul.f32 %v2163_v53, %v3535_v38 }
 0x12f   : > { %v3727_v6 = vrot.slane %v3498_v26, %v4294_v49  ;;  %v2189_v41 = vunpack.c.l.bf16 %v2015_v58  ;;  %v2195_v28 = vunpack.c.h.bf16 %v2015_v58  ;;  %v1412_v11 = vmin.f32 %v1344_v30, 6.0 }
 0x130   : > { %v2032_v48 = vpack.c.bf16 %v1987_v45, %v1986_v57  ;;  %v2164_v40 = vmul.f32 %v2163_v53, %v3721_v55  ;;  %v2160_v61 = vunpack.c.l.bf16 %v2014_v9  ;;  %v2166_v51 = vunpack.c.h.bf16 %v2014_v9 }
 0x131   : > { %v1448_v33 = vmin.f32 %v1380_v32, 6.0  ;;  %v1410_v25 = vmin.f32 %v1342_v13, 6.0  ;;  %v1378_v50 = vmax.f32 %v1310_v12, 0.0  ;;  %v2196_v58 = vmul.f32 %v2189_v41, %v3514_v21 }
 0x132   : > { %v2161_v26 = vmul.f32 %v2160_v61, %v3727_v6  ;;  %v2167_v18 = vmul.f32 %v3736_v22, %v2160_v61  ;;  %v2168_v29 = vmul.f32 %v3736_v22, %v2166_v51  ;;  %v2176_v39 = vmul.f32 %v2160_v61, %v3598_v20 }
 0x133   : > { %v2180_v53 = vmul.f32 %v2160_v61, %v3605_v23  ;;  %v2181_v57 = vmul.f32 %v2166_v51, %v3605_v23  ;;  %v2197_v56 = vmul.f32 %v2195_v28, %v3514_v21  ;;  %v2190_v12 = vmul.f32 %v2189_v41, %v3632_v59 }
 0x134   : > { %v2162_v45 = vadd.f32 %v2161_v26, %v3671_v62  ;;  %v2171_v30 = vrot.slane %v2167_v18, 1  ;;  %v2172_v32 = vrot.slane %v2168_v29, 1  ;;  %v2179_v13 = vadd.f32 %v2178_v27, %v2176_v39  ;;  %v3758_v27 = vpop.f32.mrb[33].mxu0 }
 0x135   : > { %v2184_v63 = vrot.slane %v2180_v53, 1  ;;  %v2185_v9 = vrot.slane %v2181_v57, 1  ;;  %v2192_v60 = vunpack.c.l.bf16 %v2032_v48  ;;  %v1134_v61 = vmul.f32 %v3474_v7, %v3381_v10  ;;  %v3762_v7 = vpop.f32.mrb[34].mxu0 }
 0x136   : > { %v2165_v49 = vadd.f32 %v2164_v40, %v2162_v45  ;;  %v2173_v51 = vsel %vm2069_vm1, %v2171_v30, %v2172_v32  ;;  %v1170_v62 = vmul.f32 %v3479_v37, %v3381_v10  ;;  %v1132_v26 = vmul.f32 %v3381_v10, %v3483_v2 }
 0x137   : > { %v2186_v28 = vsel %vm2069_vm1, %v2184_v63, %v2185_v9  ;;  %v2200_v41 = vrot.slane %v2196_v58, 1  ;;  %v2201_v40 = vrot.slane %v2197_v56, 1  ;;  %v1209_v29 = vadd.f32 %v3390_v14, %v1134_v61 }
 0x138   : > { %v3760_v48 = vadd.f32 %v2173_v51, %v2165_v49  ;;  %v2188_v18 = vadd.f32 %v2186_v28, %v2179_v13  ;;  %v1245_v39 = vadd.f32 %v3390_v14, %v1170_v62  ;;  %v1207_v53 = vadd.f32 %v3390_v14, %v1132_v26 }
 0x139   : > { %v1168_v37 = vmul.f32 %v3381_v10, %v3489_v19  ;;  %v2193_v2 = vmul.f32 %v2192_v60, %v3635_v4  ;;  %v1480_v58 = vmul.f32 %v1412_v11, %v3677_v36  ;;  %v1516_v56 = vmul.f32 %v1448_v33, %v3680_v0 }
 0x13a   : > { %v2191_v57 = vadd.f32 %v2190_v12, %v2188_v18  ;;  %v1277_v45 = vadd.f32 3.0, %v1209_v29  ;;  %v1313_v30 = vadd.f32 3.0, %v1245_v39  ;;  %v1275_v32 = vadd.f32 3.0, %v1207_v53  ;;  %v3780_v18 = vpop.permute.xlu0 %1874 }
 0x13b   : > { %v2202_v9 = vsel %vm2069_vm1, %v2200_v41, %v2201_v40  ;;  %v1446_v13 = vmin.f32 %v1378_v50, 6.0  ;;  %v1243_v49 = vadd.f32 %v3390_v14, %v1168_v37  ;;  %v1478_v61 = vmul.f32 %v1410_v25, %v3694_v17  ;;  %v3778_v40 = vpop.permute.xlu1 %1879 }
 0x13c   : > { %v2194_v63 = vadd.f32 %v2193_v2, %v2191_v57  ;;  %v1345_v51 = vmax.f32 %v1277_v45, 0.0  ;;  %v1381_v19 = vmax.f32 %v1313_v30, 0.0  ;;  %v1343_v12 = vmax.f32 %v1275_v32, 0.0 }
 0x13d   : > { %v1311_v60 = vadd.f32 3.0, %v1243_v49  ;;  %v1137_v36 = vmul.f32 %v3507_v15, %v3381_v10  ;;  %v1548_v62 = vmul.f32 0.16666667, %v1480_v58  ;;  %v1584_v26 = vmul.f32 0.16666667, %v1516_v56  ;;  %v4296_v58 = vld [vmem:[#allocation30_spill] sm:$0xff] }
 0x13e   : > { %v2204_v28 = vadd.f32 %v2202_v9, %v2194_v63  ;;  %v1413_v0 = vmin.f32 %v1345_v51, 6.0  ;;  %v1449_v11 = vmin.f32 %v1381_v19, 6.0  ;;  %v1411_v33 = vmin.f32 %v1343_v12, 6.0  ;;  %v4300_v12 = vld [vmem:[#allocation2_spill] sm:$0xff] }
 0x13f   : > { %v1514_v41 = vmul.f32 %v1446_v13, %v3701_v24  ;;  %v1379_v50 = vmax.f32 %v1311_v60, 0.0  ;;  %v1546_v17 = vmul.f32 0.16666667, %v1478_v61  ;;  %v3783_v45 = vadd.f32 %v3390_v14, %v1137_v36  ;;  %v4297_v24 = vld [vmem:[#allocation5_spill] sm:$0xff] }
 0x140   : > { %v1481_v25 = vmul.f32 %v1413_v0, %v1209_v29  ;;  %v1517_v37 = vmul.f32 %v1449_v11, %v1245_v39  ;;  %v1479_v57 = vmul.f32 %v1411_v33, %v1207_v53  ;;  %v1173_v56 = vmul.f32 %v4296_v58, %v3381_v10  ;;  %v4298_v29 = vld [vmem:[#allocation3_spill] sm:$0xff]  ;;  %v4299_v53 = vld [vmem:[#allocation4_spill] sm:$0xff] }
 0x141   : > { %v1447_v2 = vmin.f32 %v1379_v50, 6.0  ;;  %v1956_v63 = vmul.f32 %v4297_v24, %v1548_v62  ;;  %v3789_v9 = vmul.f32 %v3674_v43, %v1584_v26  ;;  %v1582_v13 = vmul.f32 0.16666667, %v1514_v41  ;;  %v1850_v43 = vpop.permute.xlu1 %1849  ;;  %v1845_v62 = vpop.permute.xlu0 %1844 }
 0x142   : > { %v1549_v15 = vmul.f32 0.16666667, %v1481_v25  ;;  %v1585_v30 = vmul.f32 0.16666667, %v1517_v37  ;;  %v1547_v32 = vmul.f32 0.16666667, %v1479_v57  ;;  %v1954_v39 = vmul.f32 %v4298_v29, %v1546_v17 }
 0x143   : > { %v1515_v61 = vmul.f32 %v1447_v2, %v1243_v49  ;;  %v4301_v36 = vpack.c.bf16 %v3712_v8, %v3709_v42  ;;  %v1280_v33 = vadd.f32 3.0, %v3783_v45  ;;  %v1248_v50 = vadd.f32 %v3390_v14, %v1173_v56  ;;  %v4302_v37 = vld [vmem:[#allocation31_spill] sm:$0xff] }
 0x144   : > { %v1957_v51 = vmul.f32 %v4299_v53, %v1549_v15  ;;  %v3794_v19 = vmul.f32 %v3682_v44, %v1585_v30  ;;  %v1955_v60 = vmul.f32 %v4300_v12, %v1547_v32  ;;  %v1990_v44 = vmul.f32 %v1845_v62, %v1582_v13 }
 0x145   : > { %v2208_v0 = vunpack.c.l.bf16 %v4301_v36  ;;  %v1583_v11 = vmul.f32 0.16666667, %v1515_v61  ;;  %v1135_v57 = vmul.f32 %v3381_v10, %v4302_v37  ;;  %v1348_v32 = vmax.f32 %v1280_v33, 0.0 }
 0x146   : > { %v2017_v26 = vpack.c.bf16 %v1957_v51, %v1956_v63  ;;  %v2035_v49 = vpack.c.bf16 %v3794_v19, %v3789_v9  ;;  %v2016_v41 = vpack.c.bf16 %v1955_v60, %v1954_v39  ;;  %v1316_v58 = vadd.f32 3.0, %v1248_v50 }
 0x147   : > { %v1991_v17 = vmul.f32 %v1850_v43, %v1583_v11  ;;  %v2209_v42 = vmul.f32 %v2208_v0, %v3721_v55  ;;  %v2223_v15 = vmul.f32 %v2208_v0, %v3535_v38  ;;  %v1210_v39 = vadd.f32 %v3390_v14, %v1135_v57 }
 0x148   : > { %v2205_v25 = vunpack.c.l.bf16 %v2016_v41  ;;  %v2211_v8 = vunpack.c.h.bf16 %v2016_v41  ;;  %v2234_v30 = vunpack.c.l.bf16 %v2017_v26  ;;  %v2240_v24 = vunpack.c.h.bf16 %v2017_v26 }
 0x149   : > { %v2034_v2 = vpack.c.bf16 %v1991_v17, %v1990_v44  ;;  %v1171_v53 = vmul.f32 %v3381_v10, %v3518_v52  ;;  %v1384_v43 = vmax.f32 %v1316_v58, 0.0  ;;  %v1416_v44 = vmin.f32 %v1348_v32, 6.0 }
 0x14a   : > { %v2206_v63 = vmul.f32 %v2205_v25, %v3727_v6  ;;  %v2212_v56 = vmul.f32 %v3736_v22, %v2205_v25  ;;  %v2213_v13 = vmul.f32 %v3736_v22, %v2211_v8  ;;  %v2221_v61 = vmul.f32 %v2205_v25, %v3598_v20 }
 0x14b   : > { %v2225_v29 = vmul.f32 %v2205_v25, %v3605_v23  ;;  %v2226_v36 = vmul.f32 %v2211_v8, %v3605_v23  ;;  %v2241_v0 = vmul.f32 %v2234_v30, %v3514_v21  ;;  %v2242_v62 = vmul.f32 %v2240_v24, %v3514_v21  ;;  %v4304_v8 = vld [vmem:[#allocation32_spill] sm:$0xff] }
 0x14c   : > { %v2207_v51 = vadd.f32 %v2206_v63, %v2204_v28  ;;  %v2216_v12 = vrot.slane %v2212_v56, 1  ;;  %v2217_v60 = vrot.slane %v2213_v13, 1  ;;  %v2224_v33 = vadd.f32 %v2223_v15, %v2221_v61  ;;  %v4305_v15 = vld [vmem:[#allocation33_spill] sm:$0xff] }
 0x14d   : > { %v2229_v11 = vrot.slane %v2225_v29, 1  ;;  %v2230_v41 = vrot.slane %v2226_v36, 1  ;;  %v2237_v25 = vunpack.c.l.bf16 %v2034_v2  ;;  %v1278_v37 = vadd.f32 3.0, %v1210_v39 }
 0x14e   : > { %v2210_v26 = vadd.f32 %v2209_v42, %v2207_v51  ;;  %v2218_v17 = vsel %vm2069_vm1, %v2216_v12, %v2217_v60  ;;  %v1246_v52 = vadd.f32 %v3390_v14, %v1171_v53  ;;  %v1138_v63 = vmul.f32 %v4304_v8, %v3381_v10 }
 0x14f   : > { %v2231_v57 = vsel %vm2069_vm1, %v2229_v11, %v2230_v41  ;;  %v1174_v58 = vmul.f32 %v4305_v15, %v3381_v10  ;;  %v2235_v42 = vmul.f32 %v2234_v30, %v3632_v59  ;;  %v2245_v24 = vrot.slane %v2241_v0, 1  ;;  %v4306_v30 = vld [vmem:[#allocation34_spill] sm:$0xff] }
 0x150   : > { %v3821_v28 = vadd.f32 %v2218_v17, %v2210_v26  ;;  %v2233_v32 = vadd.f32 %v2231_v57, %v2224_v33  ;;  %v1452_v56 = vmin.f32 %v1384_v43, 6.0  ;;  %v2246_v13 = vrot.slane %v2242_v62, 1 }
 0x151   : > { %v1314_v2 = vadd.f32 3.0, %v1246_v52  ;;  %v1213_v61 = vadd.f32 %v3390_v14, %v1138_v63  ;;  %v1249_v29 = vadd.f32 %v3390_v14, %v1174_v58  ;;  %v2238_v51 = vmul.f32 %v2237_v25, %v3635_v4 }
 0x152   : > { %4303 = vst [vmem:[#allocation30_spill] sm:$0xff] %v3821_v28  ;;  %v2236_v53 = vadd.f32 %v2235_v42, %v2233_v32  ;;  %v1346_v12 = vmax.f32 %v1278_v37, 0.0  ;;  %v1484_v60 = vmul.f32 %v1416_v44, %v3783_v45  ;;  %v1520_v41 = vmul.f32 %v1452_v56, %v1248_v50  ;;  %v3842_v50 = vld [vmem:[%s4224_s5] ss:$0 sm:$0xff]  ;;  %v4313_v28 = vld [vmem:[#allocation37_spill] sm:$0xff] }
 0x153   : > { %v1281_v36 = vadd.f32 3.0, %v1213_v61  ;;  %v1317_v11 = vadd.f32 3.0, %v1249_v29  ;;  %v1136_v0 = vmul.f32 %v3381_v10, %v4306_v30  ;;  %v2247_v33 = vsel %vm2069_vm1, %v2245_v24, %v2246_v13  ;;  %v4307_v10 = vld [vmem:[#allocation35_spill] sm:$0xff] }
 0x154   : > { %v2239_v26 = vadd.f32 %v2238_v51, %v2236_v53  ;;  %v1382_v43 = vmax.f32 %v1314_v2, 0.0  ;;  %v1414_v8 = vmin.f32 %v1346_v12, 6.0  ;;  %v1552_v37 = vmul.f32 0.16666667, %v1484_v60  ;;  %v3851_v2 = vld [vmem:[%s4225_s6] ss:$0 sm:$0xff] }
 0x155   : > { %v1349_v62 = vmax.f32 %v1281_v36, 0.0  ;;  %v1385_v17 = vmax.f32 %v1317_v11, 0.0  ;;  %v1211_v25 = vadd.f32 %v3390_v14, %v1136_v0  ;;  %v1588_v44 = vmul.f32 0.16666667, %v1520_v41  ;;  %v4308_v12 = vld [vmem:[#allocation9_spill] sm:$0xff]  ;;  %v4309_v41 = vld [vmem:[#allocation8_spill] sm:$0xff] }
 0x156   : > { %v3836_v57 = vadd.f32 %v2247_v33, %v2239_v26  ;;  %v1172_v58 = vmul.f32 %v3842_v50, %v4307_v10  ;;  %v1141_v42 = vmul.f32 %v3842_v50, %v3550_v1  ;;  %v1450_v24 = vmin.f32 %v1382_v43, 6.0  ;;  %v3868_v43 = vpop.f32.mrb[35].mxu0 }
 0x157   : > { %v1417_v63 = vmin.f32 %v1349_v62, 6.0  ;;  %v1453_v45 = vmin.f32 %v1385_v17, 6.0  ;;  %v1279_v15 = vadd.f32 3.0, %v1211_v25  ;;  %v1482_v14 = vmul.f32 %v1414_v8, %v1210_v39  ;;  %v3870_v62 = vpop.permute.xlu0 %1894 }
 0x158   : > { %v1247_v53 = vadd.f32 %v3851_v2, %v1172_v58  ;;  %v3855_v51 = vadd.f32 %v3851_v2, %v1141_v42  ;;  %v1960_v60 = vmul.f32 %v4308_v12, %v1552_v37  ;;  %v3859_v1 = vmul.f32 %v3780_v18, %v1588_v44  ;;  %v4310_v58 = vld [vmem:[#allocation7_spill] sm:$0xff] }
 0x159   : > { %v1485_v32 = vmul.f32 %v1417_v63, %v1213_v61  ;;  %v1521_v56 = vmul.f32 %v1453_v45, %v1249_v29  ;;  %v1347_v13 = vmax.f32 %v1279_v15, 0.0  ;;  %v1177_v29 = vmul.f32 %v3842_v50, %v3556_v54  ;;  %v3874_v63 = vpop.permute.xlu1 %1899 }
 0x15a   : > { %v1315_v39 = vadd.f32 3.0, %v1247_v53  ;;  %v1518_v26 = vmul.f32 %v1450_v24, %v1246_v52  ;;  %v1284_v33 = vadd.f32 3.0, %v3855_v51  ;;  %v1550_v17 = vmul.f32 0.16666667, %v1482_v14 }
 0x15b   : > { %v1553_v36 = vmul.f32 0.16666667, %v1485_v32  ;;  %v1589_v11 = vmul.f32 0.16666667, %v1521_v56  ;;  %v1415_v61 = vmin.f32 %v1347_v13, 6.0  ;;  %v1139_v37 = vmul.f32 %v3842_v50, %v3558_v3  ;;  %v4311_v3 = vld [vmem:[#allocation6_spill] sm:$0xff] }
 0x15c   : > { %v1383_v8 = vmax.f32 %v1315_v39, 0.0  ;;  %v2253_v15 = vunpack.c.l.bf16 %v2035_v49  ;;  %v1352_v10 = vmax.f32 %v1284_v33, 0.0  ;;  %v1958_v42 = vmul.f32 %v4310_v58, %v1550_v17 }
 0x15d   : > { %v1961_v30 = vmul.f32 %v4309_v41, %v1553_v36  ;;  %v3865_v0 = vmul.f32 %v3778_v40, %v1589_v11  ;;  %v1483_v18 = vmul.f32 %v1415_v61, %v1211_v25  ;;  %v3879_v40 = vadd.f32 %v3851_v2, %v1177_v29  ;;  %v1865_v11 = vpop.permute.xlu0 %1864  ;;  %v1870_v49 = vpop.permute.xlu1 %1869 }
 0x15e   : > { %v1451_v44 = vmin.f32 %v1383_v8, 6.0  ;;  %v1586_v25 = vmul.f32 0.16666667, %v1518_v26  ;;  %v3887_v56 = vadd.f32 %v3851_v2, %v1139_v37  ;;  %v2254_v61 = vmul.f32 %v2253_v15, %v3721_v55 }
 0x15f   : > { %v2019_v54 = vpack.c.bf16 %v1961_v30, %v1960_v60  ;;  %v1551_v45 = vmul.f32 0.16666667, %v1483_v18  ;;  %v1320_v12 = vadd.f32 3.0, %v3879_v40  ;;  %v4312_v60 = vld [vmem:[#allocation36_spill] sm:$0xff]  ;;  %v2268_v39 = vmul.f32 %v2253_v15, %v3535_v38 }
 0x160   : > { %v1519_v32 = vmul.f32 %v1451_v44, %v1247_v53  ;;  %v1175_v36 = vmul.f32 %v3842_v50, %v4312_v60  ;;  %v1994_v29 = vmul.f32 %v1865_v11, %v1586_v25  ;;  %v1420_v53 = vmin.f32 %v1352_v10, 6.0 }
 0x161   : > { %v1959_v24 = vmul.f32 %v4311_v3, %v1551_v45  ;;  %v2279_v14 = vunpack.c.l.bf16 %v2019_v54  ;;  %v2285_v13 = vunpack.c.h.bf16 %v2019_v54  ;;  %v1282_v33 = vadd.f32 3.0, %v3887_v56 }
 0x162   : > { %v1587_v19 = vmul.f32 0.16666667, %v1519_v32  ;;  %v1388_v8 = vmax.f32 %v1320_v12, 0.0  ;;  %v1250_v37 = vadd.f32 %v3851_v2, %v1175_v36 }
 0x163   : > { %v2018_v9 = vpack.c.bf16 %v1959_v24, %v1958_v42  ;;  %v2286_v17 = vmul.f32 %v2279_v14, %v3514_v21  ;;  %v2287_v18 = vmul.f32 %v2285_v13, %v3514_v21  ;;  %v2280_v25 = vmul.f32 %v2279_v14, %v3632_v59 }
 0x164   : > { %v1995_v30 = vmul.f32 %v1870_v49, %v1587_v19  ;;  %v1350_v49 = vmax.f32 %v1282_v33, 0.0  ;;  %v1318_v52 = vadd.f32 3.0, %v1250_v37 }
 0x165   : > { %v2250_v26 = vunpack.c.l.bf16 %v2018_v9  ;;  %v2256_v41 = vunpack.c.h.bf16 %v2018_v9  ;;  %v2290_v12 = vrot.slane %v2286_v17, 1  ;;  %v2291_v60 = vrot.slane %v2287_v18, 1 }
 0x166   : > { %v2036_v42 = vpack.c.bf16 %v1995_v30, %v1994_v29  ;;  %v1142_v29 = vmul.f32 %v3842_v50, %v4313_v28  ;;  %v1456_v17 = vmin.f32 %v1388_v8, 6.0  ;;  %v1386_v18 = vmax.f32 %v1318_v52, 0.0 }
 0x167   : > { %v2251_v54 = vmul.f32 %v2250_v26, %v3727_v6  ;;  %v2257_v45 = vmul.f32 %v3736_v22, %v2250_v26  ;;  %v2258_v44 = vmul.f32 %v3736_v22, %v2256_v41  ;;  %v2266_v15 = vmul.f32 %v2250_v26, %v3598_v20 }
 0x168   : > { %v2270_v10 = vmul.f32 %v2250_v26, %v3605_v23  ;;  %v2271_v58 = vmul.f32 %v2256_v41, %v3605_v23  ;;  %v2282_v19 = vunpack.c.l.bf16 %v2036_v42  ;;  %v4314_v41 = vld [vmem:[#allocation38_spill] sm:$0xff]  ;;  %v1488_v42 = vmul.f32 %v1420_v53, %v3855_v51 }
 0x169   : > { %v2252_v3 = vadd.f32 %v2251_v54, %v3836_v57  ;;  %v2261_v24 = vrot.slane %v2257_v45, 1  ;;  %v2262_v32 = vrot.slane %v2258_v44, 1  ;;  %v2269_v13 = vadd.f32 %v2268_v39, %v2266_v15  ;;  %v4315_v54 = vld [vmem:[#allocation39_spill] sm:$0xff]  ;;  %v4316_v44 = vld [vmem:[#allocation42_spill] sm:$0xff] }
 0x16a   : > { %v2274_v36 = vrot.slane %v2270_v10, 1  ;;  %v2275_v11 = vrot.slane %v2271_v58, 1  ;;  %v1178_v57 = vmul.f32 %v3842_v50, %v4314_v41  ;;  %v1140_v45 = vmul.f32 %v3842_v50, %v4315_v54 }
 0x16b   : > { %v2255_v9 = vadd.f32 %v2254_v61, %v2252_v3  ;;  %v2263_v14 = vsel %vm2069_vm1, %v2261_v24, %v2262_v32  ;;  %v1217_v61 = vadd.f32 %v3851_v2, %v1142_v29  ;;  %v1176_v15 = vmul.f32 %v3842_v50, %v4316_v44 }
 0x16c   : > { %v2276_v26 = vsel %vm2069_vm1, %v2274_v36, %v2275_v11  ;;  %v1253_v33 = vadd.f32 %v3851_v2, %v1178_v57  ;;  %v2283_v28 = vmul.f32 %v2282_v19, %v3635_v4  ;;  %v1418_v58 = vmin.f32 %v1350_v49, 6.0 }
 0x16d   : > { %v3912_v30 = vadd.f32 %v2263_v14, %v2255_v9  ;;  %v2278_v39 = vadd.f32 %v2276_v26, %v2269_v13  ;;  %v1285_v3 = vadd.f32 3.0, %v1217_v61  ;;  %v1215_v52 = vadd.f32 %v3851_v2, %v1140_v45 }
 0x16e   : > { %v1321_v24 = vadd.f32 3.0, %v1253_v33  ;;  %v2292_v32 = vsel %vm2069_vm1, %v2290_v12, %v2291_v60  ;;  %v1454_v13 = vmin.f32 %v1386_v18, 6.0  ;;  %v1251_v36 = vadd.f32 %v3851_v2, %v1176_v15  ;;  %v4317_v12 = vld [vmem:[#allocation44_spill] sm:$0xff]  ;;  %v3931_v18 = vpop.permute.xlu1 %1919 }
 0x16f   : > { %v2281_v10 = vadd.f32 %v2280_v25, %v2278_v39  ;;  %v1524_v11 = vmul.f32 %v1456_v17, %v3879_v40  ;;  %v1353_v9 = vmax.f32 %v1285_v3, 0.0  ;;  %v1283_v25 = vadd.f32 3.0, %v1215_v52  ;;  %v3933_v40 = vpop.permute.xlu0 %1914 }
 0x170   : > { %v1389_v14 = vmax.f32 %v1321_v24, 0.0  ;;  %v1486_v19 = vmul.f32 %v1418_v58, %v3887_v56  ;;  %v1319_v51 = vadd.f32 3.0, %v1251_v36  ;;  %v1556_v41 = vmul.f32 0.16666667, %v1488_v42  ;;  %v4318_v42 = vld [vmem:[#allocation45_spill] sm:$0xff] }
 0x171   : > { %v2284_v8 = vadd.f32 %v2283_v28, %v2281_v10  ;;  %v1421_v53 = vmin.f32 %v1353_v9, 6.0  ;;  %v1351_v29 = vmax.f32 %v1283_v25, 0.0  ;;  %v1522_v57 = vmul.f32 %v1454_v13, %v1250_v37  ;;  %v4319_v24 = vld [vmem:[#allocation13_spill] sm:$0xff] }
 0x172   : > { %v1457_v49 = vmin.f32 %v1389_v14, 6.0  ;;  %v1387_v39 = vmax.f32 %v1319_v51, 0.0  ;;  %v1145_v60 = vmul.f32 %v3842_v50, %v4317_v12  ;;  %v1592_v17 = vmul.f32 0.16666667, %v1524_v11  ;;  %v4322_v51 = vld [vmem:[#allocation11_spill] sm:$0xff]  ;;  %v4324_v12 = vld [vmem:[#allocation10_spill] sm:$0xff] }
 0x173   : > { %v3926_v26 = vadd.f32 %v2292_v32, %v2284_v8  ;;  %v1489_v54 = vmul.f32 %v1421_v53, %v1217_v61  ;;  %v1419_v44 = vmin.f32 %v1351_v29, 6.0  ;;  %v1554_v15 = vmul.f32 0.16666667, %v1486_v19  ;;  %v4323_v29 = vld [vmem:[#allocation46_spill] sm:$0xff] }
 0x174   : > { %v1525_v45 = vmul.f32 %v1457_v49, %v1253_v33  ;;  %v1455_v56 = vmin.f32 %v1387_v39, 6.0  ;;  %v3936_v10 = vadd.f32 %v3851_v2, %v1145_v60  ;;  %v1181_v3 = vmul.f32 %v3842_v50, %v4318_v42  ;;  %v4320_v33 = vld [vmem:[#allocation12_spill] sm:$0xff] }
 0x175   : > { %v1557_v28 = vmul.f32 0.16666667, %v1489_v54  ;;  %v1487_v37 = vmul.f32 %v1419_v44, %v1215_v52  ;;  %v1964_v8 = vmul.f32 %v4319_v24, %v1556_v41  ;;  %v1590_v32 = vmul.f32 0.16666667, %v1522_v57  ;;  %v1890_v41 = vpop.permute.xlu1 %1889  ;;  %v1885_v57 = vpop.permute.xlu0 %1884 }
 0x176   : > { %v1593_v58 = vmul.f32 0.16666667, %v1525_v45  ;;  %v1523_v13 = vmul.f32 %v1455_v56, %v1251_v36  ;;  %v1288_v11 = vadd.f32 3.0, %v3936_v10  ;;  %v3943_v61 = vmul.f32 %v3870_v62, %v1592_v17 }
 0x177   : > { %v1965_v9 = vmul.f32 %v4320_v33, %v1557_v28  ;;  %v1555_v25 = vmul.f32 0.16666667, %v1487_v37  ;;  %v4321_v52 = vpack.c.bf16 %v3865_v0, %v3859_v1  ;;  %v1962_v53 = vmul.f32 %v4322_v51, %v1554_v15 }
 0x178   : > { %v3947_v14 = vmul.f32 %v3874_v63, %v1593_v58  ;;  %v1591_v49 = vmul.f32 0.16666667, %v1523_v13  ;;  %v1143_v36 = vmul.f32 %v3842_v50, %v4323_v29  ;;  %v1256_v60 = vadd.f32 %v3851_v2, %v1181_v3 }
 0x179   : > { %v2298_v19 = vunpack.c.l.bf16 %v4321_v52  ;;  %v2021_v62 = vpack.c.bf16 %v1965_v9, %v1964_v8  ;;  %v1963_v63 = vmul.f32 %v4324_v12, %v1555_v25  ;;  %v1998_v17 = vmul.f32 %v1885_v57, %v1590_v32  ;;  %v4325_v32 = vld [vmem:[#allocation47_spill] sm:$0xff] }
 0x17a   : > { %v2039_v39 = vpack.c.bf16 %v3947_v14, %v3943_v61  ;;  %v1999_v54 = vmul.f32 %v1890_v41, %v1591_v49  ;;  %v1356_v1 = vmax.f32 %v1288_v11, 0.0  ;;  %v1218_v44 = vadd.f32 %v3851_v2, %v1143_v36 }
 0x17b   : > { %v2324_v0 = vunpack.c.l.bf16 %v2021_v62  ;;  %v2020_v45 = vpack.c.bf16 %v1963_v63, %v1962_v53  ;;  %v2299_v56 = vmul.f32 %v2298_v19, %v3721_v55  ;;  %v1324_v28 = vadd.f32 3.0, %v1256_v60 }
 0x17c   : > { %v2038_v15 = vpack.c.bf16 %v1999_v54, %v1998_v17  ;;  %v2313_v58 = vmul.f32 %v2298_v19, %v3535_v38  ;;  %v1424_v24 = vmin.f32 %v1356_v1, 6.0  ;;  %v2330_v8 = vunpack.c.h.bf16 %v2021_v62 }
 0x17d   : > { %v2295_v37 = vunpack.c.l.bf16 %v2020_v45  ;;  %v2301_v42 = vunpack.c.h.bf16 %v2020_v45  ;;  %v2331_v13 = vmul.f32 %v2324_v0, %v3514_v21  ;;  %v1286_v3 = vadd.f32 3.0, %v1218_v44 }
 0x17e   : > { %v1179_v11 = vmul.f32 %v3842_v50, %v4325_v32  ;;  %v2325_v19 = vmul.f32 %v2324_v0, %v3632_v59  ;;  %v1392_v49 = vmax.f32 %v1324_v28, 0.0  ;;  %v2332_v62 = vmul.f32 %v2330_v8, %v3514_v21  ;;  %v4326_v28 = vld [vmem:[#allocation48_spill] sm:$0xff]  ;;  %v4327_v32 = vld [vmem:[#allocation49_spill] sm:$0xff] }
 0x17f   : > { %v2296_v33 = vmul.f32 %v2295_v37, %v3727_v6  ;;  %v2302_v9 = vmul.f32 %v3736_v22, %v2295_v37  ;;  %v2303_v25 = vmul.f32 %v3736_v22, %v2301_v42  ;;  %v2311_v52 = vmul.f32 %v2295_v37, %v3598_v20 }
 0x180   : > { %v2315_v51 = vmul.f32 %v2295_v37, %v3605_v23  ;;  %v2316_v53 = vmul.f32 %v2301_v42, %v3605_v23  ;;  %v2327_v17 = vunpack.c.l.bf16 %v2038_v15  ;;  %v2335_v54 = vrot.slane %v2331_v13, 1 }
 0x181   : > { %v2297_v29 = vadd.f32 %v2296_v33, %v3926_v26  ;;  %v2306_v36 = vrot.slane %v2302_v9, 1  ;;  %v2307_v41 = vrot.slane %v2303_v25, 1  ;;  %v2314_v57 = vadd.f32 %v2313_v58, %v2311_v52 }
 0x182   : > { %v2319_v12 = vrot.slane %v2315_v51, 1  ;;  %v2320_v63 = vrot.slane %v2316_v53, 1  ;;  %v1354_v45 = vmax.f32 %v1286_v3, 0.0  ;;  %v1254_v0 = vadd.f32 %v3851_v2, %v1179_v11  ;;  %v4328_v11 = vld [vmem:[#allocation50_spill] sm:$0xff] }
 0x183   : > { %v2300_v1 = vadd.f32 %v2299_v56, %v2297_v29  ;;  %v2308_v37 = vsel %vm2069_vm1, %v2306_v36, %v2307_v41  ;;  %v1146_v26 = vmul.f32 %v3842_v50, %v4326_v28  ;;  %v1182_v58 = vmul.f32 %v3842_v50, %v4327_v32 }
 0x184   : > { %v2321_v42 = vsel %vm2069_vm1, %v2319_v12, %v2320_v63  ;;  %v1460_v9 = vmin.f32 %v1392_v49, 6.0  ;;  %v1322_v15 = vadd.f32 3.0, %v1254_v0  ;;  %v2336_v13 = vrot.slane %v2332_v62, 1 }
 0x185   : > { %v3981_v33 = vadd.f32 %v2308_v37, %v2300_v1  ;;  %v2323_v8 = vadd.f32 %v2321_v42, %v2314_v57  ;;  %v1221_v56 = vadd.f32 %v3851_v2, %v1146_v26  ;;  %v1257_v3 = vadd.f32 %v3851_v2, %v1182_v58 }
 0x186   : > { %v1144_v25 = vmul.f32 %v3842_v50, %v4328_v11  ;;  %v2328_v51 = vmul.f32 %v2327_v17, %v3635_v4  ;;  %v1422_v53 = vmin.f32 %v1354_v45, 6.0  ;;  %v1390_v29 = vmax.f32 %v1322_v15, 0.0 }
 0x187   : > { %v2326_v52 = vadd.f32 %v2325_v19, %v2323_v8  ;;  %v1289_v36 = vadd.f32 3.0, %v1221_v56  ;;  %v1325_v41 = vadd.f32 3.0, %v1257_v3  ;;  %v1492_v49 = vmul.f32 %v1424_v24, %v3936_v10 }
 0x188   : > { %v1219_v12 = vadd.f32 %v3851_v2, %v1144_v25  ;;  %v1528_v62 = vmul.f32 %v1460_v9, %v1256_v60  ;;  %v2337_v63 = vsel %vm2069_vm1, %v2335_v54, %v2336_v13  ;;  %v1490_v19 = vmul.f32 %v1422_v53, %v1218_v44 }
 0x189   : > { %v2329_v57 = vadd.f32 %v2328_v51, %v2326_v52  ;;  %v1357_v1 = vmax.f32 %v1289_v36, 0.0  ;;  %v1393_v37 = vmax.f32 %v1325_v41, 0.0  ;;  %v1458_v26 = vmin.f32 %v1390_v29, 6.0  ;;  %v4330_v36 = vld [vmem:[#allocation16_spill] sm:$0xff] }
 0x18a   : > { %v1287_v42 = vadd.f32 3.0, %v1219_v12  ;;  %v1560_v58 = vmul.f32 0.16666667, %v1492_v49  ;;  %v1596_v8 = vmul.f32 0.16666667, %v1528_v62  ;;  %v1180_v15 = vmul.f32 %v3842_v50, %v3637_v46  ;;  %v4329_v46 = vld [vmem:[#allocation17_spill] sm:$0xff] }
 0x18b   : > { %v3991_v28 = vadd.f32 %v2337_v63, %v2329_v57  ;;  %v1425_v17 = vmin.f32 %v1357_v1, 6.0  ;;  %v1461_v45 = vmin.f32 %v1393_v37, 6.0  ;;  %v1149_v10 = vmul.f32 %v3842_v50, %v3651_v47  ;;  %v4333_v63 = vld [vmem:[#allocation52_spill] sm:$0xff] }
 0x18c   : > { %v1355_v32 = vmax.f32 %v1287_v42, 0.0  ;;  %v2343_v9 = vunpack.c.l.bf16 %v2039_v39  ;;  %v1558_v44 = vmul.f32 0.16666667, %v1490_v19  ;;  %v1255_v13 = vadd.f32 %v3851_v2, %v1180_v15  ;;  %v4331_v39 = vld [vmem:[#allocation51_spill] sm:$0xff]  ;;  %v4334_v19 = vld [vmem:[#allocation14_spill] sm:$0xff]  ;;  %v1905_v15 = vpop.permute.xlu0 %1904 }
 0x18d   : > { %v1493_v60 = vmul.f32 %v1425_v17, %v1221_v56  ;;  %v1529_v24 = vmul.f32 %v1461_v45, %v1257_v3  ;;  %v1224_v11 = vadd.f32 %v3851_v2, %v1149_v10  ;;  %v1526_v25 = vmul.f32 %v1458_v26, %v1254_v0  ;;  %v4332_v0 = vld [vmem:[#allocation15_spill] sm:$0xff] }
 0x18e   : > { %v1423_v54 = vmin.f32 %v1355_v32, 6.0  ;;  %v1968_v29 = vmul.f32 %v4329_v46, %v1560_v58  ;;  %v4004_v47 = vmul.f32 %v3933_v40, %v1596_v8  ;;  %v1323_v56 = vadd.f32 3.0, %v1255_v13 }
 0x18f   : > { %v1561_v52 = vmul.f32 0.16666667, %v1493_v60  ;;  %v1597_v51 = vmul.f32 0.16666667, %v1529_v24  ;;  %v1292_v3 = vadd.f32 3.0, %v1224_v11  ;;  %v1185_v57 = vmul.f32 %v3842_v50, %v4331_v39 }
 0x190   : > { %v1491_v53 = vmul.f32 %v1423_v54, %v1219_v12  ;;  %v1966_v49 = vmul.f32 %v4332_v0, %v1558_v44  ;;  %v1391_v62 = vmax.f32 %v1323_v56, 0.0  ;;  %v1147_v1 = vmul.f32 %v3842_v50, %v4333_v63 }
 0x191   : > { %v1969_v41 = vmul.f32 %v4330_v36, %v1561_v52  ;;  %v4008_v61 = vmul.f32 %v3931_v18, %v1597_v51  ;;  %v1360_v12 = vmax.f32 %v1292_v3, 0.0  ;;  %v1594_v40 = vmul.f32 0.16666667, %v1526_v25 }
 0x192   : > { %v1559_v14 = vmul.f32 0.16666667, %v1491_v53  ;;  %v1459_v18 = vmin.f32 %v1391_v62, 6.0  ;;  %v4019_v58 = vadd.f32 %v3851_v2, %v1185_v57  ;;  %v1222_v8 = vadd.f32 %v3851_v2, %v1147_v1 }
 0x193   : > { %v2023_v37 = vpack.c.bf16 %v1969_v41, %v1968_v29  ;;  %v2041_v42 = vpack.c.bf16 %v4008_v61, %v4004_v47  ;;  %v1428_v17 = vmin.f32 %v1360_v12, 6.0  ;;  %v2344_v24 = vmul.f32 %v2343_v9, %v3721_v55  ;;  %v4341_v61 = vld [vmem:[#allocation18_spill] sm:$0xff] }
 0x194   : > { %v1967_v26 = vmul.f32 %v4334_v19, %v1559_v14  ;;  %v1527_v10 = vmul.f32 %v1459_v18, %v1255_v13  ;;  %v2358_v54 = vmul.f32 %v2343_v9, %v3535_v38  ;;  %v2002_v44 = vmul.f32 %v1905_v15, %v1594_v40  ;;  %v1910_v13 = vpop.permute.xlu1 %1909  ;;  %v4335_v19 = vld [vmem:[#allocation21_spill] sm:$0xff] }
 0x195   : > { %v2369_v45 = vunpack.c.l.bf16 %v2023_v37  ;;  %v1496_v60 = vmul.f32 %v1428_v17, %v1224_v11  ;;  %v2375_v25 = vunpack.c.h.bf16 %v2023_v37  ;;  %v1183_v46 = vmul.f32 %v3842_v50, %v3668_v35 }
 0x196   : > { %v2022_v32 = vpack.c.bf16 %v1967_v26, %v1966_v49  ;;  %v1595_v53 = vmul.f32 0.16666667, %v1527_v10  ;;  %v1328_v3 = vadd.f32 3.0, %v4019_v58  ;;  %v1290_v36 = vadd.f32 3.0, %v1222_v8 }
 0x197   : > { %v2376_v29 = vmul.f32 %v2369_v45, %v3514_v21  ;;  %v1564_v56 = vmul.f32 0.16666667, %v1496_v60  ;;  %v2377_v39 = vmul.f32 %v2375_v25, %v3514_v21  ;;  %v1258_v60 = vadd.f32 %v3851_v2, %v1183_v46 }
 0x198   : > { %v2340_v52 = vunpack.c.l.bf16 %v2022_v32  ;;  %v2346_v51 = vunpack.c.h.bf16 %v2022_v32  ;;  %v2003_v0 = vmul.f32 %v1910_v13, %v1595_v53  ;;  %v1396_v17 = vmax.f32 %v1328_v3, 0.0 }
 0x199   : > { %v4037_v26 = vmul.f32 %v4335_v19, %v1564_v56  ;;  %v1358_v32 = vmax.f32 %v1290_v36, 0.0  ;;  %v1186_v56 = vmul.f32 %v3842_v50, %v3691_v16  ;;  %v1326_v46 = vadd.f32 3.0, %v1258_v60 }
 0x19a   : > { %v2341_v11 = vmul.f32 %v2340_v52, %v3727_v6  ;;  %v2347_v41 = vmul.f32 %v3736_v22, %v2340_v52  ;;  %v2348_v9 = vmul.f32 %v3736_v22, %v2346_v51  ;;  %v2356_v14 = vmul.f32 %v2340_v52, %v3598_v20 }
 0x19b   : > { %v2360_v57 = vmul.f32 %v2340_v52, %v3605_v23  ;;  %v2361_v35 = vmul.f32 %v2346_v51, %v3605_v23  ;;  %v2040_v37 = vpack.c.bf16 %v2003_v0, %v2002_v44  ;;  %v1426_v52 = vmin.f32 %v1358_v32, 6.0 }
 0x19c   : > { %v2342_v49 = vadd.f32 %v2341_v11, %v3991_v28  ;;  %v2351_v62 = vrot.slane %v2347_v41, 1  ;;  %v2352_v12 = vrot.slane %v2348_v9, 1  ;;  %v2359_v63 = vadd.f32 %v2358_v54, %v2356_v14 }
 0x19d   : > { %v2364_v1 = vrot.slane %v2360_v57, 1  ;;  %v2365_v40 = vrot.slane %v2361_v35, 1  ;;  %v2372_v10 = vunpack.c.l.bf16 %v2040_v37  ;;  %v1150_v28 = vmul.f32 %v3842_v50, %v3688_v34  ;;  %v4337_v37 = vld [vmem:[#allocation53_spill] sm:$0xff] }
 0x19e   : > { %v2345_v22 = vadd.f32 %v2344_v24, %v2342_v49  ;;  %v2353_v18 = vsel %vm2069_vm1, %v2351_v62, %v2352_v12  ;;  %v2370_v54 = vmul.f32 %v2369_v45, %v3632_v59  ;;  %v2380_v51 = vrot.slane %v2376_v29, 1  ;;  %v4336_v49 = vld [vmem:[#allocation19_spill] sm:$0xff] }
 0x19f   : > { %v2366_v15 = vsel %vm2069_vm1, %v2364_v1, %v2365_v40  ;;  %v2381_v24 = vrot.slane %v2377_v39, 1  ;;  %v1225_v53 = vadd.f32 %v3851_v2, %v1150_v28  ;;  %v2373_v36 = vmul.f32 %v2372_v10, %v3635_v4  ;;  %v1925_v1 = vpop.permute.xlu0 %1924 }
 0x1a0   : > { %v4045_v25 = vadd.f32 %v2353_v18, %v2345_v22  ;;  %v2368_v44 = vadd.f32 %v2366_v15, %v2359_v63  ;;  %v1464_v13 = vmin.f32 %v1396_v17, 6.0  ;;  %v1494_v11 = vmul.f32 %v1426_v52, %v1222_v8  ;;  %v1930_v63 = vpop.permute.xlu1 %1929 }
 0x1a1   : > { %v1293_v34 = vadd.f32 3.0, %v1225_v53  ;;  %v1261_v45 = vadd.f32 %v3851_v2, %v1186_v56  ;;  %v2382_v9 = vsel %vm2069_vm1, %v2380_v51, %v2381_v24  ;;  %v1394_v35 = vmax.f32 %v1326_v46, 0.0  ;;  %v4338_v51 = vld [vmem:[#allocation20_spill] sm:$0xff] }
 0x1a2   : > { %v2371_v3 = vadd.f32 %v2370_v54, %v2368_v44  ;;  %v1562_v14 = vmul.f32 0.16666667, %v1494_v11  ;;  %v1148_v16 = vmul.f32 %v3842_v50, %v3703_v31  ;;  %v1532_v0 = vmul.f32 %v1464_v13, %v4019_v58 }
 0x1a3   : > { %v1361_v29 = vmax.f32 %v1293_v34, 0.0  ;;  %v1329_v39 = vadd.f32 3.0, %v1261_v45  ;;  %v1184_v19 = vmul.f32 %v3842_v50, %v4337_v37  ;;  %v1153_v17 = vmul.f32 %v3842_v50, %v3750_v5  ;;  %v1935_v5 = vpop.permute.xlu0 %1934 }
 0x1a4   : > { %v2374_v41 = vadd.f32 %v2373_v36, %v2371_v3  ;;  %v1970_v62 = vmul.f32 %v4336_v49, %v1562_v14  ;;  %v1223_v40 = vadd.f32 %v3851_v2, %v1148_v16  ;;  %v1462_v32 = vmin.f32 %v1394_v35, 6.0  ;;  %v1940_v36 = vpop.permute.xlu1 %1939 }
 0x1a5   : > { %v1429_v8 = vmin.f32 %v1361_v29, 6.0  ;;  %v1397_v12 = vmax.f32 %v1329_v39, 0.0  ;;  %v1259_v58 = vadd.f32 %v3851_v2, %v1184_v19  ;;  %v1600_v15 = vmul.f32 0.16666667, %v1532_v0  ;;  %v4339_v29 = vld [vmem:[#allocation29_spill] sm:$0xff] }
 0x1a6   : > { %v4053_v57 = vadd.f32 %v2382_v9, %v2374_v41  ;;  %v1291_v31 = vadd.f32 3.0, %v1223_v40  ;;  %v1228_v54 = vadd.f32 %v3851_v2, %v1153_v17  ;;  %v1530_v46 = vmul.f32 %v1462_v32, %v1258_v60 }
 0x1a7   : > { %v1497_v22 = vmul.f32 %v1429_v8, %v1225_v53  ;;  %v1465_v18 = vmin.f32 %v1397_v12, 6.0  ;;  %v1327_v52 = vadd.f32 3.0, %v1259_v58  ;;  %v1151_v53 = vmul.f32 %v3842_v50, %v3758_v27 }
 0x1a8   : > { %v1359_v44 = vmax.f32 %v1291_v31, 0.0  ;;  %v1296_v3 = vadd.f32 3.0, %v1228_v54  ;;  %v1154_v34 = vmul.f32 %v3842_v50, %v3762_v7  ;;  %v2046_v39 = vunpack.c.l.bf16 %v4339_v29 }
 0x1a9   : > { %v1565_v10 = vmul.f32 0.16666667, %v1497_v22  ;;  %v1533_v28 = vmul.f32 %v1465_v18, %v1261_v45  ;;  %v1395_v11 = vmax.f32 %v1327_v52, 0.0  ;;  %v4071_v45 = vmul.f32 %v1935_v5, %v1600_v15 }
 0x1aa   : > { %v1427_v13 = vmin.f32 %v1359_v44, 6.0  ;;  %v1364_v14 = vmax.f32 %v1296_v3, 0.0  ;;  %v1229_v16 = vadd.f32 %v3851_v2, %v1154_v34  ;;  %v2060_v60 = vunpack.c.h.bf16 %v4339_v29 }
 0x1ab   : > { %v1973_v24 = vmul.f32 %v4338_v51, %v1565_v10  ;;  %v1601_v56 = vmul.f32 0.16666667, %v1533_v28  ;;  %v1463_v27 = vmin.f32 %v1395_v11, 6.0  ;;  %v2388_v7 = vunpack.c.l.bf16 %v2041_v42 }
 0x1ac   : > { %v1495_v35 = vmul.f32 %v1427_v13, %v1223_v40  ;;  %v1598_v49 = vmul.f32 0.16666667, %v1530_v46  ;;  %v1297_v37 = vadd.f32 3.0, %v1229_v16  ;;  %v4340_v40 = vld [vmem:[#allocation27_spill] sm:$0xff]  ;;  %v1432_v22 = vmin.f32 %v1364_v14, 6.0 }
 0x1ad   : > { %v4074_v41 = vpack.c.bf16 %v1973_v24, %v4037_v26  ;;  %v4076_v9 = vmul.f32 %v1940_v36, %v1601_v56  ;;  %v4087_v26 = vadd.f32 %v3851_v2, %v1151_v53  ;;  %v1531_v12 = vmul.f32 %v1463_v27, %v1259_v58 }
 0x1ae   : > { %v1563_v8 = vmul.f32 0.16666667, %v1495_v35  ;;  %v2075_v19 = vunpack.c.l.bf16 %v4340_v40  ;;  %v2089_v18 = vunpack.c.h.bf16 %v4340_v40  ;;  %v4094_v47 = vmul.f32 %v3605_v23, %v2046_v39 }
 0x1af   : > { %v2043_v0 = vpack.c.bf16 %v4076_v9, %v4071_v45  ;;  %v1599_v17 = vmul.f32 0.16666667, %v1531_v12  ;;  %v4098_v32 = vmul.f32 %v3605_v23, %v2060_v60  ;;  %v4102_v31 = vmul.f32 %v3760_v48, %v3760_v48 }
 0x1b0   : > { %v1971_v42 = vmul.f32 %v4341_v61, %v1563_v8  ;;  %v1294_v58 = vadd.f32 3.0, %v4087_v26  ;;  %v1365_v15 = vmax.f32 %v1297_v37, 0.0  ;;  %v2389_v10 = vmul.f32 %v2388_v7, %v3721_v55 }
 0x1b1   : > { %v2006_v28 = vmul.f32 %v1925_v1, %v1598_v49  ;;  %v2007_v52 = vmul.f32 %v1930_v63, %v1599_v17  ;;  %v2414_v51 = vunpack.c.l.bf16 %v4074_v41  ;;  %v1500_v24 = vmul.f32 %v1432_v22, %v1228_v54  ;;  %v4116_v63 = vld [vmem:[%s4226_s7 + $0x8] ss:$0 sm:$0xff] }
 0x1b2   : > { %v2024_v44 = vpack.c.bf16 %v1971_v42, %v1970_v62  ;;  %v1433_v56 = vmin.f32 %v1365_v15, 6.0  ;;  %v1152_v3 = vmul.f32 %v3842_v50, %v3868_v43  ;;  %v2403_v53 = vmul.f32 %v2388_v7, %v3535_v38 }
 0x1b3   : > { %v2042_v46 = vpack.c.bf16 %v2007_v52, %v2006_v28  ;;  %v2420_v13 = vunpack.c.h.bf16 %v4074_v41  ;;  %v1362_v11 = vmax.f32 %v1294_v58, 0.0  ;;  %v2421_v14 = vmul.f32 %v2414_v51, %v3514_v21  ;;  %v4342_v28 = vld [vmem:[#allocation25_spill] sm:$0xff] }
 0x1b4   : > { %v2385_v36 = vunpack.c.l.bf16 %v2024_v44  ;;  %v2391_v5 = vunpack.c.h.bf16 %v2024_v44  ;;  %v1501_v34 = vmul.f32 %v1433_v56, %v1229_v16  ;;  %v1227_v1 = vadd.f32 %v3851_v2, %v1152_v3 }
 0x1b5   : > { %v1568_v2 = vmul.f32 0.16666667, %v1500_v24  ;;  %v2422_v49 = vmul.f32 %v2420_v13, %v3514_v21  ;;  %v1430_v37 = vmin.f32 %v1362_v11, 6.0  ;;  %v2417_v61 = vunpack.c.l.bf16 %v2042_v46  ;;  %v4343_v24 = vld [vmem:[#allocation24_spill] sm:$0xff] }
 0x1b6   : > { %v2386_v62 = vmul.f32 %v2385_v36, %v3727_v6  ;;  %v2392_v50 = vmul.f32 %v4116_v63, %v2385_v36  ;;  %v2393_v43 = vmul.f32 %v4116_v63, %v2391_v5  ;;  %v2401_v54 = vmul.f32 %v2385_v36, %v3598_v20 }
 0x1b7   : > { %v2405_v41 = vmul.f32 %v2385_v36, %v3605_v23  ;;  %v2406_v35 = vmul.f32 %v2391_v5, %v3605_v23  ;;  %v1569_v42 = vmul.f32 0.16666667, %v1501_v34  ;;  %v1295_v17 = vadd.f32 3.0, %v1227_v1 }
 0x1b8   : > { %v2387_v27 = vadd.f32 %v2386_v62, %v4053_v57  ;;  %v2396_v16 = vrot.slane %v2392_v50, 1  ;;  %v2397_v60 = vrot.slane %v2393_v43, 1  ;;  %v2404_v7 = vadd.f32 %v2403_v53, %v2401_v54 }
 0x1b9   : > { %v2409_v8 = vrot.slane %v2405_v41, 1  ;;  %v2410_v12 = vrot.slane %v2406_v35, 1  ;;  %v2415_v58 = vmul.f32 %v2414_v51, %v3632_v59  ;;  %v1976_v57 = vmul.f32 %v4342_v28, %v1568_v2 }
 0x1ba   : > { %v2390_v22 = vadd.f32 %v2389_v10, %v2387_v27  ;;  %v2398_v15 = vsel %vm2069_vm1, %v2396_v16, %v2397_v60  ;;  %v1977_v56 = vmul.f32 %v4343_v24, %v1569_v42  ;;  %v1363_v3 = vmax.f32 %v1295_v17, 0.0 }
 0x1bb   : > { %v2411_v23 = vsel %vm2069_vm1, %v2409_v8, %v2410_v12  ;;  %v2461_v53 = vrot.slane %v3760_v48, 4  ;;  %v2425_v10 = vrot.slane %v2421_v14, 1  ;;  %v2426_v36 = vrot.slane %v2422_v49, 1  ;;  %v4347_v12 = vld [vmem:[#allocation43_spill] sm:$0xff] }
 0x1bc   : > { %v4130_v44 = vadd.f32 %v2398_v15, %v2390_v22  ;;  %v2413_v52 = vadd.f32 %v2411_v23, %v2404_v7  ;;  %v1498_v5 = vmul.f32 %v1430_v37, %v4087_v26  ;;  %v2469_v51 = vrot.slane %v4102_v31, 4  ;;  %v4348_v22 = vld [vmem:[#allocation41_spill] sm:$0xff] }
 0x1bd   : > { %v2418_v13 = vmul.f32 %v2417_v61, %v3635_v4  ;;  %v2027_v11 = vpack.c.bf16 %v1977_v56, %v1976_v57  ;;  %v2094_v34 = vmul.f32 %v3514_v21, %v2075_v19  ;;  %v2095_v62 = vmul.f32 %v3514_v21, %v2089_v18  ;;  %v4350_v61 = vld [vmem:[#allocation23_spill] sm:$0xff] }
 0x1be   : > { %v2416_v46 = vadd.f32 %v2415_v58, %v2413_v52  ;;  %v1431_v50 = vmin.f32 %v1363_v3, 6.0  ;;  %v2051_v43 = vmul.f32 %v3598_v20, %v2046_v39  ;;  %v2070_v54 = vrot.slane %v4094_v47, 1  ;;  %v4344_v20 = vld [vmem:[#allocation28_spill] sm:$0xff]  ;;  %v4345_v39 = vld [vmem:[#allocation26_spill] sm:$0xff] }
 0x1bf   : > { %v2053_v14 = vunpack.c.l.bf16 %v2027_v11  ;;  %v2071_v41 = vrot.slane %v4098_v32, 1  ;;  %v2427_v35 = vsel %vm2069_vm1, %v2425_v10, %v2426_v36  ;;  %v1566_v2 = vmul.f32 0.16666667, %v1498_v5  ;;  %v4352_v52 = vld [vmem:[#allocation40_spill] sm:$0xff]  ;;  %v4353_v36 = vld [vmem:[#allocation30_spill] sm:$0xff] }
 0x1c0   : > { %v2419_v26 = vadd.f32 %v2418_v13, %v2416_v46  ;;  %v1499_v27 = vmul.f32 %v1431_v50, %v1227_v1  ;;  %v2462_v16 = vadd.f32 %v2461_v53, %v3760_v48  ;;  %v2470_v60 = vadd.f32 %v2469_v51, %v4102_v31 }
 0x1c1   : > { %v2058_v18 = vmul.f32 %v3535_v38, %v2053_v14  ;;  %v2098_v29 = vrot.slane %v2094_v34, 1  ;;  %v2099_v7 = vrot.slane %v2095_v62, 1  ;;  %v4346_v47 = vpack.c.bf16 %v4344_v20, %v4345_v39  ;;  %v4351_v38 = vld [vmem:[#allocation22_spill] sm:$0xff] }
 0x1c2   : > { %v2429_v21 = vadd.f32 %v2427_v35, %v2419_v26  ;;  %v1567_v8 = vmul.f32 0.16666667, %v1499_v27  ;;  %v2122_v32 = vmul.f32 %v4116_v63, %v4347_v12  ;;  %v4349_v1 = vunpack.c.h.bf16 %v4348_v22 }
 0x1c3   : > { %v2082_v49 = vunpack.c.l.bf16 %v4346_v47  ;;  %v2059_v37 = vadd.f32 %v2058_v18, %v2051_v43  ;;  %v1974_v31 = vmul.f32 %v4350_v61, %v1566_v2  ;;  %v2072_v42 = vsel %vm2069_vm1, %v2070_v54, %v2071_v41 }
 0x1c4   : > { %v2123_v48 = vmul.f32 %v4116_v63, %v4349_v1  ;;  %v1975_v17 = vmul.f32 %v4351_v38, %v1567_v8  ;;  %v2080_v58 = vmul.f32 %v3632_v59, %v2075_v19  ;;  %v2463_v15 = vrot.slane %v2462_v16, 2 }
 0x1c5   : > { %v2471_v23 = vrot.slane %v2470_v60, 2  ;;  %v2074_v28 = vadd.f32 %v2072_v42, %v2059_v37  ;;  %v2100_v57 = vsel %vm2069_vm1, %v2098_v29, %v2099_v7  ;;  %v2115_v24 = vmul.f32 %v3721_v55, %v4352_v52 }
 0x1c6   : > { %v2087_v56 = vmul.f32 %v3635_v4, %v2082_v49  ;;  %v2026_v3 = vpack.c.bf16 %v1975_v17, %v1974_v31  ;;  %v2108_v53 = vmul.f32 %v3727_v6, %v4347_v12  ;;  %v2126_v10 = vrot.slane %v2122_v32, 1 }
 0x1c7   : > { %v2483_v40 = vmul.f32 %v4353_v36, %v4353_v36  ;;  %v2081_v5 = vadd.f32 %v2080_v58, %v2074_v28  ;;  %v2127_v59 = vrot.slane %v2123_v48, 1  ;;  %v2433_v19 = vunpack.c.l.bf16 %v2043_v0 }
 0x1c8   : > { %v2430_v51 = vunpack.c.l.bf16 %v2026_v3  ;;  %v2436_v46 = vunpack.c.h.bf16 %v2026_v3  ;;  %v2464_v13 = vadd.f32 %v2463_v15, %v2462_v16  ;;  %v2472_v11 = vadd.f32 %v2471_v23, %v2470_v60 }
 0x1c9   : > { %v2476_v4 = vrot.slane %v4353_v36, 4  ;;  %v2088_v34 = vadd.f32 %v2087_v56, %v2081_v5  ;;  %v2498_v62 = vmul.f32 %v3912_v30, %v3912_v30  ;;  %v2484_v26 = vrot.slane %v2483_v40, 4 }
 0x1ca   : > { %v2431_v50 = vmul.f32 %v2430_v51, %v3727_v6  ;;  %v2437_v43 = vmul.f32 %v4116_v63, %v2430_v51  ;;  %v2438_v54 = vmul.f32 %v4116_v63, %v2436_v46  ;;  %v2491_v45 = vrot.slane %v3912_v30, 4 }
 0x1cb   : > { %v2513_v9 = vmul.f32 %v3981_v33, %v3981_v33  ;;  %v2102_v0 = vadd.f32 %v2100_v57, %v2088_v34  ;;  %v2434_v14 = vmul.f32 %v2433_v19, %v3721_v55  ;;  %v2465_v27 = vrot.slane %v2464_v13, 1 }
 0x1cc   : > { %v2432_v41 = vadd.f32 %v2431_v50, %v2429_v21  ;;  %v2441_v35 = vrot.slane %v2437_v43, 1  ;;  %v2442_v2 = vrot.slane %v2438_v54, 1  ;;  %v2473_v16 = vrot.slane %v2472_v11, 1 }
 0x1cd   : > { %v2477_v6 = vadd.f32 %v2476_v4, %v4353_v36  ;;  %v2109_v60 = vadd.f32 %v2108_v53, %v2102_v0  ;;  %v2499_v18 = vrot.slane %v2498_v62, 4  ;;  %v2506_v63 = vrot.slane %v3981_v33, 4 }
 0x1ce   : > { %v2528_v29 = vmul.f32 %v4045_v25, %v4045_v25  ;;  %v2435_v7 = vadd.f32 %v2434_v14, %v2432_v41  ;;  %v2128_v20 = vsel %vm2069_vm1, %v2126_v10, %v2127_v59  ;;  %v2485_v39 = vadd.f32 %v2484_v26, %v2483_v40 }
 0x1cf   : > { %v2116_v47 = vadd.f32 %v2115_v24, %v2109_v60  ;;  %v2443_v55 = vsel %vm2069_vm1, %v2441_v35, %v2442_v2  ;;  %v2492_v21 = vadd.f32 %v2491_v45, %v3912_v30  ;;  %v2514_v49 = vrot.slane %v2513_v9, 4 }
 0x1d0   : > { %v2521_v8 = vrot.slane %v4045_v25, 4  ;;  %v2445_v12 = vadd.f32 %v2443_v55, %v2435_v7  ;;  %v2466_v32 = vadd.f32 %v2465_v27, %v2464_v13  ;;  %v4193_v37 = vadd.f32 %v2473_v16, %v2472_v11 }
 0x1d1   : > { %v2543_v22 = vmul.f32 %v4130_v44, %v4130_v44  ;;  %v2130_v1 = vadd.f32 %v2128_v20, %v2116_v47  ;;  %v2478_v48 = vrot.slane %v2477_v6, 2  ;;  %v2500_v61 = vadd.f32 %v2499_v18, %v2498_v62 }
 0x1d2   : > { %v2507_v31 = vadd.f32 %v2506_v63, %v3981_v33  ;;  %v2529_v42 = vrot.slane %v2528_v29, 4  ;;  %v2536_v38 = vrot.slane %v4130_v44, 4  ;;  %v2558_v58 = vmul.f32 %v2445_v12, %v2445_v12 }
 0x1d3   : > { %v2446_v17 = vrot.slane %v2130_v1, 4  ;;  %v2453_v30 = vmul.f32 %v2130_v1, %v2130_v1  ;;  %v2486_v15 = vrot.slane %v2485_v39, 2  ;;  %v2493_v23 = vrot.slane %v2492_v21, 2 }
 0x1d4   : > { %v2515_v28 = vadd.f32 %v2514_v49, %v2513_v9  ;;  %v2522_v57 = vadd.f32 %v2521_v8, %v4045_v25  ;;  %v2544_v52 = vrot.slane %v2543_v22, 4  ;;  %v2551_v3 = vrot.slane %v2445_v12, 4 }
 0x1d5   : > { %v2447_v24 = vadd.f32 %v2446_v17, %v2130_v1  ;;  %v2454_v56 = vrot.slane %v2453_v30, 4  ;;  %v2479_v53 = vadd.f32 %v2478_v48, %v2477_v6  ;;  %v2501_v10 = vrot.slane %v2500_v61, 2 }
 0x1d6   : > { %v2508_v36 = vrot.slane %v2507_v31, 2  ;;  %v2530_v40 = vadd.f32 %v2529_v42, %v2528_v29  ;;  %v2537_v33 = vadd.f32 %v2536_v38, %v4130_v44  ;;  %v2559_v19 = vrot.slane %v2558_v58, 4 }
 0x1d7   : > { %v2448_v5 = vrot.slane %v2447_v24, 2  ;;  %v2455_v59 = vadd.f32 %v2454_v56, %v2453_v30  ;;  %v2487_v51 = vadd.f32 %v2486_v15, %v2485_v39  ;;  %v2494_v46 = vadd.f32 %v2493_v23, %v2492_v21 }
 0x1d8   : > { %v2516_v13 = vrot.slane %v2515_v28, 2  ;;  %v2523_v11 = vrot.slane %v2522_v57, 2  ;;  %v2545_v4 = vadd.f32 %v2544_v52, %v2543_v22  ;;  %v2552_v62 = vadd.f32 %v2551_v3, %v2445_v12 }
 0x1d9   : > { %v2449_v34 = vadd.f32 %v2448_v5, %v2447_v24  ;;  %v2456_v25 = vrot.slane %v2455_v59, 2  ;;  %v2480_v50 = vrot.slane %v2479_v53, 1  ;;  %v2502_v43 = vadd.f32 %v2501_v10, %v2500_v61 }
 0x1da   : > { %v2509_v54 = vadd.f32 %v2508_v36, %v2507_v31  ;;  %v2531_v26 = vrot.slane %v2530_v40, 2  ;;  %v2538_v45 = vrot.slane %v2537_v33, 2  ;;  %v2560_v14 = vadd.f32 %v2559_v19, %v2558_v58 }
 0x1db   : > { %v2450_v9 = vrot.slane %v2449_v34, 1  ;;  %v2457_v0 = vadd.f32 %v2456_v25, %v2455_v59  ;;  %v2488_v44 = vrot.slane %v2487_v51, 1  ;;  %v2495_v41 = vrot.slane %v2494_v46, 1 }
 0x1dc   : > { %v2517_v35 = vadd.f32 %v2516_v13, %v2515_v28  ;;  %v2524_v2 = vadd.f32 %v2523_v11, %v2522_v57  ;;  %v2546_v27 = vrot.slane %v2545_v4, 2  ;;  %v2553_v60 = vrot.slane %v2552_v62, 2 }
 0x1dd   : > { %v2451_v16 = vadd.f32 %v2450_v9, %v2449_v34  ;;  %v2458_v6 = vrot.slane %v2457_v0, 1  ;;  %v2481_v18 = vadd.f32 %v2480_v50, %v2479_v53  ;;  %v2503_v63 = vrot.slane %v2502_v43, 1 }
 0x1de   : > { %v2510_v29 = vrot.slane %v2509_v54, 1  ;;  %v2532_v7 = vadd.f32 %v2531_v26, %v2530_v40  ;;  %v2539_v20 = vadd.f32 %v2538_v45, %v2537_v33  ;;  %v2561_v55 = vrot.slane %v2560_v14, 2 }
 0x1df   : > { %v2459_v39 = vadd.f32 %v2458_v6, %v2457_v0  ;;  %v2467_v47 = vadd.f32 %v2466_v32, %v2451_v16  ;;  %v2489_v21 = vadd.f32 %v2488_v44, %v2487_v51  ;;  %v2496_v49 = vadd.f32 %v2495_v41, %v2494_v46 }
 0x1e0   : > { %v2518_v8 = vrot.slane %v2517_v35, 1  ;;  %v2525_v12 = vrot.slane %v2524_v2, 1  ;;  %v2547_v22 = vadd.f32 %v2546_v27, %v2545_v4  ;;  %v2554_v61 = vadd.f32 %v2553_v60, %v2552_v62 }
 0x1e1   : > { %v2475_v1 = vadd.f32 %v4193_v37, %v2459_v39  ;;  %v2482_v48 = vadd.f32 %v2481_v18, %v2467_v47  ;;  %v2504_v31 = vadd.f32 %v2503_v63, %v2502_v43  ;;  %v2511_v42 = vadd.f32 %v2510_v29, %v2509_v54 }
 0x1e2   : > { %v2533_v38 = vrot.slane %v2532_v7, 1  ;;  %v2540_v17 = vrot.slane %v2539_v20, 1  ;;  %v2562_v15 = vadd.f32 %v2561_v55, %v2560_v14  ;;  %v2519_v23 = vadd.f32 %v2518_v8, %v2517_v35 }
 0x1e3   : > { %v2490_v30 = vadd.f32 %v2489_v21, %v2475_v1  ;;  %v2497_v58 = vadd.f32 %v2496_v49, %v2482_v48  ;;  %v2526_v32 = vadd.f32 %v2525_v12, %v2524_v2  ;;  %v2548_v28 = vrot.slane %v2547_v22, 1 }
 0x1e4   : > { %v2555_v24 = vrot.slane %v2554_v61, 1  ;;  %v2534_v56 = vadd.f32 %v2533_v38, %v2532_v7  ;;  %v2541_v3 = vadd.f32 %v2540_v17, %v2539_v20  ;;  %v2563_v10 = vrot.slane %v2562_v15, 1 }
 0x1e5   : > { %v2505_v57 = vadd.f32 %v2504_v31, %v2490_v30  ;;  %v2512_v52 = vadd.f32 %v2511_v42, %v2497_v58  ;;  %v2549_v36 = vadd.f32 %v2548_v28, %v2547_v22 }
 0x1e6   : > { %v2556_v5 = vadd.f32 %v2555_v24, %v2554_v61  ;;  %v2564_v51 = vadd.f32 %v2563_v10, %v2562_v15 }
 0x1e7   : > { %v2520_v37 = vadd.f32 %v2519_v23, %v2505_v57  ;;  %v2527_v53 = vadd.f32 %v2526_v32, %v2512_v52 }
 0x1e9   : > { %v2535_v40 = vadd.f32 %v2534_v56, %v2520_v37  ;;  %v2542_v33 = vadd.f32 %v2541_v3, %v2527_v53 }
 0x1eb   : > { %v2550_v59 = vadd.f32 %v2549_v36, %v2535_v40  ;;  %v2557_v19 = vadd.f32 %v2556_v5, %v2542_v33 }
 0x1ed   : > { %v2565_v46 = vadd.f32 %v2564_v51, %v2550_v59  ;;  %2566 = vst [vmem:[%s373_s27] sm:$0x1] %v2557_v19 }
 0x1ef   : > { %2567 = vst [vmem:[%s378_s14] sm:$0x1] %v2565_v46 }
 0x1f0 PF: > { %s20_s11 = sadd.s32 1, %s2951_s11   ;;  %s4354_s30 = smov %s2947_s10 }
 0x1f1   : > { %p17_p5 = scmp.ge.s32.totalorder %s20_s11, 4   ;;  %s4355_s10 = smov %s4357_s12 }
 0x1f3   :  { %19 = sbr.rel (!%p17_p5) target bundleno = 2 (0x2), region = 101 }

// kernel: depthwise_separable_conv_forward.6
= control target key start
LH: loop header
LB: loop body
LE: loop exit
PB: predicated region body
PF: predicated region fallthrough
CT: control target
= control target key end

     0   :  { %s3458_s25 = smov 0   ;;  %s3460_s26 = smov 0   ;;  %s4811_s0 = inlined_call_operand.vmem [shape: bf16[2,288,16], index: 0, kind: input, shape index: {}]   ;;  %s4812_s1 = inlined_call_operand.vmem [shape: bf16[2,288,16], index: 1, kind: input, shape index: {}]   ;;  %s4813_s2 = inlined_call_operand.vmem [shape: f32[1,288,1], index: 2, kind: input, shape index: {}]   ;;  %s4814_s3 = inlined_call_operand.vmem [shape: f32[1,288,1], index: 3, kind: input, shape index: {}]   ;;  %s4815_s4 = inlined_call_operand.vmem [shape: bf16[16,128], index: 4, kind: input, shape index: {}]   ;;  %s4816_s5 = inlined_call_operand.vmem [shape: f32[1,128], index: 5, kind: input, shape index: {}]   ;;  %s4817_s6 = inlined_call_operand.vmem [shape: f32[1,128], index: 6, kind: input, shape index: {}]   ;;  %s4818_s7 = inlined_call_operand.vmem [shape: f32[9,128], index: 7, kind: input, shape index: {}]   ;;  %s4819_s8 = inlined_call_operand.vmem [shape: f32[1,128], index: 8, kind: input, shape index: {}]   ;;  %s4820_s9 = inlined_call_operand.vmem [shape: f32[1,128], index: 9, kind: input, shape index: {}]   ;;  %s4821_s10 = inlined_call_operand.vmem [shape: bf16[128,128], index: 10, kind: input, shape index: {}]   ;;  %s4822_s11 = inlined_call_operand.vmem [shape: bf16[2,64,128], index: 11, kind: output, shape index: {0}]   ;;  %s4823_s12 = inlined_call_operand.vmem [shape: f32[2,1,128], index: 12, kind: output, shape index: {1}]   ;;  %s4824_s13 = inlined_call_operand.vmem [shape: f32[2,1,128], index: 13, kind: output, shape index: {2}]  }
   0x1   :  { %s3462_s27 = smov 0  }
   0x2 LB: > { %s36_s28 = sadd.s32 1, %s3381_s26  ;;  %p3017_p0 = scmp.ge.s32.totalorder %s3385_s27, 1  ;;  %s3385_s27 = sphi %s3462_s27, %s24_s27   ;;  %s3381_s26 = sphi %s3460_s26, %s5010_s26   ;;  %s3377_s25 = sphi %s3458_s25, %s5009_s25  }
   0x3   : > { %p38_p1 = scmp.ge.s32.totalorder %s36_s28, 2  ;;  %p420_p2 = scmp.lt.s32.totalorder %s3385_s27, 3 }
   0x5   : > { %s5012_s28 = smov (%p38_p1, %s36_s28), 0  ;;  %p421_p3 = pnand %p3017_p0, %p420_p2 }
   0x7   : > { %424 = sbr.rel (%p421_p3) target bundleno = 721 (0x2d1), region = 64 }
   0xe   : > { %v762_v0 = vld [vmem:[%s4813_s2 + $0x20] sm:$0xff]  ;;  %p481_p4 = scmp.lt.s32.totalorder %s3377_s25, 1  ;;  %v3387_v2 = vmov 0   ;;  %v763_v4 = vld [vmem:[%s4813_s2 + $0x28] sm:$0xff]  ;;  %vm835_vm0 = vcmask 130048   ;;  %v761_v32 = vld [vmem:[%s4813_s2 + $0x18] sm:$0xff] }
   0xf   : > { %v758_v1 = vld [vmem:[%s4813_s2] sm:$0xff]  ;;  %3316 = vset.pattern.permute.xlu1 %v3387_v2  ;;  %3315 = vset.pattern.permute.xlu0 %v3387_v2  ;;  %v759_v5 = vld [vmem:[%s4813_s2 + $0x8] sm:$0xff]  ;;  %v760_v33 = vld [vmem:[%s4813_s2 + $0x10] sm:$0xff]  ;;  %vm2200_vm1 = vcmask 1046528  }
  0x10   : > { %1755 = vperm.xlu1 %3316, %v762_v0   ;;  %1735 = vperm.xlu0 %3315, %v758_v1   ;;  %v3317_v3 = vld [vmem:[%s4815_s4] sm:$0xff]   ;;  %s5014_s25 = smov (!%p481_p4, %s3377_s25), 1  ;;  %v767_v6 = vld [vmem:[%s4813_s2 + $0x48] sm:$0xff]  ;;  %v765_v38 = vld [vmem:[%s4813_s2 + $0x38] sm:$0xff] }
  0x11   : > { %3193 = vmatprep.subr.bf16.mxu0 %v3317_v3  ;;  %3287 = vmatprep.subr.bf16.mxu1 %v3317_v3  ;;  %s3289_s22 = smul.u32 144, %s5014_s25  ;;  %v766_v7 = vld [vmem:[%s4813_s2 + $0x40] sm:$0xff]  ;;  %v771_v11 = vld [vmem:[%s4813_s2 + $0x68] sm:$0xff]  ;;  %v764_v39 = vld [vmem:[%s4813_s2 + $0x30] sm:$0xff]  ;;  %s3114_s20 = sshll.u32 %s5014_s25, 5 }
  0x12   : > { %3194 = vmatpush3.bf16.msra.mxu0 %v3317_v3  ;;  %3288 = vmatpush3.bf16.msra.mxu1 %v3317_v3  ;;  %v770_v12 = vld [vmem:[%s4813_s2 + $0x60] sm:$0xff]  ;;  %v794_v16 = vld [vmem:[%s4814_s3 + $0x8] sm:$0xff]  ;;  %v769_v40 = vld [vmem:[%s4813_s2 + $0x58] sm:$0xff]  ;;  %s499_s24 = scalar_lea.vmem %s4822_s11, %s3114_s20  ;;  %s504_s30 = scalar_lea.vmem %s4823_s12, %s5014_s25 }
  0x13   : > { %s3503_s16 = scalar_lea.vmem %s4811_s0, %s3289_s22  ;;  %s3508_s19 = scalar_lea.vmem %s4812_s1, %s3289_s22  ;;  %v793_v17 = vld [vmem:[%s4814_s3] sm:$0xff]  ;;  %v798_v22 = vld [vmem:[%s4814_s3 + $0x28] sm:$0xff]  ;;  %v768_v41 = vld [vmem:[%s4813_s2 + $0x50] sm:$0xff] }
  0x14   : > { %1760 = vperm.xlu1 %3316, %v763_v4   ;;  %1740 = vperm.xlu0 %3315, %v759_v5   ;;  %v3318_v8 = vld [vmem:[%s3503_s16] sm:$0xff]   ;;  %v3319_v9 = vld [vmem:[%s3508_s19 + $0x18] sm:$0xff]   ;;  %v3320_v10 = vld [vmem:[%s3503_s16 + $0x8] sm:$0xff]   ;;  %s509_s15 = scalar_lea.vmem %s4824_s13, %s5014_s25 }
  0x15   : > { %3195 = vmatprep.mubr.msk.bf16.mxu0 %vm835_vm0, %v3318_v8  ;;  %v3321_v13 = vld [vmem:[%s3508_s19 + $0x20] sm:$0xff]   ;;  %3235 = vmatprep.mubr.msk.bf16.mxu1 %vm835_vm0, %v3319_v9  ;;  %v3322_v14 = vld [vmem:[%s3503_s16 + $0x10] sm:$0xff]   ;;  %v3323_v15 = vld [vmem:[%s3508_s19 + $0x28] sm:$0xff]  }
  0x16   : > { %3196 = vmatmul.mubr.msk.bf16.vlgmr.msra.gmra.mrb[0].mxu0 %vm835_vm0, %v3320_v10  ;;  %3236 = vmatmul.mubr.msk.bf16.vlgmr.msra.gmra.mrb[0].mxu1 %vm835_vm0, %v3321_v13  ;;  %v3324_v18 = vld [vmem:[%s3503_s16 + $0x18] sm:$0xff]   ;;  %v3325_v19 = vld [vmem:[%s3508_s19 + $0x30] sm:$0xff]   ;;  %v3326_v20 = vld [vmem:[%s3503_s16 + $0x20] sm:$0xff]  }
  0x17   : > { %3199 = vmatprep.mubr.msk.bf16.mxu0 %vm835_vm0, %v3322_v14  ;;  %3239 = vmatprep.mubr.msk.bf16.mxu1 %vm835_vm0, %v3323_v15  ;;  %v3327_v21 = vld [vmem:[%s3508_s19 + $0x38] sm:$0xff]   ;;  %v797_v23 = vld [vmem:[%s4814_s3 + $0x20] sm:$0xff]  ;;  %v802_v24 = vld [vmem:[%s4814_s3 + $0x48] sm:$0xff] }
  0x18   : > { %1780 = vperm.xlu1 %3316, %v767_v6   ;;  %1775 = vperm.xlu0 %3315, %v766_v7   ;;  %v801_v25 = vld [vmem:[%s4814_s3 + $0x40] sm:$0xff]  ;;  %v3328_v26 = vld [vmem:[%s3503_s16 + $0x28] sm:$0xff]   ;;  %v3330_v28 = vld [vmem:[%s3503_s16 + $0x30] sm:$0xff]  }
  0x19   : > { %v3329_v27 = vld [vmem:[%s3508_s19 + $0x40] sm:$0xff]   ;;  %v3331_v29 = vld [vmem:[%s3508_s19 + $0x48] sm:$0xff]   ;;  %v3332_v34 = vld [vmem:[%s3503_s16 + $0x38] sm:$0xff]  }
  0x1a   : > { %v806_v30 = vld [vmem:[%s4814_s3 + $0x68] sm:$0xff]  ;;  %v805_v31 = vld [vmem:[%s4814_s3 + $0x60] sm:$0xff]  ;;  %v3333_v35 = vld [vmem:[%s3508_s19 + $0x50] sm:$0xff]  }
  0x1b   : > { %v3334_v36 = vld [vmem:[%s3503_s16 + $0x40] sm:$0xff]   ;;  %v3335_v37 = vld [vmem:[%s3508_s19 + $0x58] sm:$0xff]   ;;  %v3336_v42 = vld [vmem:[%s3503_s16 + $0x48] sm:$0xff]  }
  0x1c   : > { %1800 = vperm.xlu1 %3316, %v771_v11   ;;  %1795 = vperm.xlu0 %3315, %v770_v12   ;;  %v3337_v43 = vld [vmem:[%s3508_s19 + $0x60] sm:$0xff]   ;;  %v3338_v44 = vld [vmem:[%s3503_s16 + $0x50] sm:$0xff]   ;;  %v3339_v45 = vld [vmem:[%s3508_s19 + $0x68] sm:$0xff]  }
  0x1d   : > { %v773_v46 = vld [vmem:[%s4813_s2 + $0x78] sm:$0xff]  ;;  %v772_v47 = vld [vmem:[%s4813_s2 + $0x70] sm:$0xff]  ;;  %v3342_v52 = vld [vmem:[%s3503_s16 + $0x60] sm:$0xff]  }
  0x1e   : > { %3200 = vmatmul.mubr.msk.bf16.gmra.mrb[4].mxu0 %vm835_vm0, %v3324_v18  ;;  %3240 = vmatmul.mubr.msk.bf16.gmra.mrb[4].mxu1 %vm835_vm0, %v3325_v19  ;;  %v796_v48 = vld [vmem:[%s4814_s3 + $0x18] sm:$0xff]  ;;  %v795_v49 = vld [vmem:[%s4814_s3 + $0x10] sm:$0xff]  ;;  %v775_v56 = vld [vmem:[%s4813_s2 + $0x88] sm:$0xff] }
  0x1f   : > { %3203 = vmatprep.mubr.msk.bf16.mxu0 %vm835_vm0, %v3326_v20  ;;  %3243 = vmatprep.mubr.msk.bf16.mxu1 %vm835_vm0, %v3327_v21  ;;  %v3340_v50 = vld [vmem:[%s3503_s16 + $0x58] sm:$0xff]   ;;  %v3341_v51 = vld [vmem:[%s3508_s19 + $0x70] sm:$0xff]   ;;  %v774_v57 = vld [vmem:[%s4813_s2 + $0x80] sm:$0xff] }
  0x20   : > { %1910 = vperm.xlu1 %3316, %v794_v16   ;;  %1905 = vperm.xlu0 %3315, %v793_v17   ;;  %v3343_v53 = vld [vmem:[%s3508_s19 + $0x78] sm:$0xff]   ;;  %v799_v55 = vld [vmem:[%s4814_s3 + $0x30] sm:$0xff]  ;;  %v3344_v58 = vld [vmem:[%s3503_s16 + $0x68] sm:$0xff]  }
  0x21   : > { %v800_v54 = vld [vmem:[%s4814_s3 + $0x38] sm:$0xff]  ;;  %v3345_v59 = vld [vmem:[%s3508_s19 + $0x80] sm:$0xff]   ;;  %v3346_v60 = vld [vmem:[%s3503_s16 + $0x70] sm:$0xff]  }
  0x22   : > { %v779_v61 = vld [vmem:[%s4813_s2 + $0xa8] sm:$0xff]  ;;  %v778_v62 = vld [vmem:[%s4813_s2 + $0xa0] sm:$0xff]  ;;  %v804_v63 = vld [vmem:[%s4814_s3 + $0x58] sm:$0xff] }
  0x23   : > { %v803_v0 = vld [vmem:[%s4814_s3 + $0x50] sm:$0xff]  ;;  %v3347_v1 = vld [vmem:[%s3503_s16 + $0x78] sm:$0xff]   ;;  %v3348_v2 = vld [vmem:[%s3503_s16 + $0x80] sm:$0xff]  }
  0x24   : > { %1930 = vperm.xlu1 %3316, %v798_v22   ;;  %1925 = vperm.xlu0 %3315, %v797_v23   ;;  %v808_v3 = vld [vmem:[%s4814_s3 + $0x78] sm:$0xff]  ;;  %v807_v4 = vld [vmem:[%s4814_s3 + $0x70] sm:$0xff]  ;;  %v783_v5 = vld [vmem:[%s4813_s2 + $0xc8] sm:$0xff] }
  0x25   : > { %v782_v6 = vld [vmem:[%s4813_s2 + $0xc0] sm:$0xff]  ;;  %v3350_v8 = vld [vmem:[%s3508_s19 + $0x8] sm:$0xff]   ;;  %v3351_v13 = vld [vmem:[%s3508_s19 + $0x10] sm:$0xff]  }
  0x26   : > { %3204 = vmatmul.mubr.msk.bf16.gmra.mrb[8].mxu0 %vm835_vm0, %v3328_v26  ;;  %3244 = vmatmul.mubr.msk.bf16.gmra.mrb[8].mxu1 %vm835_vm0, %v3329_v27  ;;  %v3349_v7 = vld [vmem:[%s3508_s19] sm:$0xff]   ;;  %v787_v9 = vld [vmem:[%s4813_s2 + $0xe8] sm:$0xff]  ;;  %v777_v20 = vld [vmem:[%s4813_s2 + $0x98] sm:$0xff] }
  0x27   : > { %3207 = vmatprep.mubr.msk.bf16.mxu0 %vm835_vm0, %v3330_v28  ;;  %3247 = vmatprep.mubr.msk.bf16.mxu1 %vm835_vm0, %v3331_v29  ;;  %v786_v10 = vld [vmem:[%s4813_s2 + $0xe0] sm:$0xff]  ;;  %v810_v11 = vld [vmem:[%s4814_s3 + $0x88] sm:$0xff]  ;;  %v776_v21 = vld [vmem:[%s4813_s2 + $0x90] sm:$0xff] }
  0x28   : > { %1950 = vperm.xlu1 %3316, %v802_v24   ;;  %1945 = vperm.xlu0 %3315, %v801_v25   ;;  %v809_v12 = vld [vmem:[%s4814_s3 + $0x80] sm:$0xff]  ;;  %v814_v14 = vld [vmem:[%s4814_s3 + $0xa8] sm:$0xff]  ;;  %v781_v22 = vld [vmem:[%s4813_s2 + $0xb8] sm:$0xff] }
  0x29   : > { %v813_v15 = vld [vmem:[%s4814_s3 + $0xa0] sm:$0xff]  ;;  %v818_v16 = vld [vmem:[%s4814_s3 + $0xc8] sm:$0xff]  ;;  %v780_v23 = vld [vmem:[%s4813_s2 + $0xb0] sm:$0xff] }
  0x2a   : > { %v817_v17 = vld [vmem:[%s4814_s3 + $0xc0] sm:$0xff]  ;;  %v822_v18 = vld [vmem:[%s4814_s3 + $0xe8] sm:$0xff]  ;;  %v785_v24 = vld [vmem:[%s4813_s2 + $0xd8] sm:$0xff] }
  0x2b   : > { %v821_v19 = vld [vmem:[%s4814_s3 + $0xe0] sm:$0xff]  ;;  %v784_v25 = vld [vmem:[%s4813_s2 + $0xd0] sm:$0xff]  ;;  %v789_v26 = vld [vmem:[%s4813_s2 + $0xf8] sm:$0xff] }
  0x2c   : > { %1970 = vperm.xlu1 %3316, %v806_v30   ;;  %1965 = vperm.xlu0 %3315, %v805_v31   ;;  %v788_v27 = vld [vmem:[%s4813_s2 + $0xf0] sm:$0xff]  ;;  %v812_v28 = vld [vmem:[%s4814_s3 + $0x98] sm:$0xff] }
  0x2d   : > { %v811_v29 = vld [vmem:[%s4814_s3 + $0x90] sm:$0xff]  ;;  %v816_v30 = vld [vmem:[%s4814_s3 + $0xb8] sm:$0xff] }
  0x2e   : > { %3208 = vmatmul.mubr.msk.bf16.gmra.mrb[12].mxu0 %vm835_vm0, %v3332_v34  ;;  %3248 = vmatmul.mubr.msk.bf16.gmra.mrb[12].mxu1 %vm835_vm0, %v3333_v35  ;;  %v815_v31 = vld [vmem:[%s4814_s3 + $0xb0] sm:$0xff]  ;;  %v824_v34 = vld [vmem:[%s4814_s3 + $0xf8] sm:$0xff] }
  0x2f   : > { %3211 = vmatprep.mubr.msk.bf16.mxu0 %vm835_vm0, %v3334_v36  ;;  %3251 = vmatprep.mubr.msk.bf16.mxu1 %vm835_vm0, %v3335_v37  ;;  %v823_v35 = vld [vmem:[%s4814_s3 + $0xf0] sm:$0xff]  ;;  %v791_v36 = vld [vmem:[%s4813_s2 + $0x108] sm:$0xff]  ;;  %v790_v37 = vld [vmem:[%s4813_s2 + $0x100] sm:$0xff] }
  0x30   : > { %1750 = vperm.xlu1 %3316, %v761_v32   ;;  %1745 = vperm.xlu0 %3315, %v760_v33   ;;  %v820_v32 = vld [vmem:[%s4814_s3 + $0xd8] sm:$0xff]  ;;  %v819_v33 = vld [vmem:[%s4814_s3 + $0xd0] sm:$0xff] }
  0x34   : > { %1770 = vperm.xlu1 %3316, %v765_v38   ;;  %1765 = vperm.xlu0 %3315, %v764_v39   ;;  %v826_v38 = vld [vmem:[%s4814_s3 + $0x108] sm:$0xff]  ;;  %v825_v39 = vld [vmem:[%s4814_s3 + $0x100] sm:$0xff] }
  0x36   : > { %3212 = vmatmul.mubr.msk.bf16.gmra.mrb[16].mxu0 %vm835_vm0, %v3336_v42  ;;  %3252 = vmatmul.mubr.msk.bf16.gmra.mrb[16].mxu1 %vm835_vm0, %v3337_v43 }
  0x37   : > { %3215 = vmatprep.mubr.msk.bf16.mxu0 %vm835_vm0, %v3338_v44  ;;  %3255 = vmatprep.mubr.msk.bf16.mxu1 %vm835_vm0, %v3339_v45 }
  0x38   : > { %1790 = vperm.xlu1 %3316, %v769_v40   ;;  %1785 = vperm.xlu0 %3315, %v768_v41  }
  0x3c   : > { %1810 = vperm.xlu1 %3316, %v773_v46   ;;  %1805 = vperm.xlu0 %3315, %v772_v47  }
  0x3e   : > { %3216 = vmatmul.mubr.msk.bf16.gmra.mrb[20].mxu0 %vm835_vm0, %v3340_v50  ;;  %3256 = vmatmul.mubr.msk.bf16.gmra.mrb[20].mxu1 %vm835_vm0, %v3341_v51 }
  0x3f   : > { %3219 = vmatprep.mubr.msk.bf16.mxu0 %vm835_vm0, %v3342_v52  ;;  %3259 = vmatprep.mubr.msk.bf16.mxu1 %vm835_vm0, %v3343_v53 }
  0x40   : > { %1920 = vperm.xlu1 %3316, %v796_v48   ;;  %1915 = vperm.xlu0 %3315, %v795_v49  }
  0x44   : > { %1940 = vperm.xlu1 %3316, %v800_v54   ;;  %1935 = vperm.xlu0 %3315, %v799_v55  }
  0x46   : > { %3220 = vmatmul.mubr.msk.bf16.gmra.mrb[24].mxu0 %vm835_vm0, %v3344_v58  ;;  %3260 = vmatmul.mubr.msk.bf16.gmra.mrb[24].mxu1 %vm835_vm0, %v3345_v59 }
  0x47   : > { %3223 = vmatprep.mubr.msk.bf16.mxu0 %vm835_vm0, %v3346_v60 }
  0x48   : > { %1820 = vperm.xlu1 %3316, %v775_v56   ;;  %1815 = vperm.xlu0 %3315, %v774_v57  }
  0x4c   : > { %1840 = vperm.xlu1 %3316, %v779_v61   ;;  %1835 = vperm.xlu0 %3315, %v778_v62  }
  0x4e   : > { %3224 = vmatmul.mubr.msk.bf16.gmra.mrb[28].mxu0 %vm835_vm0, %v3347_v1 }
  0x4f   : > { %3227 = vmatprep.mubr.msk.bf16.mxu0 %vm835_vm0, %v3348_v2 }
  0x50   : > { %1960 = vperm.xlu1 %3316, %v804_v63   ;;  %1955 = vperm.xlu0 %3315, %v803_v0  }
  0x54   : > { %1980 = vperm.xlu1 %3316, %v808_v3   ;;  %1975 = vperm.xlu0 %3315, %v807_v4   ;;  %v2178_v3 = vlaneseq }
  0x56   : > { %3228 = vmatmul.mubr.msk.bf16.gmra.mrb[32].mxu0 %vm835_vm0, %v3349_v7 }
  0x57   : > { %3231 = vmatprep.mubr.msk.bf16.mxu0 %vm835_vm0, %v3350_v8 }
  0x58   : > { %1860 = vperm.xlu1 %3316, %v783_v5   ;;  %1855 = vperm.xlu0 %3315, %v782_v6   ;;  %v3820_v5 = vshrl.u32 %v2178_v3, 7 }
  0x5a   : > { %v2209_v7 = vsub.s32 3, %v3820_v5  ;;  %v2223_v8 = vsub.s32 5, %v3820_v5 }
  0x5c   : > { %1880 = vperm.xlu1 %3316, %v787_v9   ;;  %1875 = vperm.xlu0 %3315, %v786_v10   ;;  %v2187_v9 = vsub.s32 1, %v3820_v5  ;;  %v3830_v10 = vld [vmem:[%s4816_s5] ss:$0 sm:$0xff] }
  0x5e   : > { %3232 = vmatmul.mubr.msk.bf16.gmra.mrb[36].mxu0 %vm835_vm0, %v3351_v13  ;;  %v2180_v13 = vsub.s32 0, %v3820_v5 }
  0x60   : > { %1990 = vperm.xlu1 %3316, %v810_v11   ;;  %1985 = vperm.xlu0 %3315, %v809_v12   ;;  %v3835_v11 = vld [vmem:[%s4818_s7] sm:$0xff]  ;;  %v2244_v12 = vsub.s32 7, %v3820_v5 }
  0x64   : > { %2010 = vperm.xlu1 %3316, %v814_v14   ;;  %2005 = vperm.xlu0 %3315, %v813_v15  }
  0x68   : > { %2030 = vperm.xlu1 %3316, %v818_v16   ;;  %2025 = vperm.xlu0 %3315, %v817_v17   ;;  %v3846_v17 = vld [vmem:[%s4817_s6] ss:$0 sm:$0xff] }
  0x6c   : > { %2050 = vperm.xlu1 %3316, %v822_v18   ;;  %2045 = vperm.xlu0 %3315, %v821_v19   ;;  %v2194_v18 = vsub.s32 2, %v3820_v5 }
  0x6e   : > { %v3875_v3 = vrot.slane %v3835_v11, %v2194_v18 }
  0x70   : > { %1830 = vperm.xlu1 %3316, %v777_v20   ;;  %1825 = vperm.xlu0 %3315, %v776_v21  }
  0x74   : > { %1850 = vperm.xlu1 %3316, %v781_v22   ;;  %1845 = vperm.xlu0 %3315, %v780_v23   ;;  %v3851_v22 = vrot.slane %v3835_v11, %v2209_v7  ;;  %v3854_v23 = vrot.slane %v3835_v11, %v2223_v8 }
  0x78   : > { %1870 = vperm.xlu1 %3316, %v785_v24   ;;  %1865 = vperm.xlu0 %3315, %v784_v25   ;;  %v3857_v24 = vrot.slane %v3835_v11, %v2187_v9 }
  0x7c   : > { %1890 = vperm.xlu1 %3316, %v789_v26   ;;  %1885 = vperm.xlu0 %3315, %v788_v27  }
  0x80   : > { %2000 = vperm.xlu1 %3316, %v812_v28   ;;  %1995 = vperm.xlu0 %3315, %v811_v29   ;;  %v3862_v29 = vrot.slane %v3835_v11, %v2244_v12 }
  0x84   : > { %2020 = vperm.xlu1 %3316, %v816_v30   ;;  %2015 = vperm.xlu0 %3315, %v815_v31   ;;  %v3865_v30 = vrot.slane %v3835_v11, %v2180_v13 }
  0x88   : > { %2040 = vperm.xlu1 %3316, %v820_v32   ;;  %2035 = vperm.xlu0 %3315, %v819_v33  }
  0x8c   : > { %2060 = vperm.xlu1 %3316, %v824_v34   ;;  %2055 = vperm.xlu0 %3315, %v823_v35  }
  0x8f   : > { %v3764_v40 = vpop.permute.xlu1 %1755  ;;  %v3766_v41 = vpop.permute.xlu0 %1735 }
  0x90   : > { %1900 = vperm.xlu1 %3316, %v791_v36   ;;  %1895 = vperm.xlu0 %3315, %v790_v37  }
  0x93   : > { %v3768_v42 = vpop.permute.xlu1 %1760  ;;  %v3770_v43 = vpop.permute.xlu0 %1740 }
  0x94   : > { %2070 = vperm.xlu1 %3316, %v826_v38   ;;  %2065 = vperm.xlu0 %3315, %v825_v39  }
  0x97   : > { %v3772_v44 = vpop.permute.xlu1 %1780  ;;  %v3774_v45 = vpop.permute.xlu0 %1775 }
  0x98   : > { %4839 = vst [vmem:[#allocation2_spill] sm:$0xff] %v3772_v44  ;;  %4840 = vst [vmem:[#allocation3_spill] sm:$0xff] %v3774_v45 }
  0x9b   : > { %v3776_v46 = vpop.permute.xlu1 %1800  ;;  %v3778_v47 = vpop.permute.xlu0 %1795 }
  0x9c   : > { %4841 = vst [vmem:[#allocation4_spill] sm:$0xff] %v3776_v46  ;;  %4842 = vst [vmem:[#allocation5_spill] sm:$0xff] %v3778_v47 }
  0x9f   : > { %v3780_v48 = vpop.permute.xlu1 %1910  ;;  %v3782_v49 = vpop.permute.xlu0 %1905 }
  0xa0   : > { %4843 = vst [vmem:[#allocation6_spill] sm:$0xff] %v3780_v48  ;;  %4844 = vst [vmem:[#allocation7_spill] sm:$0xff] %v3782_v49 }
  0xa3   : > { %v3784_v50 = vpop.permute.xlu1 %1930  ;;  %v3786_v51 = vpop.permute.xlu0 %1925 }
  0xa4   : > { %4845 = vst [vmem:[#allocation8_spill] sm:$0xff] %v3784_v50  ;;  %4846 = vst [vmem:[#allocation9_spill] sm:$0xff] %v3786_v51 }
  0xa7   : > { %v3788_v52 = vpop.permute.xlu1 %1950  ;;  %v3790_v53 = vpop.permute.xlu0 %1945 }
  0xab   : > { %v3792_v54 = vpop.permute.xlu1 %1970  ;;  %v3794_v55 = vpop.permute.xlu0 %1965 }
  0xaf   : > { %v3796_v56 = vpop.permute.xlu1 %1750  ;;  %v3798_v57 = vpop.permute.xlu0 %1745 }
  0xb3   : > { %v3800_v58 = vpop.permute.xlu1 %1770  ;;  %v3802_v59 = vpop.permute.xlu0 %1765 }
  0xb7   : > { %v3804_v60 = vpop.permute.xlu1 %1790  ;;  %v3806_v61 = vpop.permute.xlu0 %1785 }
  0xb8   : > { %4847 = vst [vmem:[#allocation10_spill] sm:$0xff] %v3804_v60 }
  0xbb   : > { %v3808_v62 = vpop.permute.xlu1 %1810  ;;  %v3810_v63 = vpop.permute.xlu0 %1805 }
  0xbc   : > { %4848 = vst [vmem:[#allocation11_spill] sm:$0xff] %v3808_v62  ;;  %4849 = vst [vmem:[#allocation12_spill] sm:$0xff] %v3810_v63 }
  0xbf   : > { %v3812_v0 = vpop.permute.xlu1 %1920  ;;  %v3814_v1 = vpop.permute.xlu0 %1915 }
  0xc0   : > { %4850 = vst [vmem:[#allocation13_spill] sm:$0xff] %v3812_v0  ;;  %4851 = vst [vmem:[#allocation14_spill] sm:$0xff] %v3814_v1 }
  0xc3   : > { %v3816_v2 = vpop.permute.xlu1 %1940  ;;  %v3818_v4 = vpop.permute.xlu0 %1935 }
  0xc7   : > { %v3822_v6 = vpop.permute.xlu1 %1820  ;;  %v3839_v14 = vpop.permute.xlu0 %1815 }
  0xc8   : > { %4852 = vst [vmem:[#allocation15_spill] sm:$0xff] %v3822_v6  ;;  %4853 = vst [vmem:[#allocation16_spill] sm:$0xff] %v3839_v14 }
  0xcb   : > { %v3841_v15 = vpop.permute.xlu1 %1840 }
  0xcc   : > { %4854 = vst [vmem:[#allocation17_spill] sm:$0xff] %v3841_v15 }
  0xe9   : > { %v3197_v16 = vpop.f32.mrb[0].mxu0  ;;  %v3237_v20 = vpop.f32.mrb[0].mxu1 }
  0xea   : > { %v1252_v19 = vmul.f32 %v3197_v16, %v3830_v10  ;;  %v972_v21 = vpop.f32.mrb[1].mxu0  ;;  %v1292_v25 = vmul.f32 %v3237_v20, %v3830_v10  ;;  %v1132_v27 = vpop.f32.mrb[1].mxu1 }
  0xeb   : > { %v1250_v26 = vmul.f32 %v3830_v10, %v972_v21  ;;  %v3198_v28 = vpop.f32.mrb[2].mxu0  ;;  %v1290_v32 = vmul.f32 %v3830_v10, %v1132_v27  ;;  %v3238_v34 = vpop.f32.mrb[2].mxu1 }
  0xec   : > { %v1327_v31 = vadd.f32 %v3846_v17, %v1252_v19  ;;  %v1253_v33 = vmul.f32 %v3198_v28, %v3830_v10  ;;  %v1367_v36 = vadd.f32 %v3846_v17, %v1292_v25  ;;  %v1293_v38 = vmul.f32 %v3238_v34, %v3830_v10  ;;  %v975_v39 = vpop.f32.mrb[3].mxu0  ;;  %v1135_v13 = vpop.f32.mrb[3].mxu1 }
  0xed   : > { %v1325_v37 = vadd.f32 %v3846_v17, %v1250_v26  ;;  %v1365_v8 = vadd.f32 %v3846_v17, %v1290_v32  ;;  %v1251_v12 = vmul.f32 %v3830_v10, %v975_v39  ;;  %v1291_v21 = vmul.f32 %v3830_v10, %v1135_v13  ;;  %v3882_v25 = vpop.permute.xlu0 %1835  ;;  %v3885_v34 = vpop.permute.xlu1 %1960 }
  0xee   : > { %v1395_v7 = vadd.f32 3.0, %v1327_v31  ;;  %v1328_v9 = vadd.f32 %v3846_v17, %v1253_v33  ;;  %v1435_v16 = vadd.f32 3.0, %v1367_v36  ;;  %v1368_v20 = vadd.f32 %v3846_v17, %v1293_v38  ;;  %4855 = vst [vmem:[#allocation18_spill] sm:$0xff] %v3882_v25 }
  0xef   : > { %v1393_v19 = vadd.f32 3.0, %v1325_v37  ;;  %v1433_v27 = vadd.f32 3.0, %v1365_v8  ;;  %v1326_v28 = vadd.f32 %v3846_v17, %v1251_v12  ;;  %v1366_v39 = vadd.f32 %v3846_v17, %v1291_v21 }
  0xf0   : > { %v1463_v26 = vmax.f32 %v1395_v7, 0.0  ;;  %v1396_v18 = vadd.f32 3.0, %v1328_v9  ;;  %v1503_v32 = vmax.f32 %v1435_v16, 0.0  ;;  %v1436_v35 = vadd.f32 3.0, %v1368_v20 }
  0xf1   : > { %v1461_v33 = vmax.f32 %v1393_v19, 0.0  ;;  %v3201_v0 = vpop.f32.mrb[4].mxu0  ;;  %v1501_v50 = vmax.f32 %v1433_v27, 0.0  ;;  %v1394_v51 = vadd.f32 3.0, %v1326_v28  ;;  %v3241_v13 = vpop.f32.mrb[4].mxu1  ;;  %v1434_v25 = vadd.f32 3.0, %v1366_v39 }
  0xf2   : > { %v1531_v1 = vmin.f32 %v1463_v26, 6.0  ;;  %v1464_v38 = vmax.f32 %v1396_v18, 0.0  ;;  %v988_v48 = vpop.f32.mrb[5].mxu0  ;;  %v1571_v49 = vmin.f32 %v1503_v32, 6.0  ;;  %v1504_v15 = vmax.f32 %v1436_v35, 0.0  ;;  %v1148_v6 = vpop.f32.mrb[5].mxu1 }
  0xf3   : > { %v1529_v7 = vmin.f32 %v1461_v33, 6.0  ;;  %v3888_v12 = vpop.f32.mrb[6].mxu0  ;;  %v1569_v16 = vmin.f32 %v1501_v50, 6.0  ;;  %v1462_v46 = vmax.f32 %v1394_v51, 0.0  ;;  %v3890_v62 = vpop.f32.mrb[6].mxu1  ;;  %v1502_v18 = vmax.f32 %v1434_v25, 0.0 }
  0xf4   : > { %v1599_v14 = vmul.f32 %v1531_v1, %v1327_v31  ;;  %v1532_v19 = vmin.f32 %v1464_v38, 6.0  ;;  %v1639_v21 = vmul.f32 %v1571_v49, %v1367_v36  ;;  %v1572_v27 = vmin.f32 %v1504_v15, 6.0  ;;  %v3892_v47 = vpop.f32.mrb[7].mxu0  ;;  %v3894_v44 = vpop.f32.mrb[7].mxu1 }
  0xf5   : > { %v1597_v26 = vmul.f32 %v1529_v7, %v1325_v37  ;;  %v1637_v32 = vmul.f32 %v1569_v16, %v1365_v8  ;;  %v1530_v35 = vmin.f32 %v1462_v46, 6.0  ;;  %v1570_v1 = vmin.f32 %v1502_v18, 6.0  ;;  %v3897_v51 = vpop.permute.xlu0 %1955  ;;  %v3899_v37 = vpop.permute.xlu1 %1980 }
  0xf6   : > { %v1667_v63 = vmul.f32 0.16666667, %v1599_v14  ;;  %v1600_v33 = vmul.f32 %v1532_v19, %v1328_v9  ;;  %v1707_v60 = vmul.f32 0.16666667, %v1639_v21  ;;  %v1640_v45 = vmul.f32 %v1572_v27, %v1368_v20 }
  0xf7   : > { %v2237_v50 = vsub.s32 6, %v3820_v5  ;;  %v1665_v31 = vmul.f32 0.16666667, %v1597_v26  ;;  %v1705_v49 = vmul.f32 0.16666667, %v1637_v32  ;;  %v1598_v15 = vmul.f32 %v1530_v35, %v1326_v28 }
  0xf8   : > { %v1668_v36 = vmul.f32 0.16666667, %v1600_v33  ;;  %v2075_v14 = vmul.f32 %v3798_v57, %v1667_v63  ;;  %v2115_v8 = vmul.f32 %v3790_v53, %v1707_v60  ;;  %v1708_v46 = vmul.f32 0.16666667, %v1640_v45 }
  0xf9   : > { %v1638_v9 = vmul.f32 %v1570_v1, %v1366_v39  ;;  %v3903_v25 = vpop.f32.mrb[8].mxu0  ;;  %v2113_v20 = vmul.f32 %v3818_v4, %v1705_v49  ;;  %v1666_v7 = vmul.f32 0.16666667, %v1598_v15  ;;  %v1256_v16 = vmul.f32 %v3201_v0, %v3830_v10  ;;  %v3908_v19 = vpop.f32.mrb[8].mxu1 }
  0xfa   : > { %v2076_v38 = vmul.f32 %v3796_v56, %v1668_v36  ;;  %v3910_v28 = vpop.f32.mrb[9].mxu0  ;;  %v2116_v21 = vmul.f32 %v3788_v52, %v1708_v46  ;;  %v1296_v53 = vmul.f32 %v3241_v13, %v3830_v10  ;;  %v1254_v45 = vmul.f32 %v3830_v10, %v988_v48  ;;  %v3915_v60 = vpop.f32.mrb[9].mxu1 }
  0xfb   : > { %v1706_v57 = vmul.f32 0.16666667, %v1638_v9  ;;  %v3917_v63 = vpop.f32.mrb[10].mxu0  ;;  %v2073_v56 = vmul.f32 %v3766_v41, %v1665_v31  ;;  %v2074_v0 = vmul.f32 %v3770_v43, %v1666_v7  ;;  %v1331_v39 = vadd.f32 %v3846_v17, %v1256_v16  ;;  %v3922_v26 = vpop.f32.mrb[10].mxu1 }
  0xfc   : > { %v2142_v4 = vpack.c.bf16 %v2076_v38, %v2075_v14  ;;  %v2162_v27 = vpack.c.bf16 %v2116_v21, %v2115_v8  ;;  %v1371_v13 = vadd.f32 %v3846_v17, %v1296_v53  ;;  %v1329_v48 = vadd.f32 %v3846_v17, %v1254_v45  ;;  %v3927_v18 = vpop.f32.mrb[11].mxu0  ;;  %v3929_v32 = vpop.permute.xlu0 %1975 }
  0xfd   : > { %v2114_v52 = vmul.f32 %v3816_v2, %v1706_v57  ;;  %v2141_v35 = vpack.c.bf16 %v2074_v0, %v2073_v56  ;;  %v1294_v43 = vmul.f32 %v3830_v10, %v1148_v6  ;;  %v3932_v1 = vpop.f32.mrb[11].mxu1  ;;  %v1399_v36 = vadd.f32 3.0, %v1331_v39  ;;  %v3940_v9 = vpop.permute.xlu1 %1860 }
  0xfe   : > { %v2206_v33 = vunpack.c.l.bf16 %v2142_v4  ;;  %v2220_v41 = vunpack.c.h.bf16 %v2142_v4  ;;  %v2294_v31 = vunpack.c.l.bf16 %v2162_v27  ;;  %v1439_v15 = vadd.f32 3.0, %v1371_v13  ;;  %4858 = vst [vmem:[#allocation21_spill] sm:$0xff] %v3940_v9 }
  0xff   : > { %v2161_v49 = vpack.c.bf16 %v2114_v52, %v2113_v20  ;;  %v2177_v8 = vunpack.c.l.bf16 %v2141_v35  ;;  %v1397_v46 = vadd.f32 3.0, %v1329_v48  ;;  %v2191_v6 = vunpack.c.h.bf16 %v2141_v35 }
 0x100   : > { %v3935_v2 = vmul.f32 %v3854_v23, %v2206_v33  ;;  %v3938_v14 = vmul.f32 %v3854_v23, %v2220_v41  ;;  %v3943_v38 = vmul.f32 %v3851_v22, %v2206_v33  ;;  %v4860_v7 = vsub.s32 4, %v3820_v5  ;;  %v3974_v41 = vpop.permute.xlu0 %1855 }
 0x101   : > { %v3950_v16 = vpop.f32.mrb[12].mxu0  ;;  %v3953_v21 = vrot.slane %v3835_v11, %v2237_v50  ;;  %v3957_v53 = vmul.f32 %v2294_v31, %v3862_v29  ;;  %v3960_v45 = vmul.f32 %v2294_v31, %v3857_v24  ;;  %v2278_v56 = vunpack.c.l.bf16 %v2161_v49  ;;  %v3962_v4 = vpop.f32.mrb[12].mxu1  ;;  %4864 = vst [vmem:[#allocation26_spill] sm:$0xff] %v3974_v41 }
 0x102   : > { %4856 = vst [vmem:[#allocation19_spill] sm:$0xff] %v3935_v2  ;;  %4857 = vst [vmem:[#allocation20_spill] sm:$0xff] %v3938_v14  ;;  %v3948_v20 = vrot.slane %v3835_v11, %v4860_v7  ;;  %v3964_v5 = vpop.f32.mrb[13].mxu0  ;;  %v3968_v27 = vmul.f32 %v3865_v30, %v2177_v8  ;;  %v1467_v11 = vmax.f32 %v1399_v36, 0.0  ;;  %v1507_v50 = vmax.f32 %v1439_v15, 0.0  ;;  %v3970_v52 = vpop.f32.mrb[13].mxu1 }
 0x103   : > { %4859 = vst [vmem:[#allocation22_spill] sm:$0xff] %v3943_v38  ;;  %4861 = vst [vmem:[#allocation23_spill] sm:$0xff] %v3953_v21  ;;  %v3972_v33 = vpop.f32.mrb[14].mxu0  ;;  %v3977_v35 = vmul.f32 %v3875_v3, %v2177_v8  ;;  %v1465_v31 = vmax.f32 %v1397_v46, 0.0  ;;  %v1369_v49 = vadd.f32 %v3846_v17, %v1294_v43  ;;  %v1257_v7 = vmul.f32 %v3888_v12, %v3830_v10  ;;  %v3982_v57 = vpop.f32.mrb[14].mxu1 }
 0x104   : > { %4862 = vst [vmem:[#allocation24_spill] sm:$0xff] %v3957_v53  ;;  %4863 = vst [vmem:[#allocation25_spill] sm:$0xff] %v3968_v27  ;;  %v3985_v36 = vmul.f32 %v3875_v3, %v2191_v6  ;;  %v1535_v15 = vmin.f32 %v1467_v11, 6.0  ;;  %v1575_v0 = vmin.f32 %v1507_v50, 6.0  ;;  %v1297_v53 = vmul.f32 %v3890_v62, %v3830_v10  ;;  %v3989_v38 = vpop.f32.mrb[15].mxu0  ;;  %v3994_v12 = vpop.f32.mrb[15].mxu1 }
 0x105   : > { %4865 = vst [vmem:[#allocation27_spill] sm:$0xff] %v3977_v35  ;;  %4867 = vst [vmem:[#allocation29_spill] sm:$0xff] %v3989_v38  ;;  %v1533_v8 = vmin.f32 %v1465_v31, 6.0  ;;  %v1437_v27 = vadd.f32 3.0, %v1369_v49  ;;  %v1332_v46 = vadd.f32 %v3846_v17, %v1257_v7  ;;  %v1255_v43 = vmul.f32 %v3830_v10, %v3892_v47  ;;  %v4000_v41 = vpop.permute.xlu1 %1880 }
 0x106   : > { %4866 = vst [vmem:[#allocation28_spill] sm:$0xff] %v3985_v36  ;;  %4868 = vst [vmem:[#allocation30_spill] sm:$0xff] %v3994_v12  ;;  %v1603_v2 = vmul.f32 %v1535_v15, %v1331_v39  ;;  %v1643_v14 = vmul.f32 %v1575_v0, %v1371_v13  ;;  %v1372_v6 = vadd.f32 %v3846_v17, %v1297_v53  ;;  %v4005_v39 = vpop.permute.xlu0 %1875 }
 0x107   : > { %v1295_v11 = vmul.f32 %v3830_v10, %v3894_v44  ;;  %v1601_v50 = vmul.f32 %v1533_v8, %v1329_v48  ;;  %v1505_v62 = vmax.f32 %v1437_v27, 0.0  ;;  %v1400_v9 = vadd.f32 3.0, %v1332_v46  ;;  %4869 = vst [vmem:[#allocation31_spill] sm:$0xff] %v4000_v41  ;;  %4870 = vst [vmem:[#allocation32_spill] sm:$0xff] %v4005_v39 }
 0x108   : > { %v1330_v31 = vadd.f32 %v3846_v17, %v1255_v43  ;;  %v1671_v7 = vmul.f32 0.16666667, %v1603_v2  ;;  %v1711_v21 = vmul.f32 0.16666667, %v1643_v14  ;;  %v1440_v38 = vadd.f32 3.0, %v1372_v6 }
 0x109   : > { %v1370_v47 = vadd.f32 %v3846_v17, %v1295_v11  ;;  %v4003_v12 = vpop.f32.mrb[16].mxu0  ;;  %v4008_v13 = vmul.f32 %v2278_v56, %v3948_v20  ;;  %v1573_v44 = vmin.f32 %v1505_v62, 6.0  ;;  %v1468_v48 = vmax.f32 %v1400_v9, 0.0  ;;  %v4010_v0 = vpop.f32.mrb[16].mxu1 }
 0x10a   : > { %v1398_v53 = vadd.f32 3.0, %v1330_v31  ;;  %4872 = vst [vmem:[#allocation34_spill] sm:$0xff] %v4010_v0  ;;  %v2079_v27 = vmul.f32 %v3802_v59, %v1671_v7  ;;  %v1669_v15 = vmul.f32 0.16666667, %v1601_v50  ;;  %v1508_v2 = vmax.f32 %v1440_v38, 0.0  ;;  %v4013_v8 = vpop.f32.mrb[17].mxu0 }
 0x10b   : > { %4871 = vst [vmem:[#allocation33_spill] sm:$0xff] %v4008_v13  ;;  %v1438_v14 = vadd.f32 3.0, %v1370_v47  ;;  %v4015_v43 = vpop.f32.mrb[17].mxu1  ;;  %v2119_v11 = vmul.f32 %v3794_v55, %v1711_v21  ;;  %v1641_v41 = vmul.f32 %v1573_v44, %v1369_v49  ;;  %v1536_v39 = vmin.f32 %v1468_v48, 6.0  ;;  %v4018_v13 = vpop.f32.mrb[18].mxu0 }
 0x10c   : > { %4873 = vst [vmem:[#allocation35_spill] sm:$0xff] %v4015_v43  ;;  %v1466_v56 = vmax.f32 %v1398_v53, 0.0  ;;  %v4020_v9 = vpop.f32.mrb[18].mxu1  ;;  %v1576_v62 = vmin.f32 %v1508_v2, 6.0  ;;  %v1260_v59 = vmul.f32 %v3903_v25, %v3830_v10  ;;  %v1300_v38 = vmul.f32 %v3908_v19, %v3830_v10  ;;  %v4028_v21 = vpop.f32.mrb[19].mxu0 }
 0x10d   : > { %v1506_v0 = vmax.f32 %v1438_v14, 0.0  ;;  %v1709_v50 = vmul.f32 0.16666667, %v1641_v41  ;;  %v1604_v7 = vmul.f32 %v1536_v39, %v1332_v46  ;;  %v1258_v55 = vmul.f32 %v3830_v10, %v3910_v28  ;;  %4874 = vst [vmem:[#allocation36_spill] sm:$0xff] %v4028_v21  ;;  %v4030_v49 = vpop.f32.mrb[19].mxu1  ;;  %v4038_v46 = vpop.permute.xlu1 %1990 }
 0x10e   : > { %v1534_v43 = vmin.f32 %v1466_v56, 6.0  ;;  %4875 = vst [vmem:[#allocation37_spill] sm:$0xff] %v4030_v49  ;;  %v1644_v44 = vmul.f32 %v1576_v62, %v1372_v6  ;;  %v1335_v53 = vadd.f32 %v3846_v17, %v1260_v59  ;;  %v1375_v2 = vadd.f32 %v3846_v17, %v1300_v38  ;;  %v4040_v28 = vpop.permute.xlu0 %1985 }
 0x10f   : > { %v1574_v48 = vmin.f32 %v1506_v0, 6.0  ;;  %v2077_v25 = vmul.f32 %v3764_v40, %v1669_v15  ;;  %v1672_v14 = vmul.f32 0.16666667, %v1604_v7  ;;  %v4036_v41 = vadd.f32 %v3846_v17, %v1258_v55 }
 0x110   : > { %v1602_v19 = vmul.f32 %v1534_v43, %v1330_v31  ;;  %v1712_v39 = vmul.f32 0.16666667, %v1644_v44  ;;  %v1403_v49 = vadd.f32 3.0, %v1335_v53  ;;  %v1443_v6 = vadd.f32 3.0, %v1375_v2 }
 0x111   : > { %v1642_v56 = vmul.f32 %v1574_v48, %v1370_v47  ;;  %v2117_v0 = vmul.f32 %v3897_v51, %v1709_v50  ;;  %v2080_v62 = vmul.f32 %v3800_v58, %v1672_v14  ;;  %v1401_v40 = vadd.f32 3.0, %v4036_v41  ;;  %v4045_v15 = vpop.f32.mrb[20].mxu0  ;;  %v4047_v31 = vpop.f32.mrb[20].mxu1 }
 0x112   : > { %v1670_v59 = vmul.f32 0.16666667, %v1602_v19  ;;  %4876 = vst [vmem:[#allocation38_spill] sm:$0xff] %v4045_v15  ;;  %4877 = vst [vmem:[#allocation39_spill] sm:$0xff] %v4047_v31  ;;  %v2120_v43 = vmul.f32 %v3792_v54, %v1712_v39  ;;  %v1471_v7 = vmax.f32 %v1403_v49, 0.0  ;;  %v1511_v55 = vmax.f32 %v1443_v6, 0.0 }
 0x113   : > { %v1710_v38 = vmul.f32 0.16666667, %v1642_v56  ;;  %v4050_v47 = vpop.f32.mrb[21].mxu0  ;;  %v4052_v44 = vpop.f32.mrb[21].mxu1  ;;  %v2144_v51 = vpack.c.bf16 %v2080_v62, %v2079_v27  ;;  %v1469_v50 = vmax.f32 %v1401_v40, 0.0  ;;  %v1298_v48 = vmul.f32 %v3830_v10, %v3915_v60 }
 0x114   : > { %4878 = vst [vmem:[#allocation40_spill] sm:$0xff] %v4050_v47  ;;  %4879 = vst [vmem:[#allocation41_spill] sm:$0xff] %v4052_v44  ;;  %v2078_v58 = vmul.f32 %v3768_v42, %v1670_v59  ;;  %v4057_v14 = vpop.f32.mrb[22].mxu0  ;;  %v4059_v19 = vpop.f32.mrb[22].mxu1  ;;  %v2164_v31 = vpack.c.bf16 %v2120_v43, %v2119_v11  ;;  %v1539_v49 = vmin.f32 %v1471_v7, 6.0  ;;  %v1579_v39 = vmin.f32 %v1511_v55, 6.0 }
 0x115   : > { %4880 = vst [vmem:[#allocation42_spill] sm:$0xff] %v4057_v14  ;;  %4881 = vst [vmem:[#allocation43_spill] sm:$0xff] %v4059_v19  ;;  %v2118_v54 = vmul.f32 %v3885_v34, %v1710_v38  ;;  %v4062_v56 = vpop.f32.mrb[23].mxu0  ;;  %v4064_v6 = vpop.f32.mrb[23].mxu1  ;;  %v2275_v42 = vunpack.c.l.bf16 %v2144_v51  ;;  %v2281_v62 = vunpack.c.h.bf16 %v2144_v51  ;;  %v4075_v43 = vld [vmem:[%s4818_s7 + $0x8] ss:$0 sm:$0xff] }
 0x116   : > { %4882 = vst [vmem:[#allocation44_spill] sm:$0xff] %v4062_v56  ;;  %4883 = vst [vmem:[#allocation45_spill] sm:$0xff] %v4064_v6  ;;  %v2143_v59 = vpack.c.bf16 %v2078_v58, %v2077_v25  ;;  %v2339_v40 = vunpack.c.l.bf16 %v2164_v31  ;;  %v1607_v44 = vmul.f32 %v1539_v49, %v1335_v53  ;;  %v4068_v19 = vpop.permute.xlu0 %2005  ;;  %v1647_v7 = vmul.f32 %v1579_v39, %v1375_v2  ;;  %v4079_v25 = vpop.permute.xlu1 %2010 }
 0x117   : > { %v2163_v14 = vpack.c.bf16 %v2118_v54, %v2117_v0  ;;  %v2282_v34 = vmul.f32 %v2275_v42, %v3854_v23  ;;  %v2283_v11 = vmul.f32 %v2281_v62, %v3854_v23  ;;  %v1537_v0 = vmin.f32 %v1469_v50, 6.0 }
 0x118   : > { %v4077_v38 = vunpack.c.l.bf16 %v2143_v59  ;;  %v2248_v55 = vunpack.c.h.bf16 %v2143_v59  ;;  %v1373_v53 = vadd.f32 %v3846_v17, %v1298_v48  ;;  %v1675_v62 = vmul.f32 0.16666667, %v1607_v44 }
 0x119   : > { %v2323_v31 = vunpack.c.l.bf16 %v2163_v14  ;;  %v4082_v51 = vpop.f32.mrb[24].mxu0  ;;  %v2286_v58 = vrot.slane %v2282_v34, 1  ;;  %v2287_v54 = vrot.slane %v2283_v11, 1  ;;  %v4088_v27 = vpop.f32.mrb[24].mxu1  ;;  %v4093_v2 = vmul.f32 %v2275_v42, %v3851_v22 }
 0x11a   : > { %4884 = vst [vmem:[#allocation46_spill] sm:$0xff] %v4077_v38  ;;  %4885 = vst [vmem:[#allocation47_spill] sm:$0xff] %v4082_v51  ;;  %v4086_v49 = vmul.f32 %v4077_v38, %v3875_v3  ;;  %v4090_v60 = vpop.f32.mrb[25].mxu0  ;;  %v4096_v50 = vmul.f32 %v2339_v40, %v3862_v29  ;;  %v4099_v48 = vmul.f32 %v2339_v40, %v3857_v24  ;;  %v4104_v39 = vpop.f32.mrb[25].mxu1  ;;  %v1715_v11 = vmul.f32 0.16666667, %v1647_v7 }
 0x11b   : > { %4887 = vst [vmem:[#allocation49_spill] sm:$0xff] %v4088_v27  ;;  %4888 = vst [vmem:[#allocation50_spill] sm:$0xff] %v4090_v60  ;;  %v4102_v14 = vmul.f32 %v4075_v43, %v2248_v55  ;;  %v4106_v59 = vpop.f32.mrb[26].mxu0  ;;  %v4109_v44 = vsel %vm2200_vm1, %v2286_v58, %v2287_v54  ;;  %v4112_v34 = vmul.f32 %v2248_v55, %v3875_v3  ;;  %v1441_v58 = vadd.f32 3.0, %v1373_v53  ;;  %v4128_v55 = vpop.permute.xlu0 %2025 }
 0x11c   : > { %4886 = vst [vmem:[#allocation48_spill] sm:$0xff] %v4086_v49  ;;  %4889 = vst [vmem:[#allocation51_spill] sm:$0xff] %v4093_v2  ;;  %v4115_v42 = vmul.f32 %v2323_v31, %v3948_v20  ;;  %v4117_v2 = vpop.f32.mrb[26].mxu1  ;;  %v4119_v40 = vpop.f32.mrb[27].mxu0  ;;  %v4123_v35 = vmul.f32 %v3806_v61, %v1675_v62  ;;  %v1605_v36 = vmul.f32 %v1537_v0, %v4036_v41 }
 0x11d   : > { %4890 = vst [vmem:[#allocation52_spill] sm:$0xff] %v4102_v14  ;;  %4891 = vst [vmem:[#allocation53_spill] sm:$0xff] %v4104_v39  ;;  %v4126_v54 = vpop.f32.mrb[27].mxu1  ;;  %v1261_v7 = vmul.f32 %v3917_v63, %v3830_v10  ;;  %v1259_v38 = vmul.f32 %v3830_v10, %v3927_v18  ;;  %v1509_v61 = vmax.f32 %v1441_v58, 0.0  ;;  %v1299_v41 = vmul.f32 %v3830_v10, %v3932_v1  ;;  %v4143_v31 = vpop.permute.xlu1 %2030 }
 0x11e   : > { %4892 = vst [vmem:[#allocation54_spill] sm:$0xff] %v4106_v59  ;;  %4893 = vst [vmem:[#allocation55_spill] sm:$0xff] %v4109_v44  ;;  %v1301_v44 = vmul.f32 %v3922_v26, %v3830_v10  ;;  %v1264_v0 = vmul.f32 %v3950_v16, %v3830_v10  ;;  %v1304_v62 = vmul.f32 %v3962_v4, %v3830_v10  ;;  %v1673_v27 = vmul.f32 0.16666667, %v1605_v36 }
 0x11f   : > { %4894 = vst [vmem:[#allocation56_spill] sm:$0xff] %v4112_v34  ;;  %4895 = vst [vmem:[#allocation57_spill] sm:$0xff] %v4117_v2  ;;  %v4146_v63 = vmul.f32 %v4040_v28, %v1715_v11  ;;  %v1336_v26 = vadd.f32 %v3846_v17, %v1261_v7  ;;  %v1334_v18 = vadd.f32 %v3846_v17, %v1259_v38  ;;  %v1577_v58 = vmin.f32 %v1509_v61, 6.0 }
 0x120   : > { %4896 = vst [vmem:[#allocation58_spill] sm:$0xff] %v4119_v40  ;;  %4897 = vst [vmem:[#allocation59_spill] sm:$0xff] %v4126_v54  ;;  %v1376_v14 = vadd.f32 %v3846_v17, %v1301_v44  ;;  %v1374_v1 = vadd.f32 %v3846_v17, %v1299_v41  ;;  %v1339_v49 = vadd.f32 %v3846_v17, %v1264_v0  ;;  %v4162_v41 = vpop.permute.xlu0 %2045 }
 0x121   : > { %4898 = vst [vmem:[#allocation60_spill] sm:$0xff] %v4143_v31  ;;  %v1379_v16 = vadd.f32 %v3846_v17, %v1304_v62  ;;  %v4154_v54 = vpop.f32.mrb[28].mxu0  ;;  %v1404_v4 = vadd.f32 3.0, %v1336_v26  ;;  %v1402_v2 = vadd.f32 3.0, %v1334_v18  ;;  %v1262_v28 = vmul.f32 %v3830_v10, %v3964_v5  ;;  %4902 = vst [vmem:[#allocation64_spill] sm:$0xff] %v4162_v41 }
 0x122   : > { %4899 = vst [vmem:[#allocation61_spill] sm:$0xff] %v4154_v54  ;;  %v1444_v40 = vadd.f32 3.0, %v1376_v14  ;;  %v4158_v11 = vpop.f32.mrb[29].mxu0  ;;  %v1645_v44 = vmul.f32 %v1577_v58, %v1373_v53  ;;  %v1442_v7 = vadd.f32 3.0, %v1374_v1  ;;  %v1407_v38 = vadd.f32 3.0, %v1339_v49 }
 0x123   : > { %4900 = vst [vmem:[#allocation62_spill] sm:$0xff] %v4158_v11  ;;  %v1447_v61 = vadd.f32 3.0, %v1379_v16  ;;  %v4160_v59 = vpop.f32.mrb[30].mxu0  ;;  %v1472_v0 = vmax.f32 %v1404_v4, 0.0  ;;  %v1470_v39 = vmax.f32 %v1402_v2, 0.0  ;;  %v1337_v54 = vadd.f32 %v3846_v17, %v1262_v28  ;;  %v4167_v11 = vpop.permute.xlu1 %2050 }
 0x124   : > { %4901 = vst [vmem:[#allocation63_spill] sm:$0xff] %v4160_v59  ;;  %v1512_v62 = vmax.f32 %v1444_v40, 0.0  ;;  %v4165_v60 = vpop.f32.mrb[31].mxu0  ;;  %v1510_v51 = vmax.f32 %v1442_v7, 0.0  ;;  %v1475_v5 = vmax.f32 %v1407_v38, 0.0  ;;  %v1302_v7 = vmul.f32 %v3830_v10, %v3970_v52 }
 0x125   : > { %4903 = vst [vmem:[#allocation65_spill] sm:$0xff] %v4165_v60  ;;  %v1515_v6 = vmax.f32 %v1447_v61, 0.0  ;;  %v1540_v53 = vmin.f32 %v1472_v0, 6.0  ;;  %v1538_v56 = vmin.f32 %v1470_v39, 6.0  ;;  %v1405_v31 = vadd.f32 3.0, %v1337_v54  ;;  %v4173_v61 = vpop.permute.xlu0 %1825  ;;  %v4904_v39 = vld [vmem:[#allocation3_spill] sm:$0xff] }
 0x126   : > { %v1580_v58 = vmin.f32 %v1512_v62, 6.0  ;;  %v1713_v59 = vmul.f32 0.16666667, %v1645_v44  ;;  %v1578_v47 = vmin.f32 %v1510_v51, 6.0  ;;  %v1543_v41 = vmin.f32 %v1475_v5, 6.0 }
 0x127   : > { %v1583_v4 = vmin.f32 %v1515_v6, 6.0  ;;  %v1608_v40 = vmul.f32 %v1540_v53, %v1336_v26  ;;  %v1606_v15 = vmul.f32 %v1538_v56, %v1334_v18  ;;  %v1473_v28 = vmax.f32 %v1405_v31, 0.0  ;;  %v4905_v31 = vld [vmem:[#allocation10_spill] sm:$0xff] }
 0x128   : > { %v1648_v2 = vmul.f32 %v1580_v58, %v1376_v14  ;;  %v1646_v21 = vmul.f32 %v1578_v47, %v1374_v1  ;;  %v1611_v60 = vmul.f32 %v1543_v41, %v1339_v49  ;;  %v2081_v0 = vmul.f32 %v4904_v39, %v1673_v27  ;;  %v4178_v49 = vpop.permute.xlu1 %1830  ;;  %v4906_v18 = vld [vmem:[#allocation2_spill] sm:$0xff] }
 0x129   : > { %v1651_v36 = vmul.f32 %v1583_v4, %v1379_v16  ;;  %v4171_v38 = vpop.f32.mrb[32].mxu0  ;;  %v1676_v44 = vmul.f32 0.16666667, %v1608_v40  ;;  %v1674_v62 = vmul.f32 0.16666667, %v1606_v15  ;;  %v2121_v6 = vmul.f32 %v3929_v32, %v1713_v59  ;;  %v4909_v40 = vld [vmem:[#allocation12_spill] sm:$0xff] }
 0x12a   : > { %v1716_v51 = vmul.f32 0.16666667, %v1648_v2  ;;  %v1714_v14 = vmul.f32 0.16666667, %v1646_v21  ;;  %v1679_v56 = vmul.f32 0.16666667, %v1611_v60  ;;  %v1377_v47 = vadd.f32 %v3846_v17, %v1302_v7 }
 0x12b   : > { %v2084_v26 = vmul.f32 %v4905_v31, %v1676_v44  ;;  %v2082_v1 = vmul.f32 %v4906_v18, %v1674_v62  ;;  %v1541_v16 = vmin.f32 %v1473_v28, 6.0  ;;  %v4183_v41 = vpop.f32.mrb[33].mxu0  ;;  %v1719_v15 = vmul.f32 0.16666667, %v1651_v36  ;;  %v4196_v28 = vpop.permute.xlu0 %1845 }
 0x12c   : > { %v2124_v52 = vmul.f32 %v4038_v46, %v1716_v51  ;;  %4907 = vst [vmem:[#allocation3_spill] sm:$0xff] %v4183_v41  ;;  %v2122_v27 = vmul.f32 %v3899_v37, %v1714_v14  ;;  %v1445_v5 = vadd.f32 3.0, %v1377_v47  ;;  %v1265_v32 = vmul.f32 %v3972_v33, %v3830_v10  ;;  %v4188_v21 = vpop.f32.mrb[34].mxu0 }
 0x12d   : > { %4908 = vst [vmem:[#allocation10_spill] sm:$0xff] %v4188_v21  ;;  %v2146_v60 = vpack.c.bf16 %v2084_v26, %v4123_v35  ;;  %v2145_v53 = vpack.c.bf16 %v2082_v1, %v2081_v0  ;;  %v1609_v46 = vmul.f32 %v1541_v16, %v1337_v54  ;;  %v4194_v2 = vmul.f32 %v4909_v40, %v1679_v56  ;;  %v4206_v0 = vpop.permute.xlu1 %1850  ;;  %v4915_v40 = vld [vmem:[#allocation5_spill] sm:$0xff]  ;;  %v4921_v21 = vld [vmem:[#allocation11_spill] sm:$0xff] }
 0x12e   : > { %v2166_v59 = vpack.c.bf16 %v2124_v52, %v4146_v63  ;;  %v2165_v4 = vpack.c.bf16 %v2122_v27, %v2121_v6  ;;  %v1513_v37 = vmax.f32 %v1445_v5, 0.0  ;;  %v4201_v35 = vmul.f32 %v4068_v19, %v1719_v15  ;;  %v4217_v52 = vpop.f32.mrb[35].mxu0  ;;  %v3352_v15 = vld [vmem:[%s4821_s10] sm:$0xff]  }
 0x12f   : > { %v2320_v36 = vunpack.c.l.bf16 %v2146_v60  ;;  %v2326_v7 = vunpack.c.h.bf16 %v2146_v60  ;;  %v4198_v39 = vunpack.c.l.bf16 %v2145_v53  ;;  %v2297_v44 = vunpack.c.h.bf16 %v2145_v53  ;;  %4911 = vst [vmem:[#allocation12_spill] sm:$0xff] %v4217_v52  ;;  %3263 = vmatprep.subr.bf16.mxu1 %v3352_v15 }
 0x130   : > { %v2384_v33 = vunpack.c.l.bf16 %v2166_v59  ;;  %v1340_v54 = vadd.f32 %v3846_v17, %v1265_v32  ;;  %v1305_v63 = vmul.f32 %v3982_v57, %v3830_v10  ;;  %v1677_v6 = vmul.f32 0.16666667, %v1609_v46  ;;  %v4237_v46 = vpop.permute.xlu0 %1865  ;;  %3264 = vmatpush3.bf16.msra.mxu1 %v3352_v15 }
 0x131   : > { %4910 = vst [vmem:[#allocation2_spill] sm:$0xff] %v4198_v39  ;;  %v2327_v51 = vmul.f32 %v2320_v36, %v3854_v23  ;;  %v2328_v62 = vmul.f32 %v2326_v7, %v3854_v23  ;;  %v1581_v14 = vmin.f32 %v1513_v37, 6.0  ;;  %v2321_v56 = vmul.f32 %v2320_v36, %v3851_v22  ;;  %v4223_v27 = vpop.f32.mrb[36].mxu0 }
 0x132   : > { %v2307_v31 = vmul.f32 %v4198_v39, %v3865_v30  ;;  %v2311_v19 = vmul.f32 %v4198_v39, %v3875_v3  ;;  %v4215_v26 = vunpack.c.l.bf16 %v2165_v4  ;;  %v4220_v1 = vmul.f32 %v2384_v33, %v3862_v29  ;;  %4912 = vst [vmem:[#allocation66_spill] sm:$0xff] %v4223_v27  ;;  %v4235_v53 = vpop.f32.mrb[37].mxu0 }
 0x133   : > { %v2331_v57 = vrot.slane %v2327_v51, 1  ;;  %v2332_v18 = vrot.slane %v2328_v62, 1  ;;  %v2312_v16 = vmul.f32 %v2297_v44, %v3875_v3  ;;  %v4229_v5 = vmul.f32 %v2384_v33, %v3857_v24  ;;  %4914 = vst [vmem:[#allocation68_spill] sm:$0xff] %v4235_v53  ;;  %v4242_v51 = vpop.f32.mrb[38].mxu0 }
 0x134   : > { %v4232_v32 = vmul.f32 %v4075_v43, %v2297_v44  ;;  %v2310_v60 = vadd.f32 %v3960_v45, %v2307_v31  ;;  %v2315_v59 = vrot.slane %v2311_v19, 1  ;;  %v4240_v37 = vmul.f32 %v4915_v40, %v1677_v6  ;;  %4916 = vst [vmem:[#allocation5_spill] sm:$0xff] %v4242_v51  ;;  %v4917_v44 = vld [vmem:[#allocation29_spill] sm:$0xff]  ;;  %v4918_v45 = vld [vmem:[#allocation30_spill] sm:$0xff] }
 0x135   : > { %v2316_v4 = vrot.slane %v2312_v16, 1  ;;  %v1649_v36 = vmul.f32 %v1581_v14, %v1377_v47  ;;  %v1408_v7 = vadd.f32 3.0, %v1340_v54  ;;  %v1380_v33 = vadd.f32 %v3846_v17, %v1305_v63  ;;  %v4251_v16 = vpop.permute.xlu1 %1870  ;;  %v4919_v40 = vld [vmem:[#allocation34_spill] sm:$0xff] }
 0x136   : > { %4913 = vst [vmem:[#allocation67_spill] sm:$0xff] %v4232_v32  ;;  %v1263_v62 = vmul.f32 %v3830_v10, %v4917_v44  ;;  %v1303_v31 = vmul.f32 %v3830_v10, %v4918_v45  ;;  %v1268_v19 = vmul.f32 %v4003_v12, %v3830_v10  ;;  %v2333_v47 = vsel %vm2200_vm1, %v2331_v57, %v2332_v18 }
 0x137   : > { %v2317_v6 = vsel %vm2200_vm1, %v2315_v59, %v2316_v4  ;;  %v1476_v14 = vmax.f32 %v1408_v7, 0.0  ;;  %v1308_v63 = vmul.f32 %v4919_v40, %v3830_v10  ;;  %v1448_v39 = vadd.f32 3.0, %v1380_v33  ;;  %v4261_v4 = vpop.permute.xlu0 %1885 }
 0x138   : > { %v2319_v58 = vadd.f32 %v2317_v6, %v2310_v60  ;;  %v1338_v44 = vadd.f32 %v3846_v17, %v1263_v62  ;;  %v1378_v45 = vadd.f32 %v3846_v17, %v1303_v31  ;;  %v1717_v34 = vmul.f32 0.16666667, %v1649_v36  ;;  %4920 = vst [vmem:[#allocation29_spill] sm:$0xff] %v4261_v4 }
 0x139   : > { %v1544_v51 = vmin.f32 %v1476_v14, 6.0  ;;  %v1343_v12 = vadd.f32 %v3846_v17, %v1268_v19  ;;  %v1383_v15 = vadd.f32 %v3846_v17, %v1308_v63  ;;  %v1516_v57 = vmax.f32 %v1448_v39, 0.0  ;;  %v4266_v19 = vpop.permute.xlu1 %1890 }
 0x13a   : > { %v2322_v53 = vadd.f32 %v2321_v56, %v2319_v58  ;;  %v1406_v18 = vadd.f32 3.0, %v1338_v44  ;;  %v1446_v59 = vadd.f32 3.0, %v1378_v45  ;;  %v1266_v62 = vmul.f32 %v3830_v10, %v4013_v8 }
 0x13b   : > { %v1612_v7 = vmul.f32 %v1544_v51, %v1340_v54  ;;  %v1411_v40 = vadd.f32 3.0, %v1343_v12  ;;  %v1451_v60 = vadd.f32 3.0, %v1383_v15  ;;  %v1584_v36 = vmin.f32 %v1516_v57, 6.0 }
 0x13c   : > { %v2325_v31 = vadd.f32 %v4115_v42, %v2322_v53  ;;  %v1474_v6 = vmax.f32 %v1406_v18, 0.0  ;;  %v1514_v14 = vmax.f32 %v1446_v59, 0.0  ;;  %v1341_v56 = vadd.f32 %v3846_v17, %v1266_v62  ;;  %v4922_v59 = vld [vmem:[#allocation35_spill] sm:$0xff] }
 0x13d   : > { %v1680_v63 = vmul.f32 0.16666667, %v1612_v7  ;;  %v1479_v58 = vmax.f32 %v1411_v40, 0.0  ;;  %v1519_v39 = vmax.f32 %v1451_v60, 0.0  ;;  %v1652_v27 = vmul.f32 %v1584_v36, %v1380_v33  ;;  %v1996_v40 = vpop.permute.xlu0 %1995 }
 0x13e   : > { %v1542_v52 = vmin.f32 %v1474_v6, 6.0  ;;  %v4269_v54 = vadd.f32 %v2333_v47, %v2325_v31  ;;  %v1582_v51 = vmin.f32 %v1514_v14, 6.0  ;;  %v1409_v42 = vadd.f32 3.0, %v1341_v56  ;;  %v4275_v47 = vpop.f32.mrb[39].mxu0  ;;  %v2001_v31 = vpop.permute.xlu1 %2000  ;;  %v4923_v6 = vld [vmem:[#allocation4_spill] sm:$0xff] }
 0x13f   : > { %v2088_v4 = vmul.f32 %v4921_v21, %v1680_v63  ;;  %v1547_v8 = vmin.f32 %v1479_v58, 6.0  ;;  %v1587_v41 = vmin.f32 %v1519_v39, 6.0  ;;  %v1720_v53 = vmul.f32 0.16666667, %v1652_v27  ;;  %v3353_v21 = vld [vmem:[%s4821_s10 + $0x8] sm:$0xff]  }
 0x140   : > { %v1610_v57 = vmul.f32 %v1542_v52, %v1338_v44  ;;  %v1650_v18 = vmul.f32 %v1582_v51, %v1378_v45  ;;  %v1306_v7 = vmul.f32 %v3830_v10, %v4922_v59  ;;  %v1477_v36 = vmax.f32 %v1409_v42, 0.0  ;;  %v3354_v52 = vld [vmem:[%s4821_s10 + $0x10] sm:$0xff]   ;;  %3265 = vmatprep.subr.bf16.mxu1 %v3353_v21 }
 0x141   : > { %v2148_v60 = vpack.c.bf16 %v2088_v4, %v4194_v2  ;;  %v1615_v62 = vmul.f32 %v1547_v8, %v1343_v12  ;;  %v1655_v33 = vmul.f32 %v1587_v41, %v1383_v15  ;;  %v2125_v27 = vmul.f32 %v1996_v40, %v1717_v34  ;;  %3266 = vmatpush3.bf16.msra.mxu1 %v3353_v21  ;;  %v3356_v21 = vld [vmem:[%s4821_s10 + $0x20] sm:$0xff]  }
 0x142   : > { %v2128_v44 = vmul.f32 %v4079_v25, %v1720_v53  ;;  %v1678_v10 = vmul.f32 0.16666667, %v1610_v57  ;;  %v1718_v45 = vmul.f32 0.16666667, %v1650_v18  ;;  %v1381_v15 = vadd.f32 %v3846_v17, %v1306_v7  ;;  %3267 = vmatprep.subr.bf16.mxu1 %v3354_v52  ;;  %v3355_v17 = vld [vmem:[%s4821_s10 + $0x18] sm:$0xff]  }
 0x143   : > { %v2365_v2 = vunpack.c.l.bf16 %v2148_v60  ;;  %v2371_v12 = vunpack.c.h.bf16 %v2148_v60  ;;  %v1683_v41 = vmul.f32 0.16666667, %v1615_v62  ;;  %v1545_v58 = vmin.f32 %v1477_v36, 6.0 }
 0x144   : > { %v2168_v4 = vpack.c.bf16 %v2128_v44, %v4201_v35  ;;  %v2086_v14 = vmul.f32 %v4923_v6, %v1678_v10  ;;  %v2126_v63 = vmul.f32 %v2001_v31, %v1718_v45  ;;  %v4289_v34 = vmul.f32 %v4215_v26, %v3948_v20 }
 0x145   : > { %v2372_v25 = vmul.f32 %v2365_v2, %v3854_v23  ;;  %v2373_v39 = vmul.f32 %v2371_v12, %v3854_v23  ;;  %v1723_v51 = vmul.f32 0.16666667, %v1655_v33  ;;  %v1613_v18 = vmul.f32 %v1545_v58, %v1341_v56  ;;  %3268 = vmatpush3.bf16.msra.mxu1 %v3354_v52 }
 0x146   : > { %v4297_v8 = vunpack.c.l.bf16 %v2168_v4  ;;  %v2147_v42 = vpack.c.bf16 %v2086_v14, %v4240_v37  ;;  %v2167_v53 = vpack.c.bf16 %v2126_v63, %v2125_v27  ;;  %v1449_v59 = vadd.f32 3.0, %v1381_v15  ;;  %3269 = vmatprep.subr.bf16.mxu1 %v3355_v17  ;;  %v4925_v27 = vld [vmem:[#allocation23_spill] sm:$0xff] }
 0x147   : > { %v2376_v57 = vrot.slane %v2372_v25, 1  ;;  %v2377_v26 = vrot.slane %v2373_v39, 1  ;;  %v2366_v7 = vmul.f32 %v2365_v2, %v3851_v22  ;;  %v4302_v62 = vmul.f32 %v4173_v61, %v1683_v41  ;;  %v4330_v25 = vld [vmem:[%s4816_s5] ss:$0 sm:$0xff] }
 0x148   : > { %v2336_v40 = vunpack.c.l.bf16 %v2147_v42  ;;  %v2342_v60 = vunpack.c.h.bf16 %v2147_v42  ;;  %v4309_v36 = vmul.f32 %v4297_v8, %v3862_v29  ;;  %v4312_v37 = vmul.f32 %v4128_v55, %v1723_v51  ;;  %v4926_v42 = vld [vmem:[#allocation36_spill] sm:$0xff] }
 0x149   : > { %v4305_v33 = vsel %vm2200_vm1, %v2376_v57, %v2377_v26  ;;  %v1517_v56 = vmax.f32 %v1449_v59, 0.0  ;;  %v4323_v55 = vunpack.c.l.bf16 %v2167_v53  ;;  %v1681_v2 = vmul.f32 0.16666667, %v1613_v18  ;;  %3270 = vmatpush3.bf16.msra.mxu1 %v3355_v17  ;;  %v4927_v59 = vld [vmem:[#allocation37_spill] sm:$0xff] }
 0x14a   : > { %4924 = vst [vmem:[#allocation30_spill] sm:$0xff] %v4309_v36  ;;  %v2337_v61 = vmul.f32 %v2336_v40, %v4925_v27  ;;  %v2343_v52 = vmul.f32 %v4075_v43, %v2336_v40  ;;  %v2344_v44 = vmul.f32 %v4075_v43, %v2342_v60  ;;  %v2352_v10 = vmul.f32 %v2336_v40, %v3865_v30 }
 0x14b   : > { %v2356_v45 = vmul.f32 %v2336_v40, %v3875_v3  ;;  %v2357_v31 = vmul.f32 %v2342_v60, %v3875_v3  ;;  %v1585_v58 = vmin.f32 %v1517_v56, 6.0  ;;  %v1269_v39 = vmul.f32 %v4330_v25, %v4018_v13  ;;  %3271 = vmatprep.subr.bf16.mxu1 %v3356_v21  ;;  %v4347_v13 = vld [vmem:[%s4817_s6] ss:$0 sm:$0xff] }
 0x14c   : > { %v2338_v12 = vadd.f32 %v2337_v61, %v4269_v54  ;;  %v2347_v41 = vrot.slane %v2343_v52, 1  ;;  %v2348_v4 = vrot.slane %v2344_v44, 1  ;;  %v2355_v6 = vadd.f32 %v4099_v48, %v2352_v10  ;;  %v3357_v54 = vld [vmem:[%s4821_s10 + $0x28] sm:$0xff]   ;;  %v4928_v61 = vld [vmem:[#allocation16_spill] sm:$0xff]  ;;  %v4929_v10 = vld [vmem:[#allocation38_spill] sm:$0xff] }
 0x14d   : > { %v2360_v14 = vrot.slane %v2356_v45, 1  ;;  %v2361_v63 = vrot.slane %v2357_v31, 1  ;;  %v1309_v17 = vmul.f32 %v4330_v25, %v4020_v9  ;;  %v1267_v53 = vmul.f32 %v4330_v25, %v4926_v42  ;;  %3272 = vmatpush3.bf16.msra.mxu1 %v3356_v21  ;;  %v3358_v31 = vld [vmem:[%s4821_s10 + $0x30] sm:$0xff]  }
 0x14e   : > { %v2341_v51 = vadd.f32 %v4096_v50, %v2338_v12  ;;  %v2349_v48 = vsel %vm2200_vm1, %v2347_v41, %v2348_v4  ;;  %v1653_v26 = vmul.f32 %v1585_v58, %v1381_v15  ;;  %v1344_v18 = vadd.f32 %v4347_v13, %v1269_v39  ;;  %3273 = vmatprep.subr.bf16.mxu1 %v3357_v54 }
 0x14f   : > { %v2362_v57 = vsel %vm2200_vm1, %v2360_v14, %v2361_v63  ;;  %v1307_v50 = vmul.f32 %v4330_v25, %v4927_v59  ;;  %v1384_v9 = vadd.f32 %v4347_v13, %v1309_v17  ;;  %v1342_v56 = vadd.f32 %v4347_v13, %v1267_v53 }
 0x150   : > { %v4352_v40 = vadd.f32 %v2349_v48, %v2341_v51  ;;  %v2364_v60 = vadd.f32 %v2362_v57, %v2355_v6  ;;  %v4357_v15 = vmul.f32 %v4928_v61, %v1681_v2  ;;  %v1412_v52 = vadd.f32 3.0, %v1344_v18  ;;  %v4930_v6 = vld [vmem:[#allocation39_spill] sm:$0xff]  ;;  %v4931_v57 = vld [vmem:[#allocation40_spill] sm:$0xff] }
 0x151   : > { %v1382_v44 = vadd.f32 %v4347_v13, %v1307_v50  ;;  %v1272_v45 = vmul.f32 %v4330_v25, %v4929_v10  ;;  %v1452_v41 = vadd.f32 3.0, %v1384_v9  ;;  %v1410_v4 = vadd.f32 3.0, %v1342_v56  ;;  %3274 = vmatpush3.bf16.msra.mxu1 %v3357_v54 }
 0x152   : > { %v2367_v12 = vadd.f32 %v2366_v7, %v2364_v60  ;;  %v1312_v21 = vmul.f32 %v4330_v25, %v4930_v6  ;;  %v1721_v14 = vmul.f32 0.16666667, %v1653_v26  ;;  %v1480_v2 = vmax.f32 %v1412_v52, 0.0  ;;  %3275 = vmatprep.subr.bf16.mxu1 %v3358_v31  ;;  %v3359_v26 = vld [vmem:[%s4821_s10 + $0x38] sm:$0xff]  }
 0x153   : > { %v1450_v63 = vadd.f32 3.0, %v1382_v44  ;;  %v1347_v58 = vadd.f32 %v4347_v13, %v1272_v45  ;;  %v1520_v51 = vmax.f32 %v1452_v41, 0.0  ;;  %v1478_v48 = vmax.f32 %v1410_v4, 0.0  ;;  %v4932_v6 = vld [vmem:[#allocation41_spill] sm:$0xff] }
 0x154   : > { %v2370_v39 = vadd.f32 %v4289_v34, %v2367_v12  ;;  %v1387_v17 = vadd.f32 %v4347_v13, %v1312_v21  ;;  %v1548_v42 = vmin.f32 %v1480_v2, 6.0  ;;  %v1270_v59 = vmul.f32 %v4330_v25, %v4931_v57 }
 0x155   : > { %v1518_v53 = vmax.f32 %v1450_v63, 0.0  ;;  %v1415_v7 = vadd.f32 3.0, %v1347_v58  ;;  %v1588_v50 = vmin.f32 %v1520_v51, 6.0  ;;  %v1546_v60 = vmin.f32 %v1478_v48, 6.0  ;;  %3276 = vmatpush3.bf16.msra.mxu1 %v3358_v31 }
 0x156   : > { %v2380_v34 = vadd.f32 %v4305_v33, %v2370_v39  ;;  %v1455_v61 = vadd.f32 3.0, %v1387_v17  ;;  %v1616_v52 = vmul.f32 %v1548_v42, %v1344_v18  ;;  %v4377_v54 = vadd.f32 %v4347_v13, %v1270_v59  ;;  %3277 = vmatprep.subr.bf16.mxu1 %v3359_v26  ;;  %v2016_v33 = vpop.permute.xlu0 %2015  ;;  %v2021_v59 = vpop.permute.xlu1 %2020 }
 0x157   : > { %v1586_v10 = vmin.f32 %v1518_v53, 6.0  ;;  %v1483_v45 = vmax.f32 %v1415_v7, 0.0  ;;  %v1656_v12 = vmul.f32 %v1588_v50, %v1384_v9  ;;  %v1614_v41 = vmul.f32 %v1546_v60, %v1342_v56  ;;  %v4933_v50 = vld [vmem:[#allocation60_spill] sm:$0xff]  ;;  %v4934_v60 = vld [vmem:[#allocation15_spill] sm:$0xff] }
 0x158   : > { %v1523_v4 = vmax.f32 %v1455_v61, 0.0  ;;  %v1310_v21 = vmul.f32 %v4330_v25, %v4932_v6  ;;  %v1684_v2 = vmul.f32 0.16666667, %v1616_v52  ;;  %v1413_v48 = vadd.f32 3.0, %v4377_v54 }
 0x159   : > { %v1654_v63 = vmul.f32 %v1586_v10, %v1382_v44  ;;  %v1551_v51 = vmin.f32 %v1483_v45, 6.0  ;;  %v1724_v18 = vmul.f32 0.16666667, %v1656_v12  ;;  %v1682_v39 = vmul.f32 0.16666667, %v1614_v41  ;;  %3278 = vmatpush3.bf16.msra.mxu1 %v3359_v26 }
 0x15a   : > { %v1591_v42 = vmin.f32 %v1523_v4, 6.0  ;;  %v1385_v53 = vadd.f32 %v4347_v13, %v1310_v21  ;;  %v2129_v7 = vmul.f32 %v2016_v33, %v1721_v14  ;;  %v2092_v9 = vmul.f32 %v4178_v49, %v1684_v2 }
 0x15b   : > { %v1722_v56 = vmul.f32 0.16666667, %v1654_v63  ;;  %v1619_v57 = vmul.f32 %v1551_v51, %v1347_v58  ;;  %v2132_v31 = vmul.f32 %v4933_v50, %v1724_v18  ;;  %v2090_v44 = vmul.f32 %v4934_v60, %v1682_v39  ;;  %v4935_v39 = vld [vmem:[#allocation64_spill] sm:$0xff] }
 0x15c   : > { %v1659_v61 = vmul.f32 %v1591_v42, %v1387_v17  ;;  %v1481_v52 = vmax.f32 %v1413_v48, 0.0  ;;  %v2150_v10 = vpack.c.bf16 %v2092_v9, %v4302_v62  ;;  %v1453_v41 = vadd.f32 3.0, %v1385_v53 }
 0x15d   : > { %v2130_v45 = vmul.f32 %v2021_v59, %v1722_v56  ;;  %v1687_v12 = vmul.f32 0.16666667, %v1619_v57  ;;  %v4389_v14 = vmul.f32 %v4297_v8, %v3857_v24  ;;  %v2170_v49 = vpack.c.bf16 %v2132_v31, %v4312_v37 }
 0x15e   : > { %v2149_v58 = vpack.c.bf16 %v2090_v44, %v4357_v15  ;;  %v1727_v4 = vmul.f32 0.16666667, %v1659_v61  ;;  %v4395_v6 = vmul.f32 %v4323_v55, %v3948_v20  ;;  %v2410_v17 = vunpack.c.l.bf16 %v2150_v10 }
 0x15f   : > { %v2416_v26 = vunpack.c.h.bf16 %v2150_v10  ;;  %v2169_v21 = vpack.c.bf16 %v2130_v45, %v2129_v7  ;;  %v2474_v62 = vunpack.c.l.bf16 %v2170_v49  ;;  %v1549_v51 = vmin.f32 %v1481_v52, 6.0 }
 0x160   : > { %v2381_v2 = vunpack.c.l.bf16 %v2149_v58  ;;  %v2387_v63 = vunpack.c.h.bf16 %v2149_v58  ;;  %v2417_v48 = vmul.f32 %v2410_v17, %v3854_v23  ;;  %v4400_v37 = vmul.f32 %v4196_v28, %v1687_v12 }
 0x161   : > { %v2418_v8 = vmul.f32 %v2416_v26, %v3854_v23  ;;  %v1521_v15 = vmax.f32 %v1453_v41, 0.0  ;;  %v2411_v33 = vmul.f32 %v2410_v17, %v3851_v22  ;;  %v4406_v42 = vmul.f32 %v4935_v39, %v1727_v4  ;;  %v4938_v17 = vld [vmem:[#allocation43_spill] sm:$0xff] }
 0x162   : > { %v2382_v55 = vmul.f32 %v2381_v2, %v4925_v27  ;;  %v2388_v18 = vmul.f32 %v4075_v43, %v2381_v2  ;;  %v4409_v7 = vmul.f32 %v2474_v62, %v3862_v29  ;;  %v2389_v9 = vmul.f32 %v4075_v43, %v2387_v63 }
 0x163   : > { %v2397_v56 = vmul.f32 %v2381_v2, %v3865_v30  ;;  %v4413_v57 = vunpack.c.l.bf16 %v2169_v21  ;;  %v2401_v50 = vmul.f32 %v2381_v2, %v3875_v3  ;;  %v2402_v31 = vmul.f32 %v2387_v63, %v3875_v3 }
 0x164   : > { %4936 = vst [vmem:[#allocation34_spill] sm:$0xff] %v4409_v7  ;;  %v2383_v28 = vadd.f32 %v2382_v55, %v2380_v34  ;;  %v2392_v59 = vrot.slane %v2388_v18, 1  ;;  %v2421_v60 = vrot.slane %v2417_v48, 1  ;;  %v2422_v44 = vrot.slane %v2418_v8, 1  ;;  %v4937_v34 = vld [vmem:[#allocation42_spill] sm:$0xff]  ;;  %v4941_v18 = vld [vmem:[#allocation45_spill] sm:$0xff] }
 0x165   : > { %v2393_v61 = vrot.slane %v2389_v9, 1  ;;  %v2400_v52 = vadd.f32 %v4229_v5, %v2397_v56  ;;  %v2405_v45 = vrot.slane %v2401_v50, 1  ;;  %v2406_v12 = vrot.slane %v2402_v31, 1  ;;  %v4939_v5 = vld [vmem:[#allocation44_spill] sm:$0xff]  ;;  %v4942_v9 = vld [vmem:[#allocation47_spill] sm:$0xff] }
 0x166   : > { %v2386_v10 = vadd.f32 %v4220_v1, %v2383_v28  ;;  %v1617_v41 = vmul.f32 %v1549_v51, %v4377_v54  ;;  %v1589_v58 = vmin.f32 %v1521_v15, 6.0  ;;  %v1273_v4 = vmul.f32 %v4330_v25, %v4937_v34  ;;  %v4433_v54 = vpop.permute.xlu0 %2035 }
 0x167   : > { %v2394_v49 = vsel %vm2200_vm1, %v2392_v59, %v2393_v61  ;;  %v1313_v26 = vmul.f32 %v4330_v25, %v4938_v17  ;;  %v4426_v21 = vmul.f32 %v2474_v62, %v3857_v24  ;;  %v2407_v1 = vsel %vm2200_vm1, %v2405_v45, %v2406_v12 }
 0x168   : > { %v4428_v2 = vadd.f32 %v2394_v49, %v2386_v10  ;;  %v1271_v63 = vmul.f32 %v4330_v25, %v4939_v5  ;;  %v2409_v51 = vadd.f32 %v2407_v1, %v2400_v52  ;;  %v1657_v48 = vmul.f32 %v1589_v58, %v1385_v53  ;;  %v4944_v49 = vld [vmem:[#allocation50_spill] sm:$0xff] }
 0x169   : > { %v1348_v8 = vadd.f32 %v4347_v13, %v1273_v4  ;;  %v1388_v15 = vadd.f32 %v4347_v13, %v1313_v26  ;;  %v4438_v55 = vsel %vm2200_vm1, %v2421_v60, %v2422_v44  ;;  %v1311_v39 = vmul.f32 %v4330_v25, %v4941_v18  ;;  %v4943_v60 = vld [vmem:[#allocation49_spill] sm:$0xff] }
 0x16a   : > { %4940 = vst [vmem:[#allocation11_spill] sm:$0xff] %v4438_v55  ;;  %v1346_v62 = vadd.f32 %v4347_v13, %v1271_v63  ;;  %v1276_v56 = vmul.f32 %v4330_v25, %v4942_v9  ;;  %v4445_v28 = vadd.f32 %v2411_v33, %v2409_v51  ;;  %v1685_v59 = vmul.f32 0.16666667, %v1617_v41  ;;  %v4454_v17 = vpop.permute.xlu0 %2055  ;;  %v4945_v63 = vld [vmem:[#allocation53_spill] sm:$0xff] }
 0x16b   : > { %v1416_v50 = vadd.f32 3.0, %v1348_v8  ;;  %v1456_v53 = vadd.f32 3.0, %v1388_v15  ;;  %v1386_v61 = vadd.f32 %v4347_v13, %v1311_v39  ;;  %v1316_v44 = vmul.f32 %v4330_v25, %v4943_v60 }
 0x16c   : > { %v1414_v31 = vadd.f32 3.0, %v1346_v62  ;;  %v1351_v52 = vadd.f32 %v4347_v13, %v1276_v56  ;;  %v1725_v10 = vmul.f32 0.16666667, %v1657_v48  ;;  %v1274_v58 = vmul.f32 %v4330_v25, %v4944_v49 }
 0x16d   : > { %v1484_v45 = vmax.f32 %v1416_v50, 0.0  ;;  %v1524_v12 = vmax.f32 %v1456_v53, 0.0  ;;  %v1454_v33 = vadd.f32 3.0, %v1386_v61  ;;  %v1391_v41 = vadd.f32 %v4347_v13, %v1316_v44 }
 0x16e   : > { %v1482_v34 = vmax.f32 %v1414_v31, 0.0  ;;  %v1419_v4 = vadd.f32 3.0, %v1351_v52  ;;  %v1349_v5 = vadd.f32 %v4347_v13, %v1274_v58  ;;  %v1314_v51 = vmul.f32 %v4330_v25, %v4945_v63 }
 0x16f   : > { %v1552_v26 = vmin.f32 %v1484_v45, 6.0  ;;  %v1592_v1 = vmin.f32 %v1524_v12, 6.0  ;;  %v1522_v18 = vmax.f32 %v1454_v33, 0.0  ;;  %v1459_v9 = vadd.f32 3.0, %v1391_v41  ;;  %v4460_v33 = vpop.permute.xlu0 %1895 }
 0x170   : > { %v1550_v48 = vmin.f32 %v1482_v34, 6.0  ;;  %v1487_v39 = vmax.f32 %v1419_v4, 0.0  ;;  %v1417_v53 = vadd.f32 3.0, %v1349_v5  ;;  %v1389_v31 = vadd.f32 %v4347_v13, %v1314_v51  ;;  %v4946_v4 = vld [vmem:[#allocation18_spill] sm:$0xff] }
 0x171   : > { %v1620_v56 = vmul.f32 %v1552_v26, %v1348_v8  ;;  %v1660_v50 = vmul.f32 %v1592_v1, %v1388_v15  ;;  %v1590_v44 = vmin.f32 %v1522_v18, 6.0  ;;  %v1527_v35 = vmax.f32 %v1459_v9, 0.0  ;;  %v4947_v1 = vld [vmem:[#allocation17_spill] sm:$0xff]  ;;  %v2041_v9 = vpop.permute.xlu1 %2040 }
 0x172   : > { %v1618_v60 = vmul.f32 %v1550_v48, %v1346_v62  ;;  %v1555_v49 = vmin.f32 %v1487_v39, 6.0  ;;  %v1485_v32 = vmax.f32 %v1417_v53, 0.0  ;;  %v1457_v58 = vadd.f32 3.0, %v1389_v31 }
 0x173   : > { %v1688_v45 = vmul.f32 0.16666667, %v1620_v56  ;;  %v1728_v12 = vmul.f32 0.16666667, %v1660_v50  ;;  %v1658_v36 = vmul.f32 %v1590_v44, %v1386_v61  ;;  %v1595_v34 = vmin.f32 %v1527_v35, 6.0 }
 0x174   : > { %v1686_v7 = vmul.f32 0.16666667, %v1618_v60  ;;  %v1623_v63 = vmul.f32 %v1555_v49, %v1351_v52  ;;  %v2093_v8 = vmul.f32 %v4946_v4, %v1685_v59  ;;  %v1553_v62 = vmin.f32 %v1485_v32, 6.0 }
 0x175   : > { %v2096_v15 = vmul.f32 %v4206_v0, %v1688_v45  ;;  %v2136_v26 = vmul.f32 %v4167_v11, %v1728_v12  ;;  %v1726_v48 = vmul.f32 0.16666667, %v1658_v36  ;;  %v1663_v18 = vmul.f32 %v1595_v34, %v1391_v41 }
 0x176   : > { %v2094_v51 = vmul.f32 %v4947_v1, %v1686_v7  ;;  %v1525_v39 = vmax.f32 %v1457_v58, 0.0  ;;  %v1691_v35 = vmul.f32 0.16666667, %v1623_v63  ;;  %v1621_v52 = vmul.f32 %v1553_v62, %v1349_v5 }
 0x177   : > { %v2152_v56 = vpack.c.bf16 %v2096_v15, %v4400_v37  ;;  %v2172_v61 = vpack.c.bf16 %v2136_v26, %v4406_v42  ;;  %v2133_v50 = vmul.f32 %v4433_v54, %v1725_v10  ;;  %v2134_v53 = vmul.f32 %v2041_v9, %v1726_v48  ;;  %v2066_v42 = vpop.permute.xlu0 %2065  ;;  %v4952_v9 = vld [vmem:[#allocation57_spill] sm:$0xff] }
 0x178   : > { %v2151_v59 = vpack.c.bf16 %v2094_v51, %v2093_v8  ;;  %v1731_v0 = vmul.f32 0.16666667, %v1663_v18  ;;  %v4471_v11 = vmul.f32 %v4413_v57, %v3948_v20  ;;  %v1593_v44 = vmin.f32 %v1525_v39, 6.0  ;;  %v4951_v18 = vld [vmem:[#allocation54_spill] sm:$0xff] }
 0x179   : > { %v2455_v32 = vunpack.c.l.bf16 %v2152_v56  ;;  %v2461_v36 = vunpack.c.h.bf16 %v2152_v56  ;;  %v2519_v7 = vunpack.c.l.bf16 %v2172_v61  ;;  %v2171_v37 = vpack.c.bf16 %v2134_v53, %v2133_v50  ;;  %v4953_v61 = vld [vmem:[#allocation58_spill] sm:$0xff] }
 0x17a   : > { %4948 = vst [vmem:[#allocation35_spill] sm:$0xff] %v4471_v11  ;;  %v4473_v41 = vunpack.c.l.bf16 %v2151_v59  ;;  %v2432_v60 = vunpack.c.h.bf16 %v2151_v59  ;;  %v4482_v10 = vmul.f32 %v4237_v46, %v1691_v35  ;;  %v1689_v57 = vmul.f32 0.16666667, %v1621_v52  ;;  %v4954_v52 = vld [vmem:[#allocation59_spill] sm:$0xff]  ;;  %v4955_v53 = vld [vmem:[#allocation26_spill] sm:$0xff] }
 0x17b   : > { %v4476_v5 = vmul.f32 %v2455_v32, %v3854_v23  ;;  %v4479_v54 = vmul.f32 %v2461_v36, %v3854_v23  ;;  %v4491_v58 = vmul.f32 %v2066_v42, %v1731_v0  ;;  %v2456_v63 = vmul.f32 %v2455_v32, %v3851_v22  ;;  %v4956_v32 = vld [vmem:[#allocation61_spill] sm:$0xff]  ;;  %v4957_v36 = vld [vmem:[#allocation62_spill] sm:$0xff] }
 0x17c   : > { %v4485_v49 = vmul.f32 %v4075_v43, %v2432_v60  ;;  %v2442_v45 = vmul.f32 %v4473_v41, %v3865_v30  ;;  %v2446_v12 = vmul.f32 %v4473_v41, %v3875_v3  ;;  %v4495_v34 = vmul.f32 %v2519_v7, %v3862_v29 }
 0x17d   : > { %v4498_v46 = vmul.f32 %v2519_v7, %v3857_v24  ;;  %v2447_v4 = vmul.f32 %v2432_v60, %v3875_v3  ;;  %v2466_v43 = vrot.slane %v4476_v5, 1  ;;  %v2467_v8 = vrot.slane %v4479_v54, 1 }
 0x17e   : > { %4949 = vst [vmem:[#allocation4_spill] sm:$0xff] %v4485_v49  ;;  %4950 = vst [vmem:[#allocation23_spill] sm:$0xff] %v4495_v34  ;;  %v2445_v15 = vadd.f32 %v4389_v14, %v2442_v45  ;;  %v2450_v26 = vrot.slane %v2446_v12, 1  ;;  %v4505_v51 = vunpack.c.l.bf16 %v2171_v37  ;;  %v1661_v48 = vmul.f32 %v1593_v44, %v1389_v31  ;;  %v2061_v14 = vpop.permute.xlu1 %2060 }
 0x17f   : > { %v2451_v1 = vrot.slane %v2447_v4, 1  ;;  %v1277_v39 = vmul.f32 %v4330_v25, %v4951_v18  ;;  %v1317_v56 = vmul.f32 %v4330_v25, %v4952_v9  ;;  %v1275_v35 = vmul.f32 %v4330_v25, %v4953_v61 }
 0x180   : > { %v1315_v50 = vmul.f32 %v4330_v25, %v4954_v52  ;;  %v4517_v0 = vmul.f32 %v4955_v53, %v1689_v57  ;;  %v1280_v31 = vmul.f32 %v4330_v25, %v4956_v32  ;;  %v1278_v7 = vmul.f32 %v4330_v25, %v4957_v36  ;;  %v4960_v52 = vld [vmem:[#allocation65_spill] sm:$0xff] }
 0x181   : > { %v2452_v59 = vsel %vm2200_vm1, %v2450_v26, %v2451_v1  ;;  %v1352_v37 = vadd.f32 %v4347_v13, %v1277_v39  ;;  %v1392_v44 = vadd.f32 %v4347_v13, %v1317_v56  ;;  %v1350_v42 = vadd.f32 %v4347_v13, %v1275_v35  ;;  %v4959_v39 = vld [vmem:[#allocation63_spill] sm:$0xff] }
 0x182   : > { %v2454_v60 = vadd.f32 %v2452_v59, %v2445_v15  ;;  %v1729_v5 = vmul.f32 0.16666667, %v1661_v48  ;;  %v1390_v54 = vadd.f32 %v4347_v13, %v1315_v50  ;;  %v1355_v45 = vadd.f32 %v4347_v13, %v1280_v31  ;;  %v4535_v59 = vpop.permute.xlu1 %1900 }
 0x183   : > { %v1353_v57 = vadd.f32 %v4347_v13, %v1278_v7  ;;  %v1420_v4 = vadd.f32 3.0, %v1352_v37  ;;  %v1460_v26 = vadd.f32 3.0, %v1392_v44  ;;  %v1418_v1 = vadd.f32 3.0, %v1350_v42 }
 0x184   : > { %v4529_v12 = vadd.f32 %v2456_v63, %v2454_v60  ;;  %v1458_v18 = vadd.f32 3.0, %v1390_v54  ;;  %v1423_v15 = vadd.f32 3.0, %v1355_v45  ;;  %v1281_v56 = vmul.f32 %v4330_v25, %v4959_v39 }
 0x185   : > { %v1421_v9 = vadd.f32 3.0, %v1353_v57  ;;  %v1488_v61 = vmax.f32 %v1420_v4, 0.0  ;;  %v1528_v35 = vmax.f32 %v1460_v26, 0.0  ;;  %v1486_v48 = vmax.f32 %v1418_v1, 0.0 }
 0x186   : > { %4958 = vst [vmem:[#allocation36_spill] sm:$0xff] %v4529_v12  ;;  %v1279_v50 = vmul.f32 %v4330_v25, %v4960_v52  ;;  %v1526_v53 = vmax.f32 %v1458_v18, 0.0  ;;  %v1491_v63 = vmax.f32 %v1423_v15, 0.0  ;;  %v1356_v31 = vadd.f32 %v4347_v13, %v1281_v56 }
 0x187   : > { %v1489_v32 = vmax.f32 %v1421_v9, 0.0  ;;  %v1556_v36 = vmin.f32 %v1488_v61, 6.0  ;;  %v1596_v7 = vmin.f32 %v1528_v35, 6.0  ;;  %v1554_v60 = vmin.f32 %v1486_v48, 6.0  ;;  %v2071_v48 = vpop.permute.xlu1 %2070 }
 0x188   : > { %v1354_v62 = vadd.f32 %v4347_v13, %v1279_v50  ;;  %v1594_v34 = vmin.f32 %v1526_v53, 6.0  ;;  %v1559_v39 = vmin.f32 %v1491_v63, 6.0  ;;  %v1424_v26 = vadd.f32 3.0, %v1356_v31 }
 0x189   : > { %v1557_v4 = vmin.f32 %v1489_v32, 6.0  ;;  %v1624_v1 = vmul.f32 %v1556_v36, %v1352_v37  ;;  %v1664_v49 = vmul.f32 %v1596_v7, %v1392_v44  ;;  %v1622_v11 = vmul.f32 %v1554_v60, %v1350_v42  ;;  %v4961_v42 = vld [vmem:[#allocation21_spill] sm:$0xff]  ;;  %v4962_v32 = vld [vmem:[#allocation3_spill] sm:$0xff] }
 0x18a   : > { %v1422_v52 = vadd.f32 3.0, %v1354_v62  ;;  %v1662_v12 = vmul.f32 %v1594_v34, %v1390_v54  ;;  %v1627_v55 = vmul.f32 %v1559_v39, %v1355_v45  ;;  %v1492_v15 = vmax.f32 %v1424_v26, 0.0 }
 0x18b   : > { %v1625_v18 = vmul.f32 %v1557_v4, %v1353_v57  ;;  %v4540_v9 = vsel %vm2200_vm1, %v2466_v43, %v2467_v8  ;;  %v1692_v56 = vmul.f32 0.16666667, %v1624_v1  ;;  %v1732_v61 = vmul.f32 0.16666667, %v1664_v49 }
 0x18c   : > { %v1690_v35 = vmul.f32 0.16666667, %v1622_v11  ;;  %v2137_v50 = vmul.f32 %v4454_v17, %v1729_v5  ;;  %v1730_v53 = vmul.f32 0.16666667, %v1662_v12  ;;  %v1695_v63 = vmul.f32 0.16666667, %v1627_v55 }
 0x18d   : > { %v1284_v37 = vmul.f32 %v4330_v25, %v4171_v38  ;;  %v2100_v44 = vmul.f32 %v4251_v16, %v1692_v56  ;;  %v2140_v34 = vmul.f32 %v2071_v48, %v1732_v61  ;;  %v1560_v45 = vmin.f32 %v1492_v15, 6.0  ;;  %v4963_v12 = vld [vmem:[#allocation29_spill] sm:$0xff] }
 0x18e   : > { %v2098_v54 = vmul.f32 %v4961_v42, %v1690_v35  ;;  %v2138_v57 = vmul.f32 %v2061_v14, %v1730_v53  ;;  %v1693_v43 = vmul.f32 0.16666667, %v1625_v18  ;;  %v1490_v8 = vmax.f32 %v1422_v52, 0.0 }
 0x18f   : > { %v1282_v11 = vmul.f32 %v4330_v25, %v4962_v32  ;;  %v2154_v49 = vpack.c.bf16 %v2100_v44, %v4482_v10  ;;  %v2174_v17 = vpack.c.bf16 %v2140_v34, %v4491_v58  ;;  %v1628_v5 = vmul.f32 %v1560_v45, %v1356_v31  ;;  %v4964_v10 = vld [vmem:[#allocation32_spill] sm:$0xff] }
 0x190   : > { %v2153_v55 = vpack.c.bf16 %v2098_v54, %v4517_v0  ;;  %v4554_v38 = vmul.f32 %v4505_v51, %v3948_v20  ;;  %v2173_v16 = vpack.c.bf16 %v2138_v57, %v2137_v50  ;;  %v2103_v36 = vmul.f32 %v4963_v12, %v1695_v63 }
 0x191   : > { %v1558_v14 = vmin.f32 %v1490_v8, 6.0  ;;  %v2500_v7 = vunpack.c.l.bf16 %v2154_v49  ;;  %v2506_v60 = vunpack.c.h.bf16 %v2154_v49  ;;  %v2564_v39 = vunpack.c.l.bf16 %v2174_v17  ;;  %v4965_v49 = vld [vmem:[#allocation10_spill] sm:$0xff] }
 0x192   : > { %v4557_v4 = vunpack.c.l.bf16 %v2153_v55  ;;  %v2477_v26 = vunpack.c.h.bf16 %v2153_v55  ;;  %v2101_v1 = vmul.f32 %v4964_v10, %v1693_v43  ;;  %v1696_v58 = vmul.f32 0.16666667, %v1628_v5 }
 0x193   : > { %v1359_v0 = vadd.f32 %v4347_v13, %v1284_v37  ;;  %v2507_v31 = vmul.f32 %v2500_v7, %v3854_v23  ;;  %v2508_v51 = vmul.f32 %v2506_v60, %v3854_v23  ;;  %v1626_v52 = vmul.f32 %v1558_v14, %v1354_v62  ;;  %v4576_v62 = vld [vmem:[%s4818_s7 + $0x8] ss:$0 sm:$0xff] }
 0x194   : > { %v1357_v18 = vadd.f32 %v4347_v13, %v1282_v11  ;;  %v2487_v15 = vmul.f32 %v4557_v4, %v3865_v30  ;;  %v2491_v56 = vmul.f32 %v4557_v4, %v3875_v3  ;;  %v2492_v61 = vmul.f32 %v2477_v26, %v3875_v3 }
 0x195   : > { %v2548_v35 = vunpack.c.l.bf16 %v2173_v16  ;;  %v2501_v48 = vmul.f32 %v2500_v7, %v3851_v22  ;;  %v4571_v50 = vmul.f32 %v2564_v39, %v3862_v29  ;;  %v4579_v53 = vmul.f32 %v4576_v62, %v2477_v26  ;;  %v4966_v16 = vld [vmem:[#allocation31_spill] sm:$0xff]  ;;  %v4967_v7 = vld [vmem:[#allocation12_spill] sm:$0xff] }
 0x196   : > { %v2104_v63 = vmul.f32 %v4266_v19, %v1696_v58  ;;  %v2511_v37 = vrot.slane %v2507_v31, 1  ;;  %v2490_v44 = vadd.f32 %v4426_v21, %v2487_v15  ;;  %v2495_v34 = vrot.slane %v2491_v56, 1 }
 0x197   : > { %v2496_v42 = vrot.slane %v2492_v61, 1  ;;  %v2512_v54 = vrot.slane %v2508_v51, 1  ;;  %v1694_v57 = vmul.f32 0.16666667, %v1626_v52  ;;  %v1427_v43 = vadd.f32 3.0, %v1359_v0  ;;  %v4968_v61 = vld [vmem:[#allocation28_spill] sm:$0xff] }
 0x198   : > { %v2156_v45 = vpack.c.bf16 %v2104_v63, %v2103_v36  ;;  %v4585_v32 = vmul.f32 %v2548_v35, %v3948_v20  ;;  %v1425_v11 = vadd.f32 3.0, %v1357_v18  ;;  %v1285_v17 = vmul.f32 %v4330_v25, %v4965_v49  ;;  %v4970_v63 = vld [vmem:[#allocation27_spill] sm:$0xff] }
 0x199   : > { %v2497_v8 = vsel %vm2200_vm1, %v2495_v34, %v2496_v42  ;;  %v2102_v21 = vmul.f32 %v4966_v16, %v1694_v57  ;;  %v1495_v12 = vmax.f32 %v1427_v43, 0.0  ;;  %v1283_v60 = vmul.f32 %v4330_v25, %v4967_v7  ;;  %v4972_v42 = vld [vmem:[#allocation66_spill] sm:$0xff] }
 0x19a   : > { %v2499_v55 = vadd.f32 %v2497_v8, %v2490_v44  ;;  %v2545_v19 = vunpack.c.l.bf16 %v2156_v45  ;;  %v2551_v5 = vunpack.c.h.bf16 %v2156_v45  ;;  %v1493_v14 = vmax.f32 %v1425_v11, 0.0 }
 0x19b   : > { %v1360_v36 = vadd.f32 %v4347_v13, %v1285_v17  ;;  %v2483_v39 = vrot.slane %v4579_v53, 1  ;;  %v2155_v31 = vpack.c.bf16 %v2102_v21, %v2101_v1  ;;  %v1563_v51 = vmin.f32 %v1495_v12, 6.0 }
 0x19c   : > { %v4594_v26 = vadd.f32 %v2501_v48, %v2499_v55  ;;  %v2552_v10 = vmul.f32 %v2545_v19, %v3854_v23  ;;  %v2553_v58 = vmul.f32 %v2551_v5, %v3854_v23  ;;  %v1561_v52 = vmin.f32 %v1493_v14, 6.0 }
 0x19d   : > { %v1428_v15 = vadd.f32 3.0, %v1360_v36  ;;  %v4599_v56 = vsel %vm2200_vm1, %v2511_v37, %v2512_v54  ;;  %v4969_v35 = vrot.slane %v4968_v61, 1  ;;  %v4971_v44 = vrot.slane %v4970_v63, 1 }
 0x19e   : > { %v1358_v48 = vadd.f32 %v4347_v13, %v1283_v60  ;;  %v1288_v45 = vmul.f32 %v4330_v25, %v4972_v42  ;;  %v2556_v23 = vrot.slane %v2552_v10, 1  ;;  %v4611_v1 = vunpack.c.l.bf16 %v2155_v31  ;;  %v4975_v42 = vld [vmem:[#allocation7_spill] sm:$0xff] }
 0x19f   : > { %v4606_v34 = vsel %vm2200_vm1, %v4971_v44, %v4969_v35  ;;  %v2522_v57 = vunpack.c.h.bf16 %v2155_v31  ;;  %v1631_v43 = vmul.f32 %v1563_v51, %v1359_v0  ;;  %v2557_v8 = vrot.slane %v2553_v58, 1 }
 0x1a0   : > { %v1629_v37 = vmul.f32 %v1561_v52, %v1357_v18  ;;  %v1496_v54 = vmax.f32 %v1428_v15, 0.0  ;;  %v1426_v11 = vadd.f32 3.0, %v1358_v48  ;;  %v2532_v49 = vmul.f32 %v4611_v1, %v3865_v30  ;;  %v4973_v15 = vld [vmem:[#allocation68_spill] sm:$0xff] }
 0x1a1   : > { %v2536_v17 = vmul.f32 %v4611_v1, %v3875_v3  ;;  %v2537_v55 = vmul.f32 %v2522_v57, %v3875_v3  ;;  %v1363_v5 = vadd.f32 %v4347_v13, %v1288_v45  ;;  %v2546_v16 = vmul.f32 %v2545_v19, %v3851_v22  ;;  %v4974_v19 = vld [vmem:[#allocation5_spill] sm:$0xff] }
 0x1a2   : > { %v4621_v21 = vmul.f32 %v4576_v62, %v2522_v57  ;;  %v1564_v0 = vmin.f32 %v1496_v54, 6.0  ;;  %v1494_v12 = vmax.f32 %v1426_v11, 0.0  ;;  %v2535_v18 = vadd.f32 %v4498_v46, %v2532_v49 }
 0x1a3   : > { %v2540_v14 = vrot.slane %v2536_v17, 1  ;;  %v2541_v7 = vrot.slane %v2537_v55, 1  ;;  %v1699_v60 = vmul.f32 0.16666667, %v1631_v43  ;;  %v1697_v10 = vmul.f32 0.16666667, %v1629_v37 }
 0x1a4   : > { %v1632_v58 = vmul.f32 %v1564_v0, %v1360_v36  ;;  %v1562_v31 = vmin.f32 %v1494_v12, 6.0  ;;  %v2558_v51 = vsel %vm2200_vm1, %v2556_v23, %v2557_v8  ;;  %v1431_v52 = vadd.f32 3.0, %v1363_v5  ;;  %v4976_v43 = vld [vmem:[#allocation6_spill] sm:$0xff] }
 0x1a5   : > { %v2542_v3 = vsel %vm2200_vm1, %v2540_v14, %v2541_v7  ;;  %v1286_v22 = vmul.f32 %v4330_v25, %v4973_v15  ;;  %v1289_v61 = vmul.f32 %v4330_v25, %v4974_v19  ;;  %v2528_v35 = vrot.slane %v4621_v21, 1 }
 0x1a6   : > { %v2544_v46 = vadd.f32 %v2542_v3, %v2535_v18  ;;  %v1700_v63 = vmul.f32 0.16666667, %v1632_v58  ;;  %v1630_v44 = vmul.f32 %v1562_v31, %v1358_v48  ;;  %v2107_v45 = vmul.f32 %v4975_v42, %v1699_v60  ;;  %v4982_v42 = vld [vmem:[#allocation20_spill] sm:$0xff] }
 0x1a7   : > { %v1499_v36 = vmax.f32 %v1431_v52, 0.0  ;;  %v1361_v57 = vadd.f32 %v4347_v13, %v1286_v22  ;;  %v1364_v23 = vadd.f32 %v4347_v13, %v1289_v61  ;;  %v1287_v11 = vmul.f32 %v4330_v25, %v4275_v47 }
 0x1a8   : > { %v2108_v8 = vmul.f32 %v4976_v43, %v1700_v63  ;;  %v1698_v37 = vmul.f32 0.16666667, %v1630_v44  ;;  %v2547_v54 = vadd.f32 %v2546_v16, %v2544_v46  ;;  %v2105_v49 = vmul.f32 %v4460_v33, %v1697_v10  ;;  %v4977_v16 = vld [vmem:[#allocation46_spill] sm:$0xff]  ;;  %v4980_v63 = vld [vmem:[#allocation48_spill] sm:$0xff] }
 0x1a9   : > { %v1567_v17 = vmin.f32 %v1499_v36, 6.0  ;;  %v1429_v55 = vadd.f32 3.0, %v1361_v57  ;;  %v1432_v0 = vadd.f32 3.0, %v1364_v23  ;;  %v1362_v14 = vadd.f32 %v4347_v13, %v1287_v11  ;;  %v4984_v36 = vld [vmem:[#allocation19_spill] sm:$0xff] }
 0x1aa   : > { %v2158_v48 = vpack.c.bf16 %v2108_v8, %v2107_v45  ;;  %v2106_v12 = vmul.f32 %v4535_v59, %v1698_v37  ;;  %v2550_v18 = vadd.f32 %v4585_v32, %v2547_v54  ;;  %v4643_v31 = vmul.f32 %v4977_v16, %v3865_v30  ;;  %v4978_v30 = vld [vmem:[#allocation56_spill] sm:$0xff]  ;;  %v4986_v37 = vld [vmem:[#allocation25_spill] sm:$0xff] }
 0x1ab   : > { %v1635_v7 = vmul.f32 %v1567_v17, %v1363_v5  ;;  %v1497_v60 = vmax.f32 %v1429_v55, 0.0  ;;  %v1500_v58 = vmax.f32 %v1432_v0, 0.0  ;;  %v1430_v10 = vadd.f32 3.0, %v1362_v14 }
 0x1ac   : > { %v2184_v47 = vunpack.c.l.bf16 %v2158_v48  ;;  %v2157_v25 = vpack.c.bf16 %v2106_v12, %v2105_v49  ;;  %v2560_v33 = vadd.f32 %v2558_v51, %v2550_v18  ;;  %v4647_v59 = vmul.f32 %v4576_v62, %v4977_v16  ;;  %v4673_v49 = vld [vmem:[%s4819_s8] ss:$0 sm:$0xff] }
 0x1ad   : > { %v1703_v3 = vmul.f32 0.16666667, %v1635_v7  ;;  %v1565_v52 = vmin.f32 %v1497_v60, 6.0  ;;  %v1568_v15 = vmin.f32 %v1500_v58, 6.0  ;;  %v1498_v22 = vmax.f32 %v1430_v10, 0.0  ;;  %v4987_v7 = vld [vmem:[#allocation9_spill] sm:$0xff] }
 0x1ae   : > { %v2189_v13 = vmul.f32 %v3857_v24, %v2184_v47  ;;  %v2561_v32 = vunpack.c.l.bf16 %v2157_v25  ;;  %v2567_v5 = vunpack.c.h.bf16 %v2157_v25  ;;  %v4979_v46 = vrot.slane %v4978_v30, 1  ;;  %v4988_v10 = vld [vmem:[#allocation8_spill] sm:$0xff] }
 0x1af   : > { %v1633_v19 = vmul.f32 %v1565_v52, %v1361_v57  ;;  %v1636_v61 = vmul.f32 %v1568_v15, %v1364_v23  ;;  %v4981_v44 = vrot.slane %v4980_v63, 1  ;;  %v4983_v45 = vrot.slane %v4982_v42, 1  ;;  %v4992_v42 = vld [vmem:[#allocation13_spill] sm:$0xff] }
 0x1b0   : > { %v4985_v43 = vrot.slane %v4984_v36, 1  ;;  %v2190_v54 = vadd.f32 %v2189_v13, %v4986_v37  ;;  %v2562_v11 = vmul.f32 %v2561_v32, %v4925_v27  ;;  %v4665_v57 = vmul.f32 %v4576_v62, %v2561_v32  ;;  %v4989_v13 = vld [vmem:[#allocation14_spill] sm:$0xff]  ;;  %v4993_v36 = vld [vmem:[#allocation11_spill] sm:$0xff]  ;;  %v4994_v37 = vld [vmem:[#allocation36_spill] sm:$0xff] }
 0x1b1   : > { %v2272_v51 = vsel %vm2200_vm1, %v4981_v44, %v4979_v46  ;;  %v4668_v23 = vmul.f32 %v4576_v62, %v2567_v5  ;;  %v1701_v17 = vmul.f32 0.16666667, %v1633_v19  ;;  %v1704_v55 = vmul.f32 0.16666667, %v1636_v61  ;;  %v4991_v61 = vld [vmem:[#allocation2_spill] sm:$0xff] }
 0x1b2   : > { %v4660_v8 = vsel %vm2200_vm1, %v4985_v43, %v4983_v45  ;;  %v1566_v0 = vmin.f32 %v1498_v22, 6.0  ;;  %v4677_v48 = vmul.f32 %v4925_v27, %v4977_v16  ;;  %v2205_v12 = vadd.f32 %v4606_v34, %v2190_v54  ;;  %v4690_v16 = vld [vmem:[%s4820_s9] ss:$0 sm:$0xff]  ;;  %v4995_v54 = vld [vmem:[#allocation35_spill] sm:$0xff] }
 0x1b3   : > { %v4680_v18 = vadd.f32 %v2562_v11, %v2560_v33  ;;  %v2111_v60 = vmul.f32 %v4987_v7, %v1703_v3  ;;  %v2257_v58 = vrot.slane %v4647_v59, 1  ;;  %v2572_v47 = vrot.slane %v4665_v57, 1  ;;  %v4990_v33 = vld [vmem:[#allocation22_spill] sm:$0xff] }
 0x1b4   : > { %v2573_v25 = vrot.slane %v4668_v23, 1  ;;  %v2112_v52 = vmul.f32 %v4988_v10, %v1704_v55  ;;  %v1634_v15 = vmul.f32 %v1566_v0, %v1362_v14  ;;  %v2109_v34 = vmul.f32 %v4989_v13, %v1701_v17 }
 0x1b5   : > { %v2212_v32 = vadd.f32 %v4990_v33, %v2205_v12  ;;  %v2605_v3 = vmul.f32 %v4673_v49, %v4352_v40  ;;  %v2612_v5 = vmul.f32 %v4673_v49, %v4428_v2  ;;  %v4700_v14 = vmul.f32 %v4991_v61, %v4925_v27 }
 0x1b6   : > { %v2160_v22 = vpack.c.bf16 %v2112_v52, %v2111_v60  ;;  %v1702_v19 = vmul.f32 0.16666667, %v1634_v15  ;;  %v2415_v30 = vadd.f32 %v4395_v6, %v4445_v28  ;;  %v2427_v44 = vmul.f32 %v4473_v41, %v4925_v27  ;;  %v4996_v52 = vld [vmem:[#allocation4_spill] sm:$0xff] }
 0x1b7   : > { %v2606_v46 = vadd.f32 %v4690_v16, %v2605_v3  ;;  %v2613_v63 = vadd.f32 %v4690_v16, %v2612_v5  ;;  %v2433_v40 = vmul.f32 %v4576_v62, %v4473_v41  ;;  %v2460_v11 = vadd.f32 %v4995_v54, %v4994_v37 }
 0x1b8   : > { %v2241_v2 = vunpack.c.l.bf16 %v2160_v22  ;;  %v2110_v45 = vmul.f32 %v4992_v42, %v1702_v19  ;;  %v2425_v43 = vadd.f32 %v4993_v36, %v2415_v30  ;;  %v4716_v6 = vmul.f32 %v4576_v62, %v4991_v61  ;;  %v4998_v22 = vld [vmem:[#allocation30_spill] sm:$0xff] }
 0x1b9   : > { %v2607_v28 = vadd.f32 3.0, %v2606_v46  ;;  %v2614_v17 = vadd.f32 3.0, %v2613_v63  ;;  %v2437_v55 = vrot.slane %v2433_v40, 1  ;;  %v4997_v15 = vrot.slane %v4996_v52, 1  ;;  %v5003_v52 = vld [vmem:[#allocation23_spill] sm:$0xff] }
 0x1ba   : > { %v2246_v0 = vmul.f32 %v3862_v29, %v2241_v2  ;;  %v2264_v12 = vmul.f32 %v2241_v2, %v3857_v24  ;;  %v2159_v41 = vpack.c.bf16 %v2110_v45, %v2109_v34  ;;  %v2428_v7 = vadd.f32 %v2427_v44, %v2425_v43  ;;  %v4999_v43 = vld [vmem:[#allocation51_spill] sm:$0xff] }
 0x1bb   : > { %v2608_v60 = vmax.f32 %v2607_v28, 0.0  ;;  %v2615_v10 = vmax.f32 %v2614_v17, 0.0  ;;  %v2439_v13 = vsel %vm2200_vm1, %v2437_v55, %v4997_v15  ;;  %v2470_v33 = vadd.f32 %v4540_v9, %v2460_v11  ;;  %v5000_v11 = vld [vmem:[#allocation34_spill] sm:$0xff] }
 0x1bc   : > { %v2265_v3 = vadd.f32 %v2264_v12, %v4643_v31  ;;  %v2213_v5 = vunpack.c.l.bf16 %v2159_v41  ;;  %v2431_v19 = vadd.f32 %v4998_v22, %v2428_v7  ;;  %v2472_v29 = vmul.f32 %v4557_v4, %v4925_v27  ;;  %v5006_v22 = vld [vmem:[#allocation24_spill] sm:$0xff] }
 0x1bd   : > { %v2609_v61 = vmin.f32 %v2608_v60, 6.0  ;;  %v2616_v24 = vmin.f32 %v2615_v10, 6.0  ;;  %v2478_v34 = vmul.f32 %v4576_v62, %v4557_v4  ;;  %v2505_v30 = vadd.f32 %v4554_v38, %v4594_v26 }
 0x1be   : > { %v2274_v44 = vadd.f32 %v2272_v51, %v2265_v3  ;;  %v2218_v40 = vmul.f32 %v3948_v20, %v2213_v5  ;;  %v2441_v9 = vadd.f32 %v2439_v13, %v2431_v19  ;;  %v2473_v2 = vadd.f32 %v2472_v29, %v2470_v33  ;;  %v5001_v51 = vld [vmem:[#allocation33_spill] sm:$0xff]  ;;  %v5004_v33 = vld [vmem:[#allocation52_spill] sm:$0xff] }
 0x1bf   : > { %v2610_v31 = vmul.f32 %v2609_v61, %v2606_v46  ;;  %v2617_v42 = vmul.f32 %v2616_v24, %v2613_v63  ;;  %v2482_v45 = vrot.slane %v2478_v34, 1  ;;  %v2515_v36 = vadd.f32 %v4599_v56, %v2505_v30 }
 0x1c0   : > { %v2277_v37 = vadd.f32 %v4999_v43, %v2274_v44  ;;  %v2219_v54 = vadd.f32 %v2218_v40, %v2212_v32  ;;  %v2476_v28 = vadd.f32 %v5000_v11, %v2473_v2  ;;  %v2619_v4 = vmul.f32 %v4673_v49, %v2441_v9 }
 0x1c1   : > { %v4737_v17 = vmul.f32 0.16666667, %v2610_v31  ;;  %v4739_v38 = vmul.f32 0.16666667, %v2617_v42  ;;  %v2484_v20 = vsel %vm2200_vm1, %v2482_v45, %v2483_v39  ;;  %v2517_v26 = vmul.f32 %v4611_v1, %v4925_v27  ;;  %v5002_v27 = vld [vmem:[#allocation55_spill] sm:$0xff] }
 0x1c2   : > { %v2280_v56 = vadd.f32 %v5001_v51, %v2277_v37  ;;  %v2233_v46 = vadd.f32 %v4660_v8, %v2219_v54  ;;  %v2486_v32 = vadd.f32 %v2484_v20, %v2476_v28  ;;  %v2620_v63 = vadd.f32 %v4690_v16, %v2619_v4 }
 0x1c3   : > { %v2648_v55 = vpack.c.bf16 %v4739_v38, %v4737_v17  ;;  %v2518_v12 = vadd.f32 %v2517_v26, %v2515_v36  ;;  %v2523_v41 = vmul.f32 %v4576_v62, %v4611_v1  ;;  %v2566_v53 = vadd.f32 %v4571_v50, %v4680_v18 }
 0x1c4   : > { %v2240_v39 = vadd.f32 %v4677_v48, %v2233_v46  ;;  %v2290_v7 = vadd.f32 %v5002_v27, %v2280_v56  ;;  %v2621_v60 = vadd.f32 3.0, %v2620_v63  ;;  %v2626_v8 = vmul.f32 %v4673_v49, %v2486_v32 }
 0x1c5   : > { %v2302_v10 = vrot.slane %v4716_v6, 1  ;;  %v2521_v15 = vadd.f32 %v5003_v52, %v2518_v12  ;;  %v2527_v13 = vrot.slane %v2523_v41, 1  ;;  %v2574_v62 = vsel %vm2200_vm1, %v2572_v47, %v2573_v25 }
 0x1c6   : > { %v2247_v1 = vadd.f32 %v2246_v0, %v2240_v39  ;;  %v2293_v50 = vadd.f32 %v4700_v14, %v2290_v7  ;;  %v2622_v48 = vmax.f32 %v2621_v60, 0.0  ;;  %v2627_v18 = vadd.f32 %v4690_v16, %v2626_v8  ;;  %v5007_v14 = vld [vmem:[#allocation67_spill] sm:$0xff] }
 0x1c7   : > { %v5005_v3 = vrot.slane %v5004_v33, 1  ;;  %v2529_v23 = vsel %vm2200_vm1, %v2527_v13, %v2528_v35  ;;  %v2576_v5 = vadd.f32 %v2574_v62, %v2566_v53  ;;  %v5008_v19 = vrot.slane %v5007_v14, 1 }
 0x1c8   : > { %v2296_v47 = vadd.f32 %v5006_v22, %v2293_v50  ;;  %v2623_v25 = vmin.f32 %v2622_v48, 6.0  ;;  %v2628_v0 = vadd.f32 3.0, %v2627_v18  ;;  %v2531_v61 = vadd.f32 %v2529_v23, %v2521_v15 }
 0x1c9   : > { %v2259_v6 = vsel %vm2200_vm1, %v2257_v58, %v5005_v3  ;;  %v2304_v29 = vsel %vm2200_vm1, %v2302_v10, %v5008_v19  ;;  %v2640_v24 = vmul.f32 %v4673_v49, %v2576_v5 }
 0x1ca   : > { %v2261_v57 = vadd.f32 %v2259_v6, %v2247_v1  ;;  %v2306_v59 = vadd.f32 %v2304_v29, %v2296_v47  ;;  %v2629_v34 = vmax.f32 %v2628_v0, 0.0  ;;  %v2633_v21 = vmul.f32 %v4673_v49, %v2531_v61 }
 0x1cb   : > { %v2641_v35 = vadd.f32 %v4690_v16, %v2640_v24  ;;  %v2624_v40 = vmul.f32 %v2623_v25, %v2620_v63 }
 0x1cc   : > { %v2585_v58 = vmul.f32 %v4673_v49, %v2261_v57  ;;  %v2598_v44 = vmul.f32 %v4673_v49, %v2306_v59  ;;  %v2630_v9 = vmin.f32 %v2629_v34, 6.0  ;;  %v2634_v2 = vadd.f32 %v4690_v16, %v2633_v21 }
 0x1cd   : > { %v2642_v31 = vadd.f32 3.0, %v2641_v35  ;;  %v2625_v28 = vmul.f32 0.16666667, %v2624_v40 }
 0x1ce   : > { %v2592_v30 = vadd.f32 %v4690_v16, %v2585_v58  ;;  %v2599_v45 = vadd.f32 %v4690_v16, %v2598_v44  ;;  %v2631_v36 = vmul.f32 %v2630_v9, %v2627_v18  ;;  %v2635_v43 = vadd.f32 3.0, %v2634_v2 }
 0x1cf   : > { %v2643_v37 = vmax.f32 %v2642_v31, 0.0 }
 0x1d0   : > { %v2593_v42 = vadd.f32 3.0, %v2592_v30  ;;  %v2600_v11 = vadd.f32 3.0, %v2599_v45  ;;  %v2632_v4 = vmul.f32 0.16666667, %v2631_v36  ;;  %v2636_v20 = vmax.f32 %v2635_v43, 0.0 }
 0x1d1   : > { %v2644_v26 = vmin.f32 %v2643_v37, 6.0 }
 0x1d2   : > { %v2594_v54 = vmax.f32 %v2593_v42, 0.0  ;;  %v2601_v56 = vmax.f32 %v2600_v11, 0.0  ;;  %v2649_v49 = vpack.c.bf16 %v2632_v4, %v2625_v28  ;;  %v2637_v46 = vmin.f32 %v2636_v20, 6.0 }
 0x1d3   : > { %v2645_v32 = vmul.f32 %v2644_v26, %v2641_v35 }
 0x1d4   : > { %v2595_v51 = vmin.f32 %v2594_v54, 6.0  ;;  %v2602_v12 = vmin.f32 %v2601_v56, 6.0  ;;  %v2638_v41 = vmul.f32 %v2637_v46, %v2634_v2 }
 0x1d5   : > { %v2646_v53 = vmul.f32 0.16666667, %v2645_v32 }
 0x1d6   : > { %v2596_v63 = vmul.f32 %v2595_v51, %v2592_v30  ;;  %v2603_v16 = vmul.f32 %v2602_v12, %v2599_v45  ;;  %v2639_v39 = vmul.f32 0.16666667, %v2638_v41 }
 0x1d8   : > { %v2597_v27 = vmul.f32 0.16666667, %v2596_v63  ;;  %v2604_v7 = vmul.f32 0.16666667, %v2603_v16  ;;  %v2650_v60 = vpack.c.bf16 %v2646_v53, %v2639_v39 }
 0x1da   : > { %v2647_v8 = vpack.c.bf16 %v2604_v7, %v2597_v27 }
 0x1dc   : > { %3279 = vmatprep.mubr.bf16.mxu1 %v2647_v8 }
 0x1dd   : > { %3280 = vmatmul.mubr.bf16.vlgmr.msra.gmra.mrb[28].mxu1 %v2648_v55 }
 0x1de   : > { %3283 = vmatprep.mubr.bf16.mxu1 %v2649_v49 }
 0x1e5   : > { %3284 = vmatmul.mubr.bf16.gmra.mrb[32].mxu1 %v2650_v60 }
 0x2b0   : > { %v3281_v10 = vpop.f32.mrb[28].mxu1 }
 0x2b1   : > { %v2749_v52 = vpop.f32.mrb[29].mxu1  ;;  %v2836_v33 = vmul.f32 %v3281_v10, %v3281_v10 }
 0x2b2   : > { %v3282_v15 = vpop.f32.mrb[30].mxu1  ;;  %v2834_v1 = vmul.f32 %v2749_v52, %v2749_v52 }
 0x2b3   : > { %v3131_v13 = vpack.c.bf16 %v3282_v15, %v3281_v10  ;;  %v2752_v62 = vpop.f32.mrb[31].mxu1  ;;  %v2837_v55 = vmul.f32 %v3282_v15, %v3282_v15 }
 0x2b4   : > { %v3126_v50 = vpack.c.bf16 %v2752_v62, %v2749_v52  ;;  %v2820_v48 = vadd.f32 %v2752_v62, %v2749_v52  ;;  %v2835_v18 = vmul.f32 %v2752_v62, %v2752_v62 }
 0x2b5   : > { %3143 = vst [vmem:[%s499_s24 + $0x8] sm:$0xff] %v3131_v13  }
 0x2b6   : > { %3127 = vst [vmem:[%s499_s24] sm:$0xff] %v3126_v50   ;;  %v2821_v17 = vadd.f32 %v3281_v10, %v2820_v48  ;;  %v2842_v38 = vadd.f32 %v2835_v18, %v2834_v1 }
 0x2b8   : > { %v2843_v3 = vadd.f32 %v2842_v38, %v2836_v33  ;;  %v3285_v6 = vpop.f32.mrb[32].mxu1  ;;  %v2822_v23 = vadd.f32 %v3282_v15, %v2821_v17 }
 0x2b9   : > { %v2765_v5 = vpop.f32.mrb[33].mxu1  ;;  %v2840_v59 = vmul.f32 %v3285_v6, %v3285_v6 }
 0x2ba   : > { %v2823_v57 = vadd.f32 %v2822_v23, %v2765_v5  ;;  %v2838_v22 = vmul.f32 %v2765_v5, %v2765_v5  ;;  %v2844_v47 = vadd.f32 %v2843_v3, %v2837_v55  ;;  %v3286_v25 = vpop.f32.mrb[34].mxu1 }
 0x2bb   : > { %v3141_v0 = vpack.c.bf16 %v3286_v25, %v3285_v6  ;;  %v2768_v14 = vpop.f32.mrb[35].mxu1  ;;  %v2841_v21 = vmul.f32 %v3286_v25, %v3286_v25 }
 0x2bc   : > { %v2845_v19 = vadd.f32 %v2844_v47, %v2838_v22  ;;  %v3136_v29 = vpack.c.bf16 %v2768_v14, %v2765_v5  ;;  %v2824_v61 = vadd.f32 %v2823_v57, %v2768_v14  ;;  %v2839_v24 = vmul.f32 %v2768_v14, %v2768_v14 }
 0x2bd   : > { %3145 = vst [vmem:[%s499_s24 + $0x18] sm:$0xff] %v3141_v0  }
 0x2be   : > { %3144 = vst [vmem:[%s499_s24 + $0x10] sm:$0xff] %v3136_v29   ;;  %v2825_v58 = vadd.f32 %v3285_v6, %v2824_v61  ;;  %v2846_v34 = vadd.f32 %v2845_v19, %v2839_v24 }
 0x2c0   : > { %v2826_v35 = vadd.f32 %v3286_v25, %v2825_v58  ;;  %v2847_v30 = vadd.f32 %v2846_v34, %v2840_v59 }
 0x2c2   : > { %v2827_v44 = vrot.slane %v2826_v35, 4  ;;  %v2848_v40 = vadd.f32 %v2847_v30, %v2841_v21 }
 0x2c4   : > { %v2828_v9 = vadd.f32 %v2827_v44, %v2826_v35  ;;  %v2849_v2 = vrot.slane %v2848_v40, 4 }
 0x2c6   : > { %v2829_v31 = vrot.slane %v2828_v9, 2  ;;  %v2850_v42 = vadd.f32 %v2849_v2, %v2848_v40 }
 0x2c8   : > { %v2830_v45 = vadd.f32 %v2829_v31, %v2828_v9  ;;  %v2851_v36 = vrot.slane %v2850_v42, 2 }
 0x2ca   : > { %v2831_v43 = vrot.slane %v2830_v45, 1  ;;  %v2852_v37 = vadd.f32 %v2851_v36, %v2850_v42 }
 0x2cc   : > { %v2832_v54 = vadd.f32 %v2831_v43, %v2830_v45  ;;  %v2853_v11 = vrot.slane %v2852_v37, 1 }
 0x2ce   : > { %2833 = vst [vmem:[%s504_s30] sm:$0x1] %v2832_v54  ;;  %v2854_v28 = vadd.f32 %v2853_v11, %v2852_v37 }
 0x2d0   : > { %2855 = vst [vmem:[%s509_s15] sm:$0x1] %v2854_v28 }
 0x2d1 PF: > { %s24_s27 = sadd.s32 1, %s3385_s27   ;;  %s5009_s25 = smov %s3381_s26 }
 0x2d2   : > { %p21_p5 = scmp.ge.s32.totalorder %s24_s27, 4   ;;  %s5010_s26 = smov %s5012_s28 }
 0x2d4   :  { %23 = sbr.rel (!%p21_p5) target bundleno = 2 (0x2), region = 125 }

</bundles_post_ra>
